<compile_context>
chip_gen: v7x
topology: tpu7x:2x2x1
jax: 0.10.0
libtpu: 0.0.40
codegen_flags: <defaults>
</compile_context>

<pallas_src>
import jax
import jax.numpy as jnp
from jax.experimental import pallas as pl
from jax.experimental.pallas import tpu as pltpu

# ----------------------------- config ---------------------------------------
B = 4            # batch
T_IN = 8         # source sequence length
T_TGT = 8        # target sequence length
EN_VOCAB = 32
CN_VOCAB = 48
V_PAD = 128      # lane-dense padded vocab width for the final projection
EMB = 16         # embedding dim
HID = 32         # encoder hidden dim (per direction)
NLAYERS = 2
DHID = 2 * HID   # decoder hidden dim (= concatenated fwd/bwd encoder hidden)
GP = 128         # padded lane width of one GRU gate slot (tile-aligned gates)

# Set to jnp.bfloat16 on v6e/v7x for bf16-native MXU matmuls (f32 accumulation).
MATMUL_DTYPE = jnp.float32


def _dot(a, b):
    return jnp.dot(a.astype(MATMUL_DTYPE), b.astype(MATMUL_DTYPE),
                   preferred_element_type=jnp.float32)


# ----------------------------- GRU cell --------------------------------------
def _gru_cell(x, h, wih, whh, bih, bhh, hdim):
    """PyTorch-semantics GRU cell with 128-lane-aligned fused gate slots.

    x:   [rows, D_in]      h:   [rows, hdim]
    wih: [D_in, 3*GP]      whh: [hdim, 3*GP]     bih/bhh: [1, 3*GP]
    Gate g (r, z, n) lives in lanes [g*GP : g*GP + hdim]; pad lanes are zero.
    """
    gi = _dot(x, wih) + bih          # [rows, 3*GP]
    gh = _dot(h, whh) + bhh          # [rows, 3*GP]
    r = jax.nn.sigmoid(gi[:, 0:hdim] + gh[:, 0:hdim])
    z = jax.nn.sigmoid(gi[:, GP:GP + hdim] + gh[:, GP:GP + hdim])
    n = jnp.tanh(gi[:, 2 * GP:2 * GP + hdim] + r * gh[:, 2 * GP:2 * GP + hdim])
    return (1.0 - z) * n + z * h


# ----------------------------- the one fused kernel ---------------------------
def _seq2seq_kernel(x_enc_ref, x_dec_ref,
                    e_wih0, e_whh0, e_bih0, e_bhh0,
                    e_wih1, e_whh1, e_bih1, e_bhh1,
                    d_wih0, d_whh0, d_bih0, d_bhh0,
                    d_wih1, d_whh1, d_bih1, d_bhh1,
                    w1, b1, w2, b2, w3, b3,
                    logits_ref):
    T = x_enc_ref.shape[0]
    Tdec = x_dec_ref.shape[0]
    Bk = x_enc_ref.shape[1]
    hid = e_whh0.shape[1]        # encoder hidden (per direction)
    dhid = d_whh0.shape[0]       # decoder hidden
    vpad = logits_ref.shape[-1]

    # ---------------- encoder layer 0 (fwd + bwd; bwd reversal via index math)
    hf = jnp.zeros((Bk, hid), jnp.float32)
    hb = jnp.zeros((Bk, hid), jnp.float32)
    out_f = [None] * T
    out_b = [None] * T
    for s in range(T):
        hf = _gru_cell(x_enc_ref[s], hf,
                       e_wih0[0], e_whh0[0], e_bih0[0], e_bhh0[0], hid)
        hb = _gru_cell(x_enc_ref[T - 1 - s], hb,
                       e_wih0[1], e_whh0[1], e_bih0[1], e_bhh0[1], hid)
        out_f[s] = hf
        out_b[T - 1 - s] = hb
    fin0_f, fin0_b = hf, hb            # layer-0 final hidden (fwd, bwd)

    # ---------------- encoder layer 1 ----------------------------------------
    # Per-step layer-1 input: concat(fwd_out[t], bwd_out[t]) -> [B, 2*hid].
    x1 = [jnp.concatenate([out_f[t], out_b[t]], axis=-1) for t in range(T)]
    hf = jnp.zeros((Bk, hid), jnp.float32)
    hb = jnp.zeros((Bk, hid), jnp.float32)
    for s in range(T):
        hf = _gru_cell(x1[s], hf,
                       e_wih1[0], e_whh1[0], e_bih1[0], e_bhh1[0], hid)
        hb = _gru_cell(x1[T - 1 - s], hb,
                       e_wih1[1], e_whh1[1], e_bih1[1], e_bhh1[1], hid)
    fin1_f, fin1_b = hf, hb
    # NOTE: per-step encoder outputs never leave VMEM/vregs -- the hw8 decoder
    # runs without attention, so encoder_outputs is unused.

    # decoder initial hidden = concat(fwd_final, bwd_final) per layer  [B, dhid]
    h0 = jnp.concatenate([fin0_f, fin0_b], axis=-1)
    h1 = jnp.concatenate([fin1_f, fin1_b], axis=-1)

    # ---------------- decoder: 2-layer GRU; vocab MLP hoisted out of the loop
    tops = []
    for t in range(Tdec):
        h0 = _gru_cell(x_dec_ref[t], h0,
                       d_wih0[...], d_whh0[...], d_bih0[...], d_bhh0[...], dhid)
        h1 = _gru_cell(h0, h1,
                       d_wih1[...], d_whh1[...], d_bih1[...], d_bhh1[...], dhid)
        tops.append(h1)
    hcat = jnp.concatenate(tops, axis=0)                       # [Tdec*B, dhid]

    m = _dot(hcat, w1[...]) + b1[...]
    m = _dot(m, w2[...]) + b2[...]
    lg = _dot(m, w3[...]) + b3[...]                            # [Tdec*B, vpad]
    logits_ref[...] = lg.reshape(Tdec, Bk, vpad)               # one lane-dense store


def fused_forward(params, x_enc, x_dec):
    """x_enc: [T_IN, B, EMB], x_dec: [T_dec, B, EMB] -> logits [T_dec, B, V_PAD]."""
    (e0, e1) = params["enc"]
    (d0, d1) = params["dec_rnn"]
    w1, b1, w2, b2, w3, b3 = params["out"]
    args = (x_enc, x_dec, *e0, *e1, *d0, *d1, w1, b1, w2, b2, w3, b3)
    Tdec = x_dec.shape[0]
    vmem = lambda: pl.BlockSpec(memory_space=pltpu.MemorySpace.VMEM)
    return pl.pallas_call(
        _seq2seq_kernel,
        out_shape=jax.ShapeDtypeStruct((Tdec, B, V_PAD), jnp.float32),
        in_specs=[vmem() for _ in args],
        out_specs=vmem(),
    )(*args)


# ----------------------------- parameters ------------------------------------
def _pad_gate_cols(w, hdim):
    """[..., 3*hdim] fused r|z|n -> [..., 3*GP]; gate g left-aligned in its slot."""
    out = jnp.zeros(w.shape[:-1] + (3 * GP,), jnp.float32)
    for g in range(3):
        out = out.at[..., g * GP:g * GP + hdim].set(w[..., g * hdim:(g + 1) * hdim])
    return out


def init_params(key):
    def u(k, shape, scale=0.1):
        return jax.random.uniform(k, shape, jnp.float32, -scale, scale)

    keys = iter(jax.random.split(key, 64))
    params = {
        "en_emb": u(next(keys), (EN_VOCAB, EMB)),
        "cn_emb": u(next(keys), (CN_VOCAB, EMB)),
        "enc": [],
        "dec_rnn": [],
        "out": None,
    }
    # encoder: NLAYERS bidirectional layers; fwd/bwd stacked on the leading axis,
    # gates (r|z|n) fused along lanes with 128-lane-aligned gate slots.
    for layer in range(NLAYERS):
        in_dim = EMB if layer == 0 else 2 * HID
        wih = jnp.stack([_pad_gate_cols(u(next(keys), (in_dim, 3 * HID)), HID)
                         for _ in range(2)])
        whh = jnp.stack([_pad_gate_cols(u(next(keys), (HID, 3 * HID)), HID)
                         for _ in range(2)])
        bih = jnp.stack([_pad_gate_cols(u(next(keys), (1, 3 * HID)), HID)
                         for _ in range(2)])
        bhh = jnp.stack([_pad_gate_cols(u(next(keys), (1, 3 * HID)), HID)
                         for _ in range(2)])
        params["enc"].append((wih, whh, bih, bhh))
    # decoder GRU: NLAYERS layers, hidden DHID, same aligned gate layout.
    for layer in range(NLAYERS):
        in_dim = EMB if layer == 0 else DHID
        params["dec_rnn"].append((
            _pad_gate_cols(u(next(keys), (in_dim, 3 * DHID)), DHID),
            _pad_gate_cols(u(next(keys), (DHID, 3 * DHID)), DHID),
            _pad_gate_cols(u(next(keys), (1, 3 * DHID)), DHID),
            _pad_gate_cols(u(next(keys), (1, 3 * DHID)), DHID),
        ))
    # decoder output MLP: DHID -> 2*DHID -> 4*DHID -> CN_VOCAB (padded to 128
    # lanes; pad columns are zero and sliced off in JAX before argmax).
    w3 = jnp.zeros((4 * DHID, V_PAD), jnp.float32).at[:, :CN_VOCAB].set(
        u(next(keys), (4 * DHID, CN_VOCAB)))
    b3 = jnp.zeros((1, V_PAD), jnp.float32).at[:, :CN_VOCAB].set(
        u(next(keys), (1, CN_VOCAB)))
    params["out"] = (
        u(next(keys), (DHID, 2 * DHID)), u(next(keys), (1, 2 * DHID)),
        u(next(keys), (2 * DHID, 4 * DHID)), u(next(keys), (1, 4 * DHID)),
        w3, b3,
    )
    return params


# ----------------------------- model glue ------------------------------------
def seq2seq_forward(params, src, tgt, teacher_forcing_ratio=0.5):
    # In the torch code `teacher_force = random.random()` is truthy w.p. 1 and
    # `t < target_len` always holds, so teacher forcing is effectively always on.
    del teacher_forcing_ratio
    batch, target_len = tgt.shape

    x_enc = jnp.swapaxes(jnp.take(params["en_emb"], src, axis=0), 0, 1)  # [T,B,EMB]
    dec_in = tgt[:, : target_len - 1]                                    # [B,T-1]
    x_dec = jnp.swapaxes(jnp.take(params["cn_emb"], dec_in, axis=0), 0, 1)

    # TODO(synk): original torch `hidden.view(n_layers, 2, batch_size - 1)` is a
    # missing-comma typo; the intended view(n_layers,2,batch,-1)+concat is what
    # the kernel implements for the decoder's initial hidden.
    logits_t = fused_forward(params, x_enc, x_dec)              # [T-1, B, V_PAD]
    logits = jnp.swapaxes(logits_t, 0, 1)[..., :CN_VOCAB]       # [B, T-1, V]

    outputs = jnp.zeros((batch, target_len, CN_VOCAB), jnp.float32)
    outputs = outputs.at[:, 1:].set(logits)
    preds = jnp.argmax(logits, axis=-1).astype(tgt.dtype)       # [B, T-1]
    return outputs, preds


# ----------------------------- driver ----------------------------------------
if __name__ == "__main__":
    root = jax.random.PRNGKey(0)
    kp, ks, kt = jax.random.split(root, 3)
    params = init_params(kp)
    src = jax.random.randint(ks, (B, T_IN), 0, EN_VOCAB, dtype=jnp.int32)
    tgt = jax.random.randint(kt, (B, T_TGT), 0, CN_VOCAB, dtype=jnp.int32)

    outputs, preds = jax.jit(seq2seq_forward)(params, src, tgt)
    jax.block_until_ready((outputs, preds))

    assert outputs.shape == (B, T_TGT, CN_VOCAB), outputs.shape
    assert preds.shape == (B, T_TGT - 1), preds.shape
    assert bool(jnp.all(outputs[:, 0] == 0.0))  # t=0 slot stays zero, as in torch
    assert bool(jnp.all(jnp.isfinite(outputs)))
    print("KERNEL_OK")
</pallas_src>

<mosaic_0001>
module attributes {stable_mosaic.version = 11 : i64} {
  func.func @_seq2seq_kernel(%arg0: memref<8x4x16xf32, #tpu.memory_space<vmem>>, %arg1: memref<7x4x16xf32, #tpu.memory_space<vmem>>, %arg2: memref<2x16x384xf32, #tpu.memory_space<vmem>>, %arg3: memref<2x32x384xf32, #tpu.memory_space<vmem>>, %arg4: memref<2x1x384xf32, #tpu.memory_space<vmem>>, %arg5: memref<2x1x384xf32, #tpu.memory_space<vmem>>, %arg6: memref<2x64x384xf32, #tpu.memory_space<vmem>>, %arg7: memref<2x32x384xf32, #tpu.memory_space<vmem>>, %arg8: memref<2x1x384xf32, #tpu.memory_space<vmem>>, %arg9: memref<2x1x384xf32, #tpu.memory_space<vmem>>, %arg10: memref<16x384xf32, #tpu.memory_space<vmem>>, %arg11: memref<64x384xf32, #tpu.memory_space<vmem>>, %arg12: memref<1x384xf32, #tpu.memory_space<vmem>>, %arg13: memref<1x384xf32, #tpu.memory_space<vmem>>, %arg14: memref<64x384xf32, #tpu.memory_space<vmem>>, %arg15: memref<64x384xf32, #tpu.memory_space<vmem>>, %arg16: memref<1x384xf32, #tpu.memory_space<vmem>>, %arg17: memref<1x384xf32, #tpu.memory_space<vmem>>, %arg18: memref<64x128xf32, #tpu.memory_space<vmem>>, %arg19: memref<1x128xf32, #tpu.memory_space<vmem>>, %arg20: memref<128x256xf32, #tpu.memory_space<vmem>>, %arg21: memref<1x256xf32, #tpu.memory_space<vmem>>, %arg22: memref<256x128xf32, #tpu.memory_space<vmem>>, %arg23: memref<1x128xf32, #tpu.memory_space<vmem>>, %arg24: memref<7x4x128xf32, #tpu.memory_space<vmem>>) attributes {dimension_semantics = [], scalar_prefetch = 0 : i64, scratch_operands = 0 : i64, tpu.core_type = #tpu.core_type<tc>} {
    %cst = arith.constant 0.000000e+00 : f32
    %0 = vector.broadcast %cst : f32 to vector<4x32xf32>
    %cst_0 = arith.constant 0.000000e+00 : f32
    %1 = vector.broadcast %cst_0 : f32 to vector<4x32xf32>
    %c0 = arith.constant 0 : index
    %c0_1 = arith.constant 0 : index
    %c0_2 = arith.constant 0 : index
    %2 = vector.load %arg0[%c0, %c0_1, %c0_2] : memref<8x4x16xf32, #tpu.memory_space<vmem>>, vector<1x4x16xf32>
    %3 = vector.shape_cast %2 : vector<1x4x16xf32> to vector<4x16xf32>
    %c0_3 = arith.constant 0 : index
    %c0_4 = arith.constant 0 : index
    %c0_5 = arith.constant 0 : index
    %4 = vector.load %arg2[%c0_3, %c0_4, %c0_5] : memref<2x16x384xf32, #tpu.memory_space<vmem>>, vector<1x16x384xf32>
    %5 = vector.shape_cast %4 : vector<1x16x384xf32> to vector<16x384xf32>
    %c0_6 = arith.constant 0 : index
    %c0_7 = arith.constant 0 : index
    %c0_8 = arith.constant 0 : index
    %6 = vector.load %arg3[%c0_6, %c0_7, %c0_8] : memref<2x32x384xf32, #tpu.memory_space<vmem>>, vector<1x32x384xf32>
    %7 = vector.shape_cast %6 : vector<1x32x384xf32> to vector<32x384xf32>
    %c0_9 = arith.constant 0 : index
    %c0_10 = arith.constant 0 : index
    %c0_11 = arith.constant 0 : index
    %8 = vector.load %arg4[%c0_9, %c0_10, %c0_11] : memref<2x1x384xf32, #tpu.memory_space<vmem>>, vector<1x1x384xf32>
    %9 = vector.shape_cast %8 : vector<1x1x384xf32> to vector<1x384xf32>
    %c0_12 = arith.constant 0 : index
    %c0_13 = arith.constant 0 : index
    %c0_14 = arith.constant 0 : index
    %10 = vector.load %arg5[%c0_12, %c0_13, %c0_14] : memref<2x1x384xf32, #tpu.memory_space<vmem>>, vector<1x1x384xf32>
    %11 = vector.shape_cast %10 : vector<1x1x384xf32> to vector<1x384xf32>
    %cst_15 = arith.constant dense<0.000000e+00> : vector<4x384xf32>
    %12 = tpu.matmul %3, %5, %cst_15 {dimension_numbers = #tpu.dot_dimension_numbers<[1], [0], [0], [1], [0, 0, 1, 1], [], []>} : vector<4x16xf32>, vector<16x384xf32>, vector<4x384xf32> -> vector<4x384xf32>
    %13 = vector.broadcast %9 : vector<1x384xf32> to vector<4x384xf32>
    %14 = arith.addf %12, %13 : vector<4x384xf32>
    %cst_16 = arith.constant dense<0.000000e+00> : vector<4x384xf32>
    %15 = tpu.matmul %0, %7, %cst_16 {dimension_numbers = #tpu.dot_dimension_numbers<[1], [0], [0], [1], [0, 0, 1, 1], [], []>} : vector<4x32xf32>, vector<32x384xf32>, vector<4x384xf32> -> vector<4x384xf32>
    %16 = vector.broadcast %11 : vector<1x384xf32> to vector<4x384xf32>
    %17 = arith.addf %15, %16 : vector<4x384xf32>
    %18 = vector.extract_strided_slice %14 {offsets = [0, 0], sizes = [4, 32], strides = [1, 1]} : vector<4x384xf32> to vector<4x32xf32>
    %19 = vector.extract_strided_slice %17 {offsets = [0, 0], sizes = [4, 32], strides = [1, 1]} : vector<4x384xf32> to vector<4x32xf32>
    %20 = arith.addf %18, %19 : vector<4x32xf32>
    %21 = arith.negf %20 : vector<4x32xf32>
    %22 = math.exp %21 : vector<4x32xf32>
    %cst_17 = arith.constant 1.000000e+00 : f32
    %23 = vector.broadcast %cst_17 : f32 to vector<4x32xf32>
    %24 = arith.addf %23, %22 : vector<4x32xf32>
    %25 = arith.divf %23, %24 : vector<4x32xf32>
    %26 = vector.extract_strided_slice %14 {offsets = [0, 128], sizes = [4, 32], strides = [1, 1]} : vector<4x384xf32> to vector<4x32xf32>
    %27 = vector.extract_strided_slice %17 {offsets = [0, 128], sizes = [4, 32], strides = [1, 1]} : vector<4x384xf32> to vector<4x32xf32>
    %28 = arith.addf %26, %27 : vector<4x32xf32>
    %29 = arith.negf %28 : vector<4x32xf32>
    %30 = math.exp %29 : vector<4x32xf32>
    %cst_18 = arith.constant 1.000000e+00 : f32
    %31 = vector.broadcast %cst_18 : f32 to vector<4x32xf32>
    %32 = arith.addf %31, %30 : vector<4x32xf32>
    %33 = arith.divf %31, %32 : vector<4x32xf32>
    %34 = vector.extract_strided_slice %14 {offsets = [0, 256], sizes = [4, 32], strides = [1, 1]} : vector<4x384xf32> to vector<4x32xf32>
    %35 = vector.extract_strided_slice %17 {offsets = [0, 256], sizes = [4, 32], strides = [1, 1]} : vector<4x384xf32> to vector<4x32xf32>
    %36 = arith.mulf %25, %35 : vector<4x32xf32>
    %37 = arith.addf %34, %36 : vector<4x32xf32>
    %38 = math.tanh %37 : vector<4x32xf32>
    %cst_19 = arith.constant 1.000000e+00 : f32
    %39 = vector.broadcast %cst_19 : f32 to vector<4x32xf32>
    %40 = arith.subf %39, %33 : vector<4x32xf32>
    %41 = arith.mulf %40, %38 : vector<4x32xf32>
    %42 = arith.mulf %33, %0 : vector<4x32xf32>
    %43 = arith.addf %41, %42 : vector<4x32xf32>
    %c7 = arith.constant 7 : index
    %c0_20 = arith.constant 0 : index
    %c0_21 = arith.constant 0 : index
    %44 = vector.load %arg0[%c7, %c0_20, %c0_21] : memref<8x4x16xf32, #tpu.memory_space<vmem>>, vector<1x4x16xf32>
    %45 = vector.shape_cast %44 : vector<1x4x16xf32> to vector<4x16xf32>
    %c1 = arith.constant 1 : index
    %c0_22 = arith.constant 0 : index
    %c0_23 = arith.constant 0 : index
    %46 = vector.load %arg2[%c1, %c0_22, %c0_23] : memref<2x16x384xf32, #tpu.memory_space<vmem>>, vector<1x16x384xf32>
    %47 = vector.shape_cast %46 : vector<1x16x384xf32> to vector<16x384xf32>
    %c1_24 = arith.constant 1 : index
    %c0_25 = arith.constant 0 : index
    %c0_26 = arith.constant 0 : index
    %48 = vector.load %arg3[%c1_24, %c0_25, %c0_26] : memref<2x32x384xf32, #tpu.memory_space<vmem>>, vector<1x32x384xf32>
    %49 = vector.shape_cast %48 : vector<1x32x384xf32> to vector<32x384xf32>
    %c1_27 = arith.constant 1 : index
    %c0_28 = arith.constant 0 : index
    %c0_29 = arith.constant 0 : index
    %50 = vector.load %arg4[%c1_27, %c0_28, %c0_29] : memref<2x1x384xf32, #tpu.memory_space<vmem>>, vector<1x1x384xf32>
    %51 = vector.shape_cast %50 : vector<1x1x384xf32> to vector<1x384xf32>
    %c1_30 = arith.constant 1 : index
    %c0_31 = arith.constant 0 : index
    %c0_32 = arith.constant 0 : index
    %52 = vector.load %arg5[%c1_30, %c0_31, %c0_32] : memref<2x1x384xf32, #tpu.memory_space<vmem>>, vector<1x1x384xf32>
    %53 = vector.shape_cast %52 : vector<1x1x384xf32> to vector<1x384xf32>
    %cst_33 = arith.constant dense<0.000000e+00> : vector<4x384xf32>
    %54 = tpu.matmul %45, %47, %cst_33 {dimension_numbers = #tpu.dot_dimension_numbers<[1], [0], [0], [1], [0, 0, 1, 1], [], []>} : vector<4x16xf32>, vector<16x384xf32>, vector<4x384xf32> -> vector<4x384xf32>
    %55 = vector.broadcast %51 : vector<1x384xf32> to vector<4x384xf32>
    %56 = arith.addf %54, %55 : vector<4x384xf32>
    %cst_34 = arith.constant dense<0.000000e+00> : vector<4x384xf32>
    %57 = tpu.matmul %1, %49, %cst_34 {dimension_numbers = #tpu.dot_dimension_numbers<[1], [0], [0], [1], [0, 0, 1, 1], [], []>} : vector<4x32xf32>, vector<32x384xf32>, vector<4x384xf32> -> vector<4x384xf32>
    %58 = vector.broadcast %53 : vector<1x384xf32> to vector<4x384xf32>
    %59 = arith.addf %57, %58 : vector<4x384xf32>
    %60 = vector.extract_strided_slice %56 {offsets = [0, 0], sizes = [4, 32], strides = [1, 1]} : vector<4x384xf32> to vector<4x32xf32>
    %61 = vector.extract_strided_slice %59 {offsets = [0, 0], sizes = [4, 32], strides = [1, 1]} : vector<4x384xf32> to vector<4x32xf32>
    %62 = arith.addf %60, %61 : vector<4x32xf32>
    %63 = arith.negf %62 : vector<4x32xf32>
    %64 = math.exp %63 : vector<4x32xf32>
    %cst_35 = arith.constant 1.000000e+00 : f32
    %65 = vector.broadcast %cst_35 : f32 to vector<4x32xf32>
    %66 = arith.addf %65, %64 : vector<4x32xf32>
    %67 = arith.divf %65, %66 : vector<4x32xf32>
    %68 = vector.extract_strided_slice %56 {offsets = [0, 128], sizes = [4, 32], strides = [1, 1]} : vector<4x384xf32> to vector<4x32xf32>
    %69 = vector.extract_strided_slice %59 {offsets = [0, 128], sizes = [4, 32], strides = [1, 1]} : vector<4x384xf32> to vector<4x32xf32>
    %70 = arith.addf %68, %69 : vector<4x32xf32>
    %71 = arith.negf %70 : vector<4x32xf32>
    %72 = math.exp %71 : vector<4x32xf32>
    %cst_36 = arith.constant 1.000000e+00 : f32
    %73 = vector.broadcast %cst_36 : f32 to vector<4x32xf32>
    %74 = arith.addf %73, %72 : vector<4x32xf32>
    %75 = arith.divf %73, %74 : vector<4x32xf32>
    %76 = vector.extract_strided_slice %56 {offsets = [0, 256], sizes = [4, 32], strides = [1, 1]} : vector<4x384xf32> to vector<4x32xf32>
    %77 = vector.extract_strided_slice %59 {offsets = [0, 256], sizes = [4, 32], strides = [1, 1]} : vector<4x384xf32> to vector<4x32xf32>
    %78 = arith.mulf %67, %77 : vector<4x32xf32>
    %79 = arith.addf %76, %78 : vector<4x32xf32>
    %80 = math.tanh %79 : vector<4x32xf32>
    %cst_37 = arith.constant 1.000000e+00 : f32
    %81 = vector.broadcast %cst_37 : f32 to vector<4x32xf32>
    %82 = arith.subf %81, %75 : vector<4x32xf32>
    %83 = arith.mulf %82, %80 : vector<4x32xf32>
    %84 = arith.mulf %75, %1 : vector<4x32xf32>
    %85 = arith.addf %83, %84 : vector<4x32xf32>
    %c1_38 = arith.constant 1 : index
    %c0_39 = arith.constant 0 : index
    %c0_40 = arith.constant 0 : index
    %86 = vector.load %arg0[%c1_38, %c0_39, %c0_40] : memref<8x4x16xf32, #tpu.memory_space<vmem>>, vector<1x4x16xf32>
    %87 = vector.shape_cast %86 : vector<1x4x16xf32> to vector<4x16xf32>
    %c0_41 = arith.constant 0 : index
    %c0_42 = arith.constant 0 : index
    %c0_43 = arith.constant 0 : index
    %88 = vector.load %arg2[%c0_41, %c0_42, %c0_43] : memref<2x16x384xf32, #tpu.memory_space<vmem>>, vector<1x16x384xf32>
    %89 = vector.shape_cast %88 : vector<1x16x384xf32> to vector<16x384xf32>
    %c0_44 = arith.constant 0 : index
    %c0_45 = arith.constant 0 : index
    %c0_46 = arith.constant 0 : index
    %90 = vector.load %arg3[%c0_44, %c0_45, %c0_46] : memref<2x32x384xf32, #tpu.memory_space<vmem>>, vector<1x32x384xf32>
    %91 = vector.shape_cast %90 : vector<1x32x384xf32> to vector<32x384xf32>
    %c0_47 = arith.constant 0 : index
    %c0_48 = arith.constant 0 : index
    %c0_49 = arith.constant 0 : index
    %92 = vector.load %arg4[%c0_47, %c0_48, %c0_49] : memref<2x1x384xf32, #tpu.memory_space<vmem>>, vector<1x1x384xf32>
    %93 = vector.shape_cast %92 : vector<1x1x384xf32> to vector<1x384xf32>
    %c0_50 = arith.constant 0 : index
    %c0_51 = arith.constant 0 : index
    %c0_52 = arith.constant 0 : index
    %94 = vector.load %arg5[%c0_50, %c0_51, %c0_52] : memref<2x1x384xf32, #tpu.memory_space<vmem>>, vector<1x1x384xf32>
    %95 = vector.shape_cast %94 : vector<1x1x384xf32> to vector<1x384xf32>
    %cst_53 = arith.constant dense<0.000000e+00> : vector<4x384xf32>
    %96 = tpu.matmul %87, %89, %cst_53 {dimension_numbers = #tpu.dot_dimension_numbers<[1], [0], [0], [1], [0, 0, 1, 1], [], []>} : vector<4x16xf32>, vector<16x384xf32>, vector<4x384xf32> -> vector<4x384xf32>
    %97 = vector.broadcast %93 : vector<1x384xf32> to vector<4x384xf32>
    %98 = arith.addf %96, %97 : vector<4x384xf32>
    %cst_54 = arith.constant dense<0.000000e+00> : vector<4x384xf32>
    %99 = tpu.matmul %43, %91, %cst_54 {dimension_numbers = #tpu.dot_dimension_numbers<[1], [0], [0], [1], [0, 0, 1, 1], [], []>} : vector<4x32xf32>, vector<32x384xf32>, vector<4x384xf32> -> vector<4x384xf32>
    %100 = vector.broadcast %95 : vector<1x384xf32> to vector<4x384xf32>
    %101 = arith.addf %99, %100 : vector<4x384xf32>
    %102 = vector.extract_strided_slice %98 {offsets = [0, 0], sizes = [4, 32], strides = [1, 1]} : vector<4x384xf32> to vector<4x32xf32>
    %103 = vector.extract_strided_slice %101 {offsets = [0, 0], sizes = [4, 32], strides = [1, 1]} : vector<4x384xf32> to vector<4x32xf32>
    %104 = arith.addf %102, %103 : vector<4x32xf32>
    %105 = arith.negf %104 : vector<4x32xf32>
    %106 = math.exp %105 : vector<4x32xf32>
    %cst_55 = arith.constant 1.000000e+00 : f32
    %107 = vector.broadcast %cst_55 : f32 to vector<4x32xf32>
    %108 = arith.addf %107, %106 : vector<4x32xf32>
    %109 = arith.divf %107, %108 : vector<4x32xf32>
    %110 = vector.extract_strided_slice %98 {offsets = [0, 128], sizes = [4, 32], strides = [1, 1]} : vector<4x384xf32> to vector<4x32xf32>
    %111 = vector.extract_strided_slice %101 {offsets = [0, 128], sizes = [4, 32], strides = [1, 1]} : vector<4x384xf32> to vector<4x32xf32>
    %112 = arith.addf %110, %111 : vector<4x32xf32>
    %113 = arith.negf %112 : vector<4x32xf32>
    %114 = math.exp %113 : vector<4x32xf32>
    %cst_56 = arith.constant 1.000000e+00 : f32
    %115 = vector.broadcast %cst_56 : f32 to vector<4x32xf32>
    %116 = arith.addf %115, %114 : vector<4x32xf32>
    %117 = arith.divf %115, %116 : vector<4x32xf32>
    %118 = vector.extract_strided_slice %98 {offsets = [0, 256], sizes = [4, 32], strides = [1, 1]} : vector<4x384xf32> to vector<4x32xf32>
    %119 = vector.extract_strided_slice %101 {offsets = [0, 256], sizes = [4, 32], strides = [1, 1]} : vector<4x384xf32> to vector<4x32xf32>
    %120 = arith.mulf %109, %119 : vector<4x32xf32>
    %121 = arith.addf %118, %120 : vector<4x32xf32>
    %122 = math.tanh %121 : vector<4x32xf32>
    %cst_57 = arith.constant 1.000000e+00 : f32
    %123 = vector.broadcast %cst_57 : f32 to vector<4x32xf32>
    %124 = arith.subf %123, %117 : vector<4x32xf32>
    %125 = arith.mulf %124, %122 : vector<4x32xf32>
    %126 = arith.mulf %117, %43 : vector<4x32xf32>
    %127 = arith.addf %125, %126 : vector<4x32xf32>
    %c6 = arith.constant 6 : index
    %c0_58 = arith.constant 0 : index
    %c0_59 = arith.constant 0 : index
    %128 = vector.load %arg0[%c6, %c0_58, %c0_59] : memref<8x4x16xf32, #tpu.memory_space<vmem>>, vector<1x4x16xf32>
    %129 = vector.shape_cast %128 : vector<1x4x16xf32> to vector<4x16xf32>
    %c1_60 = arith.constant 1 : index
    %c0_61 = arith.constant 0 : index
    %c0_62 = arith.constant 0 : index
    %130 = vector.load %arg2[%c1_60, %c0_61, %c0_62] : memref<2x16x384xf32, #tpu.memory_space<vmem>>, vector<1x16x384xf32>
    %131 = vector.shape_cast %130 : vector<1x16x384xf32> to vector<16x384xf32>
    %c1_63 = arith.constant 1 : index
    %c0_64 = arith.constant 0 : index
    %c0_65 = arith.constant 0 : index
    %132 = vector.load %arg3[%c1_63, %c0_64, %c0_65] : memref<2x32x384xf32, #tpu.memory_space<vmem>>, vector<1x32x384xf32>
    %133 = vector.shape_cast %132 : vector<1x32x384xf32> to vector<32x384xf32>
    %c1_66 = arith.constant 1 : index
    %c0_67 = arith.constant 0 : index
    %c0_68 = arith.constant 0 : index
    %134 = vector.load %arg4[%c1_66, %c0_67, %c0_68] : memref<2x1x384xf32, #tpu.memory_space<vmem>>, vector<1x1x384xf32>
    %135 = vector.shape_cast %134 : vector<1x1x384xf32> to vector<1x384xf32>
    %c1_69 = arith.constant 1 : index
    %c0_70 = arith.constant 0 : index
    %c0_71 = arith.constant 0 : index
    %136 = vector.load %arg5[%c1_69, %c0_70, %c0_71] : memref<2x1x384xf32, #tpu.memory_space<vmem>>, vector<1x1x384xf32>
    %137 = vector.shape_cast %136 : vector<1x1x384xf32> to vector<1x384xf32>
    %cst_72 = arith.constant dense<0.000000e+00> : vector<4x384xf32>
    %138 = tpu.matmul %129, %131, %cst_72 {dimension_numbers = #tpu.dot_dimension_numbers<[1], [0], [0], [1], [0, 0, 1, 1], [], []>} : vector<4x16xf32>, vector<16x384xf32>, vector<4x384xf32> -> vector<4x384xf32>
    %139 = vector.broadcast %135 : vector<1x384xf32> to vector<4x384xf32>
    %140 = arith.addf %138, %139 : vector<4x384xf32>
    %cst_73 = arith.constant dense<0.000000e+00> : vector<4x384xf32>
    %141 = tpu.matmul %85, %133, %cst_73 {dimension_numbers = #tpu.dot_dimension_numbers<[1], [0], [0], [1], [0, 0, 1, 1], [], []>} : vector<4x32xf32>, vector<32x384xf32>, vector<4x384xf32> -> vector<4x384xf32>
    %142 = vector.broadcast %137 : vector<1x384xf32> to vector<4x384xf32>
    %143 = arith.addf %141, %142 : vector<4x384xf32>
    %144 = vector.extract_strided_slice %140 {offsets = [0, 0], sizes = [4, 32], strides = [1, 1]} : vector<4x384xf32> to vector<4x32xf32>
    %145 = vector.extract_strided_slice %143 {offsets = [0, 0], sizes = [4, 32], strides = [1, 1]} : vector<4x384xf32> to vector<4x32xf32>
    %146 = arith.addf %144, %145 : vector<4x32xf32>
    %147 = arith.negf %146 : vector<4x32xf32>
    %148 = math.exp %147 : vector<4x32xf32>
    %cst_74 = arith.constant 1.000000e+00 : f32
    %149 = vector.broadcast %cst_74 : f32 to vector<4x32xf32>
    %150 = arith.addf %149, %148 : vector<4x32xf32>
    %151 = arith.divf %149, %150 : vector<4x32xf32>
    %152 = vector.extract_strided_slice %140 {offsets = [0, 128], sizes = [4, 32], strides = [1, 1]} : vector<4x384xf32> to vector<4x32xf32>
    %153 = vector.extract_strided_slice %143 {offsets = [0, 128], sizes = [4, 32], strides = [1, 1]} : vector<4x384xf32> to vector<4x32xf32>
    %154 = arith.addf %152, %153 : vector<4x32xf32>
    %155 = arith.negf %154 : vector<4x32xf32>
    %156 = math.exp %155 : vector<4x32xf32>
    %cst_75 = arith.constant 1.000000e+00 : f32
    %157 = vector.broadcast %cst_75 : f32 to vector<4x32xf32>
    %158 = arith.addf %157, %156 : vector<4x32xf32>
    %159 = arith.divf %157, %158 : vector<4x32xf32>
    %160 = vector.extract_strided_slice %140 {offsets = [0, 256], sizes = [4, 32], strides = [1, 1]} : vector<4x384xf32> to vector<4x32xf32>
    %161 = vector.extract_strided_slice %143 {offsets = [0, 256], sizes = [4, 32], strides = [1, 1]} : vector<4x384xf32> to vector<4x32xf32>
    %162 = arith.mulf %151, %161 : vector<4x32xf32>
    %163 = arith.addf %160, %162 : vector<4x32xf32>
    %164 = math.tanh %163 : vector<4x32xf32>
    %cst_76 = arith.constant 1.000000e+00 : f32
    %165 = vector.broadcast %cst_76 : f32 to vector<4x32xf32>
    %166 = arith.subf %165, %159 : vector<4x32xf32>
    %167 = arith.mulf %166, %164 : vector<4x32xf32>
    %168 = arith.mulf %159, %85 : vector<4x32xf32>
    %169 = arith.addf %167, %168 : vector<4x32xf32>
    %c2 = arith.constant 2 : index
    %c0_77 = arith.constant 0 : index
    %c0_78 = arith.constant 0 : index
    %170 = vector.load %arg0[%c2, %c0_77, %c0_78] : memref<8x4x16xf32, #tpu.memory_space<vmem>>, vector<1x4x16xf32>
    %171 = vector.shape_cast %170 : vector<1x4x16xf32> to vector<4x16xf32>
    %c0_79 = arith.constant 0 : index
    %c0_80 = arith.constant 0 : index
    %c0_81 = arith.constant 0 : index
    %172 = vector.load %arg2[%c0_79, %c0_80, %c0_81] : memref<2x16x384xf32, #tpu.memory_space<vmem>>, vector<1x16x384xf32>
    %173 = vector.shape_cast %172 : vector<1x16x384xf32> to vector<16x384xf32>
    %c0_82 = arith.constant 0 : index
    %c0_83 = arith.constant 0 : index
    %c0_84 = arith.constant 0 : index
    %174 = vector.load %arg3[%c0_82, %c0_83, %c0_84] : memref<2x32x384xf32, #tpu.memory_space<vmem>>, vector<1x32x384xf32>
    %175 = vector.shape_cast %174 : vector<1x32x384xf32> to vector<32x384xf32>
    %c0_85 = arith.constant 0 : index
    %c0_86 = arith.constant 0 : index
    %c0_87 = arith.constant 0 : index
    %176 = vector.load %arg4[%c0_85, %c0_86, %c0_87] : memref<2x1x384xf32, #tpu.memory_space<vmem>>, vector<1x1x384xf32>
    %177 = vector.shape_cast %176 : vector<1x1x384xf32> to vector<1x384xf32>
    %c0_88 = arith.constant 0 : index
    %c0_89 = arith.constant 0 : index
    %c0_90 = arith.constant 0 : index
    %178 = vector.load %arg5[%c0_88, %c0_89, %c0_90] : memref<2x1x384xf32, #tpu.memory_space<vmem>>, vector<1x1x384xf32>
    %179 = vector.shape_cast %178 : vector<1x1x384xf32> to vector<1x384xf32>
    %cst_91 = arith.constant dense<0.000000e+00> : vector<4x384xf32>
    %180 = tpu.matmul %171, %173, %cst_91 {dimension_numbers = #tpu.dot_dimension_numbers<[1], [0], [0], [1], [0, 0, 1, 1], [], []>} : vector<4x16xf32>, vector<16x384xf32>, vector<4x384xf32> -> vector<4x384xf32>
    %181 = vector.broadcast %177 : vector<1x384xf32> to vector<4x384xf32>
    %182 = arith.addf %180, %181 : vector<4x384xf32>
    %cst_92 = arith.constant dense<0.000000e+00> : vector<4x384xf32>
    %183 = tpu.matmul %127, %175, %cst_92 {dimension_numbers = #tpu.dot_dimension_numbers<[1], [0], [0], [1], [0, 0, 1, 1], [], []>} : vector<4x32xf32>, vector<32x384xf32>, vector<4x384xf32> -> vector<4x384xf32>
    %184 = vector.broadcast %179 : vector<1x384xf32> to vector<4x384xf32>
    %185 = arith.addf %183, %184 : vector<4x384xf32>
    %186 = vector.extract_strided_slice %182 {offsets = [0, 0], sizes = [4, 32], strides = [1, 1]} : vector<4x384xf32> to vector<4x32xf32>
    %187 = vector.extract_strided_slice %185 {offsets = [0, 0], sizes = [4, 32], strides = [1, 1]} : vector<4x384xf32> to vector<4x32xf32>
    %188 = arith.addf %186, %187 : vector<4x32xf32>
    %189 = arith.negf %188 : vector<4x32xf32>
    %190 = math.exp %189 : vector<4x32xf32>
    %cst_93 = arith.constant 1.000000e+00 : f32
    %191 = vector.broadcast %cst_93 : f32 to vector<4x32xf32>
    %192 = arith.addf %191, %190 : vector<4x32xf32>
    %193 = arith.divf %191, %192 : vector<4x32xf32>
    %194 = vector.extract_strided_slice %182 {offsets = [0, 128], sizes = [4, 32], strides = [1, 1]} : vector<4x384xf32> to vector<4x32xf32>
    %195 = vector.extract_strided_slice %185 {offsets = [0, 128], sizes = [4, 32], strides = [1, 1]} : vector<4x384xf32> to vector<4x32xf32>
    %196 = arith.addf %194, %195 : vector<4x32xf32>
    %197 = arith.negf %196 : vector<4x32xf32>
    %198 = math.exp %197 : vector<4x32xf32>
    %cst_94 = arith.constant 1.000000e+00 : f32
    %199 = vector.broadcast %cst_94 : f32 to vector<4x32xf32>
    %200 = arith.addf %199, %198 : vector<4x32xf32>
    %201 = arith.divf %199, %200 : vector<4x32xf32>
    %202 = vector.extract_strided_slice %182 {offsets = [0, 256], sizes = [4, 32], strides = [1, 1]} : vector<4x384xf32> to vector<4x32xf32>
    %203 = vector.extract_strided_slice %185 {offsets = [0, 256], sizes = [4, 32], strides = [1, 1]} : vector<4x384xf32> to vector<4x32xf32>
    %204 = arith.mulf %193, %203 : vector<4x32xf32>
    %205 = arith.addf %202, %204 : vector<4x32xf32>
    %206 = math.tanh %205 : vector<4x32xf32>
    %cst_95 = arith.constant 1.000000e+00 : f32
    %207 = vector.broadcast %cst_95 : f32 to vector<4x32xf32>
    %208 = arith.subf %207, %201 : vector<4x32xf32>
    %209 = arith.mulf %208, %206 : vector<4x32xf32>
    %210 = arith.mulf %201, %127 : vector<4x32xf32>
    %211 = arith.addf %209, %210 : vector<4x32xf32>
    %c5 = arith.constant 5 : index
    %c0_96 = arith.constant 0 : index
    %c0_97 = arith.constant 0 : index
    %212 = vector.load %arg0[%c5, %c0_96, %c0_97] : memref<8x4x16xf32, #tpu.memory_space<vmem>>, vector<1x4x16xf32>
    %213 = vector.shape_cast %212 : vector<1x4x16xf32> to vector<4x16xf32>
    %c1_98 = arith.constant 1 : index
    %c0_99 = arith.constant 0 : index
    %c0_100 = arith.constant 0 : index
    %214 = vector.load %arg2[%c1_98, %c0_99, %c0_100] : memref<2x16x384xf32, #tpu.memory_space<vmem>>, vector<1x16x384xf32>
    %215 = vector.shape_cast %214 : vector<1x16x384xf32> to vector<16x384xf32>
    %c1_101 = arith.constant 1 : index
    %c0_102 = arith.constant 0 : index
    %c0_103 = arith.constant 0 : index
    %216 = vector.load %arg3[%c1_101, %c0_102, %c0_103] : memref<2x32x384xf32, #tpu.memory_space<vmem>>, vector<1x32x384xf32>
    %217 = vector.shape_cast %216 : vector<1x32x384xf32> to vector<32x384xf32>
    %c1_104 = arith.constant 1 : index
    %c0_105 = arith.constant 0 : index
    %c0_106 = arith.constant 0 : index
    %218 = vector.load %arg4[%c1_104, %c0_105, %c0_106] : memref<2x1x384xf32, #tpu.memory_space<vmem>>, vector<1x1x384xf32>
    %219 = vector.shape_cast %218 : vector<1x1x384xf32> to vector<1x384xf32>
    %c1_107 = arith.constant 1 : index
    %c0_108 = arith.constant 0 : index
    %c0_109 = arith.constant 0 : index
    %220 = vector.load %arg5[%c1_107, %c0_108, %c0_109] : memref<2x1x384xf32, #tpu.memory_space<vmem>>, vector<1x1x384xf32>
    %221 = vector.shape_cast %220 : vector<1x1x384xf32> to vector<1x384xf32>
    %cst_110 = arith.constant dense<0.000000e+00> : vector<4x384xf32>
    %222 = tpu.matmul %213, %215, %cst_110 {dimension_numbers = #tpu.dot_dimension_numbers<[1], [0], [0], [1], [0, 0, 1, 1], [], []>} : vector<4x16xf32>, vector<16x384xf32>, vector<4x384xf32> -> vector<4x384xf32>
    %223 = vector.broadcast %219 : vector<1x384xf32> to vector<4x384xf32>
    %224 = arith.addf %222, %223 : vector<4x384xf32>
    %cst_111 = arith.constant dense<0.000000e+00> : vector<4x384xf32>
    %225 = tpu.matmul %169, %217, %cst_111 {dimension_numbers = #tpu.dot_dimension_numbers<[1], [0], [0], [1], [0, 0, 1, 1], [], []>} : vector<4x32xf32>, vector<32x384xf32>, vector<4x384xf32> -> vector<4x384xf32>
    %226 = vector.broadcast %221 : vector<1x384xf32> to vector<4x384xf32>
    %227 = arith.addf %225, %226 : vector<4x384xf32>
    %228 = vector.extract_strided_slice %224 {offsets = [0, 0], sizes = [4, 32], strides = [1, 1]} : vector<4x384xf32> to vector<4x32xf32>
    %229 = vector.extract_strided_slice %227 {offsets = [0, 0], sizes = [4, 32], strides = [1, 1]} : vector<4x384xf32> to vector<4x32xf32>
    %230 = arith.addf %228, %229 : vector<4x32xf32>
    %231 = arith.negf %230 : vector<4x32xf32>
    %232 = math.exp %231 : vector<4x32xf32>
    %cst_112 = arith.constant 1.000000e+00 : f32
    %233 = vector.broadcast %cst_112 : f32 to vector<4x32xf32>
    %234 = arith.addf %233, %232 : vector<4x32xf32>
    %235 = arith.divf %233, %234 : vector<4x32xf32>
    %236 = vector.extract_strided_slice %224 {offsets = [0, 128], sizes = [4, 32], strides = [1, 1]} : vector<4x384xf32> to vector<4x32xf32>
    %237 = vector.extract_strided_slice %227 {offsets = [0, 128], sizes = [4, 32], strides = [1, 1]} : vector<4x384xf32> to vector<4x32xf32>
    %238 = arith.addf %236, %237 : vector<4x32xf32>
    %239 = arith.negf %238 : vector<4x32xf32>
    %240 = math.exp %239 : vector<4x32xf32>
    %cst_113 = arith.constant 1.000000e+00 : f32
    %241 = vector.broadcast %cst_113 : f32 to vector<4x32xf32>
    %242 = arith.addf %241, %240 : vector<4x32xf32>
    %243 = arith.divf %241, %242 : vector<4x32xf32>
    %244 = vector.extract_strided_slice %224 {offsets = [0, 256], sizes = [4, 32], strides = [1, 1]} : vector<4x384xf32> to vector<4x32xf32>
    %245 = vector.extract_strided_slice %227 {offsets = [0, 256], sizes = [4, 32], strides = [1, 1]} : vector<4x384xf32> to vector<4x32xf32>
    %246 = arith.mulf %235, %245 : vector<4x32xf32>
    %247 = arith.addf %244, %246 : vector<4x32xf32>
    %248 = math.tanh %247 : vector<4x32xf32>
    %cst_114 = arith.constant 1.000000e+00 : f32
    %249 = vector.broadcast %cst_114 : f32 to vector<4x32xf32>
    %250 = arith.subf %249, %243 : vector<4x32xf32>
    %251 = arith.mulf %250, %248 : vector<4x32xf32>
    %252 = arith.mulf %243, %169 : vector<4x32xf32>
    %253 = arith.addf %251, %252 : vector<4x32xf32>
    %c3 = arith.constant 3 : index
    %c0_115 = arith.constant 0 : index
    %c0_116 = arith.constant 0 : index
    %254 = vector.load %arg0[%c3, %c0_115, %c0_116] : memref<8x4x16xf32, #tpu.memory_space<vmem>>, vector<1x4x16xf32>
    %255 = vector.shape_cast %254 : vector<1x4x16xf32> to vector<4x16xf32>
    %c0_117 = arith.constant 0 : index
    %c0_118 = arith.constant 0 : index
    %c0_119 = arith.constant 0 : index
    %256 = vector.load %arg2[%c0_117, %c0_118, %c0_119] : memref<2x16x384xf32, #tpu.memory_space<vmem>>, vector<1x16x384xf32>
    %257 = vector.shape_cast %256 : vector<1x16x384xf32> to vector<16x384xf32>
    %c0_120 = arith.constant 0 : index
    %c0_121 = arith.constant 0 : index
    %c0_122 = arith.constant 0 : index
    %258 = vector.load %arg3[%c0_120, %c0_121, %c0_122] : memref<2x32x384xf32, #tpu.memory_space<vmem>>, vector<1x32x384xf32>
    %259 = vector.shape_cast %258 : vector<1x32x384xf32> to vector<32x384xf32>
    %c0_123 = arith.constant 0 : index
    %c0_124 = arith.constant 0 : index
    %c0_125 = arith.constant 0 : index
    %260 = vector.load %arg4[%c0_123, %c0_124, %c0_125] : memref<2x1x384xf32, #tpu.memory_space<vmem>>, vector<1x1x384xf32>
    %261 = vector.shape_cast %260 : vector<1x1x384xf32> to vector<1x384xf32>
    %c0_126 = arith.constant 0 : index
    %c0_127 = arith.constant 0 : index
    %c0_128 = arith.constant 0 : index
    %262 = vector.load %arg5[%c0_126, %c0_127, %c0_128] : memref<2x1x384xf32, #tpu.memory_space<vmem>>, vector<1x1x384xf32>
    %263 = vector.shape_cast %262 : vector<1x1x384xf32> to vector<1x384xf32>
    %cst_129 = arith.constant dense<0.000000e+00> : vector<4x384xf32>
    %264 = tpu.matmul %255, %257, %cst_129 {dimension_numbers = #tpu.dot_dimension_numbers<[1], [0], [0], [1], [0, 0, 1, 1], [], []>} : vector<4x16xf32>, vector<16x384xf32>, vector<4x384xf32> -> vector<4x384xf32>
    %265 = vector.broadcast %261 : vector<1x384xf32> to vector<4x384xf32>
    %266 = arith.addf %264, %265 : vector<4x384xf32>
    %cst_130 = arith.constant dense<0.000000e+00> : vector<4x384xf32>
    %267 = tpu.matmul %211, %259, %cst_130 {dimension_numbers = #tpu.dot_dimension_numbers<[1], [0], [0], [1], [0, 0, 1, 1], [], []>} : vector<4x32xf32>, vector<32x384xf32>, vector<4x384xf32> -> vector<4x384xf32>
    %268 = vector.broadcast %263 : vector<1x384xf32> to vector<4x384xf32>
    %269 = arith.addf %267, %268 : vector<4x384xf32>
    %270 = vector.extract_strided_slice %266 {offsets = [0, 0], sizes = [4, 32], strides = [1, 1]} : vector<4x384xf32> to vector<4x32xf32>
    %271 = vector.extract_strided_slice %269 {offsets = [0, 0], sizes = [4, 32], strides = [1, 1]} : vector<4x384xf32> to vector<4x32xf32>
    %272 = arith.addf %270, %271 : vector<4x32xf32>
    %273 = arith.negf %272 : vector<4x32xf32>
    %274 = math.exp %273 : vector<4x32xf32>
    %cst_131 = arith.constant 1.000000e+00 : f32
    %275 = vector.broadcast %cst_131 : f32 to vector<4x32xf32>
    %276 = arith.addf %275, %274 : vector<4x32xf32>
    %277 = arith.divf %275, %276 : vector<4x32xf32>
    %278 = vector.extract_strided_slice %266 {offsets = [0, 128], sizes = [4, 32], strides = [1, 1]} : vector<4x384xf32> to vector<4x32xf32>
    %279 = vector.extract_strided_slice %269 {offsets = [0, 128], sizes = [4, 32], strides = [1, 1]} : vector<4x384xf32> to vector<4x32xf32>
    %280 = arith.addf %278, %279 : vector<4x32xf32>
    %281 = arith.negf %280 : vector<4x32xf32>
    %282 = math.exp %281 : vector<4x32xf32>
    %cst_132 = arith.constant 1.000000e+00 : f32
    %283 = vector.broadcast %cst_132 : f32 to vector<4x32xf32>
    %284 = arith.addf %283, %282 : vector<4x32xf32>
    %285 = arith.divf %283, %284 : vector<4x32xf32>
    %286 = vector.extract_strided_slice %266 {offsets = [0, 256], sizes = [4, 32], strides = [1, 1]} : vector<4x384xf32> to vector<4x32xf32>
    %287 = vector.extract_strided_slice %269 {offsets = [0, 256], sizes = [4, 32], strides = [1, 1]} : vector<4x384xf32> to vector<4x32xf32>
    %288 = arith.mulf %277, %287 : vector<4x32xf32>
    %289 = arith.addf %286, %288 : vector<4x32xf32>
    %290 = math.tanh %289 : vector<4x32xf32>
    %cst_133 = arith.constant 1.000000e+00 : f32
    %291 = vector.broadcast %cst_133 : f32 to vector<4x32xf32>
    %292 = arith.subf %291, %285 : vector<4x32xf32>
    %293 = arith.mulf %292, %290 : vector<4x32xf32>
    %294 = arith.mulf %285, %211 : vector<4x32xf32>
    %295 = arith.addf %293, %294 : vector<4x32xf32>
    %c4 = arith.constant 4 : index
    %c0_134 = arith.constant 0 : index
    %c0_135 = arith.constant 0 : index
    %296 = vector.load %arg0[%c4, %c0_134, %c0_135] : memref<8x4x16xf32, #tpu.memory_space<vmem>>, vector<1x4x16xf32>
    %297 = vector.shape_cast %296 : vector<1x4x16xf32> to vector<4x16xf32>
    %c1_136 = arith.constant 1 : index
    %c0_137 = arith.constant 0 : index
    %c0_138 = arith.constant 0 : index
    %298 = vector.load %arg2[%c1_136, %c0_137, %c0_138] : memref<2x16x384xf32, #tpu.memory_space<vmem>>, vector<1x16x384xf32>
    %299 = vector.shape_cast %298 : vector<1x16x384xf32> to vector<16x384xf32>
    %c1_139 = arith.constant 1 : index
    %c0_140 = arith.constant 0 : index
    %c0_141 = arith.constant 0 : index
    %300 = vector.load %arg3[%c1_139, %c0_140, %c0_141] : memref<2x32x384xf32, #tpu.memory_space<vmem>>, vector<1x32x384xf32>
    %301 = vector.shape_cast %300 : vector<1x32x384xf32> to vector<32x384xf32>
    %c1_142 = arith.constant 1 : index
    %c0_143 = arith.constant 0 : index
    %c0_144 = arith.constant 0 : index
    %302 = vector.load %arg4[%c1_142, %c0_143, %c0_144] : memref<2x1x384xf32, #tpu.memory_space<vmem>>, vector<1x1x384xf32>
    %303 = vector.shape_cast %302 : vector<1x1x384xf32> to vector<1x384xf32>
    %c1_145 = arith.constant 1 : index
    %c0_146 = arith.constant 0 : index
    %c0_147 = arith.constant 0 : index
    %304 = vector.load %arg5[%c1_145, %c0_146, %c0_147] : memref<2x1x384xf32, #tpu.memory_space<vmem>>, vector<1x1x384xf32>
    %305 = vector.shape_cast %304 : vector<1x1x384xf32> to vector<1x384xf32>
    %cst_148 = arith.constant dense<0.000000e+00> : vector<4x384xf32>
    %306 = tpu.matmul %297, %299, %cst_148 {dimension_numbers = #tpu.dot_dimension_numbers<[1], [0], [0], [1], [0, 0, 1, 1], [], []>} : vector<4x16xf32>, vector<16x384xf32>, vector<4x384xf32> -> vector<4x384xf32>
    %307 = vector.broadcast %303 : vector<1x384xf32> to vector<4x384xf32>
    %308 = arith.addf %306, %307 : vector<4x384xf32>
    %cst_149 = arith.constant dense<0.000000e+00> : vector<4x384xf32>
    %309 = tpu.matmul %253, %301, %cst_149 {dimension_numbers = #tpu.dot_dimension_numbers<[1], [0], [0], [1], [0, 0, 1, 1], [], []>} : vector<4x32xf32>, vector<32x384xf32>, vector<4x384xf32> -> vector<4x384xf32>
    %310 = vector.broadcast %305 : vector<1x384xf32> to vector<4x384xf32>
    %311 = arith.addf %309, %310 : vector<4x384xf32>
    %312 = vector.extract_strided_slice %308 {offsets = [0, 0], sizes = [4, 32], strides = [1, 1]} : vector<4x384xf32> to vector<4x32xf32>
    %313 = vector.extract_strided_slice %311 {offsets = [0, 0], sizes = [4, 32], strides = [1, 1]} : vector<4x384xf32> to vector<4x32xf32>
    %314 = arith.addf %312, %313 : vector<4x32xf32>
    %315 = arith.negf %314 : vector<4x32xf32>
    %316 = math.exp %315 : vector<4x32xf32>
    %cst_150 = arith.constant 1.000000e+00 : f32
    %317 = vector.broadcast %cst_150 : f32 to vector<4x32xf32>
    %318 = arith.addf %317, %316 : vector<4x32xf32>
    %319 = arith.divf %317, %318 : vector<4x32xf32>
    %320 = vector.extract_strided_slice %308 {offsets = [0, 128], sizes = [4, 32], strides = [1, 1]} : vector<4x384xf32> to vector<4x32xf32>
    %321 = vector.extract_strided_slice %311 {offsets = [0, 128], sizes = [4, 32], strides = [1, 1]} : vector<4x384xf32> to vector<4x32xf32>
    %322 = arith.addf %320, %321 : vector<4x32xf32>
    %323 = arith.negf %322 : vector<4x32xf32>
    %324 = math.exp %323 : vector<4x32xf32>
    %cst_151 = arith.constant 1.000000e+00 : f32
    %325 = vector.broadcast %cst_151 : f32 to vector<4x32xf32>
    %326 = arith.addf %325, %324 : vector<4x32xf32>
    %327 = arith.divf %325, %326 : vector<4x32xf32>
    %328 = vector.extract_strided_slice %308 {offsets = [0, 256], sizes = [4, 32], strides = [1, 1]} : vector<4x384xf32> to vector<4x32xf32>
    %329 = vector.extract_strided_slice %311 {offsets = [0, 256], sizes = [4, 32], strides = [1, 1]} : vector<4x384xf32> to vector<4x32xf32>
    %330 = arith.mulf %319, %329 : vector<4x32xf32>
    %331 = arith.addf %328, %330 : vector<4x32xf32>
    %332 = math.tanh %331 : vector<4x32xf32>
    %cst_152 = arith.constant 1.000000e+00 : f32
    %333 = vector.broadcast %cst_152 : f32 to vector<4x32xf32>
    %334 = arith.subf %333, %327 : vector<4x32xf32>
    %335 = arith.mulf %334, %332 : vector<4x32xf32>
    %336 = arith.mulf %327, %253 : vector<4x32xf32>
    %337 = arith.addf %335, %336 : vector<4x32xf32>
    %c4_153 = arith.constant 4 : index
    %c0_154 = arith.constant 0 : index
    %c0_155 = arith.constant 0 : index
    %338 = vector.load %arg0[%c4_153, %c0_154, %c0_155] : memref<8x4x16xf32, #tpu.memory_space<vmem>>, vector<1x4x16xf32>
    %339 = vector.shape_cast %338 : vector<1x4x16xf32> to vector<4x16xf32>
    %c0_156 = arith.constant 0 : index
    %c0_157 = arith.constant 0 : index
    %c0_158 = arith.constant 0 : index
    %340 = vector.load %arg2[%c0_156, %c0_157, %c0_158] : memref<2x16x384xf32, #tpu.memory_space<vmem>>, vector<1x16x384xf32>
    %341 = vector.shape_cast %340 : vector<1x16x384xf32> to vector<16x384xf32>
    %c0_159 = arith.constant 0 : index
    %c0_160 = arith.constant 0 : index
    %c0_161 = arith.constant 0 : index
    %342 = vector.load %arg3[%c0_159, %c0_160, %c0_161] : memref<2x32x384xf32, #tpu.memory_space<vmem>>, vector<1x32x384xf32>
    %343 = vector.shape_cast %342 : vector<1x32x384xf32> to vector<32x384xf32>
    %c0_162 = arith.constant 0 : index
    %c0_163 = arith.constant 0 : index
    %c0_164 = arith.constant 0 : index
    %344 = vector.load %arg4[%c0_162, %c0_163, %c0_164] : memref<2x1x384xf32, #tpu.memory_space<vmem>>, vector<1x1x384xf32>
    %345 = vector.shape_cast %344 : vector<1x1x384xf32> to vector<1x384xf32>
    %c0_165 = arith.constant 0 : index
    %c0_166 = arith.constant 0 : index
    %c0_167 = arith.constant 0 : index
    %346 = vector.load %arg5[%c0_165, %c0_166, %c0_167] : memref<2x1x384xf32, #tpu.memory_space<vmem>>, vector<1x1x384xf32>
    %347 = vector.shape_cast %346 : vector<1x1x384xf32> to vector<1x384xf32>
    %cst_168 = arith.constant dense<0.000000e+00> : vector<4x384xf32>
    %348 = tpu.matmul %339, %341, %cst_168 {dimension_numbers = #tpu.dot_dimension_numbers<[1], [0], [0], [1], [0, 0, 1, 1], [], []>} : vector<4x16xf32>, vector<16x384xf32>, vector<4x384xf32> -> vector<4x384xf32>
    %349 = vector.broadcast %345 : vector<1x384xf32> to vector<4x384xf32>
    %350 = arith.addf %348, %349 : vector<4x384xf32>
    %cst_169 = arith.constant dense<0.000000e+00> : vector<4x384xf32>
    %351 = tpu.matmul %295, %343, %cst_169 {dimension_numbers = #tpu.dot_dimension_numbers<[1], [0], [0], [1], [0, 0, 1, 1], [], []>} : vector<4x32xf32>, vector<32x384xf32>, vector<4x384xf32> -> vector<4x384xf32>
    %352 = vector.broadcast %347 : vector<1x384xf32> to vector<4x384xf32>
    %353 = arith.addf %351, %352 : vector<4x384xf32>
    %354 = vector.extract_strided_slice %350 {offsets = [0, 0], sizes = [4, 32], strides = [1, 1]} : vector<4x384xf32> to vector<4x32xf32>
    %355 = vector.extract_strided_slice %353 {offsets = [0, 0], sizes = [4, 32], strides = [1, 1]} : vector<4x384xf32> to vector<4x32xf32>
    %356 = arith.addf %354, %355 : vector<4x32xf32>
    %357 = arith.negf %356 : vector<4x32xf32>
    %358 = math.exp %357 : vector<4x32xf32>
    %cst_170 = arith.constant 1.000000e+00 : f32
    %359 = vector.broadcast %cst_170 : f32 to vector<4x32xf32>
    %360 = arith.addf %359, %358 : vector<4x32xf32>
    %361 = arith.divf %359, %360 : vector<4x32xf32>
    %362 = vector.extract_strided_slice %350 {offsets = [0, 128], sizes = [4, 32], strides = [1, 1]} : vector<4x384xf32> to vector<4x32xf32>
    %363 = vector.extract_strided_slice %353 {offsets = [0, 128], sizes = [4, 32], strides = [1, 1]} : vector<4x384xf32> to vector<4x32xf32>
    %364 = arith.addf %362, %363 : vector<4x32xf32>
    %365 = arith.negf %364 : vector<4x32xf32>
    %366 = math.exp %365 : vector<4x32xf32>
    %cst_171 = arith.constant 1.000000e+00 : f32
    %367 = vector.broadcast %cst_171 : f32 to vector<4x32xf32>
    %368 = arith.addf %367, %366 : vector<4x32xf32>
    %369 = arith.divf %367, %368 : vector<4x32xf32>
    %370 = vector.extract_strided_slice %350 {offsets = [0, 256], sizes = [4, 32], strides = [1, 1]} : vector<4x384xf32> to vector<4x32xf32>
    %371 = vector.extract_strided_slice %353 {offsets = [0, 256], sizes = [4, 32], strides = [1, 1]} : vector<4x384xf32> to vector<4x32xf32>
    %372 = arith.mulf %361, %371 : vector<4x32xf32>
    %373 = arith.addf %370, %372 : vector<4x32xf32>
    %374 = math.tanh %373 : vector<4x32xf32>
    %cst_172 = arith.constant 1.000000e+00 : f32
    %375 = vector.broadcast %cst_172 : f32 to vector<4x32xf32>
    %376 = arith.subf %375, %369 : vector<4x32xf32>
    %377 = arith.mulf %376, %374 : vector<4x32xf32>
    %378 = arith.mulf %369, %295 : vector<4x32xf32>
    %379 = arith.addf %377, %378 : vector<4x32xf32>
    %c3_173 = arith.constant 3 : index
    %c0_174 = arith.constant 0 : index
    %c0_175 = arith.constant 0 : index
    %380 = vector.load %arg0[%c3_173, %c0_174, %c0_175] : memref<8x4x16xf32, #tpu.memory_space<vmem>>, vector<1x4x16xf32>
    %381 = vector.shape_cast %380 : vector<1x4x16xf32> to vector<4x16xf32>
    %c1_176 = arith.constant 1 : index
    %c0_177 = arith.constant 0 : index
    %c0_178 = arith.constant 0 : index
    %382 = vector.load %arg2[%c1_176, %c0_177, %c0_178] : memref<2x16x384xf32, #tpu.memory_space<vmem>>, vector<1x16x384xf32>
    %383 = vector.shape_cast %382 : vector<1x16x384xf32> to vector<16x384xf32>
    %c1_179 = arith.constant 1 : index
    %c0_180 = arith.constant 0 : index
    %c0_181 = arith.constant 0 : index
    %384 = vector.load %arg3[%c1_179, %c0_180, %c0_181] : memref<2x32x384xf32, #tpu.memory_space<vmem>>, vector<1x32x384xf32>
    %385 = vector.shape_cast %384 : vector<1x32x384xf32> to vector<32x384xf32>
    %c1_182 = arith.constant 1 : index
    %c0_183 = arith.constant 0 : index
    %c0_184 = arith.constant 0 : index
    %386 = vector.load %arg4[%c1_182, %c0_183, %c0_184] : memref<2x1x384xf32, #tpu.memory_space<vmem>>, vector<1x1x384xf32>
    %387 = vector.shape_cast %386 : vector<1x1x384xf32> to vector<1x384xf32>
    %c1_185 = arith.constant 1 : index
    %c0_186 = arith.constant 0 : index
    %c0_187 = arith.constant 0 : index
    %388 = vector.load %arg5[%c1_185, %c0_186, %c0_187] : memref<2x1x384xf32, #tpu.memory_space<vmem>>, vector<1x1x384xf32>
    %389 = vector.shape_cast %388 : vector<1x1x384xf32> to vector<1x384xf32>
    %cst_188 = arith.constant dense<0.000000e+00> : vector<4x384xf32>
    %390 = tpu.matmul %381, %383, %cst_188 {dimension_numbers = #tpu.dot_dimension_numbers<[1], [0], [0], [1], [0, 0, 1, 1], [], []>} : vector<4x16xf32>, vector<16x384xf32>, vector<4x384xf32> -> vector<4x384xf32>
    %391 = vector.broadcast %387 : vector<1x384xf32> to vector<4x384xf32>
    %392 = arith.addf %390, %391 : vector<4x384xf32>
    %cst_189 = arith.constant dense<0.000000e+00> : vector<4x384xf32>
    %393 = tpu.matmul %337, %385, %cst_189 {dimension_numbers = #tpu.dot_dimension_numbers<[1], [0], [0], [1], [0, 0, 1, 1], [], []>} : vector<4x32xf32>, vector<32x384xf32>, vector<4x384xf32> -> vector<4x384xf32>
    %394 = vector.broadcast %389 : vector<1x384xf32> to vector<4x384xf32>
    %395 = arith.addf %393, %394 : vector<4x384xf32>
    %396 = vector.extract_strided_slice %392 {offsets = [0, 0], sizes = [4, 32], strides = [1, 1]} : vector<4x384xf32> to vector<4x32xf32>
    %397 = vector.extract_strided_slice %395 {offsets = [0, 0], sizes = [4, 32], strides = [1, 1]} : vector<4x384xf32> to vector<4x32xf32>
    %398 = arith.addf %396, %397 : vector<4x32xf32>
    %399 = arith.negf %398 : vector<4x32xf32>
    %400 = math.exp %399 : vector<4x32xf32>
    %cst_190 = arith.constant 1.000000e+00 : f32
    %401 = vector.broadcast %cst_190 : f32 to vector<4x32xf32>
    %402 = arith.addf %401, %400 : vector<4x32xf32>
    %403 = arith.divf %401, %402 : vector<4x32xf32>
    %404 = vector.extract_strided_slice %392 {offsets = [0, 128], sizes = [4, 32], strides = [1, 1]} : vector<4x384xf32> to vector<4x32xf32>
    %405 = vector.extract_strided_slice %395 {offsets = [0, 128], sizes = [4, 32], strides = [1, 1]} : vector<4x384xf32> to vector<4x32xf32>
    %406 = arith.addf %404, %405 : vector<4x32xf32>
    %407 = arith.negf %406 : vector<4x32xf32>
    %408 = math.exp %407 : vector<4x32xf32>
    %cst_191 = arith.constant 1.000000e+00 : f32
    %409 = vector.broadcast %cst_191 : f32 to vector<4x32xf32>
    %410 = arith.addf %409, %408 : vector<4x32xf32>
    %411 = arith.divf %409, %410 : vector<4x32xf32>
    %412 = vector.extract_strided_slice %392 {offsets = [0, 256], sizes = [4, 32], strides = [1, 1]} : vector<4x384xf32> to vector<4x32xf32>
    %413 = vector.extract_strided_slice %395 {offsets = [0, 256], sizes = [4, 32], strides = [1, 1]} : vector<4x384xf32> to vector<4x32xf32>
    %414 = arith.mulf %403, %413 : vector<4x32xf32>
    %415 = arith.addf %412, %414 : vector<4x32xf32>
    %416 = math.tanh %415 : vector<4x32xf32>
    %cst_192 = arith.constant 1.000000e+00 : f32
    %417 = vector.broadcast %cst_192 : f32 to vector<4x32xf32>
    %418 = arith.subf %417, %411 : vector<4x32xf32>
    %419 = arith.mulf %418, %416 : vector<4x32xf32>
    %420 = arith.mulf %411, %337 : vector<4x32xf32>
    %421 = arith.addf %419, %420 : vector<4x32xf32>
    %c5_193 = arith.constant 5 : index
    %c0_194 = arith.constant 0 : index
    %c0_195 = arith.constant 0 : index
    %422 = vector.load %arg0[%c5_193, %c0_194, %c0_195] : memref<8x4x16xf32, #tpu.memory_space<vmem>>, vector<1x4x16xf32>
    %423 = vector.shape_cast %422 : vector<1x4x16xf32> to vector<4x16xf32>
    %c0_196 = arith.constant 0 : index
    %c0_197 = arith.constant 0 : index
    %c0_198 = arith.constant 0 : index
    %424 = vector.load %arg2[%c0_196, %c0_197, %c0_198] : memref<2x16x384xf32, #tpu.memory_space<vmem>>, vector<1x16x384xf32>
    %425 = vector.shape_cast %424 : vector<1x16x384xf32> to vector<16x384xf32>
    %c0_199 = arith.constant 0 : index
    %c0_200 = arith.constant 0 : index
    %c0_201 = arith.constant 0 : index
    %426 = vector.load %arg3[%c0_199, %c0_200, %c0_201] : memref<2x32x384xf32, #tpu.memory_space<vmem>>, vector<1x32x384xf32>
    %427 = vector.shape_cast %426 : vector<1x32x384xf32> to vector<32x384xf32>
    %c0_202 = arith.constant 0 : index
    %c0_203 = arith.constant 0 : index
    %c0_204 = arith.constant 0 : index
    %428 = vector.load %arg4[%c0_202, %c0_203, %c0_204] : memref<2x1x384xf32, #tpu.memory_space<vmem>>, vector<1x1x384xf32>
    %429 = vector.shape_cast %428 : vector<1x1x384xf32> to vector<1x384xf32>
    %c0_205 = arith.constant 0 : index
    %c0_206 = arith.constant 0 : index
    %c0_207 = arith.constant 0 : index
    %430 = vector.load %arg5[%c0_205, %c0_206, %c0_207] : memref<2x1x384xf32, #tpu.memory_space<vmem>>, vector<1x1x384xf32>
    %431 = vector.shape_cast %430 : vector<1x1x384xf32> to vector<1x384xf32>
    %cst_208 = arith.constant dense<0.000000e+00> : vector<4x384xf32>
    %432 = tpu.matmul %423, %425, %cst_208 {dimension_numbers = #tpu.dot_dimension_numbers<[1], [0], [0], [1], [0, 0, 1, 1], [], []>} : vector<4x16xf32>, vector<16x384xf32>, vector<4x384xf32> -> vector<4x384xf32>
    %433 = vector.broadcast %429 : vector<1x384xf32> to vector<4x384xf32>
    %434 = arith.addf %432, %433 : vector<4x384xf32>
    %cst_209 = arith.constant dense<0.000000e+00> : vector<4x384xf32>
    %435 = tpu.matmul %379, %427, %cst_209 {dimension_numbers = #tpu.dot_dimension_numbers<[1], [0], [0], [1], [0, 0, 1, 1], [], []>} : vector<4x32xf32>, vector<32x384xf32>, vector<4x384xf32> -> vector<4x384xf32>
    %436 = vector.broadcast %431 : vector<1x384xf32> to vector<4x384xf32>
    %437 = arith.addf %435, %436 : vector<4x384xf32>
    %438 = vector.extract_strided_slice %434 {offsets = [0, 0], sizes = [4, 32], strides = [1, 1]} : vector<4x384xf32> to vector<4x32xf32>
    %439 = vector.extract_strided_slice %437 {offsets = [0, 0], sizes = [4, 32], strides = [1, 1]} : vector<4x384xf32> to vector<4x32xf32>
    %440 = arith.addf %438, %439 : vector<4x32xf32>
    %441 = arith.negf %440 : vector<4x32xf32>
    %442 = math.exp %441 : vector<4x32xf32>
    %cst_210 = arith.constant 1.000000e+00 : f32
    %443 = vector.broadcast %cst_210 : f32 to vector<4x32xf32>
    %444 = arith.addf %443, %442 : vector<4x32xf32>
    %445 = arith.divf %443, %444 : vector<4x32xf32>
    %446 = vector.extract_strided_slice %434 {offsets = [0, 128], sizes = [4, 32], strides = [1, 1]} : vector<4x384xf32> to vector<4x32xf32>
    %447 = vector.extract_strided_slice %437 {offsets = [0, 128], sizes = [4, 32], strides = [1, 1]} : vector<4x384xf32> to vector<4x32xf32>
    %448 = arith.addf %446, %447 : vector<4x32xf32>
    %449 = arith.negf %448 : vector<4x32xf32>
    %450 = math.exp %449 : vector<4x32xf32>
    %cst_211 = arith.constant 1.000000e+00 : f32
    %451 = vector.broadcast %cst_211 : f32 to vector<4x32xf32>
    %452 = arith.addf %451, %450 : vector<4x32xf32>
    %453 = arith.divf %451, %452 : vector<4x32xf32>
    %454 = vector.extract_strided_slice %434 {offsets = [0, 256], sizes = [4, 32], strides = [1, 1]} : vector<4x384xf32> to vector<4x32xf32>
    %455 = vector.extract_strided_slice %437 {offsets = [0, 256], sizes = [4, 32], strides = [1, 1]} : vector<4x384xf32> to vector<4x32xf32>
    %456 = arith.mulf %445, %455 : vector<4x32xf32>
    %457 = arith.addf %454, %456 : vector<4x32xf32>
    %458 = math.tanh %457 : vector<4x32xf32>
    %cst_212 = arith.constant 1.000000e+00 : f32
    %459 = vector.broadcast %cst_212 : f32 to vector<4x32xf32>
    %460 = arith.subf %459, %453 : vector<4x32xf32>
    %461 = arith.mulf %460, %458 : vector<4x32xf32>
    %462 = arith.mulf %453, %379 : vector<4x32xf32>
    %463 = arith.addf %461, %462 : vector<4x32xf32>
    %c2_213 = arith.constant 2 : index
    %c0_214 = arith.constant 0 : index
    %c0_215 = arith.constant 0 : index
    %464 = vector.load %arg0[%c2_213, %c0_214, %c0_215] : memref<8x4x16xf32, #tpu.memory_space<vmem>>, vector<1x4x16xf32>
    %465 = vector.shape_cast %464 : vector<1x4x16xf32> to vector<4x16xf32>
    %c1_216 = arith.constant 1 : index
    %c0_217 = arith.constant 0 : index
    %c0_218 = arith.constant 0 : index
    %466 = vector.load %arg2[%c1_216, %c0_217, %c0_218] : memref<2x16x384xf32, #tpu.memory_space<vmem>>, vector<1x16x384xf32>
    %467 = vector.shape_cast %466 : vector<1x16x384xf32> to vector<16x384xf32>
    %c1_219 = arith.constant 1 : index
    %c0_220 = arith.constant 0 : index
    %c0_221 = arith.constant 0 : index
    %468 = vector.load %arg3[%c1_219, %c0_220, %c0_221] : memref<2x32x384xf32, #tpu.memory_space<vmem>>, vector<1x32x384xf32>
    %469 = vector.shape_cast %468 : vector<1x32x384xf32> to vector<32x384xf32>
    %c1_222 = arith.constant 1 : index
    %c0_223 = arith.constant 0 : index
    %c0_224 = arith.constant 0 : index
    %470 = vector.load %arg4[%c1_222, %c0_223, %c0_224] : memref<2x1x384xf32, #tpu.memory_space<vmem>>, vector<1x1x384xf32>
    %471 = vector.shape_cast %470 : vector<1x1x384xf32> to vector<1x384xf32>
    %c1_225 = arith.constant 1 : index
    %c0_226 = arith.constant 0 : index
    %c0_227 = arith.constant 0 : index
    %472 = vector.load %arg5[%c1_225, %c0_226, %c0_227] : memref<2x1x384xf32, #tpu.memory_space<vmem>>, vector<1x1x384xf32>
    %473 = vector.shape_cast %472 : vector<1x1x384xf32> to vector<1x384xf32>
    %cst_228 = arith.constant dense<0.000000e+00> : vector<4x384xf32>
    %474 = tpu.matmul %465, %467, %cst_228 {dimension_numbers = #tpu.dot_dimension_numbers<[1], [0], [0], [1], [0, 0, 1, 1], [], []>} : vector<4x16xf32>, vector<16x384xf32>, vector<4x384xf32> -> vector<4x384xf32>
    %475 = vector.broadcast %471 : vector<1x384xf32> to vector<4x384xf32>
    %476 = arith.addf %474, %475 : vector<4x384xf32>
    %cst_229 = arith.constant dense<0.000000e+00> : vector<4x384xf32>
    %477 = tpu.matmul %421, %469, %cst_229 {dimension_numbers = #tpu.dot_dimension_numbers<[1], [0], [0], [1], [0, 0, 1, 1], [], []>} : vector<4x32xf32>, vector<32x384xf32>, vector<4x384xf32> -> vector<4x384xf32>
    %478 = vector.broadcast %473 : vector<1x384xf32> to vector<4x384xf32>
    %479 = arith.addf %477, %478 : vector<4x384xf32>
    %480 = vector.extract_strided_slice %476 {offsets = [0, 0], sizes = [4, 32], strides = [1, 1]} : vector<4x384xf32> to vector<4x32xf32>
    %481 = vector.extract_strided_slice %479 {offsets = [0, 0], sizes = [4, 32], strides = [1, 1]} : vector<4x384xf32> to vector<4x32xf32>
    %482 = arith.addf %480, %481 : vector<4x32xf32>
    %483 = arith.negf %482 : vector<4x32xf32>
    %484 = math.exp %483 : vector<4x32xf32>
    %cst_230 = arith.constant 1.000000e+00 : f32
    %485 = vector.broadcast %cst_230 : f32 to vector<4x32xf32>
    %486 = arith.addf %485, %484 : vector<4x32xf32>
    %487 = arith.divf %485, %486 : vector<4x32xf32>
    %488 = vector.extract_strided_slice %476 {offsets = [0, 128], sizes = [4, 32], strides = [1, 1]} : vector<4x384xf32> to vector<4x32xf32>
    %489 = vector.extract_strided_slice %479 {offsets = [0, 128], sizes = [4, 32], strides = [1, 1]} : vector<4x384xf32> to vector<4x32xf32>
    %490 = arith.addf %488, %489 : vector<4x32xf32>
    %491 = arith.negf %490 : vector<4x32xf32>
    %492 = math.exp %491 : vector<4x32xf32>
    %cst_231 = arith.constant 1.000000e+00 : f32
    %493 = vector.broadcast %cst_231 : f32 to vector<4x32xf32>
    %494 = arith.addf %493, %492 : vector<4x32xf32>
    %495 = arith.divf %493, %494 : vector<4x32xf32>
    %496 = vector.extract_strided_slice %476 {offsets = [0, 256], sizes = [4, 32], strides = [1, 1]} : vector<4x384xf32> to vector<4x32xf32>
    %497 = vector.extract_strided_slice %479 {offsets = [0, 256], sizes = [4, 32], strides = [1, 1]} : vector<4x384xf32> to vector<4x32xf32>
    %498 = arith.mulf %487, %497 : vector<4x32xf32>
    %499 = arith.addf %496, %498 : vector<4x32xf32>
    %500 = math.tanh %499 : vector<4x32xf32>
    %cst_232 = arith.constant 1.000000e+00 : f32
    %501 = vector.broadcast %cst_232 : f32 to vector<4x32xf32>
    %502 = arith.subf %501, %495 : vector<4x32xf32>
    %503 = arith.mulf %502, %500 : vector<4x32xf32>
    %504 = arith.mulf %495, %421 : vector<4x32xf32>
    %505 = arith.addf %503, %504 : vector<4x32xf32>
    %c6_233 = arith.constant 6 : index
    %c0_234 = arith.constant 0 : index
    %c0_235 = arith.constant 0 : index
    %506 = vector.load %arg0[%c6_233, %c0_234, %c0_235] : memref<8x4x16xf32, #tpu.memory_space<vmem>>, vector<1x4x16xf32>
    %507 = vector.shape_cast %506 : vector<1x4x16xf32> to vector<4x16xf32>
    %c0_236 = arith.constant 0 : index
    %c0_237 = arith.constant 0 : index
    %c0_238 = arith.constant 0 : index
    %508 = vector.load %arg2[%c0_236, %c0_237, %c0_238] : memref<2x16x384xf32, #tpu.memory_space<vmem>>, vector<1x16x384xf32>
    %509 = vector.shape_cast %508 : vector<1x16x384xf32> to vector<16x384xf32>
    %c0_239 = arith.constant 0 : index
    %c0_240 = arith.constant 0 : index
    %c0_241 = arith.constant 0 : index
    %510 = vector.load %arg3[%c0_239, %c0_240, %c0_241] : memref<2x32x384xf32, #tpu.memory_space<vmem>>, vector<1x32x384xf32>
    %511 = vector.shape_cast %510 : vector<1x32x384xf32> to vector<32x384xf32>
    %c0_242 = arith.constant 0 : index
    %c0_243 = arith.constant 0 : index
    %c0_244 = arith.constant 0 : index
    %512 = vector.load %arg4[%c0_242, %c0_243, %c0_244] : memref<2x1x384xf32, #tpu.memory_space<vmem>>, vector<1x1x384xf32>
    %513 = vector.shape_cast %512 : vector<1x1x384xf32> to vector<1x384xf32>
    %c0_245 = arith.constant 0 : index
    %c0_246 = arith.constant 0 : index
    %c0_247 = arith.constant 0 : index
    %514 = vector.load %arg5[%c0_245, %c0_246, %c0_247] : memref<2x1x384xf32, #tpu.memory_space<vmem>>, vector<1x1x384xf32>
    %515 = vector.shape_cast %514 : vector<1x1x384xf32> to vector<1x384xf32>
    %cst_248 = arith.constant dense<0.000000e+00> : vector<4x384xf32>
    %516 = tpu.matmul %507, %509, %cst_248 {dimension_numbers = #tpu.dot_dimension_numbers<[1], [0], [0], [1], [0, 0, 1, 1], [], []>} : vector<4x16xf32>, vector<16x384xf32>, vector<4x384xf32> -> vector<4x384xf32>
    %517 = vector.broadcast %513 : vector<1x384xf32> to vector<4x384xf32>
    %518 = arith.addf %516, %517 : vector<4x384xf32>
    %cst_249 = arith.constant dense<0.000000e+00> : vector<4x384xf32>
    %519 = tpu.matmul %463, %511, %cst_249 {dimension_numbers = #tpu.dot_dimension_numbers<[1], [0], [0], [1], [0, 0, 1, 1], [], []>} : vector<4x32xf32>, vector<32x384xf32>, vector<4x384xf32> -> vector<4x384xf32>
    %520 = vector.broadcast %515 : vector<1x384xf32> to vector<4x384xf32>
    %521 = arith.addf %519, %520 : vector<4x384xf32>
    %522 = vector.extract_strided_slice %518 {offsets = [0, 0], sizes = [4, 32], strides = [1, 1]} : vector<4x384xf32> to vector<4x32xf32>
    %523 = vector.extract_strided_slice %521 {offsets = [0, 0], sizes = [4, 32], strides = [1, 1]} : vector<4x384xf32> to vector<4x32xf32>
    %524 = arith.addf %522, %523 : vector<4x32xf32>
    %525 = arith.negf %524 : vector<4x32xf32>
    %526 = math.exp %525 : vector<4x32xf32>
    %cst_250 = arith.constant 1.000000e+00 : f32
    %527 = vector.broadcast %cst_250 : f32 to vector<4x32xf32>
    %528 = arith.addf %527, %526 : vector<4x32xf32>
    %529 = arith.divf %527, %528 : vector<4x32xf32>
    %530 = vector.extract_strided_slice %518 {offsets = [0, 128], sizes = [4, 32], strides = [1, 1]} : vector<4x384xf32> to vector<4x32xf32>
    %531 = vector.extract_strided_slice %521 {offsets = [0, 128], sizes = [4, 32], strides = [1, 1]} : vector<4x384xf32> to vector<4x32xf32>
    %532 = arith.addf %530, %531 : vector<4x32xf32>
    %533 = arith.negf %532 : vector<4x32xf32>
    %534 = math.exp %533 : vector<4x32xf32>
    %cst_251 = arith.constant 1.000000e+00 : f32
    %535 = vector.broadcast %cst_251 : f32 to vector<4x32xf32>
    %536 = arith.addf %535, %534 : vector<4x32xf32>
    %537 = arith.divf %535, %536 : vector<4x32xf32>
    %538 = vector.extract_strided_slice %518 {offsets = [0, 256], sizes = [4, 32], strides = [1, 1]} : vector<4x384xf32> to vector<4x32xf32>
    %539 = vector.extract_strided_slice %521 {offsets = [0, 256], sizes = [4, 32], strides = [1, 1]} : vector<4x384xf32> to vector<4x32xf32>
    %540 = arith.mulf %529, %539 : vector<4x32xf32>
    %541 = arith.addf %538, %540 : vector<4x32xf32>
    %542 = math.tanh %541 : vector<4x32xf32>
    %cst_252 = arith.constant 1.000000e+00 : f32
    %543 = vector.broadcast %cst_252 : f32 to vector<4x32xf32>
    %544 = arith.subf %543, %537 : vector<4x32xf32>
    %545 = arith.mulf %544, %542 : vector<4x32xf32>
    %546 = arith.mulf %537, %463 : vector<4x32xf32>
    %547 = arith.addf %545, %546 : vector<4x32xf32>
    %c1_253 = arith.constant 1 : index
    %c0_254 = arith.constant 0 : index
    %c0_255 = arith.constant 0 : index
    %548 = vector.load %arg0[%c1_253, %c0_254, %c0_255] : memref<8x4x16xf32, #tpu.memory_space<vmem>>, vector<1x4x16xf32>
    %549 = vector.shape_cast %548 : vector<1x4x16xf32> to vector<4x16xf32>
    %c1_256 = arith.constant 1 : index
    %c0_257 = arith.constant 0 : index
    %c0_258 = arith.constant 0 : index
    %550 = vector.load %arg2[%c1_256, %c0_257, %c0_258] : memref<2x16x384xf32, #tpu.memory_space<vmem>>, vector<1x16x384xf32>
    %551 = vector.shape_cast %550 : vector<1x16x384xf32> to vector<16x384xf32>
    %c1_259 = arith.constant 1 : index
    %c0_260 = arith.constant 0 : index
    %c0_261 = arith.constant 0 : index
    %552 = vector.load %arg3[%c1_259, %c0_260, %c0_261] : memref<2x32x384xf32, #tpu.memory_space<vmem>>, vector<1x32x384xf32>
    %553 = vector.shape_cast %552 : vector<1x32x384xf32> to vector<32x384xf32>
    %c1_262 = arith.constant 1 : index
    %c0_263 = arith.constant 0 : index
    %c0_264 = arith.constant 0 : index
    %554 = vector.load %arg4[%c1_262, %c0_263, %c0_264] : memref<2x1x384xf32, #tpu.memory_space<vmem>>, vector<1x1x384xf32>
    %555 = vector.shape_cast %554 : vector<1x1x384xf32> to vector<1x384xf32>
    %c1_265 = arith.constant 1 : index
    %c0_266 = arith.constant 0 : index
    %c0_267 = arith.constant 0 : index
    %556 = vector.load %arg5[%c1_265, %c0_266, %c0_267] : memref<2x1x384xf32, #tpu.memory_space<vmem>>, vector<1x1x384xf32>
    %557 = vector.shape_cast %556 : vector<1x1x384xf32> to vector<1x384xf32>
    %cst_268 = arith.constant dense<0.000000e+00> : vector<4x384xf32>
    %558 = tpu.matmul %549, %551, %cst_268 {dimension_numbers = #tpu.dot_dimension_numbers<[1], [0], [0], [1], [0, 0, 1, 1], [], []>} : vector<4x16xf32>, vector<16x384xf32>, vector<4x384xf32> -> vector<4x384xf32>
    %559 = vector.broadcast %555 : vector<1x384xf32> to vector<4x384xf32>
    %560 = arith.addf %558, %559 : vector<4x384xf32>
    %cst_269 = arith.constant dense<0.000000e+00> : vector<4x384xf32>
    %561 = tpu.matmul %505, %553, %cst_269 {dimension_numbers = #tpu.dot_dimension_numbers<[1], [0], [0], [1], [0, 0, 1, 1], [], []>} : vector<4x32xf32>, vector<32x384xf32>, vector<4x384xf32> -> vector<4x384xf32>
    %562 = vector.broadcast %557 : vector<1x384xf32> to vector<4x384xf32>
    %563 = arith.addf %561, %562 : vector<4x384xf32>
    %564 = vector.extract_strided_slice %560 {offsets = [0, 0], sizes = [4, 32], strides = [1, 1]} : vector<4x384xf32> to vector<4x32xf32>
    %565 = vector.extract_strided_slice %563 {offsets = [0, 0], sizes = [4, 32], strides = [1, 1]} : vector<4x384xf32> to vector<4x32xf32>
    %566 = arith.addf %564, %565 : vector<4x32xf32>
    %567 = arith.negf %566 : vector<4x32xf32>
    %568 = math.exp %567 : vector<4x32xf32>
    %cst_270 = arith.constant 1.000000e+00 : f32
    %569 = vector.broadcast %cst_270 : f32 to vector<4x32xf32>
    %570 = arith.addf %569, %568 : vector<4x32xf32>
    %571 = arith.divf %569, %570 : vector<4x32xf32>
    %572 = vector.extract_strided_slice %560 {offsets = [0, 128], sizes = [4, 32], strides = [1, 1]} : vector<4x384xf32> to vector<4x32xf32>
    %573 = vector.extract_strided_slice %563 {offsets = [0, 128], sizes = [4, 32], strides = [1, 1]} : vector<4x384xf32> to vector<4x32xf32>
    %574 = arith.addf %572, %573 : vector<4x32xf32>
    %575 = arith.negf %574 : vector<4x32xf32>
    %576 = math.exp %575 : vector<4x32xf32>
    %cst_271 = arith.constant 1.000000e+00 : f32
    %577 = vector.broadcast %cst_271 : f32 to vector<4x32xf32>
    %578 = arith.addf %577, %576 : vector<4x32xf32>
    %579 = arith.divf %577, %578 : vector<4x32xf32>
    %580 = vector.extract_strided_slice %560 {offsets = [0, 256], sizes = [4, 32], strides = [1, 1]} : vector<4x384xf32> to vector<4x32xf32>
    %581 = vector.extract_strided_slice %563 {offsets = [0, 256], sizes = [4, 32], strides = [1, 1]} : vector<4x384xf32> to vector<4x32xf32>
    %582 = arith.mulf %571, %581 : vector<4x32xf32>
    %583 = arith.addf %580, %582 : vector<4x32xf32>
    %584 = math.tanh %583 : vector<4x32xf32>
    %cst_272 = arith.constant 1.000000e+00 : f32
    %585 = vector.broadcast %cst_272 : f32 to vector<4x32xf32>
    %586 = arith.subf %585, %579 : vector<4x32xf32>
    %587 = arith.mulf %586, %584 : vector<4x32xf32>
    %588 = arith.mulf %579, %505 : vector<4x32xf32>
    %589 = arith.addf %587, %588 : vector<4x32xf32>
    %c7_273 = arith.constant 7 : index
    %c0_274 = arith.constant 0 : index
    %c0_275 = arith.constant 0 : index
    %590 = vector.load %arg0[%c7_273, %c0_274, %c0_275] : memref<8x4x16xf32, #tpu.memory_space<vmem>>, vector<1x4x16xf32>
    %591 = vector.shape_cast %590 : vector<1x4x16xf32> to vector<4x16xf32>
    %c0_276 = arith.constant 0 : index
    %c0_277 = arith.constant 0 : index
    %c0_278 = arith.constant 0 : index
    %592 = vector.load %arg2[%c0_276, %c0_277, %c0_278] : memref<2x16x384xf32, #tpu.memory_space<vmem>>, vector<1x16x384xf32>
    %593 = vector.shape_cast %592 : vector<1x16x384xf32> to vector<16x384xf32>
    %c0_279 = arith.constant 0 : index
    %c0_280 = arith.constant 0 : index
    %c0_281 = arith.constant 0 : index
    %594 = vector.load %arg3[%c0_279, %c0_280, %c0_281] : memref<2x32x384xf32, #tpu.memory_space<vmem>>, vector<1x32x384xf32>
    %595 = vector.shape_cast %594 : vector<1x32x384xf32> to vector<32x384xf32>
    %c0_282 = arith.constant 0 : index
    %c0_283 = arith.constant 0 : index
    %c0_284 = arith.constant 0 : index
    %596 = vector.load %arg4[%c0_282, %c0_283, %c0_284] : memref<2x1x384xf32, #tpu.memory_space<vmem>>, vector<1x1x384xf32>
    %597 = vector.shape_cast %596 : vector<1x1x384xf32> to vector<1x384xf32>
    %c0_285 = arith.constant 0 : index
    %c0_286 = arith.constant 0 : index
    %c0_287 = arith.constant 0 : index
    %598 = vector.load %arg5[%c0_285, %c0_286, %c0_287] : memref<2x1x384xf32, #tpu.memory_space<vmem>>, vector<1x1x384xf32>
    %599 = vector.shape_cast %598 : vector<1x1x384xf32> to vector<1x384xf32>
    %cst_288 = arith.constant dense<0.000000e+00> : vector<4x384xf32>
    %600 = tpu.matmul %591, %593, %cst_288 {dimension_numbers = #tpu.dot_dimension_numbers<[1], [0], [0], [1], [0, 0, 1, 1], [], []>} : vector<4x16xf32>, vector<16x384xf32>, vector<4x384xf32> -> vector<4x384xf32>
    %601 = vector.broadcast %597 : vector<1x384xf32> to vector<4x384xf32>
    %602 = arith.addf %600, %601 : vector<4x384xf32>
    %cst_289 = arith.constant dense<0.000000e+00> : vector<4x384xf32>
    %603 = tpu.matmul %547, %595, %cst_289 {dimension_numbers = #tpu.dot_dimension_numbers<[1], [0], [0], [1], [0, 0, 1, 1], [], []>} : vector<4x32xf32>, vector<32x384xf32>, vector<4x384xf32> -> vector<4x384xf32>
    %604 = vector.broadcast %599 : vector<1x384xf32> to vector<4x384xf32>
    %605 = arith.addf %603, %604 : vector<4x384xf32>
    %606 = vector.extract_strided_slice %602 {offsets = [0, 0], sizes = [4, 32], strides = [1, 1]} : vector<4x384xf32> to vector<4x32xf32>
    %607 = vector.extract_strided_slice %605 {offsets = [0, 0], sizes = [4, 32], strides = [1, 1]} : vector<4x384xf32> to vector<4x32xf32>
    %608 = arith.addf %606, %607 : vector<4x32xf32>
    %609 = arith.negf %608 : vector<4x32xf32>
    %610 = math.exp %609 : vector<4x32xf32>
    %cst_290 = arith.constant 1.000000e+00 : f32
    %611 = vector.broadcast %cst_290 : f32 to vector<4x32xf32>
    %612 = arith.addf %611, %610 : vector<4x32xf32>
    %613 = arith.divf %611, %612 : vector<4x32xf32>
    %614 = vector.extract_strided_slice %602 {offsets = [0, 128], sizes = [4, 32], strides = [1, 1]} : vector<4x384xf32> to vector<4x32xf32>
    %615 = vector.extract_strided_slice %605 {offsets = [0, 128], sizes = [4, 32], strides = [1, 1]} : vector<4x384xf32> to vector<4x32xf32>
    %616 = arith.addf %614, %615 : vector<4x32xf32>
    %617 = arith.negf %616 : vector<4x32xf32>
    %618 = math.exp %617 : vector<4x32xf32>
    %cst_291 = arith.constant 1.000000e+00 : f32
    %619 = vector.broadcast %cst_291 : f32 to vector<4x32xf32>
    %620 = arith.addf %619, %618 : vector<4x32xf32>
    %621 = arith.divf %619, %620 : vector<4x32xf32>
    %622 = vector.extract_strided_slice %602 {offsets = [0, 256], sizes = [4, 32], strides = [1, 1]} : vector<4x384xf32> to vector<4x32xf32>
    %623 = vector.extract_strided_slice %605 {offsets = [0, 256], sizes = [4, 32], strides = [1, 1]} : vector<4x384xf32> to vector<4x32xf32>
    %624 = arith.mulf %613, %623 : vector<4x32xf32>
    %625 = arith.addf %622, %624 : vector<4x32xf32>
    %626 = math.tanh %625 : vector<4x32xf32>
    %cst_292 = arith.constant 1.000000e+00 : f32
    %627 = vector.broadcast %cst_292 : f32 to vector<4x32xf32>
    %628 = arith.subf %627, %621 : vector<4x32xf32>
    %629 = arith.mulf %628, %626 : vector<4x32xf32>
    %630 = arith.mulf %621, %547 : vector<4x32xf32>
    %631 = arith.addf %629, %630 : vector<4x32xf32>
    %c0_293 = arith.constant 0 : index
    %c0_294 = arith.constant 0 : index
    %c0_295 = arith.constant 0 : index
    %632 = vector.load %arg0[%c0_293, %c0_294, %c0_295] : memref<8x4x16xf32, #tpu.memory_space<vmem>>, vector<1x4x16xf32>
    %633 = vector.shape_cast %632 : vector<1x4x16xf32> to vector<4x16xf32>
    %c1_296 = arith.constant 1 : index
    %c0_297 = arith.constant 0 : index
    %c0_298 = arith.constant 0 : index
    %634 = vector.load %arg2[%c1_296, %c0_297, %c0_298] : memref<2x16x384xf32, #tpu.memory_space<vmem>>, vector<1x16x384xf32>
    %635 = vector.shape_cast %634 : vector<1x16x384xf32> to vector<16x384xf32>
    %c1_299 = arith.constant 1 : index
    %c0_300 = arith.constant 0 : index
    %c0_301 = arith.constant 0 : index
    %636 = vector.load %arg3[%c1_299, %c0_300, %c0_301] : memref<2x32x384xf32, #tpu.memory_space<vmem>>, vector<1x32x384xf32>
    %637 = vector.shape_cast %636 : vector<1x32x384xf32> to vector<32x384xf32>
    %c1_302 = arith.constant 1 : index
    %c0_303 = arith.constant 0 : index
    %c0_304 = arith.constant 0 : index
    %638 = vector.load %arg4[%c1_302, %c0_303, %c0_304] : memref<2x1x384xf32, #tpu.memory_space<vmem>>, vector<1x1x384xf32>
    %639 = vector.shape_cast %638 : vector<1x1x384xf32> to vector<1x384xf32>
    %c1_305 = arith.constant 1 : index
    %c0_306 = arith.constant 0 : index
    %c0_307 = arith.constant 0 : index
    %640 = vector.load %arg5[%c1_305, %c0_306, %c0_307] : memref<2x1x384xf32, #tpu.memory_space<vmem>>, vector<1x1x384xf32>
    %641 = vector.shape_cast %640 : vector<1x1x384xf32> to vector<1x384xf32>
    %cst_308 = arith.constant dense<0.000000e+00> : vector<4x384xf32>
    %642 = tpu.matmul %633, %635, %cst_308 {dimension_numbers = #tpu.dot_dimension_numbers<[1], [0], [0], [1], [0, 0, 1, 1], [], []>} : vector<4x16xf32>, vector<16x384xf32>, vector<4x384xf32> -> vector<4x384xf32>
    %643 = vector.broadcast %639 : vector<1x384xf32> to vector<4x384xf32>
    %644 = arith.addf %642, %643 : vector<4x384xf32>
    %cst_309 = arith.constant dense<0.000000e+00> : vector<4x384xf32>
    %645 = tpu.matmul %589, %637, %cst_309 {dimension_numbers = #tpu.dot_dimension_numbers<[1], [0], [0], [1], [0, 0, 1, 1], [], []>} : vector<4x32xf32>, vector<32x384xf32>, vector<4x384xf32> -> vector<4x384xf32>
    %646 = vector.broadcast %641 : vector<1x384xf32> to vector<4x384xf32>
    %647 = arith.addf %645, %646 : vector<4x384xf32>
    %648 = vector.extract_strided_slice %644 {offsets = [0, 0], sizes = [4, 32], strides = [1, 1]} : vector<4x384xf32> to vector<4x32xf32>
    %649 = vector.extract_strided_slice %647 {offsets = [0, 0], sizes = [4, 32], strides = [1, 1]} : vector<4x384xf32> to vector<4x32xf32>
    %650 = arith.addf %648, %649 : vector<4x32xf32>
    %651 = arith.negf %650 : vector<4x32xf32>
    %652 = math.exp %651 : vector<4x32xf32>
    %cst_310 = arith.constant 1.000000e+00 : f32
    %653 = vector.broadcast %cst_310 : f32 to vector<4x32xf32>
    %654 = arith.addf %653, %652 : vector<4x32xf32>
    %655 = arith.divf %653, %654 : vector<4x32xf32>
    %656 = vector.extract_strided_slice %644 {offsets = [0, 128], sizes = [4, 32], strides = [1, 1]} : vector<4x384xf32> to vector<4x32xf32>
    %657 = vector.extract_strided_slice %647 {offsets = [0, 128], sizes = [4, 32], strides = [1, 1]} : vector<4x384xf32> to vector<4x32xf32>
    %658 = arith.addf %656, %657 : vector<4x32xf32>
    %659 = arith.negf %658 : vector<4x32xf32>
    %660 = math.exp %659 : vector<4x32xf32>
    %cst_311 = arith.constant 1.000000e+00 : f32
    %661 = vector.broadcast %cst_311 : f32 to vector<4x32xf32>
    %662 = arith.addf %661, %660 : vector<4x32xf32>
    %663 = arith.divf %661, %662 : vector<4x32xf32>
    %664 = vector.extract_strided_slice %644 {offsets = [0, 256], sizes = [4, 32], strides = [1, 1]} : vector<4x384xf32> to vector<4x32xf32>
    %665 = vector.extract_strided_slice %647 {offsets = [0, 256], sizes = [4, 32], strides = [1, 1]} : vector<4x384xf32> to vector<4x32xf32>
    %666 = arith.mulf %655, %665 : vector<4x32xf32>
    %667 = arith.addf %664, %666 : vector<4x32xf32>
    %668 = math.tanh %667 : vector<4x32xf32>
    %cst_312 = arith.constant 1.000000e+00 : f32
    %669 = vector.broadcast %cst_312 : f32 to vector<4x32xf32>
    %670 = arith.subf %669, %663 : vector<4x32xf32>
    %671 = arith.mulf %670, %668 : vector<4x32xf32>
    %672 = arith.mulf %663, %589 : vector<4x32xf32>
    %673 = arith.addf %671, %672 : vector<4x32xf32>
    %674 = tpu.concatenate %43, %673 in 1 : vector<4x32xf32>, vector<4x32xf32> -> vector<4x64xf32>
    %675 = tpu.concatenate %127, %589 in 1 : vector<4x32xf32>, vector<4x32xf32> -> vector<4x64xf32>
    %676 = tpu.concatenate %211, %505 in 1 : vector<4x32xf32>, vector<4x32xf32> -> vector<4x64xf32>
    %677 = tpu.concatenate %295, %421 in 1 : vector<4x32xf32>, vector<4x32xf32> -> vector<4x64xf32>
    %678 = tpu.concatenate %379, %337 in 1 : vector<4x32xf32>, vector<4x32xf32> -> vector<4x64xf32>
    %679 = tpu.concatenate %463, %253 in 1 : vector<4x32xf32>, vector<4x32xf32> -> vector<4x64xf32>
    %680 = tpu.concatenate %547, %169 in 1 : vector<4x32xf32>, vector<4x32xf32> -> vector<4x64xf32>
    %681 = tpu.concatenate %631, %85 in 1 : vector<4x32xf32>, vector<4x32xf32> -> vector<4x64xf32>
    %cst_313 = arith.constant 0.000000e+00 : f32
    %682 = vector.broadcast %cst_313 : f32 to vector<4x32xf32>
    %cst_314 = arith.constant 0.000000e+00 : f32
    %683 = vector.broadcast %cst_314 : f32 to vector<4x32xf32>
    %c0_315 = arith.constant 0 : index
    %c0_316 = arith.constant 0 : index
    %c0_317 = arith.constant 0 : index
    %684 = vector.load %arg6[%c0_315, %c0_316, %c0_317] : memref<2x64x384xf32, #tpu.memory_space<vmem>>, vector<1x64x384xf32>
    %685 = vector.shape_cast %684 : vector<1x64x384xf32> to vector<64x384xf32>
    %c0_318 = arith.constant 0 : index
    %c0_319 = arith.constant 0 : index
    %c0_320 = arith.constant 0 : index
    %686 = vector.load %arg7[%c0_318, %c0_319, %c0_320] : memref<2x32x384xf32, #tpu.memory_space<vmem>>, vector<1x32x384xf32>
    %687 = vector.shape_cast %686 : vector<1x32x384xf32> to vector<32x384xf32>
    %c0_321 = arith.constant 0 : index
    %c0_322 = arith.constant 0 : index
    %c0_323 = arith.constant 0 : index
    %688 = vector.load %arg8[%c0_321, %c0_322, %c0_323] : memref<2x1x384xf32, #tpu.memory_space<vmem>>, vector<1x1x384xf32>
    %689 = vector.shape_cast %688 : vector<1x1x384xf32> to vector<1x384xf32>
    %c0_324 = arith.constant 0 : index
    %c0_325 = arith.constant 0 : index
    %c0_326 = arith.constant 0 : index
    %690 = vector.load %arg9[%c0_324, %c0_325, %c0_326] : memref<2x1x384xf32, #tpu.memory_space<vmem>>, vector<1x1x384xf32>
    %691 = vector.shape_cast %690 : vector<1x1x384xf32> to vector<1x384xf32>
    %cst_327 = arith.constant dense<0.000000e+00> : vector<4x384xf32>
    %692 = tpu.matmul %674, %685, %cst_327 {dimension_numbers = #tpu.dot_dimension_numbers<[1], [0], [0], [1], [0, 0, 1, 1], [], []>} : vector<4x64xf32>, vector<64x384xf32>, vector<4x384xf32> -> vector<4x384xf32>
    %693 = vector.broadcast %689 : vector<1x384xf32> to vector<4x384xf32>
    %694 = arith.addf %692, %693 : vector<4x384xf32>
    %cst_328 = arith.constant dense<0.000000e+00> : vector<4x384xf32>
    %695 = tpu.matmul %682, %687, %cst_328 {dimension_numbers = #tpu.dot_dimension_numbers<[1], [0], [0], [1], [0, 0, 1, 1], [], []>} : vector<4x32xf32>, vector<32x384xf32>, vector<4x384xf32> -> vector<4x384xf32>
    %696 = vector.broadcast %691 : vector<1x384xf32> to vector<4x384xf32>
    %697 = arith.addf %695, %696 : vector<4x384xf32>
    %698 = vector.extract_strided_slice %694 {offsets = [0, 0], sizes = [4, 32], strides = [1, 1]} : vector<4x384xf32> to vector<4x32xf32>
    %699 = vector.extract_strided_slice %697 {offsets = [0, 0], sizes = [4, 32], strides = [1, 1]} : vector<4x384xf32> to vector<4x32xf32>
    %700 = arith.addf %698, %699 : vector<4x32xf32>
    %701 = arith.negf %700 : vector<4x32xf32>
    %702 = math.exp %701 : vector<4x32xf32>
    %cst_329 = arith.constant 1.000000e+00 : f32
    %703 = vector.broadcast %cst_329 : f32 to vector<4x32xf32>
    %704 = arith.addf %703, %702 : vector<4x32xf32>
    %705 = arith.divf %703, %704 : vector<4x32xf32>
    %706 = vector.extract_strided_slice %694 {offsets = [0, 128], sizes = [4, 32], strides = [1, 1]} : vector<4x384xf32> to vector<4x32xf32>
    %707 = vector.extract_strided_slice %697 {offsets = [0, 128], sizes = [4, 32], strides = [1, 1]} : vector<4x384xf32> to vector<4x32xf32>
    %708 = arith.addf %706, %707 : vector<4x32xf32>
    %709 = arith.negf %708 : vector<4x32xf32>
    %710 = math.exp %709 : vector<4x32xf32>
    %cst_330 = arith.constant 1.000000e+00 : f32
    %711 = vector.broadcast %cst_330 : f32 to vector<4x32xf32>
    %712 = arith.addf %711, %710 : vector<4x32xf32>
    %713 = arith.divf %711, %712 : vector<4x32xf32>
    %714 = vector.extract_strided_slice %694 {offsets = [0, 256], sizes = [4, 32], strides = [1, 1]} : vector<4x384xf32> to vector<4x32xf32>
    %715 = vector.extract_strided_slice %697 {offsets = [0, 256], sizes = [4, 32], strides = [1, 1]} : vector<4x384xf32> to vector<4x32xf32>
    %716 = arith.mulf %705, %715 : vector<4x32xf32>
    %717 = arith.addf %714, %716 : vector<4x32xf32>
    %718 = math.tanh %717 : vector<4x32xf32>
    %cst_331 = arith.constant 1.000000e+00 : f32
    %719 = vector.broadcast %cst_331 : f32 to vector<4x32xf32>
    %720 = arith.subf %719, %713 : vector<4x32xf32>
    %721 = arith.mulf %720, %718 : vector<4x32xf32>
    %722 = arith.mulf %713, %682 : vector<4x32xf32>
    %723 = arith.addf %721, %722 : vector<4x32xf32>
    %c1_332 = arith.constant 1 : index
    %c0_333 = arith.constant 0 : index
    %c0_334 = arith.constant 0 : index
    %724 = vector.load %arg6[%c1_332, %c0_333, %c0_334] : memref<2x64x384xf32, #tpu.memory_space<vmem>>, vector<1x64x384xf32>
    %725 = vector.shape_cast %724 : vector<1x64x384xf32> to vector<64x384xf32>
    %c1_335 = arith.constant 1 : index
    %c0_336 = arith.constant 0 : index
    %c0_337 = arith.constant 0 : index
    %726 = vector.load %arg7[%c1_335, %c0_336, %c0_337] : memref<2x32x384xf32, #tpu.memory_space<vmem>>, vector<1x32x384xf32>
    %727 = vector.shape_cast %726 : vector<1x32x384xf32> to vector<32x384xf32>
    %c1_338 = arith.constant 1 : index
    %c0_339 = arith.constant 0 : index
    %c0_340 = arith.constant 0 : index
    %728 = vector.load %arg8[%c1_338, %c0_339, %c0_340] : memref<2x1x384xf32, #tpu.memory_space<vmem>>, vector<1x1x384xf32>
    %729 = vector.shape_cast %728 : vector<1x1x384xf32> to vector<1x384xf32>
    %c1_341 = arith.constant 1 : index
    %c0_342 = arith.constant 0 : index
    %c0_343 = arith.constant 0 : index
    %730 = vector.load %arg9[%c1_341, %c0_342, %c0_343] : memref<2x1x384xf32, #tpu.memory_space<vmem>>, vector<1x1x384xf32>
    %731 = vector.shape_cast %730 : vector<1x1x384xf32> to vector<1x384xf32>
    %cst_344 = arith.constant dense<0.000000e+00> : vector<4x384xf32>
    %732 = tpu.matmul %681, %725, %cst_344 {dimension_numbers = #tpu.dot_dimension_numbers<[1], [0], [0], [1], [0, 0, 1, 1], [], []>} : vector<4x64xf32>, vector<64x384xf32>, vector<4x384xf32> -> vector<4x384xf32>
    %733 = vector.broadcast %729 : vector<1x384xf32> to vector<4x384xf32>
    %734 = arith.addf %732, %733 : vector<4x384xf32>
    %cst_345 = arith.constant dense<0.000000e+00> : vector<4x384xf32>
    %735 = tpu.matmul %683, %727, %cst_345 {dimension_numbers = #tpu.dot_dimension_numbers<[1], [0], [0], [1], [0, 0, 1, 1], [], []>} : vector<4x32xf32>, vector<32x384xf32>, vector<4x384xf32> -> vector<4x384xf32>
    %736 = vector.broadcast %731 : vector<1x384xf32> to vector<4x384xf32>
    %737 = arith.addf %735, %736 : vector<4x384xf32>
    %738 = vector.extract_strided_slice %734 {offsets = [0, 0], sizes = [4, 32], strides = [1, 1]} : vector<4x384xf32> to vector<4x32xf32>
    %739 = vector.extract_strided_slice %737 {offsets = [0, 0], sizes = [4, 32], strides = [1, 1]} : vector<4x384xf32> to vector<4x32xf32>
    %740 = arith.addf %738, %739 : vector<4x32xf32>
    %741 = arith.negf %740 : vector<4x32xf32>
    %742 = math.exp %741 : vector<4x32xf32>
    %cst_346 = arith.constant 1.000000e+00 : f32
    %743 = vector.broadcast %cst_346 : f32 to vector<4x32xf32>
    %744 = arith.addf %743, %742 : vector<4x32xf32>
    %745 = arith.divf %743, %744 : vector<4x32xf32>
    %746 = vector.extract_strided_slice %734 {offsets = [0, 128], sizes = [4, 32], strides = [1, 1]} : vector<4x384xf32> to vector<4x32xf32>
    %747 = vector.extract_strided_slice %737 {offsets = [0, 128], sizes = [4, 32], strides = [1, 1]} : vector<4x384xf32> to vector<4x32xf32>
    %748 = arith.addf %746, %747 : vector<4x32xf32>
    %749 = arith.negf %748 : vector<4x32xf32>
    %750 = math.exp %749 : vector<4x32xf32>
    %cst_347 = arith.constant 1.000000e+00 : f32
    %751 = vector.broadcast %cst_347 : f32 to vector<4x32xf32>
    %752 = arith.addf %751, %750 : vector<4x32xf32>
    %753 = arith.divf %751, %752 : vector<4x32xf32>
    %754 = vector.extract_strided_slice %734 {offsets = [0, 256], sizes = [4, 32], strides = [1, 1]} : vector<4x384xf32> to vector<4x32xf32>
    %755 = vector.extract_strided_slice %737 {offsets = [0, 256], sizes = [4, 32], strides = [1, 1]} : vector<4x384xf32> to vector<4x32xf32>
    %756 = arith.mulf %745, %755 : vector<4x32xf32>
    %757 = arith.addf %754, %756 : vector<4x32xf32>
    %758 = math.tanh %757 : vector<4x32xf32>
    %cst_348 = arith.constant 1.000000e+00 : f32
    %759 = vector.broadcast %cst_348 : f32 to vector<4x32xf32>
    %760 = arith.subf %759, %753 : vector<4x32xf32>
    %761 = arith.mulf %760, %758 : vector<4x32xf32>
    %762 = arith.mulf %753, %683 : vector<4x32xf32>
    %763 = arith.addf %761, %762 : vector<4x32xf32>
    %c0_349 = arith.constant 0 : index
    %c0_350 = arith.constant 0 : index
    %c0_351 = arith.constant 0 : index
    %764 = vector.load %arg6[%c0_349, %c0_350, %c0_351] : memref<2x64x384xf32, #tpu.memory_space<vmem>>, vector<1x64x384xf32>
    %765 = vector.shape_cast %764 : vector<1x64x384xf32> to vector<64x384xf32>
    %c0_352 = arith.constant 0 : index
    %c0_353 = arith.constant 0 : index
    %c0_354 = arith.constant 0 : index
    %766 = vector.load %arg7[%c0_352, %c0_353, %c0_354] : memref<2x32x384xf32, #tpu.memory_space<vmem>>, vector<1x32x384xf32>
    %767 = vector.shape_cast %766 : vector<1x32x384xf32> to vector<32x384xf32>
    %c0_355 = arith.constant 0 : index
    %c0_356 = arith.constant 0 : index
    %c0_357 = arith.constant 0 : index
    %768 = vector.load %arg8[%c0_355, %c0_356, %c0_357] : memref<2x1x384xf32, #tpu.memory_space<vmem>>, vector<1x1x384xf32>
    %769 = vector.shape_cast %768 : vector<1x1x384xf32> to vector<1x384xf32>
    %c0_358 = arith.constant 0 : index
    %c0_359 = arith.constant 0 : index
    %c0_360 = arith.constant 0 : index
    %770 = vector.load %arg9[%c0_358, %c0_359, %c0_360] : memref<2x1x384xf32, #tpu.memory_space<vmem>>, vector<1x1x384xf32>
    %771 = vector.shape_cast %770 : vector<1x1x384xf32> to vector<1x384xf32>
    %cst_361 = arith.constant dense<0.000000e+00> : vector<4x384xf32>
    %772 = tpu.matmul %675, %765, %cst_361 {dimension_numbers = #tpu.dot_dimension_numbers<[1], [0], [0], [1], [0, 0, 1, 1], [], []>} : vector<4x64xf32>, vector<64x384xf32>, vector<4x384xf32> -> vector<4x384xf32>
    %773 = vector.broadcast %769 : vector<1x384xf32> to vector<4x384xf32>
    %774 = arith.addf %772, %773 : vector<4x384xf32>
    %cst_362 = arith.constant dense<0.000000e+00> : vector<4x384xf32>
    %775 = tpu.matmul %723, %767, %cst_362 {dimension_numbers = #tpu.dot_dimension_numbers<[1], [0], [0], [1], [0, 0, 1, 1], [], []>} : vector<4x32xf32>, vector<32x384xf32>, vector<4x384xf32> -> vector<4x384xf32>
    %776 = vector.broadcast %771 : vector<1x384xf32> to vector<4x384xf32>
    %777 = arith.addf %775, %776 : vector<4x384xf32>
    %778 = vector.extract_strided_slice %774 {offsets = [0, 0], sizes = [4, 32], strides = [1, 1]} : vector<4x384xf32> to vector<4x32xf32>
    %779 = vector.extract_strided_slice %777 {offsets = [0, 0], sizes = [4, 32], strides = [1, 1]} : vector<4x384xf32> to vector<4x32xf32>
    %780 = arith.addf %778, %779 : vector<4x32xf32>
    %781 = arith.negf %780 : vector<4x32xf32>
    %782 = math.exp %781 : vector<4x32xf32>
    %cst_363 = arith.constant 1.000000e+00 : f32
    %783 = vector.broadcast %cst_363 : f32 to vector<4x32xf32>
    %784 = arith.addf %783, %782 : vector<4x32xf32>
    %785 = arith.divf %783, %784 : vector<4x32xf32>
    %786 = vector.extract_strided_slice %774 {offsets = [0, 128], sizes = [4, 32], strides = [1, 1]} : vector<4x384xf32> to vector<4x32xf32>
    %787 = vector.extract_strided_slice %777 {offsets = [0, 128], sizes = [4, 32], strides = [1, 1]} : vector<4x384xf32> to vector<4x32xf32>
    %788 = arith.addf %786, %787 : vector<4x32xf32>
    %789 = arith.negf %788 : vector<4x32xf32>
    %790 = math.exp %789 : vector<4x32xf32>
    %cst_364 = arith.constant 1.000000e+00 : f32
    %791 = vector.broadcast %cst_364 : f32 to vector<4x32xf32>
    %792 = arith.addf %791, %790 : vector<4x32xf32>
    %793 = arith.divf %791, %792 : vector<4x32xf32>
    %794 = vector.extract_strided_slice %774 {offsets = [0, 256], sizes = [4, 32], strides = [1, 1]} : vector<4x384xf32> to vector<4x32xf32>
    %795 = vector.extract_strided_slice %777 {offsets = [0, 256], sizes = [4, 32], strides = [1, 1]} : vector<4x384xf32> to vector<4x32xf32>
    %796 = arith.mulf %785, %795 : vector<4x32xf32>
    %797 = arith.addf %794, %796 : vector<4x32xf32>
    %798 = math.tanh %797 : vector<4x32xf32>
    %cst_365 = arith.constant 1.000000e+00 : f32
    %799 = vector.broadcast %cst_365 : f32 to vector<4x32xf32>
    %800 = arith.subf %799, %793 : vector<4x32xf32>
    %801 = arith.mulf %800, %798 : vector<4x32xf32>
    %802 = arith.mulf %793, %723 : vector<4x32xf32>
    %803 = arith.addf %801, %802 : vector<4x32xf32>
    %c1_366 = arith.constant 1 : index
    %c0_367 = arith.constant 0 : index
    %c0_368 = arith.constant 0 : index
    %804 = vector.load %arg6[%c1_366, %c0_367, %c0_368] : memref<2x64x384xf32, #tpu.memory_space<vmem>>, vector<1x64x384xf32>
    %805 = vector.shape_cast %804 : vector<1x64x384xf32> to vector<64x384xf32>
    %c1_369 = arith.constant 1 : index
    %c0_370 = arith.constant 0 : index
    %c0_371 = arith.constant 0 : index
    %806 = vector.load %arg7[%c1_369, %c0_370, %c0_371] : memref<2x32x384xf32, #tpu.memory_space<vmem>>, vector<1x32x384xf32>
    %807 = vector.shape_cast %806 : vector<1x32x384xf32> to vector<32x384xf32>
    %c1_372 = arith.constant 1 : index
    %c0_373 = arith.constant 0 : index
    %c0_374 = arith.constant 0 : index
    %808 = vector.load %arg8[%c1_372, %c0_373, %c0_374] : memref<2x1x384xf32, #tpu.memory_space<vmem>>, vector<1x1x384xf32>
    %809 = vector.shape_cast %808 : vector<1x1x384xf32> to vector<1x384xf32>
    %c1_375 = arith.constant 1 : index
    %c0_376 = arith.constant 0 : index
    %c0_377 = arith.constant 0 : index
    %810 = vector.load %arg9[%c1_375, %c0_376, %c0_377] : memref<2x1x384xf32, #tpu.memory_space<vmem>>, vector<1x1x384xf32>
    %811 = vector.shape_cast %810 : vector<1x1x384xf32> to vector<1x384xf32>
    %cst_378 = arith.constant dense<0.000000e+00> : vector<4x384xf32>
    %812 = tpu.matmul %680, %805, %cst_378 {dimension_numbers = #tpu.dot_dimension_numbers<[1], [0], [0], [1], [0, 0, 1, 1], [], []>} : vector<4x64xf32>, vector<64x384xf32>, vector<4x384xf32> -> vector<4x384xf32>
    %813 = vector.broadcast %809 : vector<1x384xf32> to vector<4x384xf32>
    %814 = arith.addf %812, %813 : vector<4x384xf32>
    %cst_379 = arith.constant dense<0.000000e+00> : vector<4x384xf32>
    %815 = tpu.matmul %763, %807, %cst_379 {dimension_numbers = #tpu.dot_dimension_numbers<[1], [0], [0], [1], [0, 0, 1, 1], [], []>} : vector<4x32xf32>, vector<32x384xf32>, vector<4x384xf32> -> vector<4x384xf32>
    %816 = vector.broadcast %811 : vector<1x384xf32> to vector<4x384xf32>
    %817 = arith.addf %815, %816 : vector<4x384xf32>
    %818 = vector.extract_strided_slice %814 {offsets = [0, 0], sizes = [4, 32], strides = [1, 1]} : vector<4x384xf32> to vector<4x32xf32>
    %819 = vector.extract_strided_slice %817 {offsets = [0, 0], sizes = [4, 32], strides = [1, 1]} : vector<4x384xf32> to vector<4x32xf32>
    %820 = arith.addf %818, %819 : vector<4x32xf32>
    %821 = arith.negf %820 : vector<4x32xf32>
    %822 = math.exp %821 : vector<4x32xf32>
    %cst_380 = arith.constant 1.000000e+00 : f32
    %823 = vector.broadcast %cst_380 : f32 to vector<4x32xf32>
    %824 = arith.addf %823, %822 : vector<4x32xf32>
    %825 = arith.divf %823, %824 : vector<4x32xf32>
    %826 = vector.extract_strided_slice %814 {offsets = [0, 128], sizes = [4, 32], strides = [1, 1]} : vector<4x384xf32> to vector<4x32xf32>
    %827 = vector.extract_strided_slice %817 {offsets = [0, 128], sizes = [4, 32], strides = [1, 1]} : vector<4x384xf32> to vector<4x32xf32>
    %828 = arith.addf %826, %827 : vector<4x32xf32>
    %829 = arith.negf %828 : vector<4x32xf32>
    %830 = math.exp %829 : vector<4x32xf32>
    %cst_381 = arith.constant 1.000000e+00 : f32
    %831 = vector.broadcast %cst_381 : f32 to vector<4x32xf32>
    %832 = arith.addf %831, %830 : vector<4x32xf32>
    %833 = arith.divf %831, %832 : vector<4x32xf32>
    %834 = vector.extract_strided_slice %814 {offsets = [0, 256], sizes = [4, 32], strides = [1, 1]} : vector<4x384xf32> to vector<4x32xf32>
    %835 = vector.extract_strided_slice %817 {offsets = [0, 256], sizes = [4, 32], strides = [1, 1]} : vector<4x384xf32> to vector<4x32xf32>
    %836 = arith.mulf %825, %835 : vector<4x32xf32>
    %837 = arith.addf %834, %836 : vector<4x32xf32>
    %838 = math.tanh %837 : vector<4x32xf32>
    %cst_382 = arith.constant 1.000000e+00 : f32
    %839 = vector.broadcast %cst_382 : f32 to vector<4x32xf32>
    %840 = arith.subf %839, %833 : vector<4x32xf32>
    %841 = arith.mulf %840, %838 : vector<4x32xf32>
    %842 = arith.mulf %833, %763 : vector<4x32xf32>
    %843 = arith.addf %841, %842 : vector<4x32xf32>
    %c0_383 = arith.constant 0 : index
    %c0_384 = arith.constant 0 : index
    %c0_385 = arith.constant 0 : index
    %844 = vector.load %arg6[%c0_383, %c0_384, %c0_385] : memref<2x64x384xf32, #tpu.memory_space<vmem>>, vector<1x64x384xf32>
    %845 = vector.shape_cast %844 : vector<1x64x384xf32> to vector<64x384xf32>
    %c0_386 = arith.constant 0 : index
    %c0_387 = arith.constant 0 : index
    %c0_388 = arith.constant 0 : index
    %846 = vector.load %arg7[%c0_386, %c0_387, %c0_388] : memref<2x32x384xf32, #tpu.memory_space<vmem>>, vector<1x32x384xf32>
    %847 = vector.shape_cast %846 : vector<1x32x384xf32> to vector<32x384xf32>
    %c0_389 = arith.constant 0 : index
    %c0_390 = arith.constant 0 : index
    %c0_391 = arith.constant 0 : index
    %848 = vector.load %arg8[%c0_389, %c0_390, %c0_391] : memref<2x1x384xf32, #tpu.memory_space<vmem>>, vector<1x1x384xf32>
    %849 = vector.shape_cast %848 : vector<1x1x384xf32> to vector<1x384xf32>
    %c0_392 = arith.constant 0 : index
    %c0_393 = arith.constant 0 : index
    %c0_394 = arith.constant 0 : index
    %850 = vector.load %arg9[%c0_392, %c0_393, %c0_394] : memref<2x1x384xf32, #tpu.memory_space<vmem>>, vector<1x1x384xf32>
    %851 = vector.shape_cast %850 : vector<1x1x384xf32> to vector<1x384xf32>
    %cst_395 = arith.constant dense<0.000000e+00> : vector<4x384xf32>
    %852 = tpu.matmul %676, %845, %cst_395 {dimension_numbers = #tpu.dot_dimension_numbers<[1], [0], [0], [1], [0, 0, 1, 1], [], []>} : vector<4x64xf32>, vector<64x384xf32>, vector<4x384xf32> -> vector<4x384xf32>
    %853 = vector.broadcast %849 : vector<1x384xf32> to vector<4x384xf32>
    %854 = arith.addf %852, %853 : vector<4x384xf32>
    %cst_396 = arith.constant dense<0.000000e+00> : vector<4x384xf32>
    %855 = tpu.matmul %803, %847, %cst_396 {dimension_numbers = #tpu.dot_dimension_numbers<[1], [0], [0], [1], [0, 0, 1, 1], [], []>} : vector<4x32xf32>, vector<32x384xf32>, vector<4x384xf32> -> vector<4x384xf32>
    %856 = vector.broadcast %851 : vector<1x384xf32> to vector<4x384xf32>
    %857 = arith.addf %855, %856 : vector<4x384xf32>
    %858 = vector.extract_strided_slice %854 {offsets = [0, 0], sizes = [4, 32], strides = [1, 1]} : vector<4x384xf32> to vector<4x32xf32>
    %859 = vector.extract_strided_slice %857 {offsets = [0, 0], sizes = [4, 32], strides = [1, 1]} : vector<4x384xf32> to vector<4x32xf32>
    %860 = arith.addf %858, %859 : vector<4x32xf32>
    %861 = arith.negf %860 : vector<4x32xf32>
    %862 = math.exp %861 : vector<4x32xf32>
    %cst_397 = arith.constant 1.000000e+00 : f32
    %863 = vector.broadcast %cst_397 : f32 to vector<4x32xf32>
    %864 = arith.addf %863, %862 : vector<4x32xf32>
    %865 = arith.divf %863, %864 : vector<4x32xf32>
    %866 = vector.extract_strided_slice %854 {offsets = [0, 128], sizes = [4, 32], strides = [1, 1]} : vector<4x384xf32> to vector<4x32xf32>
    %867 = vector.extract_strided_slice %857 {offsets = [0, 128], sizes = [4, 32], strides = [1, 1]} : vector<4x384xf32> to vector<4x32xf32>
    %868 = arith.addf %866, %867 : vector<4x32xf32>
    %869 = arith.negf %868 : vector<4x32xf32>
    %870 = math.exp %869 : vector<4x32xf32>
    %cst_398 = arith.constant 1.000000e+00 : f32
    %871 = vector.broadcast %cst_398 : f32 to vector<4x32xf32>
    %872 = arith.addf %871, %870 : vector<4x32xf32>
    %873 = arith.divf %871, %872 : vector<4x32xf32>
    %874 = vector.extract_strided_slice %854 {offsets = [0, 256], sizes = [4, 32], strides = [1, 1]} : vector<4x384xf32> to vector<4x32xf32>
    %875 = vector.extract_strided_slice %857 {offsets = [0, 256], sizes = [4, 32], strides = [1, 1]} : vector<4x384xf32> to vector<4x32xf32>
    %876 = arith.mulf %865, %875 : vector<4x32xf32>
    %877 = arith.addf %874, %876 : vector<4x32xf32>
    %878 = math.tanh %877 : vector<4x32xf32>
    %cst_399 = arith.constant 1.000000e+00 : f32
    %879 = vector.broadcast %cst_399 : f32 to vector<4x32xf32>
    %880 = arith.subf %879, %873 : vector<4x32xf32>
    %881 = arith.mulf %880, %878 : vector<4x32xf32>
    %882 = arith.mulf %873, %803 : vector<4x32xf32>
    %883 = arith.addf %881, %882 : vector<4x32xf32>
    %c1_400 = arith.constant 1 : index
    %c0_401 = arith.constant 0 : index
    %c0_402 = arith.constant 0 : index
    %884 = vector.load %arg6[%c1_400, %c0_401, %c0_402] : memref<2x64x384xf32, #tpu.memory_space<vmem>>, vector<1x64x384xf32>
    %885 = vector.shape_cast %884 : vector<1x64x384xf32> to vector<64x384xf32>
    %c1_403 = arith.constant 1 : index
    %c0_404 = arith.constant 0 : index
    %c0_405 = arith.constant 0 : index
    %886 = vector.load %arg7[%c1_403, %c0_404, %c0_405] : memref<2x32x384xf32, #tpu.memory_space<vmem>>, vector<1x32x384xf32>
    %887 = vector.shape_cast %886 : vector<1x32x384xf32> to vector<32x384xf32>
    %c1_406 = arith.constant 1 : index
    %c0_407 = arith.constant 0 : index
    %c0_408 = arith.constant 0 : index
    %888 = vector.load %arg8[%c1_406, %c0_407, %c0_408] : memref<2x1x384xf32, #tpu.memory_space<vmem>>, vector<1x1x384xf32>
    %889 = vector.shape_cast %888 : vector<1x1x384xf32> to vector<1x384xf32>
    %c1_409 = arith.constant 1 : index
    %c0_410 = arith.constant 0 : index
    %c0_411 = arith.constant 0 : index
    %890 = vector.load %arg9[%c1_409, %c0_410, %c0_411] : memref<2x1x384xf32, #tpu.memory_space<vmem>>, vector<1x1x384xf32>
    %891 = vector.shape_cast %890 : vector<1x1x384xf32> to vector<1x384xf32>
    %cst_412 = arith.constant dense<0.000000e+00> : vector<4x384xf32>
    %892 = tpu.matmul %679, %885, %cst_412 {dimension_numbers = #tpu.dot_dimension_numbers<[1], [0], [0], [1], [0, 0, 1, 1], [], []>} : vector<4x64xf32>, vector<64x384xf32>, vector<4x384xf32> -> vector<4x384xf32>
    %893 = vector.broadcast %889 : vector<1x384xf32> to vector<4x384xf32>
    %894 = arith.addf %892, %893 : vector<4x384xf32>
    %cst_413 = arith.constant dense<0.000000e+00> : vector<4x384xf32>
    %895 = tpu.matmul %843, %887, %cst_413 {dimension_numbers = #tpu.dot_dimension_numbers<[1], [0], [0], [1], [0, 0, 1, 1], [], []>} : vector<4x32xf32>, vector<32x384xf32>, vector<4x384xf32> -> vector<4x384xf32>
    %896 = vector.broadcast %891 : vector<1x384xf32> to vector<4x384xf32>
    %897 = arith.addf %895, %896 : vector<4x384xf32>
    %898 = vector.extract_strided_slice %894 {offsets = [0, 0], sizes = [4, 32], strides = [1, 1]} : vector<4x384xf32> to vector<4x32xf32>
    %899 = vector.extract_strided_slice %897 {offsets = [0, 0], sizes = [4, 32], strides = [1, 1]} : vector<4x384xf32> to vector<4x32xf32>
    %900 = arith.addf %898, %899 : vector<4x32xf32>
    %901 = arith.negf %900 : vector<4x32xf32>
    %902 = math.exp %901 : vector<4x32xf32>
    %cst_414 = arith.constant 1.000000e+00 : f32
    %903 = vector.broadcast %cst_414 : f32 to vector<4x32xf32>
    %904 = arith.addf %903, %902 : vector<4x32xf32>
    %905 = arith.divf %903, %904 : vector<4x32xf32>
    %906 = vector.extract_strided_slice %894 {offsets = [0, 128], sizes = [4, 32], strides = [1, 1]} : vector<4x384xf32> to vector<4x32xf32>
    %907 = vector.extract_strided_slice %897 {offsets = [0, 128], sizes = [4, 32], strides = [1, 1]} : vector<4x384xf32> to vector<4x32xf32>
    %908 = arith.addf %906, %907 : vector<4x32xf32>
    %909 = arith.negf %908 : vector<4x32xf32>
    %910 = math.exp %909 : vector<4x32xf32>
    %cst_415 = arith.constant 1.000000e+00 : f32
    %911 = vector.broadcast %cst_415 : f32 to vector<4x32xf32>
    %912 = arith.addf %911, %910 : vector<4x32xf32>
    %913 = arith.divf %911, %912 : vector<4x32xf32>
    %914 = vector.extract_strided_slice %894 {offsets = [0, 256], sizes = [4, 32], strides = [1, 1]} : vector<4x384xf32> to vector<4x32xf32>
    %915 = vector.extract_strided_slice %897 {offsets = [0, 256], sizes = [4, 32], strides = [1, 1]} : vector<4x384xf32> to vector<4x32xf32>
    %916 = arith.mulf %905, %915 : vector<4x32xf32>
    %917 = arith.addf %914, %916 : vector<4x32xf32>
    %918 = math.tanh %917 : vector<4x32xf32>
    %cst_416 = arith.constant 1.000000e+00 : f32
    %919 = vector.broadcast %cst_416 : f32 to vector<4x32xf32>
    %920 = arith.subf %919, %913 : vector<4x32xf32>
    %921 = arith.mulf %920, %918 : vector<4x32xf32>
    %922 = arith.mulf %913, %843 : vector<4x32xf32>
    %923 = arith.addf %921, %922 : vector<4x32xf32>
    %c0_417 = arith.constant 0 : index
    %c0_418 = arith.constant 0 : index
    %c0_419 = arith.constant 0 : index
    %924 = vector.load %arg6[%c0_417, %c0_418, %c0_419] : memref<2x64x384xf32, #tpu.memory_space<vmem>>, vector<1x64x384xf32>
    %925 = vector.shape_cast %924 : vector<1x64x384xf32> to vector<64x384xf32>
    %c0_420 = arith.constant 0 : index
    %c0_421 = arith.constant 0 : index
    %c0_422 = arith.constant 0 : index
    %926 = vector.load %arg7[%c0_420, %c0_421, %c0_422] : memref<2x32x384xf32, #tpu.memory_space<vmem>>, vector<1x32x384xf32>
    %927 = vector.shape_cast %926 : vector<1x32x384xf32> to vector<32x384xf32>
    %c0_423 = arith.constant 0 : index
    %c0_424 = arith.constant 0 : index
    %c0_425 = arith.constant 0 : index
    %928 = vector.load %arg8[%c0_423, %c0_424, %c0_425] : memref<2x1x384xf32, #tpu.memory_space<vmem>>, vector<1x1x384xf32>
    %929 = vector.shape_cast %928 : vector<1x1x384xf32> to vector<1x384xf32>
    %c0_426 = arith.constant 0 : index
    %c0_427 = arith.constant 0 : index
    %c0_428 = arith.constant 0 : index
    %930 = vector.load %arg9[%c0_426, %c0_427, %c0_428] : memref<2x1x384xf32, #tpu.memory_space<vmem>>, vector<1x1x384xf32>
    %931 = vector.shape_cast %930 : vector<1x1x384xf32> to vector<1x384xf32>
    %cst_429 = arith.constant dense<0.000000e+00> : vector<4x384xf32>
    %932 = tpu.matmul %677, %925, %cst_429 {dimension_numbers = #tpu.dot_dimension_numbers<[1], [0], [0], [1], [0, 0, 1, 1], [], []>} : vector<4x64xf32>, vector<64x384xf32>, vector<4x384xf32> -> vector<4x384xf32>
    %933 = vector.broadcast %929 : vector<1x384xf32> to vector<4x384xf32>
    %934 = arith.addf %932, %933 : vector<4x384xf32>
    %cst_430 = arith.constant dense<0.000000e+00> : vector<4x384xf32>
    %935 = tpu.matmul %883, %927, %cst_430 {dimension_numbers = #tpu.dot_dimension_numbers<[1], [0], [0], [1], [0, 0, 1, 1], [], []>} : vector<4x32xf32>, vector<32x384xf32>, vector<4x384xf32> -> vector<4x384xf32>
    %936 = vector.broadcast %931 : vector<1x384xf32> to vector<4x384xf32>
    %937 = arith.addf %935, %936 : vector<4x384xf32>
    %938 = vector.extract_strided_slice %934 {offsets = [0, 0], sizes = [4, 32], strides = [1, 1]} : vector<4x384xf32> to vector<4x32xf32>
    %939 = vector.extract_strided_slice %937 {offsets = [0, 0], sizes = [4, 32], strides = [1, 1]} : vector<4x384xf32> to vector<4x32xf32>
    %940 = arith.addf %938, %939 : vector<4x32xf32>
    %941 = arith.negf %940 : vector<4x32xf32>
    %942 = math.exp %941 : vector<4x32xf32>
    %cst_431 = arith.constant 1.000000e+00 : f32
    %943 = vector.broadcast %cst_431 : f32 to vector<4x32xf32>
    %944 = arith.addf %943, %942 : vector<4x32xf32>
    %945 = arith.divf %943, %944 : vector<4x32xf32>
    %946 = vector.extract_strided_slice %934 {offsets = [0, 128], sizes = [4, 32], strides = [1, 1]} : vector<4x384xf32> to vector<4x32xf32>
    %947 = vector.extract_strided_slice %937 {offsets = [0, 128], sizes = [4, 32], strides = [1, 1]} : vector<4x384xf32> to vector<4x32xf32>
    %948 = arith.addf %946, %947 : vector<4x32xf32>
    %949 = arith.negf %948 : vector<4x32xf32>
    %950 = math.exp %949 : vector<4x32xf32>
    %cst_432 = arith.constant 1.000000e+00 : f32
    %951 = vector.broadcast %cst_432 : f32 to vector<4x32xf32>
    %952 = arith.addf %951, %950 : vector<4x32xf32>
    %953 = arith.divf %951, %952 : vector<4x32xf32>
    %954 = vector.extract_strided_slice %934 {offsets = [0, 256], sizes = [4, 32], strides = [1, 1]} : vector<4x384xf32> to vector<4x32xf32>
    %955 = vector.extract_strided_slice %937 {offsets = [0, 256], sizes = [4, 32], strides = [1, 1]} : vector<4x384xf32> to vector<4x32xf32>
    %956 = arith.mulf %945, %955 : vector<4x32xf32>
    %957 = arith.addf %954, %956 : vector<4x32xf32>
    %958 = math.tanh %957 : vector<4x32xf32>
    %cst_433 = arith.constant 1.000000e+00 : f32
    %959 = vector.broadcast %cst_433 : f32 to vector<4x32xf32>
    %960 = arith.subf %959, %953 : vector<4x32xf32>
    %961 = arith.mulf %960, %958 : vector<4x32xf32>
    %962 = arith.mulf %953, %883 : vector<4x32xf32>
    %963 = arith.addf %961, %962 : vector<4x32xf32>
    %c1_434 = arith.constant 1 : index
    %c0_435 = arith.constant 0 : index
    %c0_436 = arith.constant 0 : index
    %964 = vector.load %arg6[%c1_434, %c0_435, %c0_436] : memref<2x64x384xf32, #tpu.memory_space<vmem>>, vector<1x64x384xf32>
    %965 = vector.shape_cast %964 : vector<1x64x384xf32> to vector<64x384xf32>
    %c1_437 = arith.constant 1 : index
    %c0_438 = arith.constant 0 : index
    %c0_439 = arith.constant 0 : index
    %966 = vector.load %arg7[%c1_437, %c0_438, %c0_439] : memref<2x32x384xf32, #tpu.memory_space<vmem>>, vector<1x32x384xf32>
    %967 = vector.shape_cast %966 : vector<1x32x384xf32> to vector<32x384xf32>
    %c1_440 = arith.constant 1 : index
    %c0_441 = arith.constant 0 : index
    %c0_442 = arith.constant 0 : index
    %968 = vector.load %arg8[%c1_440, %c0_441, %c0_442] : memref<2x1x384xf32, #tpu.memory_space<vmem>>, vector<1x1x384xf32>
    %969 = vector.shape_cast %968 : vector<1x1x384xf32> to vector<1x384xf32>
    %c1_443 = arith.constant 1 : index
    %c0_444 = arith.constant 0 : index
    %c0_445 = arith.constant 0 : index
    %970 = vector.load %arg9[%c1_443, %c0_444, %c0_445] : memref<2x1x384xf32, #tpu.memory_space<vmem>>, vector<1x1x384xf32>
    %971 = vector.shape_cast %970 : vector<1x1x384xf32> to vector<1x384xf32>
    %cst_446 = arith.constant dense<0.000000e+00> : vector<4x384xf32>
    %972 = tpu.matmul %678, %965, %cst_446 {dimension_numbers = #tpu.dot_dimension_numbers<[1], [0], [0], [1], [0, 0, 1, 1], [], []>} : vector<4x64xf32>, vector<64x384xf32>, vector<4x384xf32> -> vector<4x384xf32>
    %973 = vector.broadcast %969 : vector<1x384xf32> to vector<4x384xf32>
    %974 = arith.addf %972, %973 : vector<4x384xf32>
    %cst_447 = arith.constant dense<0.000000e+00> : vector<4x384xf32>
    %975 = tpu.matmul %923, %967, %cst_447 {dimension_numbers = #tpu.dot_dimension_numbers<[1], [0], [0], [1], [0, 0, 1, 1], [], []>} : vector<4x32xf32>, vector<32x384xf32>, vector<4x384xf32> -> vector<4x384xf32>
    %976 = vector.broadcast %971 : vector<1x384xf32> to vector<4x384xf32>
    %977 = arith.addf %975, %976 : vector<4x384xf32>
    %978 = vector.extract_strided_slice %974 {offsets = [0, 0], sizes = [4, 32], strides = [1, 1]} : vector<4x384xf32> to vector<4x32xf32>
    %979 = vector.extract_strided_slice %977 {offsets = [0, 0], sizes = [4, 32], strides = [1, 1]} : vector<4x384xf32> to vector<4x32xf32>
    %980 = arith.addf %978, %979 : vector<4x32xf32>
    %981 = arith.negf %980 : vector<4x32xf32>
    %982 = math.exp %981 : vector<4x32xf32>
    %cst_448 = arith.constant 1.000000e+00 : f32
    %983 = vector.broadcast %cst_448 : f32 to vector<4x32xf32>
    %984 = arith.addf %983, %982 : vector<4x32xf32>
    %985 = arith.divf %983, %984 : vector<4x32xf32>
    %986 = vector.extract_strided_slice %974 {offsets = [0, 128], sizes = [4, 32], strides = [1, 1]} : vector<4x384xf32> to vector<4x32xf32>
    %987 = vector.extract_strided_slice %977 {offsets = [0, 128], sizes = [4, 32], strides = [1, 1]} : vector<4x384xf32> to vector<4x32xf32>
    %988 = arith.addf %986, %987 : vector<4x32xf32>
    %989 = arith.negf %988 : vector<4x32xf32>
    %990 = math.exp %989 : vector<4x32xf32>
    %cst_449 = arith.constant 1.000000e+00 : f32
    %991 = vector.broadcast %cst_449 : f32 to vector<4x32xf32>
    %992 = arith.addf %991, %990 : vector<4x32xf32>
    %993 = arith.divf %991, %992 : vector<4x32xf32>
    %994 = vector.extract_strided_slice %974 {offsets = [0, 256], sizes = [4, 32], strides = [1, 1]} : vector<4x384xf32> to vector<4x32xf32>
    %995 = vector.extract_strided_slice %977 {offsets = [0, 256], sizes = [4, 32], strides = [1, 1]} : vector<4x384xf32> to vector<4x32xf32>
    %996 = arith.mulf %985, %995 : vector<4x32xf32>
    %997 = arith.addf %994, %996 : vector<4x32xf32>
    %998 = math.tanh %997 : vector<4x32xf32>
    %cst_450 = arith.constant 1.000000e+00 : f32
    %999 = vector.broadcast %cst_450 : f32 to vector<4x32xf32>
    %1000 = arith.subf %999, %993 : vector<4x32xf32>
    %1001 = arith.mulf %1000, %998 : vector<4x32xf32>
    %1002 = arith.mulf %993, %923 : vector<4x32xf32>
    %1003 = arith.addf %1001, %1002 : vector<4x32xf32>
    %c0_451 = arith.constant 0 : index
    %c0_452 = arith.constant 0 : index
    %c0_453 = arith.constant 0 : index
    %1004 = vector.load %arg6[%c0_451, %c0_452, %c0_453] : memref<2x64x384xf32, #tpu.memory_space<vmem>>, vector<1x64x384xf32>
    %1005 = vector.shape_cast %1004 : vector<1x64x384xf32> to vector<64x384xf32>
    %c0_454 = arith.constant 0 : index
    %c0_455 = arith.constant 0 : index
    %c0_456 = arith.constant 0 : index
    %1006 = vector.load %arg7[%c0_454, %c0_455, %c0_456] : memref<2x32x384xf32, #tpu.memory_space<vmem>>, vector<1x32x384xf32>
    %1007 = vector.shape_cast %1006 : vector<1x32x384xf32> to vector<32x384xf32>
    %c0_457 = arith.constant 0 : index
    %c0_458 = arith.constant 0 : index
    %c0_459 = arith.constant 0 : index
    %1008 = vector.load %arg8[%c0_457, %c0_458, %c0_459] : memref<2x1x384xf32, #tpu.memory_space<vmem>>, vector<1x1x384xf32>
    %1009 = vector.shape_cast %1008 : vector<1x1x384xf32> to vector<1x384xf32>
    %c0_460 = arith.constant 0 : index
    %c0_461 = arith.constant 0 : index
    %c0_462 = arith.constant 0 : index
    %1010 = vector.load %arg9[%c0_460, %c0_461, %c0_462] : memref<2x1x384xf32, #tpu.memory_space<vmem>>, vector<1x1x384xf32>
    %1011 = vector.shape_cast %1010 : vector<1x1x384xf32> to vector<1x384xf32>
    %cst_463 = arith.constant dense<0.000000e+00> : vector<4x384xf32>
    %1012 = tpu.matmul %678, %1005, %cst_463 {dimension_numbers = #tpu.dot_dimension_numbers<[1], [0], [0], [1], [0, 0, 1, 1], [], []>} : vector<4x64xf32>, vector<64x384xf32>, vector<4x384xf32> -> vector<4x384xf32>
    %1013 = vector.broadcast %1009 : vector<1x384xf32> to vector<4x384xf32>
    %1014 = arith.addf %1012, %1013 : vector<4x384xf32>
    %cst_464 = arith.constant dense<0.000000e+00> : vector<4x384xf32>
    %1015 = tpu.matmul %963, %1007, %cst_464 {dimension_numbers = #tpu.dot_dimension_numbers<[1], [0], [0], [1], [0, 0, 1, 1], [], []>} : vector<4x32xf32>, vector<32x384xf32>, vector<4x384xf32> -> vector<4x384xf32>
    %1016 = vector.broadcast %1011 : vector<1x384xf32> to vector<4x384xf32>
    %1017 = arith.addf %1015, %1016 : vector<4x384xf32>
    %1018 = vector.extract_strided_slice %1014 {offsets = [0, 0], sizes = [4, 32], strides = [1, 1]} : vector<4x384xf32> to vector<4x32xf32>
    %1019 = vector.extract_strided_slice %1017 {offsets = [0, 0], sizes = [4, 32], strides = [1, 1]} : vector<4x384xf32> to vector<4x32xf32>
    %1020 = arith.addf %1018, %1019 : vector<4x32xf32>
    %1021 = arith.negf %1020 : vector<4x32xf32>
    %1022 = math.exp %1021 : vector<4x32xf32>
    %cst_465 = arith.constant 1.000000e+00 : f32
    %1023 = vector.broadcast %cst_465 : f32 to vector<4x32xf32>
    %1024 = arith.addf %1023, %1022 : vector<4x32xf32>
    %1025 = arith.divf %1023, %1024 : vector<4x32xf32>
    %1026 = vector.extract_strided_slice %1014 {offsets = [0, 128], sizes = [4, 32], strides = [1, 1]} : vector<4x384xf32> to vector<4x32xf32>
    %1027 = vector.extract_strided_slice %1017 {offsets = [0, 128], sizes = [4, 32], strides = [1, 1]} : vector<4x384xf32> to vector<4x32xf32>
    %1028 = arith.addf %1026, %1027 : vector<4x32xf32>
    %1029 = arith.negf %1028 : vector<4x32xf32>
    %1030 = math.exp %1029 : vector<4x32xf32>
    %cst_466 = arith.constant 1.000000e+00 : f32
    %1031 = vector.broadcast %cst_466 : f32 to vector<4x32xf32>
    %1032 = arith.addf %1031, %1030 : vector<4x32xf32>
    %1033 = arith.divf %1031, %1032 : vector<4x32xf32>
    %1034 = vector.extract_strided_slice %1014 {offsets = [0, 256], sizes = [4, 32], strides = [1, 1]} : vector<4x384xf32> to vector<4x32xf32>
    %1035 = vector.extract_strided_slice %1017 {offsets = [0, 256], sizes = [4, 32], strides = [1, 1]} : vector<4x384xf32> to vector<4x32xf32>
    %1036 = arith.mulf %1025, %1035 : vector<4x32xf32>
    %1037 = arith.addf %1034, %1036 : vector<4x32xf32>
    %1038 = math.tanh %1037 : vector<4x32xf32>
    %cst_467 = arith.constant 1.000000e+00 : f32
    %1039 = vector.broadcast %cst_467 : f32 to vector<4x32xf32>
    %1040 = arith.subf %1039, %1033 : vector<4x32xf32>
    %1041 = arith.mulf %1040, %1038 : vector<4x32xf32>
    %1042 = arith.mulf %1033, %963 : vector<4x32xf32>
    %1043 = arith.addf %1041, %1042 : vector<4x32xf32>
    %c1_468 = arith.constant 1 : index
    %c0_469 = arith.constant 0 : index
    %c0_470 = arith.constant 0 : index
    %1044 = vector.load %arg6[%c1_468, %c0_469, %c0_470] : memref<2x64x384xf32, #tpu.memory_space<vmem>>, vector<1x64x384xf32>
    %1045 = vector.shape_cast %1044 : vector<1x64x384xf32> to vector<64x384xf32>
    %c1_471 = arith.constant 1 : index
    %c0_472 = arith.constant 0 : index
    %c0_473 = arith.constant 0 : index
    %1046 = vector.load %arg7[%c1_471, %c0_472, %c0_473] : memref<2x32x384xf32, #tpu.memory_space<vmem>>, vector<1x32x384xf32>
    %1047 = vector.shape_cast %1046 : vector<1x32x384xf32> to vector<32x384xf32>
    %c1_474 = arith.constant 1 : index
    %c0_475 = arith.constant 0 : index
    %c0_476 = arith.constant 0 : index
    %1048 = vector.load %arg8[%c1_474, %c0_475, %c0_476] : memref<2x1x384xf32, #tpu.memory_space<vmem>>, vector<1x1x384xf32>
    %1049 = vector.shape_cast %1048 : vector<1x1x384xf32> to vector<1x384xf32>
    %c1_477 = arith.constant 1 : index
    %c0_478 = arith.constant 0 : index
    %c0_479 = arith.constant 0 : index
    %1050 = vector.load %arg9[%c1_477, %c0_478, %c0_479] : memref<2x1x384xf32, #tpu.memory_space<vmem>>, vector<1x1x384xf32>
    %1051 = vector.shape_cast %1050 : vector<1x1x384xf32> to vector<1x384xf32>
    %cst_480 = arith.constant dense<0.000000e+00> : vector<4x384xf32>
    %1052 = tpu.matmul %677, %1045, %cst_480 {dimension_numbers = #tpu.dot_dimension_numbers<[1], [0], [0], [1], [0, 0, 1, 1], [], []>} : vector<4x64xf32>, vector<64x384xf32>, vector<4x384xf32> -> vector<4x384xf32>
    %1053 = vector.broadcast %1049 : vector<1x384xf32> to vector<4x384xf32>
    %1054 = arith.addf %1052, %1053 : vector<4x384xf32>
    %cst_481 = arith.constant dense<0.000000e+00> : vector<4x384xf32>
    %1055 = tpu.matmul %1003, %1047, %cst_481 {dimension_numbers = #tpu.dot_dimension_numbers<[1], [0], [0], [1], [0, 0, 1, 1], [], []>} : vector<4x32xf32>, vector<32x384xf32>, vector<4x384xf32> -> vector<4x384xf32>
    %1056 = vector.broadcast %1051 : vector<1x384xf32> to vector<4x384xf32>
    %1057 = arith.addf %1055, %1056 : vector<4x384xf32>
    %1058 = vector.extract_strided_slice %1054 {offsets = [0, 0], sizes = [4, 32], strides = [1, 1]} : vector<4x384xf32> to vector<4x32xf32>
    %1059 = vector.extract_strided_slice %1057 {offsets = [0, 0], sizes = [4, 32], strides = [1, 1]} : vector<4x384xf32> to vector<4x32xf32>
    %1060 = arith.addf %1058, %1059 : vector<4x32xf32>
    %1061 = arith.negf %1060 : vector<4x32xf32>
    %1062 = math.exp %1061 : vector<4x32xf32>
    %cst_482 = arith.constant 1.000000e+00 : f32
    %1063 = vector.broadcast %cst_482 : f32 to vector<4x32xf32>
    %1064 = arith.addf %1063, %1062 : vector<4x32xf32>
    %1065 = arith.divf %1063, %1064 : vector<4x32xf32>
    %1066 = vector.extract_strided_slice %1054 {offsets = [0, 128], sizes = [4, 32], strides = [1, 1]} : vector<4x384xf32> to vector<4x32xf32>
    %1067 = vector.extract_strided_slice %1057 {offsets = [0, 128], sizes = [4, 32], strides = [1, 1]} : vector<4x384xf32> to vector<4x32xf32>
    %1068 = arith.addf %1066, %1067 : vector<4x32xf32>
    %1069 = arith.negf %1068 : vector<4x32xf32>
    %1070 = math.exp %1069 : vector<4x32xf32>
    %cst_483 = arith.constant 1.000000e+00 : f32
    %1071 = vector.broadcast %cst_483 : f32 to vector<4x32xf32>
    %1072 = arith.addf %1071, %1070 : vector<4x32xf32>
    %1073 = arith.divf %1071, %1072 : vector<4x32xf32>
    %1074 = vector.extract_strided_slice %1054 {offsets = [0, 256], sizes = [4, 32], strides = [1, 1]} : vector<4x384xf32> to vector<4x32xf32>
    %1075 = vector.extract_strided_slice %1057 {offsets = [0, 256], sizes = [4, 32], strides = [1, 1]} : vector<4x384xf32> to vector<4x32xf32>
    %1076 = arith.mulf %1065, %1075 : vector<4x32xf32>
    %1077 = arith.addf %1074, %1076 : vector<4x32xf32>
    %1078 = math.tanh %1077 : vector<4x32xf32>
    %cst_484 = arith.constant 1.000000e+00 : f32
    %1079 = vector.broadcast %cst_484 : f32 to vector<4x32xf32>
    %1080 = arith.subf %1079, %1073 : vector<4x32xf32>
    %1081 = arith.mulf %1080, %1078 : vector<4x32xf32>
    %1082 = arith.mulf %1073, %1003 : vector<4x32xf32>
    %1083 = arith.addf %1081, %1082 : vector<4x32xf32>
    %c0_485 = arith.constant 0 : index
    %c0_486 = arith.constant 0 : index
    %c0_487 = arith.constant 0 : index
    %1084 = vector.load %arg6[%c0_485, %c0_486, %c0_487] : memref<2x64x384xf32, #tpu.memory_space<vmem>>, vector<1x64x384xf32>
    %1085 = vector.shape_cast %1084 : vector<1x64x384xf32> to vector<64x384xf32>
    %c0_488 = arith.constant 0 : index
    %c0_489 = arith.constant 0 : index
    %c0_490 = arith.constant 0 : index
    %1086 = vector.load %arg7[%c0_488, %c0_489, %c0_490] : memref<2x32x384xf32, #tpu.memory_space<vmem>>, vector<1x32x384xf32>
    %1087 = vector.shape_cast %1086 : vector<1x32x384xf32> to vector<32x384xf32>
    %c0_491 = arith.constant 0 : index
    %c0_492 = arith.constant 0 : index
    %c0_493 = arith.constant 0 : index
    %1088 = vector.load %arg8[%c0_491, %c0_492, %c0_493] : memref<2x1x384xf32, #tpu.memory_space<vmem>>, vector<1x1x384xf32>
    %1089 = vector.shape_cast %1088 : vector<1x1x384xf32> to vector<1x384xf32>
    %c0_494 = arith.constant 0 : index
    %c0_495 = arith.constant 0 : index
    %c0_496 = arith.constant 0 : index
    %1090 = vector.load %arg9[%c0_494, %c0_495, %c0_496] : memref<2x1x384xf32, #tpu.memory_space<vmem>>, vector<1x1x384xf32>
    %1091 = vector.shape_cast %1090 : vector<1x1x384xf32> to vector<1x384xf32>
    %cst_497 = arith.constant dense<0.000000e+00> : vector<4x384xf32>
    %1092 = tpu.matmul %679, %1085, %cst_497 {dimension_numbers = #tpu.dot_dimension_numbers<[1], [0], [0], [1], [0, 0, 1, 1], [], []>} : vector<4x64xf32>, vector<64x384xf32>, vector<4x384xf32> -> vector<4x384xf32>
    %1093 = vector.broadcast %1089 : vector<1x384xf32> to vector<4x384xf32>
    %1094 = arith.addf %1092, %1093 : vector<4x384xf32>
    %cst_498 = arith.constant dense<0.000000e+00> : vector<4x384xf32>
    %1095 = tpu.matmul %1043, %1087, %cst_498 {dimension_numbers = #tpu.dot_dimension_numbers<[1], [0], [0], [1], [0, 0, 1, 1], [], []>} : vector<4x32xf32>, vector<32x384xf32>, vector<4x384xf32> -> vector<4x384xf32>
    %1096 = vector.broadcast %1091 : vector<1x384xf32> to vector<4x384xf32>
    %1097 = arith.addf %1095, %1096 : vector<4x384xf32>
    %1098 = vector.extract_strided_slice %1094 {offsets = [0, 0], sizes = [4, 32], strides = [1, 1]} : vector<4x384xf32> to vector<4x32xf32>
    %1099 = vector.extract_strided_slice %1097 {offsets = [0, 0], sizes = [4, 32], strides = [1, 1]} : vector<4x384xf32> to vector<4x32xf32>
    %1100 = arith.addf %1098, %1099 : vector<4x32xf32>
    %1101 = arith.negf %1100 : vector<4x32xf32>
    %1102 = math.exp %1101 : vector<4x32xf32>
    %cst_499 = arith.constant 1.000000e+00 : f32
    %1103 = vector.broadcast %cst_499 : f32 to vector<4x32xf32>
    %1104 = arith.addf %1103, %1102 : vector<4x32xf32>
    %1105 = arith.divf %1103, %1104 : vector<4x32xf32>
    %1106 = vector.extract_strided_slice %1094 {offsets = [0, 128], sizes = [4, 32], strides = [1, 1]} : vector<4x384xf32> to vector<4x32xf32>
    %1107 = vector.extract_strided_slice %1097 {offsets = [0, 128], sizes = [4, 32], strides = [1, 1]} : vector<4x384xf32> to vector<4x32xf32>
    %1108 = arith.addf %1106, %1107 : vector<4x32xf32>
    %1109 = arith.negf %1108 : vector<4x32xf32>
    %1110 = math.exp %1109 : vector<4x32xf32>
    %cst_500 = arith.constant 1.000000e+00 : f32
    %1111 = vector.broadcast %cst_500 : f32 to vector<4x32xf32>
    %1112 = arith.addf %1111, %1110 : vector<4x32xf32>
    %1113 = arith.divf %1111, %1112 : vector<4x32xf32>
    %1114 = vector.extract_strided_slice %1094 {offsets = [0, 256], sizes = [4, 32], strides = [1, 1]} : vector<4x384xf32> to vector<4x32xf32>
    %1115 = vector.extract_strided_slice %1097 {offsets = [0, 256], sizes = [4, 32], strides = [1, 1]} : vector<4x384xf32> to vector<4x32xf32>
    %1116 = arith.mulf %1105, %1115 : vector<4x32xf32>
    %1117 = arith.addf %1114, %1116 : vector<4x32xf32>
    %1118 = math.tanh %1117 : vector<4x32xf32>
    %cst_501 = arith.constant 1.000000e+00 : f32
    %1119 = vector.broadcast %cst_501 : f32 to vector<4x32xf32>
    %1120 = arith.subf %1119, %1113 : vector<4x32xf32>
    %1121 = arith.mulf %1120, %1118 : vector<4x32xf32>
    %1122 = arith.mulf %1113, %1043 : vector<4x32xf32>
    %1123 = arith.addf %1121, %1122 : vector<4x32xf32>
    %c1_502 = arith.constant 1 : index
    %c0_503 = arith.constant 0 : index
    %c0_504 = arith.constant 0 : index
    %1124 = vector.load %arg6[%c1_502, %c0_503, %c0_504] : memref<2x64x384xf32, #tpu.memory_space<vmem>>, vector<1x64x384xf32>
    %1125 = vector.shape_cast %1124 : vector<1x64x384xf32> to vector<64x384xf32>
    %c1_505 = arith.constant 1 : index
    %c0_506 = arith.constant 0 : index
    %c0_507 = arith.constant 0 : index
    %1126 = vector.load %arg7[%c1_505, %c0_506, %c0_507] : memref<2x32x384xf32, #tpu.memory_space<vmem>>, vector<1x32x384xf32>
    %1127 = vector.shape_cast %1126 : vector<1x32x384xf32> to vector<32x384xf32>
    %c1_508 = arith.constant 1 : index
    %c0_509 = arith.constant 0 : index
    %c0_510 = arith.constant 0 : index
    %1128 = vector.load %arg8[%c1_508, %c0_509, %c0_510] : memref<2x1x384xf32, #tpu.memory_space<vmem>>, vector<1x1x384xf32>
    %1129 = vector.shape_cast %1128 : vector<1x1x384xf32> to vector<1x384xf32>
    %c1_511 = arith.constant 1 : index
    %c0_512 = arith.constant 0 : index
    %c0_513 = arith.constant 0 : index
    %1130 = vector.load %arg9[%c1_511, %c0_512, %c0_513] : memref<2x1x384xf32, #tpu.memory_space<vmem>>, vector<1x1x384xf32>
    %1131 = vector.shape_cast %1130 : vector<1x1x384xf32> to vector<1x384xf32>
    %cst_514 = arith.constant dense<0.000000e+00> : vector<4x384xf32>
    %1132 = tpu.matmul %676, %1125, %cst_514 {dimension_numbers = #tpu.dot_dimension_numbers<[1], [0], [0], [1], [0, 0, 1, 1], [], []>} : vector<4x64xf32>, vector<64x384xf32>, vector<4x384xf32> -> vector<4x384xf32>
    %1133 = vector.broadcast %1129 : vector<1x384xf32> to vector<4x384xf32>
    %1134 = arith.addf %1132, %1133 : vector<4x384xf32>
    %cst_515 = arith.constant dense<0.000000e+00> : vector<4x384xf32>
    %1135 = tpu.matmul %1083, %1127, %cst_515 {dimension_numbers = #tpu.dot_dimension_numbers<[1], [0], [0], [1], [0, 0, 1, 1], [], []>} : vector<4x32xf32>, vector<32x384xf32>, vector<4x384xf32> -> vector<4x384xf32>
    %1136 = vector.broadcast %1131 : vector<1x384xf32> to vector<4x384xf32>
    %1137 = arith.addf %1135, %1136 : vector<4x384xf32>
    %1138 = vector.extract_strided_slice %1134 {offsets = [0, 0], sizes = [4, 32], strides = [1, 1]} : vector<4x384xf32> to vector<4x32xf32>
    %1139 = vector.extract_strided_slice %1137 {offsets = [0, 0], sizes = [4, 32], strides = [1, 1]} : vector<4x384xf32> to vector<4x32xf32>
    %1140 = arith.addf %1138, %1139 : vector<4x32xf32>
    %1141 = arith.negf %1140 : vector<4x32xf32>
    %1142 = math.exp %1141 : vector<4x32xf32>
    %cst_516 = arith.constant 1.000000e+00 : f32
    %1143 = vector.broadcast %cst_516 : f32 to vector<4x32xf32>
    %1144 = arith.addf %1143, %1142 : vector<4x32xf32>
    %1145 = arith.divf %1143, %1144 : vector<4x32xf32>
    %1146 = vector.extract_strided_slice %1134 {offsets = [0, 128], sizes = [4, 32], strides = [1, 1]} : vector<4x384xf32> to vector<4x32xf32>
    %1147 = vector.extract_strided_slice %1137 {offsets = [0, 128], sizes = [4, 32], strides = [1, 1]} : vector<4x384xf32> to vector<4x32xf32>
    %1148 = arith.addf %1146, %1147 : vector<4x32xf32>
    %1149 = arith.negf %1148 : vector<4x32xf32>
    %1150 = math.exp %1149 : vector<4x32xf32>
    %cst_517 = arith.constant 1.000000e+00 : f32
    %1151 = vector.broadcast %cst_517 : f32 to vector<4x32xf32>
    %1152 = arith.addf %1151, %1150 : vector<4x32xf32>
    %1153 = arith.divf %1151, %1152 : vector<4x32xf32>
    %1154 = vector.extract_strided_slice %1134 {offsets = [0, 256], sizes = [4, 32], strides = [1, 1]} : vector<4x384xf32> to vector<4x32xf32>
    %1155 = vector.extract_strided_slice %1137 {offsets = [0, 256], sizes = [4, 32], strides = [1, 1]} : vector<4x384xf32> to vector<4x32xf32>
    %1156 = arith.mulf %1145, %1155 : vector<4x32xf32>
    %1157 = arith.addf %1154, %1156 : vector<4x32xf32>
    %1158 = math.tanh %1157 : vector<4x32xf32>
    %cst_518 = arith.constant 1.000000e+00 : f32
    %1159 = vector.broadcast %cst_518 : f32 to vector<4x32xf32>
    %1160 = arith.subf %1159, %1153 : vector<4x32xf32>
    %1161 = arith.mulf %1160, %1158 : vector<4x32xf32>
    %1162 = arith.mulf %1153, %1083 : vector<4x32xf32>
    %1163 = arith.addf %1161, %1162 : vector<4x32xf32>
    %c0_519 = arith.constant 0 : index
    %c0_520 = arith.constant 0 : index
    %c0_521 = arith.constant 0 : index
    %1164 = vector.load %arg6[%c0_519, %c0_520, %c0_521] : memref<2x64x384xf32, #tpu.memory_space<vmem>>, vector<1x64x384xf32>
    %1165 = vector.shape_cast %1164 : vector<1x64x384xf32> to vector<64x384xf32>
    %c0_522 = arith.constant 0 : index
    %c0_523 = arith.constant 0 : index
    %c0_524 = arith.constant 0 : index
    %1166 = vector.load %arg7[%c0_522, %c0_523, %c0_524] : memref<2x32x384xf32, #tpu.memory_space<vmem>>, vector<1x32x384xf32>
    %1167 = vector.shape_cast %1166 : vector<1x32x384xf32> to vector<32x384xf32>
    %c0_525 = arith.constant 0 : index
    %c0_526 = arith.constant 0 : index
    %c0_527 = arith.constant 0 : index
    %1168 = vector.load %arg8[%c0_525, %c0_526, %c0_527] : memref<2x1x384xf32, #tpu.memory_space<vmem>>, vector<1x1x384xf32>
    %1169 = vector.shape_cast %1168 : vector<1x1x384xf32> to vector<1x384xf32>
    %c0_528 = arith.constant 0 : index
    %c0_529 = arith.constant 0 : index
    %c0_530 = arith.constant 0 : index
    %1170 = vector.load %arg9[%c0_528, %c0_529, %c0_530] : memref<2x1x384xf32, #tpu.memory_space<vmem>>, vector<1x1x384xf32>
    %1171 = vector.shape_cast %1170 : vector<1x1x384xf32> to vector<1x384xf32>
    %cst_531 = arith.constant dense<0.000000e+00> : vector<4x384xf32>
    %1172 = tpu.matmul %680, %1165, %cst_531 {dimension_numbers = #tpu.dot_dimension_numbers<[1], [0], [0], [1], [0, 0, 1, 1], [], []>} : vector<4x64xf32>, vector<64x384xf32>, vector<4x384xf32> -> vector<4x384xf32>
    %1173 = vector.broadcast %1169 : vector<1x384xf32> to vector<4x384xf32>
    %1174 = arith.addf %1172, %1173 : vector<4x384xf32>
    %cst_532 = arith.constant dense<0.000000e+00> : vector<4x384xf32>
    %1175 = tpu.matmul %1123, %1167, %cst_532 {dimension_numbers = #tpu.dot_dimension_numbers<[1], [0], [0], [1], [0, 0, 1, 1], [], []>} : vector<4x32xf32>, vector<32x384xf32>, vector<4x384xf32> -> vector<4x384xf32>
    %1176 = vector.broadcast %1171 : vector<1x384xf32> to vector<4x384xf32>
    %1177 = arith.addf %1175, %1176 : vector<4x384xf32>
    %1178 = vector.extract_strided_slice %1174 {offsets = [0, 0], sizes = [4, 32], strides = [1, 1]} : vector<4x384xf32> to vector<4x32xf32>
    %1179 = vector.extract_strided_slice %1177 {offsets = [0, 0], sizes = [4, 32], strides = [1, 1]} : vector<4x384xf32> to vector<4x32xf32>
    %1180 = arith.addf %1178, %1179 : vector<4x32xf32>
    %1181 = arith.negf %1180 : vector<4x32xf32>
    %1182 = math.exp %1181 : vector<4x32xf32>
    %cst_533 = arith.constant 1.000000e+00 : f32
    %1183 = vector.broadcast %cst_533 : f32 to vector<4x32xf32>
    %1184 = arith.addf %1183, %1182 : vector<4x32xf32>
    %1185 = arith.divf %1183, %1184 : vector<4x32xf32>
    %1186 = vector.extract_strided_slice %1174 {offsets = [0, 128], sizes = [4, 32], strides = [1, 1]} : vector<4x384xf32> to vector<4x32xf32>
    %1187 = vector.extract_strided_slice %1177 {offsets = [0, 128], sizes = [4, 32], strides = [1, 1]} : vector<4x384xf32> to vector<4x32xf32>
    %1188 = arith.addf %1186, %1187 : vector<4x32xf32>
    %1189 = arith.negf %1188 : vector<4x32xf32>
    %1190 = math.exp %1189 : vector<4x32xf32>
    %cst_534 = arith.constant 1.000000e+00 : f32
    %1191 = vector.broadcast %cst_534 : f32 to vector<4x32xf32>
    %1192 = arith.addf %1191, %1190 : vector<4x32xf32>
    %1193 = arith.divf %1191, %1192 : vector<4x32xf32>
    %1194 = vector.extract_strided_slice %1174 {offsets = [0, 256], sizes = [4, 32], strides = [1, 1]} : vector<4x384xf32> to vector<4x32xf32>
    %1195 = vector.extract_strided_slice %1177 {offsets = [0, 256], sizes = [4, 32], strides = [1, 1]} : vector<4x384xf32> to vector<4x32xf32>
    %1196 = arith.mulf %1185, %1195 : vector<4x32xf32>
    %1197 = arith.addf %1194, %1196 : vector<4x32xf32>
    %1198 = math.tanh %1197 : vector<4x32xf32>
    %cst_535 = arith.constant 1.000000e+00 : f32
    %1199 = vector.broadcast %cst_535 : f32 to vector<4x32xf32>
    %1200 = arith.subf %1199, %1193 : vector<4x32xf32>
    %1201 = arith.mulf %1200, %1198 : vector<4x32xf32>
    %1202 = arith.mulf %1193, %1123 : vector<4x32xf32>
    %1203 = arith.addf %1201, %1202 : vector<4x32xf32>
    %c1_536 = arith.constant 1 : index
    %c0_537 = arith.constant 0 : index
    %c0_538 = arith.constant 0 : index
    %1204 = vector.load %arg6[%c1_536, %c0_537, %c0_538] : memref<2x64x384xf32, #tpu.memory_space<vmem>>, vector<1x64x384xf32>
    %1205 = vector.shape_cast %1204 : vector<1x64x384xf32> to vector<64x384xf32>
    %c1_539 = arith.constant 1 : index
    %c0_540 = arith.constant 0 : index
    %c0_541 = arith.constant 0 : index
    %1206 = vector.load %arg7[%c1_539, %c0_540, %c0_541] : memref<2x32x384xf32, #tpu.memory_space<vmem>>, vector<1x32x384xf32>
    %1207 = vector.shape_cast %1206 : vector<1x32x384xf32> to vector<32x384xf32>
    %c1_542 = arith.constant 1 : index
    %c0_543 = arith.constant 0 : index
    %c0_544 = arith.constant 0 : index
    %1208 = vector.load %arg8[%c1_542, %c0_543, %c0_544] : memref<2x1x384xf32, #tpu.memory_space<vmem>>, vector<1x1x384xf32>
    %1209 = vector.shape_cast %1208 : vector<1x1x384xf32> to vector<1x384xf32>
    %c1_545 = arith.constant 1 : index
    %c0_546 = arith.constant 0 : index
    %c0_547 = arith.constant 0 : index
    %1210 = vector.load %arg9[%c1_545, %c0_546, %c0_547] : memref<2x1x384xf32, #tpu.memory_space<vmem>>, vector<1x1x384xf32>
    %1211 = vector.shape_cast %1210 : vector<1x1x384xf32> to vector<1x384xf32>
    %cst_548 = arith.constant dense<0.000000e+00> : vector<4x384xf32>
    %1212 = tpu.matmul %675, %1205, %cst_548 {dimension_numbers = #tpu.dot_dimension_numbers<[1], [0], [0], [1], [0, 0, 1, 1], [], []>} : vector<4x64xf32>, vector<64x384xf32>, vector<4x384xf32> -> vector<4x384xf32>
    %1213 = vector.broadcast %1209 : vector<1x384xf32> to vector<4x384xf32>
    %1214 = arith.addf %1212, %1213 : vector<4x384xf32>
    %cst_549 = arith.constant dense<0.000000e+00> : vector<4x384xf32>
    %1215 = tpu.matmul %1163, %1207, %cst_549 {dimension_numbers = #tpu.dot_dimension_numbers<[1], [0], [0], [1], [0, 0, 1, 1], [], []>} : vector<4x32xf32>, vector<32x384xf32>, vector<4x384xf32> -> vector<4x384xf32>
    %1216 = vector.broadcast %1211 : vector<1x384xf32> to vector<4x384xf32>
    %1217 = arith.addf %1215, %1216 : vector<4x384xf32>
    %1218 = vector.extract_strided_slice %1214 {offsets = [0, 0], sizes = [4, 32], strides = [1, 1]} : vector<4x384xf32> to vector<4x32xf32>
    %1219 = vector.extract_strided_slice %1217 {offsets = [0, 0], sizes = [4, 32], strides = [1, 1]} : vector<4x384xf32> to vector<4x32xf32>
    %1220 = arith.addf %1218, %1219 : vector<4x32xf32>
    %1221 = arith.negf %1220 : vector<4x32xf32>
    %1222 = math.exp %1221 : vector<4x32xf32>
    %cst_550 = arith.constant 1.000000e+00 : f32
    %1223 = vector.broadcast %cst_550 : f32 to vector<4x32xf32>
    %1224 = arith.addf %1223, %1222 : vector<4x32xf32>
    %1225 = arith.divf %1223, %1224 : vector<4x32xf32>
    %1226 = vector.extract_strided_slice %1214 {offsets = [0, 128], sizes = [4, 32], strides = [1, 1]} : vector<4x384xf32> to vector<4x32xf32>
    %1227 = vector.extract_strided_slice %1217 {offsets = [0, 128], sizes = [4, 32], strides = [1, 1]} : vector<4x384xf32> to vector<4x32xf32>
    %1228 = arith.addf %1226, %1227 : vector<4x32xf32>
    %1229 = arith.negf %1228 : vector<4x32xf32>
    %1230 = math.exp %1229 : vector<4x32xf32>
    %cst_551 = arith.constant 1.000000e+00 : f32
    %1231 = vector.broadcast %cst_551 : f32 to vector<4x32xf32>
    %1232 = arith.addf %1231, %1230 : vector<4x32xf32>
    %1233 = arith.divf %1231, %1232 : vector<4x32xf32>
    %1234 = vector.extract_strided_slice %1214 {offsets = [0, 256], sizes = [4, 32], strides = [1, 1]} : vector<4x384xf32> to vector<4x32xf32>
    %1235 = vector.extract_strided_slice %1217 {offsets = [0, 256], sizes = [4, 32], strides = [1, 1]} : vector<4x384xf32> to vector<4x32xf32>
    %1236 = arith.mulf %1225, %1235 : vector<4x32xf32>
    %1237 = arith.addf %1234, %1236 : vector<4x32xf32>
    %1238 = math.tanh %1237 : vector<4x32xf32>
    %cst_552 = arith.constant 1.000000e+00 : f32
    %1239 = vector.broadcast %cst_552 : f32 to vector<4x32xf32>
    %1240 = arith.subf %1239, %1233 : vector<4x32xf32>
    %1241 = arith.mulf %1240, %1238 : vector<4x32xf32>
    %1242 = arith.mulf %1233, %1163 : vector<4x32xf32>
    %1243 = arith.addf %1241, %1242 : vector<4x32xf32>
    %c0_553 = arith.constant 0 : index
    %c0_554 = arith.constant 0 : index
    %c0_555 = arith.constant 0 : index
    %1244 = vector.load %arg6[%c0_553, %c0_554, %c0_555] : memref<2x64x384xf32, #tpu.memory_space<vmem>>, vector<1x64x384xf32>
    %1245 = vector.shape_cast %1244 : vector<1x64x384xf32> to vector<64x384xf32>
    %c0_556 = arith.constant 0 : index
    %c0_557 = arith.constant 0 : index
    %c0_558 = arith.constant 0 : index
    %1246 = vector.load %arg7[%c0_556, %c0_557, %c0_558] : memref<2x32x384xf32, #tpu.memory_space<vmem>>, vector<1x32x384xf32>
    %1247 = vector.shape_cast %1246 : vector<1x32x384xf32> to vector<32x384xf32>
    %c0_559 = arith.constant 0 : index
    %c0_560 = arith.constant 0 : index
    %c0_561 = arith.constant 0 : index
    %1248 = vector.load %arg8[%c0_559, %c0_560, %c0_561] : memref<2x1x384xf32, #tpu.memory_space<vmem>>, vector<1x1x384xf32>
    %1249 = vector.shape_cast %1248 : vector<1x1x384xf32> to vector<1x384xf32>
    %c0_562 = arith.constant 0 : index
    %c0_563 = arith.constant 0 : index
    %c0_564 = arith.constant 0 : index
    %1250 = vector.load %arg9[%c0_562, %c0_563, %c0_564] : memref<2x1x384xf32, #tpu.memory_space<vmem>>, vector<1x1x384xf32>
    %1251 = vector.shape_cast %1250 : vector<1x1x384xf32> to vector<1x384xf32>
    %cst_565 = arith.constant dense<0.000000e+00> : vector<4x384xf32>
    %1252 = tpu.matmul %681, %1245, %cst_565 {dimension_numbers = #tpu.dot_dimension_numbers<[1], [0], [0], [1], [0, 0, 1, 1], [], []>} : vector<4x64xf32>, vector<64x384xf32>, vector<4x384xf32> -> vector<4x384xf32>
    %1253 = vector.broadcast %1249 : vector<1x384xf32> to vector<4x384xf32>
    %1254 = arith.addf %1252, %1253 : vector<4x384xf32>
    %cst_566 = arith.constant dense<0.000000e+00> : vector<4x384xf32>
    %1255 = tpu.matmul %1203, %1247, %cst_566 {dimension_numbers = #tpu.dot_dimension_numbers<[1], [0], [0], [1], [0, 0, 1, 1], [], []>} : vector<4x32xf32>, vector<32x384xf32>, vector<4x384xf32> -> vector<4x384xf32>
    %1256 = vector.broadcast %1251 : vector<1x384xf32> to vector<4x384xf32>
    %1257 = arith.addf %1255, %1256 : vector<4x384xf32>
    %1258 = vector.extract_strided_slice %1254 {offsets = [0, 0], sizes = [4, 32], strides = [1, 1]} : vector<4x384xf32> to vector<4x32xf32>
    %1259 = vector.extract_strided_slice %1257 {offsets = [0, 0], sizes = [4, 32], strides = [1, 1]} : vector<4x384xf32> to vector<4x32xf32>
    %1260 = arith.addf %1258, %1259 : vector<4x32xf32>
    %1261 = arith.negf %1260 : vector<4x32xf32>
    %1262 = math.exp %1261 : vector<4x32xf32>
    %cst_567 = arith.constant 1.000000e+00 : f32
    %1263 = vector.broadcast %cst_567 : f32 to vector<4x32xf32>
    %1264 = arith.addf %1263, %1262 : vector<4x32xf32>
    %1265 = arith.divf %1263, %1264 : vector<4x32xf32>
    %1266 = vector.extract_strided_slice %1254 {offsets = [0, 128], sizes = [4, 32], strides = [1, 1]} : vector<4x384xf32> to vector<4x32xf32>
    %1267 = vector.extract_strided_slice %1257 {offsets = [0, 128], sizes = [4, 32], strides = [1, 1]} : vector<4x384xf32> to vector<4x32xf32>
    %1268 = arith.addf %1266, %1267 : vector<4x32xf32>
    %1269 = arith.negf %1268 : vector<4x32xf32>
    %1270 = math.exp %1269 : vector<4x32xf32>
    %cst_568 = arith.constant 1.000000e+00 : f32
    %1271 = vector.broadcast %cst_568 : f32 to vector<4x32xf32>
    %1272 = arith.addf %1271, %1270 : vector<4x32xf32>
    %1273 = arith.divf %1271, %1272 : vector<4x32xf32>
    %1274 = vector.extract_strided_slice %1254 {offsets = [0, 256], sizes = [4, 32], strides = [1, 1]} : vector<4x384xf32> to vector<4x32xf32>
    %1275 = vector.extract_strided_slice %1257 {offsets = [0, 256], sizes = [4, 32], strides = [1, 1]} : vector<4x384xf32> to vector<4x32xf32>
    %1276 = arith.mulf %1265, %1275 : vector<4x32xf32>
    %1277 = arith.addf %1274, %1276 : vector<4x32xf32>
    %1278 = math.tanh %1277 : vector<4x32xf32>
    %cst_569 = arith.constant 1.000000e+00 : f32
    %1279 = vector.broadcast %cst_569 : f32 to vector<4x32xf32>
    %1280 = arith.subf %1279, %1273 : vector<4x32xf32>
    %1281 = arith.mulf %1280, %1278 : vector<4x32xf32>
    %1282 = arith.mulf %1273, %1203 : vector<4x32xf32>
    %1283 = arith.addf %1281, %1282 : vector<4x32xf32>
    %c1_570 = arith.constant 1 : index
    %c0_571 = arith.constant 0 : index
    %c0_572 = arith.constant 0 : index
    %1284 = vector.load %arg6[%c1_570, %c0_571, %c0_572] : memref<2x64x384xf32, #tpu.memory_space<vmem>>, vector<1x64x384xf32>
    %1285 = vector.shape_cast %1284 : vector<1x64x384xf32> to vector<64x384xf32>
    %c1_573 = arith.constant 1 : index
    %c0_574 = arith.constant 0 : index
    %c0_575 = arith.constant 0 : index
    %1286 = vector.load %arg7[%c1_573, %c0_574, %c0_575] : memref<2x32x384xf32, #tpu.memory_space<vmem>>, vector<1x32x384xf32>
    %1287 = vector.shape_cast %1286 : vector<1x32x384xf32> to vector<32x384xf32>
    %c1_576 = arith.constant 1 : index
    %c0_577 = arith.constant 0 : index
    %c0_578 = arith.constant 0 : index
    %1288 = vector.load %arg8[%c1_576, %c0_577, %c0_578] : memref<2x1x384xf32, #tpu.memory_space<vmem>>, vector<1x1x384xf32>
    %1289 = vector.shape_cast %1288 : vector<1x1x384xf32> to vector<1x384xf32>
    %c1_579 = arith.constant 1 : index
    %c0_580 = arith.constant 0 : index
    %c0_581 = arith.constant 0 : index
    %1290 = vector.load %arg9[%c1_579, %c0_580, %c0_581] : memref<2x1x384xf32, #tpu.memory_space<vmem>>, vector<1x1x384xf32>
    %1291 = vector.shape_cast %1290 : vector<1x1x384xf32> to vector<1x384xf32>
    %cst_582 = arith.constant dense<0.000000e+00> : vector<4x384xf32>
    %1292 = tpu.matmul %674, %1285, %cst_582 {dimension_numbers = #tpu.dot_dimension_numbers<[1], [0], [0], [1], [0, 0, 1, 1], [], []>} : vector<4x64xf32>, vector<64x384xf32>, vector<4x384xf32> -> vector<4x384xf32>
    %1293 = vector.broadcast %1289 : vector<1x384xf32> to vector<4x384xf32>
    %1294 = arith.addf %1292, %1293 : vector<4x384xf32>
    %cst_583 = arith.constant dense<0.000000e+00> : vector<4x384xf32>
    %1295 = tpu.matmul %1243, %1287, %cst_583 {dimension_numbers = #tpu.dot_dimension_numbers<[1], [0], [0], [1], [0, 0, 1, 1], [], []>} : vector<4x32xf32>, vector<32x384xf32>, vector<4x384xf32> -> vector<4x384xf32>
    %1296 = vector.broadcast %1291 : vector<1x384xf32> to vector<4x384xf32>
    %1297 = arith.addf %1295, %1296 : vector<4x384xf32>
    %1298 = vector.extract_strided_slice %1294 {offsets = [0, 0], sizes = [4, 32], strides = [1, 1]} : vector<4x384xf32> to vector<4x32xf32>
    %1299 = vector.extract_strided_slice %1297 {offsets = [0, 0], sizes = [4, 32], strides = [1, 1]} : vector<4x384xf32> to vector<4x32xf32>
    %1300 = arith.addf %1298, %1299 : vector<4x32xf32>
    %1301 = arith.negf %1300 : vector<4x32xf32>
    %1302 = math.exp %1301 : vector<4x32xf32>
    %cst_584 = arith.constant 1.000000e+00 : f32
    %1303 = vector.broadcast %cst_584 : f32 to vector<4x32xf32>
    %1304 = arith.addf %1303, %1302 : vector<4x32xf32>
    %1305 = arith.divf %1303, %1304 : vector<4x32xf32>
    %1306 = vector.extract_strided_slice %1294 {offsets = [0, 128], sizes = [4, 32], strides = [1, 1]} : vector<4x384xf32> to vector<4x32xf32>
    %1307 = vector.extract_strided_slice %1297 {offsets = [0, 128], sizes = [4, 32], strides = [1, 1]} : vector<4x384xf32> to vector<4x32xf32>
    %1308 = arith.addf %1306, %1307 : vector<4x32xf32>
    %1309 = arith.negf %1308 : vector<4x32xf32>
    %1310 = math.exp %1309 : vector<4x32xf32>
    %cst_585 = arith.constant 1.000000e+00 : f32
    %1311 = vector.broadcast %cst_585 : f32 to vector<4x32xf32>
    %1312 = arith.addf %1311, %1310 : vector<4x32xf32>
    %1313 = arith.divf %1311, %1312 : vector<4x32xf32>
    %1314 = vector.extract_strided_slice %1294 {offsets = [0, 256], sizes = [4, 32], strides = [1, 1]} : vector<4x384xf32> to vector<4x32xf32>
    %1315 = vector.extract_strided_slice %1297 {offsets = [0, 256], sizes = [4, 32], strides = [1, 1]} : vector<4x384xf32> to vector<4x32xf32>
    %1316 = arith.mulf %1305, %1315 : vector<4x32xf32>
    %1317 = arith.addf %1314, %1316 : vector<4x32xf32>
    %1318 = math.tanh %1317 : vector<4x32xf32>
    %cst_586 = arith.constant 1.000000e+00 : f32
    %1319 = vector.broadcast %cst_586 : f32 to vector<4x32xf32>
    %1320 = arith.subf %1319, %1313 : vector<4x32xf32>
    %1321 = arith.mulf %1320, %1318 : vector<4x32xf32>
    %1322 = arith.mulf %1313, %1243 : vector<4x32xf32>
    %1323 = arith.addf %1321, %1322 : vector<4x32xf32>
    %1324 = tpu.concatenate %631, %673 in 1 : vector<4x32xf32>, vector<4x32xf32> -> vector<4x64xf32>
    %1325 = tpu.concatenate %1283, %1323 in 1 : vector<4x32xf32>, vector<4x32xf32> -> vector<4x64xf32>
    %c0_587 = arith.constant 0 : index
    %c0_588 = arith.constant 0 : index
    %c0_589 = arith.constant 0 : index
    %1326 = vector.load %arg1[%c0_587, %c0_588, %c0_589] : memref<7x4x16xf32, #tpu.memory_space<vmem>>, vector<1x4x16xf32>
    %1327 = vector.shape_cast %1326 : vector<1x4x16xf32> to vector<4x16xf32>
    %c0_590 = arith.constant 0 : index
    %c0_591 = arith.constant 0 : index
    %1328 = vector.load %arg10[%c0_590, %c0_591] : memref<16x384xf32, #tpu.memory_space<vmem>>, vector<16x384xf32>
    %c0_592 = arith.constant 0 : index
    %c0_593 = arith.constant 0 : index
    %1329 = vector.load %arg11[%c0_592, %c0_593] : memref<64x384xf32, #tpu.memory_space<vmem>>, vector<64x384xf32>
    %c0_594 = arith.constant 0 : index
    %c0_595 = arith.constant 0 : index
    %1330 = vector.load %arg12[%c0_594, %c0_595] : memref<1x384xf32, #tpu.memory_space<vmem>>, vector<1x384xf32>
    %c0_596 = arith.constant 0 : index
    %c0_597 = arith.constant 0 : index
    %1331 = vector.load %arg13[%c0_596, %c0_597] : memref<1x384xf32, #tpu.memory_space<vmem>>, vector<1x384xf32>
    %cst_598 = arith.constant dense<0.000000e+00> : vector<4x384xf32>
    %1332 = tpu.matmul %1327, %1328, %cst_598 {dimension_numbers = #tpu.dot_dimension_numbers<[1], [0], [0], [1], [0, 0, 1, 1], [], []>} : vector<4x16xf32>, vector<16x384xf32>, vector<4x384xf32> -> vector<4x384xf32>
    %1333 = vector.broadcast %1330 : vector<1x384xf32> to vector<4x384xf32>
    %1334 = arith.addf %1332, %1333 : vector<4x384xf32>
    %cst_599 = arith.constant dense<0.000000e+00> : vector<4x384xf32>
    %1335 = tpu.matmul %1324, %1329, %cst_599 {dimension_numbers = #tpu.dot_dimension_numbers<[1], [0], [0], [1], [0, 0, 1, 1], [], []>} : vector<4x64xf32>, vector<64x384xf32>, vector<4x384xf32> -> vector<4x384xf32>
    %1336 = vector.broadcast %1331 : vector<1x384xf32> to vector<4x384xf32>
    %1337 = arith.addf %1335, %1336 : vector<4x384xf32>
    %1338 = vector.extract_strided_slice %1334 {offsets = [0, 0], sizes = [4, 64], strides = [1, 1]} : vector<4x384xf32> to vector<4x64xf32>
    %1339 = vector.extract_strided_slice %1337 {offsets = [0, 0], sizes = [4, 64], strides = [1, 1]} : vector<4x384xf32> to vector<4x64xf32>
    %1340 = arith.addf %1338, %1339 : vector<4x64xf32>
    %1341 = arith.negf %1340 : vector<4x64xf32>
    %1342 = math.exp %1341 : vector<4x64xf32>
    %cst_600 = arith.constant 1.000000e+00 : f32
    %1343 = vector.broadcast %cst_600 : f32 to vector<4x64xf32>
    %1344 = arith.addf %1343, %1342 : vector<4x64xf32>
    %1345 = arith.divf %1343, %1344 : vector<4x64xf32>
    %1346 = vector.extract_strided_slice %1334 {offsets = [0, 128], sizes = [4, 64], strides = [1, 1]} : vector<4x384xf32> to vector<4x64xf32>
    %1347 = vector.extract_strided_slice %1337 {offsets = [0, 128], sizes = [4, 64], strides = [1, 1]} : vector<4x384xf32> to vector<4x64xf32>
    %1348 = arith.addf %1346, %1347 : vector<4x64xf32>
    %1349 = arith.negf %1348 : vector<4x64xf32>
    %1350 = math.exp %1349 : vector<4x64xf32>
    %cst_601 = arith.constant 1.000000e+00 : f32
    %1351 = vector.broadcast %cst_601 : f32 to vector<4x64xf32>
    %1352 = arith.addf %1351, %1350 : vector<4x64xf32>
    %1353 = arith.divf %1351, %1352 : vector<4x64xf32>
    %1354 = vector.extract_strided_slice %1334 {offsets = [0, 256], sizes = [4, 64], strides = [1, 1]} : vector<4x384xf32> to vector<4x64xf32>
    %1355 = vector.extract_strided_slice %1337 {offsets = [0, 256], sizes = [4, 64], strides = [1, 1]} : vector<4x384xf32> to vector<4x64xf32>
    %1356 = arith.mulf %1345, %1355 : vector<4x64xf32>
    %1357 = arith.addf %1354, %1356 : vector<4x64xf32>
    %1358 = math.tanh %1357 : vector<4x64xf32>
    %cst_602 = arith.constant 1.000000e+00 : f32
    %1359 = vector.broadcast %cst_602 : f32 to vector<4x64xf32>
    %1360 = arith.subf %1359, %1353 : vector<4x64xf32>
    %1361 = arith.mulf %1360, %1358 : vector<4x64xf32>
    %1362 = arith.mulf %1353, %1324 : vector<4x64xf32>
    %1363 = arith.addf %1361, %1362 : vector<4x64xf32>
    %c0_603 = arith.constant 0 : index
    %c0_604 = arith.constant 0 : index
    %1364 = vector.load %arg14[%c0_603, %c0_604] : memref<64x384xf32, #tpu.memory_space<vmem>>, vector<64x384xf32>
    %c0_605 = arith.constant 0 : index
    %c0_606 = arith.constant 0 : index
    %1365 = vector.load %arg15[%c0_605, %c0_606] : memref<64x384xf32, #tpu.memory_space<vmem>>, vector<64x384xf32>
    %c0_607 = arith.constant 0 : index
    %c0_608 = arith.constant 0 : index
    %1366 = vector.load %arg16[%c0_607, %c0_608] : memref<1x384xf32, #tpu.memory_space<vmem>>, vector<1x384xf32>
    %c0_609 = arith.constant 0 : index
    %c0_610 = arith.constant 0 : index
    %1367 = vector.load %arg17[%c0_609, %c0_610] : memref<1x384xf32, #tpu.memory_space<vmem>>, vector<1x384xf32>
    %cst_611 = arith.constant dense<0.000000e+00> : vector<4x384xf32>
    %1368 = tpu.matmul %1363, %1364, %cst_611 {dimension_numbers = #tpu.dot_dimension_numbers<[1], [0], [0], [1], [0, 0, 1, 1], [], []>} : vector<4x64xf32>, vector<64x384xf32>, vector<4x384xf32> -> vector<4x384xf32>
    %1369 = vector.broadcast %1366 : vector<1x384xf32> to vector<4x384xf32>
    %1370 = arith.addf %1368, %1369 : vector<4x384xf32>
    %cst_612 = arith.constant dense<0.000000e+00> : vector<4x384xf32>
    %1371 = tpu.matmul %1325, %1365, %cst_612 {dimension_numbers = #tpu.dot_dimension_numbers<[1], [0], [0], [1], [0, 0, 1, 1], [], []>} : vector<4x64xf32>, vector<64x384xf32>, vector<4x384xf32> -> vector<4x384xf32>
    %1372 = vector.broadcast %1367 : vector<1x384xf32> to vector<4x384xf32>
    %1373 = arith.addf %1371, %1372 : vector<4x384xf32>
    %1374 = vector.extract_strided_slice %1370 {offsets = [0, 0], sizes = [4, 64], strides = [1, 1]} : vector<4x384xf32> to vector<4x64xf32>
    %1375 = vector.extract_strided_slice %1373 {offsets = [0, 0], sizes = [4, 64], strides = [1, 1]} : vector<4x384xf32> to vector<4x64xf32>
    %1376 = arith.addf %1374, %1375 : vector<4x64xf32>
    %1377 = arith.negf %1376 : vector<4x64xf32>
    %1378 = math.exp %1377 : vector<4x64xf32>
    %cst_613 = arith.constant 1.000000e+00 : f32
    %1379 = vector.broadcast %cst_613 : f32 to vector<4x64xf32>
    %1380 = arith.addf %1379, %1378 : vector<4x64xf32>
    %1381 = arith.divf %1379, %1380 : vector<4x64xf32>
    %1382 = vector.extract_strided_slice %1370 {offsets = [0, 128], sizes = [4, 64], strides = [1, 1]} : vector<4x384xf32> to vector<4x64xf32>
    %1383 = vector.extract_strided_slice %1373 {offsets = [0, 128], sizes = [4, 64], strides = [1, 1]} : vector<4x384xf32> to vector<4x64xf32>
    %1384 = arith.addf %1382, %1383 : vector<4x64xf32>
    %1385 = arith.negf %1384 : vector<4x64xf32>
    %1386 = math.exp %1385 : vector<4x64xf32>
    %cst_614 = arith.constant 1.000000e+00 : f32
    %1387 = vector.broadcast %cst_614 : f32 to vector<4x64xf32>
    %1388 = arith.addf %1387, %1386 : vector<4x64xf32>
    %1389 = arith.divf %1387, %1388 : vector<4x64xf32>
    %1390 = vector.extract_strided_slice %1370 {offsets = [0, 256], sizes = [4, 64], strides = [1, 1]} : vector<4x384xf32> to vector<4x64xf32>
    %1391 = vector.extract_strided_slice %1373 {offsets = [0, 256], sizes = [4, 64], strides = [1, 1]} : vector<4x384xf32> to vector<4x64xf32>
    %1392 = arith.mulf %1381, %1391 : vector<4x64xf32>
    %1393 = arith.addf %1390, %1392 : vector<4x64xf32>
    %1394 = math.tanh %1393 : vector<4x64xf32>
    %cst_615 = arith.constant 1.000000e+00 : f32
    %1395 = vector.broadcast %cst_615 : f32 to vector<4x64xf32>
    %1396 = arith.subf %1395, %1389 : vector<4x64xf32>
    %1397 = arith.mulf %1396, %1394 : vector<4x64xf32>
    %1398 = arith.mulf %1389, %1325 : vector<4x64xf32>
    %1399 = arith.addf %1397, %1398 : vector<4x64xf32>
    %c1_616 = arith.constant 1 : index
    %c0_617 = arith.constant 0 : index
    %c0_618 = arith.constant 0 : index
    %1400 = vector.load %arg1[%c1_616, %c0_617, %c0_618] : memref<7x4x16xf32, #tpu.memory_space<vmem>>, vector<1x4x16xf32>
    %1401 = vector.shape_cast %1400 : vector<1x4x16xf32> to vector<4x16xf32>
    %c0_619 = arith.constant 0 : index
    %c0_620 = arith.constant 0 : index
    %1402 = vector.load %arg10[%c0_619, %c0_620] : memref<16x384xf32, #tpu.memory_space<vmem>>, vector<16x384xf32>
    %c0_621 = arith.constant 0 : index
    %c0_622 = arith.constant 0 : index
    %1403 = vector.load %arg11[%c0_621, %c0_622] : memref<64x384xf32, #tpu.memory_space<vmem>>, vector<64x384xf32>
    %c0_623 = arith.constant 0 : index
    %c0_624 = arith.constant 0 : index
    %1404 = vector.load %arg12[%c0_623, %c0_624] : memref<1x384xf32, #tpu.memory_space<vmem>>, vector<1x384xf32>
    %c0_625 = arith.constant 0 : index
    %c0_626 = arith.constant 0 : index
    %1405 = vector.load %arg13[%c0_625, %c0_626] : memref<1x384xf32, #tpu.memory_space<vmem>>, vector<1x384xf32>
    %cst_627 = arith.constant dense<0.000000e+00> : vector<4x384xf32>
    %1406 = tpu.matmul %1401, %1402, %cst_627 {dimension_numbers = #tpu.dot_dimension_numbers<[1], [0], [0], [1], [0, 0, 1, 1], [], []>} : vector<4x16xf32>, vector<16x384xf32>, vector<4x384xf32> -> vector<4x384xf32>
    %1407 = vector.broadcast %1404 : vector<1x384xf32> to vector<4x384xf32>
    %1408 = arith.addf %1406, %1407 : vector<4x384xf32>
    %cst_628 = arith.constant dense<0.000000e+00> : vector<4x384xf32>
    %1409 = tpu.matmul %1363, %1403, %cst_628 {dimension_numbers = #tpu.dot_dimension_numbers<[1], [0], [0], [1], [0, 0, 1, 1], [], []>} : vector<4x64xf32>, vector<64x384xf32>, vector<4x384xf32> -> vector<4x384xf32>
    %1410 = vector.broadcast %1405 : vector<1x384xf32> to vector<4x384xf32>
    %1411 = arith.addf %1409, %1410 : vector<4x384xf32>
    %1412 = vector.extract_strided_slice %1408 {offsets = [0, 0], sizes = [4, 64], strides = [1, 1]} : vector<4x384xf32> to vector<4x64xf32>
    %1413 = vector.extract_strided_slice %1411 {offsets = [0, 0], sizes = [4, 64], strides = [1, 1]} : vector<4x384xf32> to vector<4x64xf32>
    %1414 = arith.addf %1412, %1413 : vector<4x64xf32>
    %1415 = arith.negf %1414 : vector<4x64xf32>
    %1416 = math.exp %1415 : vector<4x64xf32>
    %cst_629 = arith.constant 1.000000e+00 : f32
    %1417 = vector.broadcast %cst_629 : f32 to vector<4x64xf32>
    %1418 = arith.addf %1417, %1416 : vector<4x64xf32>
    %1419 = arith.divf %1417, %1418 : vector<4x64xf32>
    %1420 = vector.extract_strided_slice %1408 {offsets = [0, 128], sizes = [4, 64], strides = [1, 1]} : vector<4x384xf32> to vector<4x64xf32>
    %1421 = vector.extract_strided_slice %1411 {offsets = [0, 128], sizes = [4, 64], strides = [1, 1]} : vector<4x384xf32> to vector<4x64xf32>
    %1422 = arith.addf %1420, %1421 : vector<4x64xf32>
    %1423 = arith.negf %1422 : vector<4x64xf32>
    %1424 = math.exp %1423 : vector<4x64xf32>
    %cst_630 = arith.constant 1.000000e+00 : f32
    %1425 = vector.broadcast %cst_630 : f32 to vector<4x64xf32>
    %1426 = arith.addf %1425, %1424 : vector<4x64xf32>
    %1427 = arith.divf %1425, %1426 : vector<4x64xf32>
    %1428 = vector.extract_strided_slice %1408 {offsets = [0, 256], sizes = [4, 64], strides = [1, 1]} : vector<4x384xf32> to vector<4x64xf32>
    %1429 = vector.extract_strided_slice %1411 {offsets = [0, 256], sizes = [4, 64], strides = [1, 1]} : vector<4x384xf32> to vector<4x64xf32>
    %1430 = arith.mulf %1419, %1429 : vector<4x64xf32>
    %1431 = arith.addf %1428, %1430 : vector<4x64xf32>
    %1432 = math.tanh %1431 : vector<4x64xf32>
    %cst_631 = arith.constant 1.000000e+00 : f32
    %1433 = vector.broadcast %cst_631 : f32 to vector<4x64xf32>
    %1434 = arith.subf %1433, %1427 : vector<4x64xf32>
    %1435 = arith.mulf %1434, %1432 : vector<4x64xf32>
    %1436 = arith.mulf %1427, %1363 : vector<4x64xf32>
    %1437 = arith.addf %1435, %1436 : vector<4x64xf32>
    %c0_632 = arith.constant 0 : index
    %c0_633 = arith.constant 0 : index
    %1438 = vector.load %arg14[%c0_632, %c0_633] : memref<64x384xf32, #tpu.memory_space<vmem>>, vector<64x384xf32>
    %c0_634 = arith.constant 0 : index
    %c0_635 = arith.constant 0 : index
    %1439 = vector.load %arg15[%c0_634, %c0_635] : memref<64x384xf32, #tpu.memory_space<vmem>>, vector<64x384xf32>
    %c0_636 = arith.constant 0 : index
    %c0_637 = arith.constant 0 : index
    %1440 = vector.load %arg16[%c0_636, %c0_637] : memref<1x384xf32, #tpu.memory_space<vmem>>, vector<1x384xf32>
    %c0_638 = arith.constant 0 : index
    %c0_639 = arith.constant 0 : index
    %1441 = vector.load %arg17[%c0_638, %c0_639] : memref<1x384xf32, #tpu.memory_space<vmem>>, vector<1x384xf32>
    %cst_640 = arith.constant dense<0.000000e+00> : vector<4x384xf32>
    %1442 = tpu.matmul %1437, %1438, %cst_640 {dimension_numbers = #tpu.dot_dimension_numbers<[1], [0], [0], [1], [0, 0, 1, 1], [], []>} : vector<4x64xf32>, vector<64x384xf32>, vector<4x384xf32> -> vector<4x384xf32>
    %1443 = vector.broadcast %1440 : vector<1x384xf32> to vector<4x384xf32>
    %1444 = arith.addf %1442, %1443 : vector<4x384xf32>
    %cst_641 = arith.constant dense<0.000000e+00> : vector<4x384xf32>
    %1445 = tpu.matmul %1399, %1439, %cst_641 {dimension_numbers = #tpu.dot_dimension_numbers<[1], [0], [0], [1], [0, 0, 1, 1], [], []>} : vector<4x64xf32>, vector<64x384xf32>, vector<4x384xf32> -> vector<4x384xf32>
    %1446 = vector.broadcast %1441 : vector<1x384xf32> to vector<4x384xf32>
    %1447 = arith.addf %1445, %1446 : vector<4x384xf32>
    %1448 = vector.extract_strided_slice %1444 {offsets = [0, 0], sizes = [4, 64], strides = [1, 1]} : vector<4x384xf32> to vector<4x64xf32>
    %1449 = vector.extract_strided_slice %1447 {offsets = [0, 0], sizes = [4, 64], strides = [1, 1]} : vector<4x384xf32> to vector<4x64xf32>
    %1450 = arith.addf %1448, %1449 : vector<4x64xf32>
    %1451 = arith.negf %1450 : vector<4x64xf32>
    %1452 = math.exp %1451 : vector<4x64xf32>
    %cst_642 = arith.constant 1.000000e+00 : f32
    %1453 = vector.broadcast %cst_642 : f32 to vector<4x64xf32>
    %1454 = arith.addf %1453, %1452 : vector<4x64xf32>
    %1455 = arith.divf %1453, %1454 : vector<4x64xf32>
    %1456 = vector.extract_strided_slice %1444 {offsets = [0, 128], sizes = [4, 64], strides = [1, 1]} : vector<4x384xf32> to vector<4x64xf32>
    %1457 = vector.extract_strided_slice %1447 {offsets = [0, 128], sizes = [4, 64], strides = [1, 1]} : vector<4x384xf32> to vector<4x64xf32>
    %1458 = arith.addf %1456, %1457 : vector<4x64xf32>
    %1459 = arith.negf %1458 : vector<4x64xf32>
    %1460 = math.exp %1459 : vector<4x64xf32>
    %cst_643 = arith.constant 1.000000e+00 : f32
    %1461 = vector.broadcast %cst_643 : f32 to vector<4x64xf32>
    %1462 = arith.addf %1461, %1460 : vector<4x64xf32>
    %1463 = arith.divf %1461, %1462 : vector<4x64xf32>
    %1464 = vector.extract_strided_slice %1444 {offsets = [0, 256], sizes = [4, 64], strides = [1, 1]} : vector<4x384xf32> to vector<4x64xf32>
    %1465 = vector.extract_strided_slice %1447 {offsets = [0, 256], sizes = [4, 64], strides = [1, 1]} : vector<4x384xf32> to vector<4x64xf32>
    %1466 = arith.mulf %1455, %1465 : vector<4x64xf32>
    %1467 = arith.addf %1464, %1466 : vector<4x64xf32>
    %1468 = math.tanh %1467 : vector<4x64xf32>
    %cst_644 = arith.constant 1.000000e+00 : f32
    %1469 = vector.broadcast %cst_644 : f32 to vector<4x64xf32>
    %1470 = arith.subf %1469, %1463 : vector<4x64xf32>
    %1471 = arith.mulf %1470, %1468 : vector<4x64xf32>
    %1472 = arith.mulf %1463, %1399 : vector<4x64xf32>
    %1473 = arith.addf %1471, %1472 : vector<4x64xf32>
    %c2_645 = arith.constant 2 : index
    %c0_646 = arith.constant 0 : index
    %c0_647 = arith.constant 0 : index
    %1474 = vector.load %arg1[%c2_645, %c0_646, %c0_647] : memref<7x4x16xf32, #tpu.memory_space<vmem>>, vector<1x4x16xf32>
    %1475 = vector.shape_cast %1474 : vector<1x4x16xf32> to vector<4x16xf32>
    %c0_648 = arith.constant 0 : index
    %c0_649 = arith.constant 0 : index
    %1476 = vector.load %arg10[%c0_648, %c0_649] : memref<16x384xf32, #tpu.memory_space<vmem>>, vector<16x384xf32>
    %c0_650 = arith.constant 0 : index
    %c0_651 = arith.constant 0 : index
    %1477 = vector.load %arg11[%c0_650, %c0_651] : memref<64x384xf32, #tpu.memory_space<vmem>>, vector<64x384xf32>
    %c0_652 = arith.constant 0 : index
    %c0_653 = arith.constant 0 : index
    %1478 = vector.load %arg12[%c0_652, %c0_653] : memref<1x384xf32, #tpu.memory_space<vmem>>, vector<1x384xf32>
    %c0_654 = arith.constant 0 : index
    %c0_655 = arith.constant 0 : index
    %1479 = vector.load %arg13[%c0_654, %c0_655] : memref<1x384xf32, #tpu.memory_space<vmem>>, vector<1x384xf32>
    %cst_656 = arith.constant dense<0.000000e+00> : vector<4x384xf32>
    %1480 = tpu.matmul %1475, %1476, %cst_656 {dimension_numbers = #tpu.dot_dimension_numbers<[1], [0], [0], [1], [0, 0, 1, 1], [], []>} : vector<4x16xf32>, vector<16x384xf32>, vector<4x384xf32> -> vector<4x384xf32>
    %1481 = vector.broadcast %1478 : vector<1x384xf32> to vector<4x384xf32>
    %1482 = arith.addf %1480, %1481 : vector<4x384xf32>
    %cst_657 = arith.constant dense<0.000000e+00> : vector<4x384xf32>
    %1483 = tpu.matmul %1437, %1477, %cst_657 {dimension_numbers = #tpu.dot_dimension_numbers<[1], [0], [0], [1], [0, 0, 1, 1], [], []>} : vector<4x64xf32>, vector<64x384xf32>, vector<4x384xf32> -> vector<4x384xf32>
    %1484 = vector.broadcast %1479 : vector<1x384xf32> to vector<4x384xf32>
    %1485 = arith.addf %1483, %1484 : vector<4x384xf32>
    %1486 = vector.extract_strided_slice %1482 {offsets = [0, 0], sizes = [4, 64], strides = [1, 1]} : vector<4x384xf32> to vector<4x64xf32>
    %1487 = vector.extract_strided_slice %1485 {offsets = [0, 0], sizes = [4, 64], strides = [1, 1]} : vector<4x384xf32> to vector<4x64xf32>
    %1488 = arith.addf %1486, %1487 : vector<4x64xf32>
    %1489 = arith.negf %1488 : vector<4x64xf32>
    %1490 = math.exp %1489 : vector<4x64xf32>
    %cst_658 = arith.constant 1.000000e+00 : f32
    %1491 = vector.broadcast %cst_658 : f32 to vector<4x64xf32>
    %1492 = arith.addf %1491, %1490 : vector<4x64xf32>
    %1493 = arith.divf %1491, %1492 : vector<4x64xf32>
    %1494 = vector.extract_strided_slice %1482 {offsets = [0, 128], sizes = [4, 64], strides = [1, 1]} : vector<4x384xf32> to vector<4x64xf32>
    %1495 = vector.extract_strided_slice %1485 {offsets = [0, 128], sizes = [4, 64], strides = [1, 1]} : vector<4x384xf32> to vector<4x64xf32>
    %1496 = arith.addf %1494, %1495 : vector<4x64xf32>
    %1497 = arith.negf %1496 : vector<4x64xf32>
    %1498 = math.exp %1497 : vector<4x64xf32>
    %cst_659 = arith.constant 1.000000e+00 : f32
    %1499 = vector.broadcast %cst_659 : f32 to vector<4x64xf32>
    %1500 = arith.addf %1499, %1498 : vector<4x64xf32>
    %1501 = arith.divf %1499, %1500 : vector<4x64xf32>
    %1502 = vector.extract_strided_slice %1482 {offsets = [0, 256], sizes = [4, 64], strides = [1, 1]} : vector<4x384xf32> to vector<4x64xf32>
    %1503 = vector.extract_strided_slice %1485 {offsets = [0, 256], sizes = [4, 64], strides = [1, 1]} : vector<4x384xf32> to vector<4x64xf32>
    %1504 = arith.mulf %1493, %1503 : vector<4x64xf32>
    %1505 = arith.addf %1502, %1504 : vector<4x64xf32>
    %1506 = math.tanh %1505 : vector<4x64xf32>
    %cst_660 = arith.constant 1.000000e+00 : f32
    %1507 = vector.broadcast %cst_660 : f32 to vector<4x64xf32>
    %1508 = arith.subf %1507, %1501 : vector<4x64xf32>
    %1509 = arith.mulf %1508, %1506 : vector<4x64xf32>
    %1510 = arith.mulf %1501, %1437 : vector<4x64xf32>
    %1511 = arith.addf %1509, %1510 : vector<4x64xf32>
    %c0_661 = arith.constant 0 : index
    %c0_662 = arith.constant 0 : index
    %1512 = vector.load %arg14[%c0_661, %c0_662] : memref<64x384xf32, #tpu.memory_space<vmem>>, vector<64x384xf32>
    %c0_663 = arith.constant 0 : index
    %c0_664 = arith.constant 0 : index
    %1513 = vector.load %arg15[%c0_663, %c0_664] : memref<64x384xf32, #tpu.memory_space<vmem>>, vector<64x384xf32>
    %c0_665 = arith.constant 0 : index
    %c0_666 = arith.constant 0 : index
    %1514 = vector.load %arg16[%c0_665, %c0_666] : memref<1x384xf32, #tpu.memory_space<vmem>>, vector<1x384xf32>
    %c0_667 = arith.constant 0 : index
    %c0_668 = arith.constant 0 : index
    %1515 = vector.load %arg17[%c0_667, %c0_668] : memref<1x384xf32, #tpu.memory_space<vmem>>, vector<1x384xf32>
    %cst_669 = arith.constant dense<0.000000e+00> : vector<4x384xf32>
    %1516 = tpu.matmul %1511, %1512, %cst_669 {dimension_numbers = #tpu.dot_dimension_numbers<[1], [0], [0], [1], [0, 0, 1, 1], [], []>} : vector<4x64xf32>, vector<64x384xf32>, vector<4x384xf32> -> vector<4x384xf32>
    %1517 = vector.broadcast %1514 : vector<1x384xf32> to vector<4x384xf32>
    %1518 = arith.addf %1516, %1517 : vector<4x384xf32>
    %cst_670 = arith.constant dense<0.000000e+00> : vector<4x384xf32>
    %1519 = tpu.matmul %1473, %1513, %cst_670 {dimension_numbers = #tpu.dot_dimension_numbers<[1], [0], [0], [1], [0, 0, 1, 1], [], []>} : vector<4x64xf32>, vector<64x384xf32>, vector<4x384xf32> -> vector<4x384xf32>
    %1520 = vector.broadcast %1515 : vector<1x384xf32> to vector<4x384xf32>
    %1521 = arith.addf %1519, %1520 : vector<4x384xf32>
    %1522 = vector.extract_strided_slice %1518 {offsets = [0, 0], sizes = [4, 64], strides = [1, 1]} : vector<4x384xf32> to vector<4x64xf32>
    %1523 = vector.extract_strided_slice %1521 {offsets = [0, 0], sizes = [4, 64], strides = [1, 1]} : vector<4x384xf32> to vector<4x64xf32>
    %1524 = arith.addf %1522, %1523 : vector<4x64xf32>
    %1525 = arith.negf %1524 : vector<4x64xf32>
    %1526 = math.exp %1525 : vector<4x64xf32>
    %cst_671 = arith.constant 1.000000e+00 : f32
    %1527 = vector.broadcast %cst_671 : f32 to vector<4x64xf32>
    %1528 = arith.addf %1527, %1526 : vector<4x64xf32>
    %1529 = arith.divf %1527, %1528 : vector<4x64xf32>
    %1530 = vector.extract_strided_slice %1518 {offsets = [0, 128], sizes = [4, 64], strides = [1, 1]} : vector<4x384xf32> to vector<4x64xf32>
    %1531 = vector.extract_strided_slice %1521 {offsets = [0, 128], sizes = [4, 64], strides = [1, 1]} : vector<4x384xf32> to vector<4x64xf32>
    %1532 = arith.addf %1530, %1531 : vector<4x64xf32>
    %1533 = arith.negf %1532 : vector<4x64xf32>
    %1534 = math.exp %1533 : vector<4x64xf32>
    %cst_672 = arith.constant 1.000000e+00 : f32
    %1535 = vector.broadcast %cst_672 : f32 to vector<4x64xf32>
    %1536 = arith.addf %1535, %1534 : vector<4x64xf32>
    %1537 = arith.divf %1535, %1536 : vector<4x64xf32>
    %1538 = vector.extract_strided_slice %1518 {offsets = [0, 256], sizes = [4, 64], strides = [1, 1]} : vector<4x384xf32> to vector<4x64xf32>
    %1539 = vector.extract_strided_slice %1521 {offsets = [0, 256], sizes = [4, 64], strides = [1, 1]} : vector<4x384xf32> to vector<4x64xf32>
    %1540 = arith.mulf %1529, %1539 : vector<4x64xf32>
    %1541 = arith.addf %1538, %1540 : vector<4x64xf32>
    %1542 = math.tanh %1541 : vector<4x64xf32>
    %cst_673 = arith.constant 1.000000e+00 : f32
    %1543 = vector.broadcast %cst_673 : f32 to vector<4x64xf32>
    %1544 = arith.subf %1543, %1537 : vector<4x64xf32>
    %1545 = arith.mulf %1544, %1542 : vector<4x64xf32>
    %1546 = arith.mulf %1537, %1473 : vector<4x64xf32>
    %1547 = arith.addf %1545, %1546 : vector<4x64xf32>
    %c3_674 = arith.constant 3 : index
    %c0_675 = arith.constant 0 : index
    %c0_676 = arith.constant 0 : index
    %1548 = vector.load %arg1[%c3_674, %c0_675, %c0_676] : memref<7x4x16xf32, #tpu.memory_space<vmem>>, vector<1x4x16xf32>
    %1549 = vector.shape_cast %1548 : vector<1x4x16xf32> to vector<4x16xf32>
    %c0_677 = arith.constant 0 : index
    %c0_678 = arith.constant 0 : index
    %1550 = vector.load %arg10[%c0_677, %c0_678] : memref<16x384xf32, #tpu.memory_space<vmem>>, vector<16x384xf32>
    %c0_679 = arith.constant 0 : index
    %c0_680 = arith.constant 0 : index
    %1551 = vector.load %arg11[%c0_679, %c0_680] : memref<64x384xf32, #tpu.memory_space<vmem>>, vector<64x384xf32>
    %c0_681 = arith.constant 0 : index
    %c0_682 = arith.constant 0 : index
    %1552 = vector.load %arg12[%c0_681, %c0_682] : memref<1x384xf32, #tpu.memory_space<vmem>>, vector<1x384xf32>
    %c0_683 = arith.constant 0 : index
    %c0_684 = arith.constant 0 : index
    %1553 = vector.load %arg13[%c0_683, %c0_684] : memref<1x384xf32, #tpu.memory_space<vmem>>, vector<1x384xf32>
    %cst_685 = arith.constant dense<0.000000e+00> : vector<4x384xf32>
    %1554 = tpu.matmul %1549, %1550, %cst_685 {dimension_numbers = #tpu.dot_dimension_numbers<[1], [0], [0], [1], [0, 0, 1, 1], [], []>} : vector<4x16xf32>, vector<16x384xf32>, vector<4x384xf32> -> vector<4x384xf32>
    %1555 = vector.broadcast %1552 : vector<1x384xf32> to vector<4x384xf32>
    %1556 = arith.addf %1554, %1555 : vector<4x384xf32>
    %cst_686 = arith.constant dense<0.000000e+00> : vector<4x384xf32>
    %1557 = tpu.matmul %1511, %1551, %cst_686 {dimension_numbers = #tpu.dot_dimension_numbers<[1], [0], [0], [1], [0, 0, 1, 1], [], []>} : vector<4x64xf32>, vector<64x384xf32>, vector<4x384xf32> -> vector<4x384xf32>
    %1558 = vector.broadcast %1553 : vector<1x384xf32> to vector<4x384xf32>
    %1559 = arith.addf %1557, %1558 : vector<4x384xf32>
    %1560 = vector.extract_strided_slice %1556 {offsets = [0, 0], sizes = [4, 64], strides = [1, 1]} : vector<4x384xf32> to vector<4x64xf32>
    %1561 = vector.extract_strided_slice %1559 {offsets = [0, 0], sizes = [4, 64], strides = [1, 1]} : vector<4x384xf32> to vector<4x64xf32>
    %1562 = arith.addf %1560, %1561 : vector<4x64xf32>
    %1563 = arith.negf %1562 : vector<4x64xf32>
    %1564 = math.exp %1563 : vector<4x64xf32>
    %cst_687 = arith.constant 1.000000e+00 : f32
    %1565 = vector.broadcast %cst_687 : f32 to vector<4x64xf32>
    %1566 = arith.addf %1565, %1564 : vector<4x64xf32>
    %1567 = arith.divf %1565, %1566 : vector<4x64xf32>
    %1568 = vector.extract_strided_slice %1556 {offsets = [0, 128], sizes = [4, 64], strides = [1, 1]} : vector<4x384xf32> to vector<4x64xf32>
    %1569 = vector.extract_strided_slice %1559 {offsets = [0, 128], sizes = [4, 64], strides = [1, 1]} : vector<4x384xf32> to vector<4x64xf32>
    %1570 = arith.addf %1568, %1569 : vector<4x64xf32>
    %1571 = arith.negf %1570 : vector<4x64xf32>
    %1572 = math.exp %1571 : vector<4x64xf32>
    %cst_688 = arith.constant 1.000000e+00 : f32
    %1573 = vector.broadcast %cst_688 : f32 to vector<4x64xf32>
    %1574 = arith.addf %1573, %1572 : vector<4x64xf32>
    %1575 = arith.divf %1573, %1574 : vector<4x64xf32>
    %1576 = vector.extract_strided_slice %1556 {offsets = [0, 256], sizes = [4, 64], strides = [1, 1]} : vector<4x384xf32> to vector<4x64xf32>
    %1577 = vector.extract_strided_slice %1559 {offsets = [0, 256], sizes = [4, 64], strides = [1, 1]} : vector<4x384xf32> to vector<4x64xf32>
    %1578 = arith.mulf %1567, %1577 : vector<4x64xf32>
    %1579 = arith.addf %1576, %1578 : vector<4x64xf32>
    %1580 = math.tanh %1579 : vector<4x64xf32>
    %cst_689 = arith.constant 1.000000e+00 : f32
    %1581 = vector.broadcast %cst_689 : f32 to vector<4x64xf32>
    %1582 = arith.subf %1581, %1575 : vector<4x64xf32>
    %1583 = arith.mulf %1582, %1580 : vector<4x64xf32>
    %1584 = arith.mulf %1575, %1511 : vector<4x64xf32>
    %1585 = arith.addf %1583, %1584 : vector<4x64xf32>
    %c0_690 = arith.constant 0 : index
    %c0_691 = arith.constant 0 : index
    %1586 = vector.load %arg14[%c0_690, %c0_691] : memref<64x384xf32, #tpu.memory_space<vmem>>, vector<64x384xf32>
    %c0_692 = arith.constant 0 : index
    %c0_693 = arith.constant 0 : index
    %1587 = vector.load %arg15[%c0_692, %c0_693] : memref<64x384xf32, #tpu.memory_space<vmem>>, vector<64x384xf32>
    %c0_694 = arith.constant 0 : index
    %c0_695 = arith.constant 0 : index
    %1588 = vector.load %arg16[%c0_694, %c0_695] : memref<1x384xf32, #tpu.memory_space<vmem>>, vector<1x384xf32>
    %c0_696 = arith.constant 0 : index
    %c0_697 = arith.constant 0 : index
    %1589 = vector.load %arg17[%c0_696, %c0_697] : memref<1x384xf32, #tpu.memory_space<vmem>>, vector<1x384xf32>
    %cst_698 = arith.constant dense<0.000000e+00> : vector<4x384xf32>
    %1590 = tpu.matmul %1585, %1586, %cst_698 {dimension_numbers = #tpu.dot_dimension_numbers<[1], [0], [0], [1], [0, 0, 1, 1], [], []>} : vector<4x64xf32>, vector<64x384xf32>, vector<4x384xf32> -> vector<4x384xf32>
    %1591 = vector.broadcast %1588 : vector<1x384xf32> to vector<4x384xf32>
    %1592 = arith.addf %1590, %1591 : vector<4x384xf32>
    %cst_699 = arith.constant dense<0.000000e+00> : vector<4x384xf32>
    %1593 = tpu.matmul %1547, %1587, %cst_699 {dimension_numbers = #tpu.dot_dimension_numbers<[1], [0], [0], [1], [0, 0, 1, 1], [], []>} : vector<4x64xf32>, vector<64x384xf32>, vector<4x384xf32> -> vector<4x384xf32>
    %1594 = vector.broadcast %1589 : vector<1x384xf32> to vector<4x384xf32>
    %1595 = arith.addf %1593, %1594 : vector<4x384xf32>
    %1596 = vector.extract_strided_slice %1592 {offsets = [0, 0], sizes = [4, 64], strides = [1, 1]} : vector<4x384xf32> to vector<4x64xf32>
    %1597 = vector.extract_strided_slice %1595 {offsets = [0, 0], sizes = [4, 64], strides = [1, 1]} : vector<4x384xf32> to vector<4x64xf32>
    %1598 = arith.addf %1596, %1597 : vector<4x64xf32>
    %1599 = arith.negf %1598 : vector<4x64xf32>
    %1600 = math.exp %1599 : vector<4x64xf32>
    %cst_700 = arith.constant 1.000000e+00 : f32
    %1601 = vector.broadcast %cst_700 : f32 to vector<4x64xf32>
    %1602 = arith.addf %1601, %1600 : vector<4x64xf32>
    %1603 = arith.divf %1601, %1602 : vector<4x64xf32>
    %1604 = vector.extract_strided_slice %1592 {offsets = [0, 128], sizes = [4, 64], strides = [1, 1]} : vector<4x384xf32> to vector<4x64xf32>
    %1605 = vector.extract_strided_slice %1595 {offsets = [0, 128], sizes = [4, 64], strides = [1, 1]} : vector<4x384xf32> to vector<4x64xf32>
    %1606 = arith.addf %1604, %1605 : vector<4x64xf32>
    %1607 = arith.negf %1606 : vector<4x64xf32>
    %1608 = math.exp %1607 : vector<4x64xf32>
    %cst_701 = arith.constant 1.000000e+00 : f32
    %1609 = vector.broadcast %cst_701 : f32 to vector<4x64xf32>
    %1610 = arith.addf %1609, %1608 : vector<4x64xf32>
    %1611 = arith.divf %1609, %1610 : vector<4x64xf32>
    %1612 = vector.extract_strided_slice %1592 {offsets = [0, 256], sizes = [4, 64], strides = [1, 1]} : vector<4x384xf32> to vector<4x64xf32>
    %1613 = vector.extract_strided_slice %1595 {offsets = [0, 256], sizes = [4, 64], strides = [1, 1]} : vector<4x384xf32> to vector<4x64xf32>
    %1614 = arith.mulf %1603, %1613 : vector<4x64xf32>
    %1615 = arith.addf %1612, %1614 : vector<4x64xf32>
    %1616 = math.tanh %1615 : vector<4x64xf32>
    %cst_702 = arith.constant 1.000000e+00 : f32
    %1617 = vector.broadcast %cst_702 : f32 to vector<4x64xf32>
    %1618 = arith.subf %1617, %1611 : vector<4x64xf32>
    %1619 = arith.mulf %1618, %1616 : vector<4x64xf32>
    %1620 = arith.mulf %1611, %1547 : vector<4x64xf32>
    %1621 = arith.addf %1619, %1620 : vector<4x64xf32>
    %c4_703 = arith.constant 4 : index
    %c0_704 = arith.constant 0 : index
    %c0_705 = arith.constant 0 : index
    %1622 = vector.load %arg1[%c4_703, %c0_704, %c0_705] : memref<7x4x16xf32, #tpu.memory_space<vmem>>, vector<1x4x16xf32>
    %1623 = vector.shape_cast %1622 : vector<1x4x16xf32> to vector<4x16xf32>
    %c0_706 = arith.constant 0 : index
    %c0_707 = arith.constant 0 : index
    %1624 = vector.load %arg10[%c0_706, %c0_707] : memref<16x384xf32, #tpu.memory_space<vmem>>, vector<16x384xf32>
    %c0_708 = arith.constant 0 : index
    %c0_709 = arith.constant 0 : index
    %1625 = vector.load %arg11[%c0_708, %c0_709] : memref<64x384xf32, #tpu.memory_space<vmem>>, vector<64x384xf32>
    %c0_710 = arith.constant 0 : index
    %c0_711 = arith.constant 0 : index
    %1626 = vector.load %arg12[%c0_710, %c0_711] : memref<1x384xf32, #tpu.memory_space<vmem>>, vector<1x384xf32>
    %c0_712 = arith.constant 0 : index
    %c0_713 = arith.constant 0 : index
    %1627 = vector.load %arg13[%c0_712, %c0_713] : memref<1x384xf32, #tpu.memory_space<vmem>>, vector<1x384xf32>
    %cst_714 = arith.constant dense<0.000000e+00> : vector<4x384xf32>
    %1628 = tpu.matmul %1623, %1624, %cst_714 {dimension_numbers = #tpu.dot_dimension_numbers<[1], [0], [0], [1], [0, 0, 1, 1], [], []>} : vector<4x16xf32>, vector<16x384xf32>, vector<4x384xf32> -> vector<4x384xf32>
    %1629 = vector.broadcast %1626 : vector<1x384xf32> to vector<4x384xf32>
    %1630 = arith.addf %1628, %1629 : vector<4x384xf32>
    %cst_715 = arith.constant dense<0.000000e+00> : vector<4x384xf32>
    %1631 = tpu.matmul %1585, %1625, %cst_715 {dimension_numbers = #tpu.dot_dimension_numbers<[1], [0], [0], [1], [0, 0, 1, 1], [], []>} : vector<4x64xf32>, vector<64x384xf32>, vector<4x384xf32> -> vector<4x384xf32>
    %1632 = vector.broadcast %1627 : vector<1x384xf32> to vector<4x384xf32>
    %1633 = arith.addf %1631, %1632 : vector<4x384xf32>
    %1634 = vector.extract_strided_slice %1630 {offsets = [0, 0], sizes = [4, 64], strides = [1, 1]} : vector<4x384xf32> to vector<4x64xf32>
    %1635 = vector.extract_strided_slice %1633 {offsets = [0, 0], sizes = [4, 64], strides = [1, 1]} : vector<4x384xf32> to vector<4x64xf32>
    %1636 = arith.addf %1634, %1635 : vector<4x64xf32>
    %1637 = arith.negf %1636 : vector<4x64xf32>
    %1638 = math.exp %1637 : vector<4x64xf32>
    %cst_716 = arith.constant 1.000000e+00 : f32
    %1639 = vector.broadcast %cst_716 : f32 to vector<4x64xf32>
    %1640 = arith.addf %1639, %1638 : vector<4x64xf32>
    %1641 = arith.divf %1639, %1640 : vector<4x64xf32>
    %1642 = vector.extract_strided_slice %1630 {offsets = [0, 128], sizes = [4, 64], strides = [1, 1]} : vector<4x384xf32> to vector<4x64xf32>
    %1643 = vector.extract_strided_slice %1633 {offsets = [0, 128], sizes = [4, 64], strides = [1, 1]} : vector<4x384xf32> to vector<4x64xf32>
    %1644 = arith.addf %1642, %1643 : vector<4x64xf32>
    %1645 = arith.negf %1644 : vector<4x64xf32>
    %1646 = math.exp %1645 : vector<4x64xf32>
    %cst_717 = arith.constant 1.000000e+00 : f32
    %1647 = vector.broadcast %cst_717 : f32 to vector<4x64xf32>
    %1648 = arith.addf %1647, %1646 : vector<4x64xf32>
    %1649 = arith.divf %1647, %1648 : vector<4x64xf32>
    %1650 = vector.extract_strided_slice %1630 {offsets = [0, 256], sizes = [4, 64], strides = [1, 1]} : vector<4x384xf32> to vector<4x64xf32>
    %1651 = vector.extract_strided_slice %1633 {offsets = [0, 256], sizes = [4, 64], strides = [1, 1]} : vector<4x384xf32> to vector<4x64xf32>
    %1652 = arith.mulf %1641, %1651 : vector<4x64xf32>
    %1653 = arith.addf %1650, %1652 : vector<4x64xf32>
    %1654 = math.tanh %1653 : vector<4x64xf32>
    %cst_718 = arith.constant 1.000000e+00 : f32
    %1655 = vector.broadcast %cst_718 : f32 to vector<4x64xf32>
    %1656 = arith.subf %1655, %1649 : vector<4x64xf32>
    %1657 = arith.mulf %1656, %1654 : vector<4x64xf32>
    %1658 = arith.mulf %1649, %1585 : vector<4x64xf32>
    %1659 = arith.addf %1657, %1658 : vector<4x64xf32>
    %c0_719 = arith.constant 0 : index
    %c0_720 = arith.constant 0 : index
    %1660 = vector.load %arg14[%c0_719, %c0_720] : memref<64x384xf32, #tpu.memory_space<vmem>>, vector<64x384xf32>
    %c0_721 = arith.constant 0 : index
    %c0_722 = arith.constant 0 : index
    %1661 = vector.load %arg15[%c0_721, %c0_722] : memref<64x384xf32, #tpu.memory_space<vmem>>, vector<64x384xf32>
    %c0_723 = arith.constant 0 : index
    %c0_724 = arith.constant 0 : index
    %1662 = vector.load %arg16[%c0_723, %c0_724] : memref<1x384xf32, #tpu.memory_space<vmem>>, vector<1x384xf32>
    %c0_725 = arith.constant 0 : index
    %c0_726 = arith.constant 0 : index
    %1663 = vector.load %arg17[%c0_725, %c0_726] : memref<1x384xf32, #tpu.memory_space<vmem>>, vector<1x384xf32>
    %cst_727 = arith.constant dense<0.000000e+00> : vector<4x384xf32>
    %1664 = tpu.matmul %1659, %1660, %cst_727 {dimension_numbers = #tpu.dot_dimension_numbers<[1], [0], [0], [1], [0, 0, 1, 1], [], []>} : vector<4x64xf32>, vector<64x384xf32>, vector<4x384xf32> -> vector<4x384xf32>
    %1665 = vector.broadcast %1662 : vector<1x384xf32> to vector<4x384xf32>
    %1666 = arith.addf %1664, %1665 : vector<4x384xf32>
    %cst_728 = arith.constant dense<0.000000e+00> : vector<4x384xf32>
    %1667 = tpu.matmul %1621, %1661, %cst_728 {dimension_numbers = #tpu.dot_dimension_numbers<[1], [0], [0], [1], [0, 0, 1, 1], [], []>} : vector<4x64xf32>, vector<64x384xf32>, vector<4x384xf32> -> vector<4x384xf32>
    %1668 = vector.broadcast %1663 : vector<1x384xf32> to vector<4x384xf32>
    %1669 = arith.addf %1667, %1668 : vector<4x384xf32>
    %1670 = vector.extract_strided_slice %1666 {offsets = [0, 0], sizes = [4, 64], strides = [1, 1]} : vector<4x384xf32> to vector<4x64xf32>
    %1671 = vector.extract_strided_slice %1669 {offsets = [0, 0], sizes = [4, 64], strides = [1, 1]} : vector<4x384xf32> to vector<4x64xf32>
    %1672 = arith.addf %1670, %1671 : vector<4x64xf32>
    %1673 = arith.negf %1672 : vector<4x64xf32>
    %1674 = math.exp %1673 : vector<4x64xf32>
    %cst_729 = arith.constant 1.000000e+00 : f32
    %1675 = vector.broadcast %cst_729 : f32 to vector<4x64xf32>
    %1676 = arith.addf %1675, %1674 : vector<4x64xf32>
    %1677 = arith.divf %1675, %1676 : vector<4x64xf32>
    %1678 = vector.extract_strided_slice %1666 {offsets = [0, 128], sizes = [4, 64], strides = [1, 1]} : vector<4x384xf32> to vector<4x64xf32>
    %1679 = vector.extract_strided_slice %1669 {offsets = [0, 128], sizes = [4, 64], strides = [1, 1]} : vector<4x384xf32> to vector<4x64xf32>
    %1680 = arith.addf %1678, %1679 : vector<4x64xf32>
    %1681 = arith.negf %1680 : vector<4x64xf32>
    %1682 = math.exp %1681 : vector<4x64xf32>
    %cst_730 = arith.constant 1.000000e+00 : f32
    %1683 = vector.broadcast %cst_730 : f32 to vector<4x64xf32>
    %1684 = arith.addf %1683, %1682 : vector<4x64xf32>
    %1685 = arith.divf %1683, %1684 : vector<4x64xf32>
    %1686 = vector.extract_strided_slice %1666 {offsets = [0, 256], sizes = [4, 64], strides = [1, 1]} : vector<4x384xf32> to vector<4x64xf32>
    %1687 = vector.extract_strided_slice %1669 {offsets = [0, 256], sizes = [4, 64], strides = [1, 1]} : vector<4x384xf32> to vector<4x64xf32>
    %1688 = arith.mulf %1677, %1687 : vector<4x64xf32>
    %1689 = arith.addf %1686, %1688 : vector<4x64xf32>
    %1690 = math.tanh %1689 : vector<4x64xf32>
    %cst_731 = arith.constant 1.000000e+00 : f32
    %1691 = vector.broadcast %cst_731 : f32 to vector<4x64xf32>
    %1692 = arith.subf %1691, %1685 : vector<4x64xf32>
    %1693 = arith.mulf %1692, %1690 : vector<4x64xf32>
    %1694 = arith.mulf %1685, %1621 : vector<4x64xf32>
    %1695 = arith.addf %1693, %1694 : vector<4x64xf32>
    %c5_732 = arith.constant 5 : index
    %c0_733 = arith.constant 0 : index
    %c0_734 = arith.constant 0 : index
    %1696 = vector.load %arg1[%c5_732, %c0_733, %c0_734] : memref<7x4x16xf32, #tpu.memory_space<vmem>>, vector<1x4x16xf32>
    %1697 = vector.shape_cast %1696 : vector<1x4x16xf32> to vector<4x16xf32>
    %c0_735 = arith.constant 0 : index
    %c0_736 = arith.constant 0 : index
    %1698 = vector.load %arg10[%c0_735, %c0_736] : memref<16x384xf32, #tpu.memory_space<vmem>>, vector<16x384xf32>
    %c0_737 = arith.constant 0 : index
    %c0_738 = arith.constant 0 : index
    %1699 = vector.load %arg11[%c0_737, %c0_738] : memref<64x384xf32, #tpu.memory_space<vmem>>, vector<64x384xf32>
    %c0_739 = arith.constant 0 : index
    %c0_740 = arith.constant 0 : index
    %1700 = vector.load %arg12[%c0_739, %c0_740] : memref<1x384xf32, #tpu.memory_space<vmem>>, vector<1x384xf32>
    %c0_741 = arith.constant 0 : index
    %c0_742 = arith.constant 0 : index
    %1701 = vector.load %arg13[%c0_741, %c0_742] : memref<1x384xf32, #tpu.memory_space<vmem>>, vector<1x384xf32>
    %cst_743 = arith.constant dense<0.000000e+00> : vector<4x384xf32>
    %1702 = tpu.matmul %1697, %1698, %cst_743 {dimension_numbers = #tpu.dot_dimension_numbers<[1], [0], [0], [1], [0, 0, 1, 1], [], []>} : vector<4x16xf32>, vector<16x384xf32>, vector<4x384xf32> -> vector<4x384xf32>
    %1703 = vector.broadcast %1700 : vector<1x384xf32> to vector<4x384xf32>
    %1704 = arith.addf %1702, %1703 : vector<4x384xf32>
    %cst_744 = arith.constant dense<0.000000e+00> : vector<4x384xf32>
    %1705 = tpu.matmul %1659, %1699, %cst_744 {dimension_numbers = #tpu.dot_dimension_numbers<[1], [0], [0], [1], [0, 0, 1, 1], [], []>} : vector<4x64xf32>, vector<64x384xf32>, vector<4x384xf32> -> vector<4x384xf32>
    %1706 = vector.broadcast %1701 : vector<1x384xf32> to vector<4x384xf32>
    %1707 = arith.addf %1705, %1706 : vector<4x384xf32>
    %1708 = vector.extract_strided_slice %1704 {offsets = [0, 0], sizes = [4, 64], strides = [1, 1]} : vector<4x384xf32> to vector<4x64xf32>
    %1709 = vector.extract_strided_slice %1707 {offsets = [0, 0], sizes = [4, 64], strides = [1, 1]} : vector<4x384xf32> to vector<4x64xf32>
    %1710 = arith.addf %1708, %1709 : vector<4x64xf32>
    %1711 = arith.negf %1710 : vector<4x64xf32>
    %1712 = math.exp %1711 : vector<4x64xf32>
    %cst_745 = arith.constant 1.000000e+00 : f32
    %1713 = vector.broadcast %cst_745 : f32 to vector<4x64xf32>
    %1714 = arith.addf %1713, %1712 : vector<4x64xf32>
    %1715 = arith.divf %1713, %1714 : vector<4x64xf32>
    %1716 = vector.extract_strided_slice %1704 {offsets = [0, 128], sizes = [4, 64], strides = [1, 1]} : vector<4x384xf32> to vector<4x64xf32>
    %1717 = vector.extract_strided_slice %1707 {offsets = [0, 128], sizes = [4, 64], strides = [1, 1]} : vector<4x384xf32> to vector<4x64xf32>
    %1718 = arith.addf %1716, %1717 : vector<4x64xf32>
    %1719 = arith.negf %1718 : vector<4x64xf32>
    %1720 = math.exp %1719 : vector<4x64xf32>
    %cst_746 = arith.constant 1.000000e+00 : f32
    %1721 = vector.broadcast %cst_746 : f32 to vector<4x64xf32>
    %1722 = arith.addf %1721, %1720 : vector<4x64xf32>
    %1723 = arith.divf %1721, %1722 : vector<4x64xf32>
    %1724 = vector.extract_strided_slice %1704 {offsets = [0, 256], sizes = [4, 64], strides = [1, 1]} : vector<4x384xf32> to vector<4x64xf32>
    %1725 = vector.extract_strided_slice %1707 {offsets = [0, 256], sizes = [4, 64], strides = [1, 1]} : vector<4x384xf32> to vector<4x64xf32>
    %1726 = arith.mulf %1715, %1725 : vector<4x64xf32>
    %1727 = arith.addf %1724, %1726 : vector<4x64xf32>
    %1728 = math.tanh %1727 : vector<4x64xf32>
    %cst_747 = arith.constant 1.000000e+00 : f32
    %1729 = vector.broadcast %cst_747 : f32 to vector<4x64xf32>
    %1730 = arith.subf %1729, %1723 : vector<4x64xf32>
    %1731 = arith.mulf %1730, %1728 : vector<4x64xf32>
    %1732 = arith.mulf %1723, %1659 : vector<4x64xf32>
    %1733 = arith.addf %1731, %1732 : vector<4x64xf32>
    %c0_748 = arith.constant 0 : index
    %c0_749 = arith.constant 0 : index
    %1734 = vector.load %arg14[%c0_748, %c0_749] : memref<64x384xf32, #tpu.memory_space<vmem>>, vector<64x384xf32>
    %c0_750 = arith.constant 0 : index
    %c0_751 = arith.constant 0 : index
    %1735 = vector.load %arg15[%c0_750, %c0_751] : memref<64x384xf32, #tpu.memory_space<vmem>>, vector<64x384xf32>
    %c0_752 = arith.constant 0 : index
    %c0_753 = arith.constant 0 : index
    %1736 = vector.load %arg16[%c0_752, %c0_753] : memref<1x384xf32, #tpu.memory_space<vmem>>, vector<1x384xf32>
    %c0_754 = arith.constant 0 : index
    %c0_755 = arith.constant 0 : index
    %1737 = vector.load %arg17[%c0_754, %c0_755] : memref<1x384xf32, #tpu.memory_space<vmem>>, vector<1x384xf32>
    %cst_756 = arith.constant dense<0.000000e+00> : vector<4x384xf32>
    %1738 = tpu.matmul %1733, %1734, %cst_756 {dimension_numbers = #tpu.dot_dimension_numbers<[1], [0], [0], [1], [0, 0, 1, 1], [], []>} : vector<4x64xf32>, vector<64x384xf32>, vector<4x384xf32> -> vector<4x384xf32>
    %1739 = vector.broadcast %1736 : vector<1x384xf32> to vector<4x384xf32>
    %1740 = arith.addf %1738, %1739 : vector<4x384xf32>
    %cst_757 = arith.constant dense<0.000000e+00> : vector<4x384xf32>
    %1741 = tpu.matmul %1695, %1735, %cst_757 {dimension_numbers = #tpu.dot_dimension_numbers<[1], [0], [0], [1], [0, 0, 1, 1], [], []>} : vector<4x64xf32>, vector<64x384xf32>, vector<4x384xf32> -> vector<4x384xf32>
    %1742 = vector.broadcast %1737 : vector<1x384xf32> to vector<4x384xf32>
    %1743 = arith.addf %1741, %1742 : vector<4x384xf32>
    %1744 = vector.extract_strided_slice %1740 {offsets = [0, 0], sizes = [4, 64], strides = [1, 1]} : vector<4x384xf32> to vector<4x64xf32>
    %1745 = vector.extract_strided_slice %1743 {offsets = [0, 0], sizes = [4, 64], strides = [1, 1]} : vector<4x384xf32> to vector<4x64xf32>
    %1746 = arith.addf %1744, %1745 : vector<4x64xf32>
    %1747 = arith.negf %1746 : vector<4x64xf32>
    %1748 = math.exp %1747 : vector<4x64xf32>
    %cst_758 = arith.constant 1.000000e+00 : f32
    %1749 = vector.broadcast %cst_758 : f32 to vector<4x64xf32>
    %1750 = arith.addf %1749, %1748 : vector<4x64xf32>
    %1751 = arith.divf %1749, %1750 : vector<4x64xf32>
    %1752 = vector.extract_strided_slice %1740 {offsets = [0, 128], sizes = [4, 64], strides = [1, 1]} : vector<4x384xf32> to vector<4x64xf32>
    %1753 = vector.extract_strided_slice %1743 {offsets = [0, 128], sizes = [4, 64], strides = [1, 1]} : vector<4x384xf32> to vector<4x64xf32>
    %1754 = arith.addf %1752, %1753 : vector<4x64xf32>
    %1755 = arith.negf %1754 : vector<4x64xf32>
    %1756 = math.exp %1755 : vector<4x64xf32>
    %cst_759 = arith.constant 1.000000e+00 : f32
    %1757 = vector.broadcast %cst_759 : f32 to vector<4x64xf32>
    %1758 = arith.addf %1757, %1756 : vector<4x64xf32>
    %1759 = arith.divf %1757, %1758 : vector<4x64xf32>
    %1760 = vector.extract_strided_slice %1740 {offsets = [0, 256], sizes = [4, 64], strides = [1, 1]} : vector<4x384xf32> to vector<4x64xf32>
    %1761 = vector.extract_strided_slice %1743 {offsets = [0, 256], sizes = [4, 64], strides = [1, 1]} : vector<4x384xf32> to vector<4x64xf32>
    %1762 = arith.mulf %1751, %1761 : vector<4x64xf32>
    %1763 = arith.addf %1760, %1762 : vector<4x64xf32>
    %1764 = math.tanh %1763 : vector<4x64xf32>
    %cst_760 = arith.constant 1.000000e+00 : f32
    %1765 = vector.broadcast %cst_760 : f32 to vector<4x64xf32>
    %1766 = arith.subf %1765, %1759 : vector<4x64xf32>
    %1767 = arith.mulf %1766, %1764 : vector<4x64xf32>
    %1768 = arith.mulf %1759, %1695 : vector<4x64xf32>
    %1769 = arith.addf %1767, %1768 : vector<4x64xf32>
    %c6_761 = arith.constant 6 : index
    %c0_762 = arith.constant 0 : index
    %c0_763 = arith.constant 0 : index
    %1770 = vector.load %arg1[%c6_761, %c0_762, %c0_763] : memref<7x4x16xf32, #tpu.memory_space<vmem>>, vector<1x4x16xf32>
    %1771 = vector.shape_cast %1770 : vector<1x4x16xf32> to vector<4x16xf32>
    %c0_764 = arith.constant 0 : index
    %c0_765 = arith.constant 0 : index
    %1772 = vector.load %arg10[%c0_764, %c0_765] : memref<16x384xf32, #tpu.memory_space<vmem>>, vector<16x384xf32>
    %c0_766 = arith.constant 0 : index
    %c0_767 = arith.constant 0 : index
    %1773 = vector.load %arg11[%c0_766, %c0_767] : memref<64x384xf32, #tpu.memory_space<vmem>>, vector<64x384xf32>
    %c0_768 = arith.constant 0 : index
    %c0_769 = arith.constant 0 : index
    %1774 = vector.load %arg12[%c0_768, %c0_769] : memref<1x384xf32, #tpu.memory_space<vmem>>, vector<1x384xf32>
    %c0_770 = arith.constant 0 : index
    %c0_771 = arith.constant 0 : index
    %1775 = vector.load %arg13[%c0_770, %c0_771] : memref<1x384xf32, #tpu.memory_space<vmem>>, vector<1x384xf32>
    %cst_772 = arith.constant dense<0.000000e+00> : vector<4x384xf32>
    %1776 = tpu.matmul %1771, %1772, %cst_772 {dimension_numbers = #tpu.dot_dimension_numbers<[1], [0], [0], [1], [0, 0, 1, 1], [], []>} : vector<4x16xf32>, vector<16x384xf32>, vector<4x384xf32> -> vector<4x384xf32>
    %1777 = vector.broadcast %1774 : vector<1x384xf32> to vector<4x384xf32>
    %1778 = arith.addf %1776, %1777 : vector<4x384xf32>
    %cst_773 = arith.constant dense<0.000000e+00> : vector<4x384xf32>
    %1779 = tpu.matmul %1733, %1773, %cst_773 {dimension_numbers = #tpu.dot_dimension_numbers<[1], [0], [0], [1], [0, 0, 1, 1], [], []>} : vector<4x64xf32>, vector<64x384xf32>, vector<4x384xf32> -> vector<4x384xf32>
    %1780 = vector.broadcast %1775 : vector<1x384xf32> to vector<4x384xf32>
    %1781 = arith.addf %1779, %1780 : vector<4x384xf32>
    %1782 = vector.extract_strided_slice %1778 {offsets = [0, 0], sizes = [4, 64], strides = [1, 1]} : vector<4x384xf32> to vector<4x64xf32>
    %1783 = vector.extract_strided_slice %1781 {offsets = [0, 0], sizes = [4, 64], strides = [1, 1]} : vector<4x384xf32> to vector<4x64xf32>
    %1784 = arith.addf %1782, %1783 : vector<4x64xf32>
    %1785 = arith.negf %1784 : vector<4x64xf32>
    %1786 = math.exp %1785 : vector<4x64xf32>
    %cst_774 = arith.constant 1.000000e+00 : f32
    %1787 = vector.broadcast %cst_774 : f32 to vector<4x64xf32>
    %1788 = arith.addf %1787, %1786 : vector<4x64xf32>
    %1789 = arith.divf %1787, %1788 : vector<4x64xf32>
    %1790 = vector.extract_strided_slice %1778 {offsets = [0, 128], sizes = [4, 64], strides = [1, 1]} : vector<4x384xf32> to vector<4x64xf32>
    %1791 = vector.extract_strided_slice %1781 {offsets = [0, 128], sizes = [4, 64], strides = [1, 1]} : vector<4x384xf32> to vector<4x64xf32>
    %1792 = arith.addf %1790, %1791 : vector<4x64xf32>
    %1793 = arith.negf %1792 : vector<4x64xf32>
    %1794 = math.exp %1793 : vector<4x64xf32>
    %cst_775 = arith.constant 1.000000e+00 : f32
    %1795 = vector.broadcast %cst_775 : f32 to vector<4x64xf32>
    %1796 = arith.addf %1795, %1794 : vector<4x64xf32>
    %1797 = arith.divf %1795, %1796 : vector<4x64xf32>
    %1798 = vector.extract_strided_slice %1778 {offsets = [0, 256], sizes = [4, 64], strides = [1, 1]} : vector<4x384xf32> to vector<4x64xf32>
    %1799 = vector.extract_strided_slice %1781 {offsets = [0, 256], sizes = [4, 64], strides = [1, 1]} : vector<4x384xf32> to vector<4x64xf32>
    %1800 = arith.mulf %1789, %1799 : vector<4x64xf32>
    %1801 = arith.addf %1798, %1800 : vector<4x64xf32>
    %1802 = math.tanh %1801 : vector<4x64xf32>
    %cst_776 = arith.constant 1.000000e+00 : f32
    %1803 = vector.broadcast %cst_776 : f32 to vector<4x64xf32>
    %1804 = arith.subf %1803, %1797 : vector<4x64xf32>
    %1805 = arith.mulf %1804, %1802 : vector<4x64xf32>
    %1806 = arith.mulf %1797, %1733 : vector<4x64xf32>
    %1807 = arith.addf %1805, %1806 : vector<4x64xf32>
    %c0_777 = arith.constant 0 : index
    %c0_778 = arith.constant 0 : index
    %1808 = vector.load %arg14[%c0_777, %c0_778] : memref<64x384xf32, #tpu.memory_space<vmem>>, vector<64x384xf32>
    %c0_779 = arith.constant 0 : index
    %c0_780 = arith.constant 0 : index
    %1809 = vector.load %arg15[%c0_779, %c0_780] : memref<64x384xf32, #tpu.memory_space<vmem>>, vector<64x384xf32>
    %c0_781 = arith.constant 0 : index
    %c0_782 = arith.constant 0 : index
    %1810 = vector.load %arg16[%c0_781, %c0_782] : memref<1x384xf32, #tpu.memory_space<vmem>>, vector<1x384xf32>
    %c0_783 = arith.constant 0 : index
    %c0_784 = arith.constant 0 : index
    %1811 = vector.load %arg17[%c0_783, %c0_784] : memref<1x384xf32, #tpu.memory_space<vmem>>, vector<1x384xf32>
    %cst_785 = arith.constant dense<0.000000e+00> : vector<4x384xf32>
    %1812 = tpu.matmul %1807, %1808, %cst_785 {dimension_numbers = #tpu.dot_dimension_numbers<[1], [0], [0], [1], [0, 0, 1, 1], [], []>} : vector<4x64xf32>, vector<64x384xf32>, vector<4x384xf32> -> vector<4x384xf32>
    %1813 = vector.broadcast %1810 : vector<1x384xf32> to vector<4x384xf32>
    %1814 = arith.addf %1812, %1813 : vector<4x384xf32>
    %cst_786 = arith.constant dense<0.000000e+00> : vector<4x384xf32>
    %1815 = tpu.matmul %1769, %1809, %cst_786 {dimension_numbers = #tpu.dot_dimension_numbers<[1], [0], [0], [1], [0, 0, 1, 1], [], []>} : vector<4x64xf32>, vector<64x384xf32>, vector<4x384xf32> -> vector<4x384xf32>
    %1816 = vector.broadcast %1811 : vector<1x384xf32> to vector<4x384xf32>
    %1817 = arith.addf %1815, %1816 : vector<4x384xf32>
    %1818 = vector.extract_strided_slice %1814 {offsets = [0, 0], sizes = [4, 64], strides = [1, 1]} : vector<4x384xf32> to vector<4x64xf32>
    %1819 = vector.extract_strided_slice %1817 {offsets = [0, 0], sizes = [4, 64], strides = [1, 1]} : vector<4x384xf32> to vector<4x64xf32>
    %1820 = arith.addf %1818, %1819 : vector<4x64xf32>
    %1821 = arith.negf %1820 : vector<4x64xf32>
    %1822 = math.exp %1821 : vector<4x64xf32>
    %cst_787 = arith.constant 1.000000e+00 : f32
    %1823 = vector.broadcast %cst_787 : f32 to vector<4x64xf32>
    %1824 = arith.addf %1823, %1822 : vector<4x64xf32>
    %1825 = arith.divf %1823, %1824 : vector<4x64xf32>
    %1826 = vector.extract_strided_slice %1814 {offsets = [0, 128], sizes = [4, 64], strides = [1, 1]} : vector<4x384xf32> to vector<4x64xf32>
    %1827 = vector.extract_strided_slice %1817 {offsets = [0, 128], sizes = [4, 64], strides = [1, 1]} : vector<4x384xf32> to vector<4x64xf32>
    %1828 = arith.addf %1826, %1827 : vector<4x64xf32>
    %1829 = arith.negf %1828 : vector<4x64xf32>
    %1830 = math.exp %1829 : vector<4x64xf32>
    %cst_788 = arith.constant 1.000000e+00 : f32
    %1831 = vector.broadcast %cst_788 : f32 to vector<4x64xf32>
    %1832 = arith.addf %1831, %1830 : vector<4x64xf32>
    %1833 = arith.divf %1831, %1832 : vector<4x64xf32>
    %1834 = vector.extract_strided_slice %1814 {offsets = [0, 256], sizes = [4, 64], strides = [1, 1]} : vector<4x384xf32> to vector<4x64xf32>
    %1835 = vector.extract_strided_slice %1817 {offsets = [0, 256], sizes = [4, 64], strides = [1, 1]} : vector<4x384xf32> to vector<4x64xf32>
    %1836 = arith.mulf %1825, %1835 : vector<4x64xf32>
    %1837 = arith.addf %1834, %1836 : vector<4x64xf32>
    %1838 = math.tanh %1837 : vector<4x64xf32>
    %cst_789 = arith.constant 1.000000e+00 : f32
    %1839 = vector.broadcast %cst_789 : f32 to vector<4x64xf32>
    %1840 = arith.subf %1839, %1833 : vector<4x64xf32>
    %1841 = arith.mulf %1840, %1838 : vector<4x64xf32>
    %1842 = arith.mulf %1833, %1769 : vector<4x64xf32>
    %1843 = arith.addf %1841, %1842 : vector<4x64xf32>
    %1844 = tpu.concatenate %1399, %1473, %1547, %1621, %1695, %1769, %1843 in 0 : vector<4x64xf32>, vector<4x64xf32>, vector<4x64xf32>, vector<4x64xf32>, vector<4x64xf32>, vector<4x64xf32>, vector<4x64xf32> -> vector<28x64xf32>
    %c0_790 = arith.constant 0 : index
    %c0_791 = arith.constant 0 : index
    %1845 = vector.load %arg18[%c0_790, %c0_791] : memref<64x128xf32, #tpu.memory_space<vmem>>, vector<64x128xf32>
    %cst_792 = arith.constant dense<0.000000e+00> : vector<28x128xf32>
    %1846 = tpu.matmul %1844, %1845, %cst_792 {dimension_numbers = #tpu.dot_dimension_numbers<[1], [0], [0], [1], [0, 0, 1, 1], [], []>} : vector<28x64xf32>, vector<64x128xf32>, vector<28x128xf32> -> vector<28x128xf32>
    %c0_793 = arith.constant 0 : index
    %c0_794 = arith.constant 0 : index
    %1847 = vector.load %arg19[%c0_793, %c0_794] : memref<1x128xf32, #tpu.memory_space<vmem>>, vector<1x128xf32>
    %1848 = vector.broadcast %1847 : vector<1x128xf32> to vector<28x128xf32>
    %1849 = arith.addf %1846, %1848 : vector<28x128xf32>
    %c0_795 = arith.constant 0 : index
    %c0_796 = arith.constant 0 : index
    %1850 = vector.load %arg20[%c0_795, %c0_796] : memref<128x256xf32, #tpu.memory_space<vmem>>, vector<128x256xf32>
    %cst_797 = arith.constant dense<0.000000e+00> : vector<28x256xf32>
    %1851 = tpu.matmul %1849, %1850, %cst_797 {dimension_numbers = #tpu.dot_dimension_numbers<[1], [0], [0], [1], [0, 0, 1, 1], [], []>} : vector<28x128xf32>, vector<128x256xf32>, vector<28x256xf32> -> vector<28x256xf32>
    %c0_798 = arith.constant 0 : index
    %c0_799 = arith.constant 0 : index
    %1852 = vector.load %arg21[%c0_798, %c0_799] : memref<1x256xf32, #tpu.memory_space<vmem>>, vector<1x256xf32>
    %1853 = vector.broadcast %1852 : vector<1x256xf32> to vector<28x256xf32>
    %1854 = arith.addf %1851, %1853 : vector<28x256xf32>
    %c0_800 = arith.constant 0 : index
    %c0_801 = arith.constant 0 : index
    %1855 = vector.load %arg22[%c0_800, %c0_801] : memref<256x128xf32, #tpu.memory_space<vmem>>, vector<256x128xf32>
    %cst_802 = arith.constant dense<0.000000e+00> : vector<28x128xf32>
    %1856 = tpu.matmul %1854, %1855, %cst_802 {dimension_numbers = #tpu.dot_dimension_numbers<[1], [0], [0], [1], [0, 0, 1, 1], [], []>} : vector<28x256xf32>, vector<256x128xf32>, vector<28x128xf32> -> vector<28x128xf32>
    %c0_803 = arith.constant 0 : index
    %c0_804 = arith.constant 0 : index
    %1857 = vector.load %arg23[%c0_803, %c0_804] : memref<1x128xf32, #tpu.memory_space<vmem>>, vector<1x128xf32>
    %1858 = vector.broadcast %1857 : vector<1x128xf32> to vector<28x128xf32>
    %1859 = arith.addf %1856, %1858 : vector<28x128xf32>
    %1860 = vector.shape_cast %1859 : vector<28x128xf32> to vector<7x4x128xf32>
    %c0_805 = arith.constant 0 : index
    %c0_806 = arith.constant 0 : index
    %c0_807 = arith.constant 0 : index
    %1861 = vector.load %arg24[%c0_805, %c0_806, %c0_807] : memref<7x4x128xf32, #tpu.memory_space<vmem>>, vector<7x4x128xf32>
    tpu.vector_store %arg24[%c0_805, %c0_806, %c0_807], %1860 {strides = array<i32>} : memref<7x4x128xf32, #tpu.memory_space<vmem>>, vector<7x4x128xf32>,
    return
  }
}

</mosaic_0001>

<bundles_post_ra>
// kernel: seq2seq_forward.1
= control target key start
LH: loop header
LB: loop body
LE: loop exit
PB: predicated region body
PF: predicated region fallthrough
CT: control target
= control target key end

     0   :  { %s23504_s0 = inlined_call_operand.vmem [shape: f32[8,4,16], index: 0, kind: input, shape index: {}]   ;;  %s23505_s1 = inlined_call_operand.vmem [shape: f32[7,4,16], index: 1, kind: input, shape index: {}]   ;;  %s23506_s2 = inlined_call_operand.vmem [shape: f32[2,16,384], index: 2, kind: input, shape index: {}]   ;;  %s23507_s3 = inlined_call_operand.hbm [shape: f32[2,32,384], index: 3, kind: input, shape index: {}]   ;;  %s23508_s4 = inlined_call_operand.hbm [shape: f32[2,1,384], index: 4, kind: input, shape index: {}]   ;;  %s23509_s5 = inlined_call_operand.hbm [shape: f32[2,1,384], index: 5, kind: input, shape index: {}]   ;;  %s23510_s6 = inlined_call_operand.vmem [shape: f32[2,64,384], index: 6, kind: input, shape index: {}]   ;;  %s23511_s7 = inlined_call_operand.hbm [shape: f32[2,32,384], index: 7, kind: input, shape index: {}]   ;;  %s23512_s8 = inlined_call_operand.hbm [shape: f32[2,1,384], index: 8, kind: input, shape index: {}]   ;;  %s23513_s9 = inlined_call_operand.hbm [shape: f32[2,1,384], index: 9, kind: input, shape index: {}]   ;;  %s23514_s10 = inlined_call_operand.hbm [shape: f32[16,384], index: 10, kind: input, shape index: {}]   ;;  %s23515_s11 = inlined_call_operand.hbm [shape: f32[64,384], index: 11, kind: input, shape index: {}]   ;;  %s23516_s12 = inlined_call_operand.hbm [shape: f32[1,384], index: 12, kind: input, shape index: {}]   ;;  %s23517_s13 = inlined_call_operand.hbm [shape: f32[1,384], index: 13, kind: input, shape index: {}]   ;;  %s23518_s14 = inlined_call_operand.hbm [shape: f32[64,384], index: 14, kind: input, shape index: {}]   ;;  %s23519_s15 = inlined_call_operand.hbm [shape: f32[64,384], index: 15, kind: input, shape index: {}]   ;;  %s23520_s16 = inlined_call_operand.hbm [shape: f32[1,384], index: 16, kind: input, shape index: {}]   ;;  %s23521_s17 = inlined_call_operand.hbm [shape: f32[1,384], index: 17, kind: input, shape index: {}]   ;;  %s23522_s18 = inlined_call_operand.hbm [shape: f32[64,128], index: 18, kind: input, shape index: {}]   ;;  %s23523_s19 = inlined_call_operand.hbm [shape: f32[1,128], index: 19, kind: input, shape index: {}]   ;;  %s23524_s20 = inlined_call_operand.vmem [shape: f32[128,256], index: 20, kind: input, shape index: {}]   ;;  %s23525_s21 = inlined_call_operand.hbm [shape: f32[1,256], index: 21, kind: input, shape index: {}]   ;;  %s23526_s22 = inlined_call_operand.vmem [shape: f32[256,128], index: 22, kind: input, shape index: {}]   ;;  %s23527_s23 = inlined_call_operand.hbm [shape: f32[1,128], index: 23, kind: input, shape index: {}]   ;;  %s23528_s24 = inlined_call_operand.vmem [shape: f32[7,4,128], index: 24, kind: output, shape index: {}]  }
   0x1   :  { %23611 = sst [smem:[#allocation59_spill]] %s23504_s0 }
   0x2   :  { %23612 = sst [smem:[#allocation60_spill]] %s23505_s1 }
   0x3   :  { %23613 = sst [smem:[#allocation61_spill]] %s23506_s2 }
   0x4   :  { %23614 = sst [smem:[#allocation62_spill]] %s23507_s3 }
   0x5   :  { %23615 = sst [smem:[#allocation63_spill]] %s23508_s4 }
   0x6   :  { %23616 = sst [smem:[#allocation64_spill]] %s23509_s5 }
   0x7   :  { %23617 = sst [smem:[#allocation65_spill]] %s23510_s6 }
   0x8   :  { %23618 = sst [smem:[#allocation66_spill]] %s23511_s7 }
   0x9   :  { %23619 = sst [smem:[#allocation67_spill]] %s23512_s8 }
   0xa   :  { %23620 = sst [smem:[#allocation68_spill]] %s23524_s20 }
   0xb   :  { %23621 = sst [smem:[#allocation69_spill]] %s23526_s22 }
   0xc   :  { %23622 = sst [smem:[#allocation70_spill]] %s23528_s24 }
   0xd   :  { %29 = vsyncpa [#allocation3], 0 }
   0xe   :  { %30 = vsyncpa [#allocation5], 0 }
   0xf   :  { %31 = vsyncpa [#allocation8], 0 }
  0x10   :  { %32 = vsyncpa [#allocation11], 0 }
  0x11   :  { %33 = vsyncpa [#allocation14], 0 }
  0x12   :  { %34 = vsyncpa [#allocation17], 0 }
  0x13   :  { %35 = vsyncpa [#allocation20], 0 }
  0x14   :  { %36 = vsyncpa [#allocation23], 0 }
  0x15   :  { %37 = vsyncpa [#allocation26], 0 }
  0x16   :  { %38 = vsyncpa [#allocation29], 0  ;;  %s20404_s5 = smov [#allocation4]   ;;  %s23623_s6 = sld [smem:[#allocation63_spill]] }
  0x17   :  { %s62_s26 = sshll.u32 %s20404_s5, 4  ;;  %s63_s26 = int_to_ptr.vmem [resolvable:$true] %s62_s26 }
  0x1c   :  { %s19988_s2 = scalar_lea.hbm %s23623_s6, 96 }
  0x1d   :  { %p19989_p0 = scmp.ne.s32.totalorder %s23623_s6, %s19988_s2  ;;  %p19992_p1 = scmp.lt.u32.totalorder %s19988_s2, %s23623_s6 }
  0x1f   :  { %p19994_p2 = pnand %p19992_p1, %p19989_p0 }
  0x21   :  { %19997 = shalt.err (!%p19994_p2)
}
  0x22   :  { %s19998_s3 = scalar_lea.vmem %s63_s26, 96  ;;  %p20003_p4 = scmp.lt.s32.totalorder %s63_s26, %s63_s26 }
  0x23   :  { %p19999_p3 = scmp.ne.s32.totalorder %s63_s26, %s19998_s3  ;;  %p20004_p5 = scmp.lt.s32.totalorder %s19998_s3, %s19998_s3 }
  0x25   :  { %p20005_p6 = por %p20004_p5, %p20003_p4 }
  0x27   :  { %p20006_p7 = pnand %p20005_p6, %p19999_p3 }
  0x29   :  { %20009 = shalt.err (!%p20006_p7)
}
  0x2a   :  { %s20405_s25 = smov 48   ;;  %s20406_s8 = smov 3  }
  0x2b   :  { %68 = dma.hbm_to_vmem [thread:$0]  %s23623_s6, 96, %s63_s26, [#allocation5], %s20405_s25, %s20405_s25, %s20406_s8  }
  0x2c   :  { %s20407_s5 = smov [#allocation7]   ;;  %s20408_s28 = smov [#allocation10]  }
  0x2d   :  { %s88_s27 = sshll.u32 %s20407_s5, 4  ;;  %s112_s2 = sshll.u32 %s20408_s28, 4  ;;  %s89_s27 = int_to_ptr.vmem [resolvable:$true] %s88_s27  ;;  %s113_s2 = int_to_ptr.vmem [resolvable:$true] %s112_s2 }
  0x2e   :  { %s23624_s7 = sld [smem:[#allocation66_spill]] }
  0x34   :  { %s20010_s30 = scalar_lea.hbm %s23624_s7, 3072 }
  0x35   :  { %p20011_p8 = scmp.ne.s32.totalorder %s23624_s7, %s20010_s30  ;;  %p20014_p9 = scmp.lt.u32.totalorder %s20010_s30, %s23624_s7 }
  0x37   :  { %p20016_p10 = pnand %p20014_p9, %p20011_p8 }
  0x39   :  { %20019 = shalt.err (!%p20016_p10)
}
  0x3a   :  { %s20020_s26 = scalar_lea.vmem %s89_s27, 3072  ;;  %p20025_p12 = scmp.lt.s32.totalorder %s89_s27, %s89_s27 }
  0x3b   :  { %p20021_p11 = scmp.ne.s32.totalorder %s89_s27, %s20020_s26  ;;  %p20026_p13 = scmp.lt.s32.totalorder %s20020_s26, %s20020_s26 }
  0x3d   :  { %p20027_p0 = por %p20026_p13, %p20025_p12 }
  0x3f   :  { %p20028_p1 = pnand %p20027_p0, %p20021_p11 }
  0x41   :  { %20031 = shalt.err (!%p20028_p1)
}
  0x42   :  { %s20409_s6 = smov 384   ;;  %s20410_s4 = smov 24  }
  0x43   :  { %94 = dma.hbm_to_vmem [thread:$0]  %s23624_s7, 3072, %s89_s27, [#allocation8], %s20409_s6, %s20409_s6, %s20410_s4  }
  0x44   :  { %s20032_s5 = scalar_lea.hbm %s23513_s9, 96 }
  0x45   :  { %p20033_p2 = scmp.ne.s32.totalorder %s23513_s9, %s20032_s5  ;;  %p20036_p3 = scmp.lt.u32.totalorder %s20032_s5, %s23513_s9 }
  0x47   :  { %p20038_p4 = pnand %p20036_p3, %p20033_p2 }
  0x49   :  { %20041 = shalt.err (!%p20038_p4)
}
  0x4a   :  { %s20042_s3 = scalar_lea.vmem %s113_s2, 96  ;;  %p20047_p6 = scmp.lt.s32.totalorder %s113_s2, %s113_s2 }
  0x4b   :  { %p20043_p5 = scmp.ne.s32.totalorder %s113_s2, %s20042_s3  ;;  %p20048_p7 = scmp.lt.s32.totalorder %s20042_s3, %s20042_s3 }
  0x4d   :  { %p20049_p8 = por %p20048_p7, %p20047_p6 }
  0x4f   :  { %p20050_p9 = pnand %p20049_p8, %p20043_p5 }
  0x51   :  { %20053 = shalt.err (!%p20050_p9)
}
  0x52   :  { %118 = dma.hbm_to_vmem [thread:$0]  %s23513_s9, 96, %s113_s2, [#allocation11], %s20405_s25, %s20405_s25, %s20406_s8  }
  0x53   :  { %s20411_s26 = smov [#allocation13]   ;;  %s20412_s1 = smov [#allocation16]  }
  0x54   :  { %s136_s24 = sshll.u32 %s20411_s26, 4  ;;  %s159_s20 = sshll.u32 %s20412_s1, 4  ;;  %s137_s24 = int_to_ptr.vmem [resolvable:$true] %s136_s24  ;;  %s160_s20 = int_to_ptr.vmem [resolvable:$true] %s159_s20 }
  0x55   :  { %s20054_s28 = scalar_lea.hbm %s23515_s11, 3072 }
  0x56   :  { %p20055_p10 = scmp.ne.s32.totalorder %s23515_s11, %s20054_s28  ;;  %p20058_p11 = scmp.lt.u32.totalorder %s20054_s28, %s23515_s11 }
  0x58   :  { %p20060_p12 = pnand %p20058_p11, %p20055_p10 }
  0x5a   :  { %20063 = shalt.err (!%p20060_p12)
}
  0x5b   :  { %s20064_s9 = scalar_lea.vmem %s137_s24, 3072  ;;  %p20069_p0 = scmp.lt.s32.totalorder %s137_s24, %s137_s24 }
  0x5c   :  { %p20065_p13 = scmp.ne.s32.totalorder %s137_s24, %s20064_s9  ;;  %p20070_p1 = scmp.lt.s32.totalorder %s20064_s9, %s20064_s9 }
  0x5e   :  { %p20071_p2 = por %p20070_p1, %p20069_p0 }
  0x60   :  { %p20072_p3 = pnand %p20071_p2, %p20065_p13 }
  0x62   :  { %20075 = shalt.err (!%p20072_p3)
}
  0x63   :  { %142 = dma.hbm_to_vmem [thread:$0]  %s23515_s11, 3072, %s137_s24, [#allocation14], %s20409_s6, %s20409_s6, %s20410_s4  }
  0x64   :  { %s20076_s1 = scalar_lea.hbm %s23517_s13, 48 }
  0x65   :  { %p20077_p4 = scmp.ne.s32.totalorder %s23517_s13, %s20076_s1  ;;  %p20080_p5 = scmp.lt.u32.totalorder %s20076_s1, %s23517_s13 }
  0x67   :  { %p20082_p6 = pnand %p20080_p5, %p20077_p4 }
  0x69   :  { %20085 = shalt.err (!%p20082_p6)
}
  0x6a   :  { %s20086_s0 = scalar_lea.vmem %s160_s20, 48  ;;  %s20090_s30 = scalar_lea.vmem %s160_s20, 64 }
  0x6b   :  { %p20087_p7 = scmp.ne.s32.totalorder %s160_s20, %s20086_s0  ;;  %p20091_p8 = scmp.lt.s32.totalorder %s160_s20, %s160_s20 }
  0x6c   :  { %p20092_p9 = scmp.lt.s32.totalorder %s20090_s30, %s20086_s0 }
  0x6e   :  { %p20093_p10 = por %p20092_p9, %p20091_p8 }
  0x70   :  { %p20094_p11 = pnand %p20093_p10, %p20087_p7 }
  0x72   :  { %20097 = shalt.err (!%p20094_p11)
}
  0x73   :  { %162 = dma.hbm_to_vmem [thread:$0]  %s23517_s13, 48, %s160_s20, [#allocation17]  }
  0x74   :  { %s20413_s3 = smov [#allocation19]   ;;  %s20414_s2 = smov [#allocation22]  }
  0x75   :  { %s180_s9 = sshll.u32 %s20413_s3, 4  ;;  %s203_s27 = sshll.u32 %s20414_s2, 4  ;;  %s181_s9 = int_to_ptr.vmem [resolvable:$true] %s180_s9  ;;  %s204_s27 = int_to_ptr.vmem [resolvable:$true] %s203_s27 }
  0x76   :  { %s20098_s1 = scalar_lea.hbm %s23519_s15, 3072 }
  0x77   :  { %p20099_p12 = scmp.ne.s32.totalorder %s23519_s15, %s20098_s1  ;;  %p20102_p13 = scmp.lt.u32.totalorder %s20098_s1, %s23519_s15 }
  0x79   :  { %p20104_p0 = pnand %p20102_p13, %p20099_p12 }
  0x7b   :  { %20107 = shalt.err (!%p20104_p0)
}
  0x7c   :  { %s20108_s13 = scalar_lea.vmem %s181_s9, 3072  ;;  %p20113_p2 = scmp.lt.s32.totalorder %s181_s9, %s181_s9 }
  0x7d   :  { %p20109_p1 = scmp.ne.s32.totalorder %s181_s9, %s20108_s13  ;;  %p20114_p3 = scmp.lt.s32.totalorder %s20108_s13, %s20108_s13 }
  0x7f   :  { %p20115_p4 = por %p20114_p3, %p20113_p2 }
  0x81   :  { %p20116_p5 = pnand %p20115_p4, %p20109_p1 }
  0x83   :  { %20119 = shalt.err (!%p20116_p5)
}
  0x84   :  { %186 = dma.hbm_to_vmem [thread:$0]  %s23519_s15, 3072, %s181_s9, [#allocation20], %s20409_s6, %s20409_s6, %s20410_s4  }
  0x85   :  { %s20120_s24 = scalar_lea.hbm %s23521_s17, 48 }
  0x86   :  { %p20121_p6 = scmp.ne.s32.totalorder %s23521_s17, %s20120_s24  ;;  %p20124_p7 = scmp.lt.u32.totalorder %s20120_s24, %s23521_s17 }
  0x88   :  { %p20126_p8 = pnand %p20124_p7, %p20121_p6 }
  0x8a   :  { %20129 = shalt.err (!%p20126_p8)
}
  0x8b   :  { %s20130_s1 = scalar_lea.vmem %s204_s27, 48  ;;  %s20134_s22 = scalar_lea.vmem %s204_s27, 64 }
  0x8c   :  { %p20131_p9 = scmp.ne.s32.totalorder %s204_s27, %s20130_s1  ;;  %p20135_p10 = scmp.lt.s32.totalorder %s204_s27, %s204_s27 }
  0x8d   :  { %p20136_p11 = scmp.lt.s32.totalorder %s20134_s22, %s20130_s1 }
  0x8f   :  { %p20137_p12 = por %p20136_p11, %p20135_p10 }
  0x91   :  { %p20138_p13 = pnand %p20137_p12, %p20131_p9 }
  0x93   :  { %20141 = shalt.err (!%p20138_p13)
}
  0x94   :  { %206 = dma.hbm_to_vmem [thread:$0]  %s23521_s17, 48, %s204_s27, [#allocation23]  }
  0x95   :  { %s20415_s5 = smov [#allocation25]   ;;  %s20416_s29 = smov [#allocation2]  }
  0x96   :  { %s225_s28 = sshll.u32 %s20415_s5, 4  ;;  %s50_s13 = sshll.u32 %s20416_s29, 4  ;;  %s226_s28 = int_to_ptr.vmem [resolvable:$true] %s225_s28  ;;  %s51_s13 = int_to_ptr.vmem [resolvable:$true] %s50_s13 }
  0x97   :  { %s20142_s30 = scalar_lea.hbm %s23523_s19, 16 }
  0x98   :  { %p20143_p0 = scmp.ne.s32.totalorder %s23523_s19, %s20142_s30  ;;  %p20146_p1 = scmp.lt.u32.totalorder %s20142_s30, %s23523_s19 }
  0x9a   :  { %p20148_p2 = pnand %p20146_p1, %p20143_p0 }
  0x9c   :  { %20151 = shalt.err (!%p20148_p2)
}
  0x9d   :  { %s20152_s17 = scalar_lea.vmem %s226_s28, 16  ;;  %s20156_s27 = scalar_lea.vmem %s226_s28, 32 }
  0x9e   :  { %p20153_p3 = scmp.ne.s32.totalorder %s226_s28, %s20152_s17  ;;  %p20157_p4 = scmp.lt.s32.totalorder %s226_s28, %s226_s28 }
  0x9f   :  { %p20158_p5 = scmp.lt.s32.totalorder %s20156_s27, %s20152_s17 }
  0xa1   :  { %p20159_p6 = por %p20158_p5, %p20157_p4 }
  0xa3   :  { %p20160_p7 = pnand %p20159_p6, %p20153_p3 }
  0xa5   :  { %20163 = shalt.err (!%p20160_p7)
}
  0xa6   :  { %228 = dma.hbm_to_vmem [thread:$0]  %s23523_s19, 16, %s226_s28, [#allocation26]  }
  0xa7   :  { %s23625_s15 = sld [smem:[#allocation62_spill]] }
  0xad   :  { %s20164_s9 = scalar_lea.hbm %s23625_s15, 3072 }
  0xae   :  { %p20165_p8 = scmp.ne.s32.totalorder %s23625_s15, %s20164_s9  ;;  %p20168_p9 = scmp.lt.u32.totalorder %s20164_s9, %s23625_s15 }
  0xb0   :  { %p20170_p10 = pnand %p20168_p9, %p20165_p8 }
  0xb2   :  { %20173 = shalt.err (!%p20170_p10)
}
  0xb3   :  { %s20174_s30 = scalar_lea.vmem %s51_s13, 3072  ;;  %p20179_p12 = scmp.lt.s32.totalorder %s51_s13, %s51_s13 }
  0xb4   :  { %p20175_p11 = scmp.ne.s32.totalorder %s51_s13, %s20174_s30  ;;  %p20180_p13 = scmp.lt.s32.totalorder %s20174_s30, %s20174_s30 }
  0xb6   :  { %p20181_p0 = por %p20180_p13, %p20179_p12 }
  0xb8   :  { %p20182_p1 = pnand %p20181_p0, %p20175_p11 }
  0xba   :  { %20185 = shalt.err (!%p20182_p1)
}
  0xbb   :  { %56 = dma.hbm_to_vmem [thread:$0]  %s23625_s15, 3072, %s51_s13, [#allocation3], %s20409_s6, %s20409_s6, %s20410_s4  }
  0xbc   :  { %s20417_s11 = smov [#allocation6]   ;;  %s20418_s3 = smov [#allocation9]  }
  0xbd   :  { %s74_s24 = sshll.u32 %s20417_s11, 4  ;;  %s100_s2 = sshll.u32 %s20418_s3, 4  ;;  %s75_s24 = int_to_ptr.vmem [resolvable:$true] %s74_s24  ;;  %s101_s2 = int_to_ptr.vmem [resolvable:$true] %s100_s2 }
  0xbe   :  { %s23626_s7 = sld [smem:[#allocation64_spill]] }
  0xc4   :  { %s20186_s26 = scalar_lea.hbm %s23626_s7, 96 }
  0xc5   :  { %p20187_p2 = scmp.ne.s32.totalorder %s23626_s7, %s20186_s26  ;;  %p20190_p3 = scmp.lt.u32.totalorder %s20186_s26, %s23626_s7 }
  0xc7   :  { %p20192_p4 = pnand %p20190_p3, %p20187_p2 }
  0xc9   :  { %20195 = shalt.err (!%p20192_p4)
}
  0xca   :  { %s20196_s13 = scalar_lea.vmem %s75_s24, 96  ;;  %p20201_p6 = scmp.lt.s32.totalorder %s75_s24, %s75_s24 }
  0xcb   :  { %p20197_p5 = scmp.ne.s32.totalorder %s75_s24, %s20196_s13  ;;  %p20202_p7 = scmp.lt.s32.totalorder %s20196_s13, %s20196_s13 }
  0xcd   :  { %p20203_p8 = por %p20202_p7, %p20201_p6 }
  0xcf   :  { %p20204_p9 = pnand %p20203_p8, %p20197_p5 }
  0xd1   :  { %20207 = shalt.err (!%p20204_p9)
}
  0xd2   :  { %80 = dma.hbm_to_vmem [thread:$0]  %s23626_s7, 96, %s75_s24, [#allocation5], %s20405_s25, %s20405_s25, %s20406_s8  }
  0xd3   :  { %s23627_s30 = sld [smem:[#allocation67_spill]] }
  0xd9   :  { %s20208_s19 = scalar_lea.hbm %s23627_s30, 96 }
  0xda   :  { %p20209_p10 = scmp.ne.s32.totalorder %s23627_s30, %s20208_s19  ;;  %p20212_p11 = scmp.lt.u32.totalorder %s20208_s19, %s23627_s30 }
  0xdc   :  { %p20214_p12 = pnand %p20212_p11, %p20209_p10 }
  0xde   :  { %20217 = shalt.err (!%p20214_p12)
}
  0xdf   :  { %s20218_s27 = scalar_lea.vmem %s101_s2, 96  ;;  %p20223_p0 = scmp.lt.s32.totalorder %s101_s2, %s101_s2 }
  0xe0   :  { %p20219_p13 = scmp.ne.s32.totalorder %s101_s2, %s20218_s27  ;;  %p20224_p1 = scmp.lt.s32.totalorder %s20218_s27, %s20218_s27 }
  0xe2   :  { %p20225_p2 = por %p20224_p1, %p20223_p0 }
  0xe4   :  { %p20226_p3 = pnand %p20225_p2, %p20219_p13 }
  0xe6   :  { %20229 = shalt.err (!%p20226_p3)
}
  0xe7   :  { %106 = dma.hbm_to_vmem [thread:$0]  %s23627_s30, 96, %s101_s2, [#allocation8], %s20405_s25, %s20405_s25, %s20406_s8  }
  0xe8   :  { %s20419_s26 = smov [#allocation12]   ;;  %s20420_s22 = smov [#allocation15]  }
  0xe9   :  { %s124_s1 = sshll.u32 %s20419_s26, 4  ;;  %s149_s9 = sshll.u32 %s20420_s22, 4  ;;  %s125_s1 = int_to_ptr.vmem [resolvable:$true] %s124_s1  ;;  %s150_s9 = int_to_ptr.vmem [resolvable:$true] %s149_s9 }
  0xea   :  { %s20230_s15 = scalar_lea.hbm %s23514_s10, 768 }
  0xeb   :  { %p20231_p4 = scmp.ne.s32.totalorder %s23514_s10, %s20230_s15  ;;  %p20234_p5 = scmp.lt.u32.totalorder %s20230_s15, %s23514_s10 }
  0xed   :  { %p20236_p6 = pnand %p20234_p5, %p20231_p4 }
  0xef   :  { %20239 = shalt.err (!%p20236_p6)
}
  0xf0   :  { %s20240_s25 = scalar_lea.vmem %s125_s1, 768  ;;  %p20245_p8 = scmp.lt.s32.totalorder %s125_s1, %s125_s1 }
  0xf1   :  { %p20241_p7 = scmp.ne.s32.totalorder %s125_s1, %s20240_s25  ;;  %p20246_p9 = scmp.lt.s32.totalorder %s20240_s25, %s20240_s25 }
  0xf3   :  { %p20247_p10 = por %p20246_p9, %p20245_p8 }
  0xf5   :  { %p20248_p11 = pnand %p20247_p10, %p20241_p7 }
  0xf7   :  { %20251 = shalt.err (!%p20248_p11)
}
  0xf8   :  { %130 = dma.hbm_to_vmem [thread:$0]  %s23514_s10, 768, %s125_s1, [#allocation11], %s20409_s6, %s20409_s6, %s20410_s4  }
  0xf9   :  { %s20252_s11 = scalar_lea.hbm %s23516_s12, 48 }
  0xfa   :  { %p20253_p12 = scmp.ne.s32.totalorder %s23516_s12, %s20252_s11  ;;  %p20256_p13 = scmp.lt.u32.totalorder %s20252_s11, %s23516_s12 }
  0xfc   :  { %p20258_p0 = pnand %p20256_p13, %p20253_p12 }
  0xfe   :  { %20261 = shalt.err (!%p20258_p0)
}
  0xff   :  { %s20262_s7 = scalar_lea.vmem %s150_s9, 48  ;;  %s20266_s26 = scalar_lea.vmem %s150_s9, 64 }
 0x100   :  { %p20263_p1 = scmp.ne.s32.totalorder %s150_s9, %s20262_s7  ;;  %p20267_p2 = scmp.lt.s32.totalorder %s150_s9, %s150_s9 }
 0x101   :  { %p20268_p3 = scmp.lt.s32.totalorder %s20266_s26, %s20262_s7 }
 0x103   :  { %p20269_p4 = por %p20268_p3, %p20267_p2 }
 0x105   :  { %p20270_p5 = pnand %p20269_p4, %p20263_p1 }
 0x107   :  { %20273 = shalt.err (!%p20270_p5)
}
 0x108   :  { %152 = dma.hbm_to_vmem [thread:$0]  %s23516_s12, 48, %s150_s9, [#allocation14]  }
 0x109   :  { %s20421_s22 = smov [#allocation18]   ;;  %s20422_s13 = smov [#allocation21]  }
 0x10a   :  { %s168_s5 = sshll.u32 %s20421_s22, 4  ;;  %s193_s15 = sshll.u32 %s20422_s13, 4  ;;  %s169_s5 = int_to_ptr.vmem [resolvable:$true] %s168_s5  ;;  %s194_s15 = int_to_ptr.vmem [resolvable:$true] %s193_s15 }
 0x10b   :  { %s20274_s0 = scalar_lea.hbm %s23518_s14, 3072 }
 0x10c   :  { %p20275_p6 = scmp.ne.s32.totalorder %s23518_s14, %s20274_s0  ;;  %p20278_p7 = scmp.lt.u32.totalorder %s20274_s0, %s23518_s14 }
 0x10e   :  { %p20280_p8 = pnand %p20278_p7, %p20275_p6 }
 0x110   :  { %20283 = shalt.err (!%p20280_p8)
}
 0x111   :  { %s20284_s12 = scalar_lea.vmem %s169_s5, 3072  ;;  %p20289_p10 = scmp.lt.s32.totalorder %s169_s5, %s169_s5 }
 0x112   :  { %p20285_p9 = scmp.ne.s32.totalorder %s169_s5, %s20284_s12  ;;  %p20290_p11 = scmp.lt.s32.totalorder %s20284_s12, %s20284_s12 }
 0x114   :  { %p20291_p12 = por %p20290_p11, %p20289_p10 }
 0x116   :  { %p20292_p13 = pnand %p20291_p12, %p20285_p9 }
 0x118   :  { %20295 = shalt.err (!%p20292_p13)
}
 0x119   :  { %174 = dma.hbm_to_vmem [thread:$0]  %s23518_s14, 3072, %s169_s5, [#allocation17], %s20409_s6, %s20409_s6, %s20410_s4  }
 0x11a   :  { %s20296_s3 = scalar_lea.hbm %s23520_s16, 48 }
 0x11b   :  { %p20297_p0 = scmp.ne.s32.totalorder %s23520_s16, %s20296_s3  ;;  %p20300_p1 = scmp.lt.u32.totalorder %s20296_s3, %s23520_s16 }
 0x11d   :  { %p20302_p2 = pnand %p20300_p1, %p20297_p0 }
 0x11f   :  { %20305 = shalt.err (!%p20302_p2)
}
 0x120   :  { %s20306_s26 = scalar_lea.vmem %s194_s15, 48  ;;  %s20310_s10 = scalar_lea.vmem %s194_s15, 64 }
 0x121   :  { %p20307_p3 = scmp.ne.s32.totalorder %s194_s15, %s20306_s26  ;;  %p20311_p4 = scmp.lt.s32.totalorder %s194_s15, %s194_s15 }
 0x122   :  { %p20312_p5 = scmp.lt.s32.totalorder %s20310_s10, %s20306_s26 }
 0x124   :  { %p20313_p6 = por %p20312_p5, %p20311_p4 }
 0x126   :  { %p20314_p7 = pnand %p20313_p6, %p20307_p3 }
 0x128   :  { %20317 = shalt.err (!%p20314_p7)
}
 0x129   :  { %196 = dma.hbm_to_vmem [thread:$0]  %s23520_s16, 48, %s194_s15, [#allocation20]  }
 0x12a   :  { %s20423_s4 = smov [#allocation24]   ;;  %s20318_s13 = scalar_lea.hbm %s23522_s18, 1024 }
 0x12b   :  { %s212_s1 = sshll.u32 %s20423_s4, 4  ;;  %p20319_p8 = scmp.ne.s32.totalorder %s23522_s18, %s20318_s13  ;;  %s213_s1 = int_to_ptr.vmem [resolvable:$true] %s212_s1 }
 0x12c   :  { %p20322_p9 = scmp.lt.u32.totalorder %s20318_s13, %s23522_s18 }
 0x12e   :  { %p20324_p10 = pnand %p20322_p9, %p20319_p8 }
 0x130   :  { %20327 = shalt.err (!%p20324_p10)
}
 0x131   :  { %s20328_s25 = scalar_lea.vmem %s213_s1, 1024  ;;  %p20333_p12 = scmp.lt.s32.totalorder %s213_s1, %s213_s1 }
 0x132   :  { %p20329_p11 = scmp.ne.s32.totalorder %s213_s1, %s20328_s25  ;;  %p20334_p13 = scmp.lt.s32.totalorder %s20328_s25, %s20328_s25 }
 0x134   :  { %p20335_p0 = por %p20334_p13, %p20333_p12 }
 0x136   :  { %p20336_p1 = pnand %p20335_p0, %p20329_p11 }
 0x138   :  { %20339 = shalt.err (!%p20336_p1)
}
 0x139   :  { %s20424_s16 = smov 128   ;;  %s20425_s15 = smov 8  }
 0x13a   :  { %218 = dma.hbm_to_vmem [thread:$0]  %s23522_s18, 1024, %s213_s1, [#allocation23], %s20424_s16, %s20424_s16, %s20425_s15  }
 0x13b   :  { %s20426_s12 = smov [#allocation27]   ;;  %s20427_s30 = smov [#allocation28]  }
 0x13c   :  { %s237_s9 = sshll.u32 %s20426_s12, 4  ;;  %s249_s28 = sshll.u32 %s20427_s30, 4  ;;  %s238_s9 = int_to_ptr.vmem [resolvable:$true] %s237_s9  ;;  %s250_s28 = int_to_ptr.vmem [resolvable:$true] %s249_s28 }
 0x13d   :  { %s20340_s17 = scalar_lea.hbm %s23525_s21, 32 }
 0x13e   :  { %p20341_p2 = scmp.ne.s32.totalorder %s23525_s21, %s20340_s17  ;;  %p20344_p3 = scmp.lt.u32.totalorder %s20340_s17, %s23525_s21 }
 0x140   :  { %p20346_p4 = pnand %p20344_p3, %p20341_p2 }
 0x142   :  { %20349 = shalt.err (!%p20346_p4)
}
 0x143   :  { %s20350_s18 = scalar_lea.vmem %s238_s9, 32  ;;  %p20355_p6 = scmp.lt.s32.totalorder %s238_s9, %s238_s9 }
 0x144   :  { %p20351_p5 = scmp.ne.s32.totalorder %s238_s9, %s20350_s18  ;;  %p20356_p7 = scmp.lt.s32.totalorder %s20350_s18, %s20350_s18 }
 0x146   :  { %p20357_p8 = por %p20356_p7, %p20355_p6 }
 0x148   :  { %p20358_p9 = pnand %p20357_p8, %p20351_p5 }
 0x14a   :  { %20361 = shalt.err (!%p20358_p9)
}
 0x14b   :  { %240 = dma.hbm_to_vmem [thread:$0]  %s23525_s21, 32, %s238_s9, [#allocation26]  }
 0x14c   :  { %s20362_s1 = scalar_lea.hbm %s23527_s23, 16 }
 0x14d   :  { %p20363_p10 = scmp.ne.s32.totalorder %s23527_s23, %s20362_s1  ;;  %p20366_p11 = scmp.lt.u32.totalorder %s20362_s1, %s23527_s23 }
 0x14f   :  { %p20368_p12 = pnand %p20366_p11, %p20363_p10 }
 0x151   :  { %20371 = shalt.err (!%p20368_p12)
}
 0x152   :  { %s20372_s20 = scalar_lea.vmem %s250_s28, 16  ;;  %s20376_s0 = scalar_lea.vmem %s250_s28, 32 }
 0x153   :  { %p20373_p13 = scmp.ne.s32.totalorder %s250_s28, %s20372_s20  ;;  %p20377_p0 = scmp.lt.s32.totalorder %s250_s28, %s250_s28 }
 0x154   :  { %p20378_p1 = scmp.lt.s32.totalorder %s20376_s0, %s20372_s20 }
 0x156   :  { %p20379_p2 = por %p20378_p1, %p20377_p0 }
 0x158   :  { %p20380_p3 = pnand %p20379_p2, %p20373_p13 }
 0x15a   :  { %20383 = shalt.err (!%p20380_p3)
}
 0x15b   :  { %252 = dma.hbm_to_vmem [thread:$0]  %s23527_s23, 16, %s250_s28, [#allocation29]  }
 0x15c   :  { %20384 = dma.done.wait [#allocation3], 3072  }
 0x15d   :  { %20385 = vsyncadd [#allocation3], 4294964224 }
 0x15e   :  { %20386 = dma.done.wait [#allocation5], 192  }
 0x15f   :  { %20387 = vsyncadd [#allocation5], 4294967104 }
 0x160   :  { %20388 = dma.done.wait [#allocation8], 3168  }
 0x161   :  { %20389 = vsyncadd [#allocation8], 4294964128 }
 0x162   :  { %20390 = dma.done.wait [#allocation11], 864  }
 0x163   :  { %20391 = vsyncadd [#allocation11], 4294966432 }
 0x164   :  { %20392 = dma.done.wait [#allocation14], 3120  }
 0x165   :  { %20393 = vsyncadd [#allocation14], 4294964176 }
 0x166   :  { %20394 = dma.done.wait [#allocation17], 3120  }
 0x167   :  { %20395 = vsyncadd [#allocation17], 4294964176 }
 0x168   :  { %20396 = dma.done.wait [#allocation20], 3120  }
 0x169   :  { %20397 = vsyncadd [#allocation20], 4294964176 }
 0x16a   :  { %20398 = dma.done.wait [#allocation23], 1072  }
 0x16b   :  { %20399 = vsyncadd [#allocation23], 4294966224 }
 0x16c   :  { %20400 = dma.done.wait [#allocation26], 48  }
 0x16d   :  { %20401 = vsyncadd [#allocation26], 4294967248 }
 0x16e   :  { %20402 = dma.done.wait [#allocation29], 16  }
 0x16f   :  { %20403 = vsyncadd [#allocation29], 4294967280  ;;  %v23543_v0 = vmov 0.0|0.0   ;;  %vm20429_vm0 = vmmov 0   ;;  %v23541_v1 = vmov 0.0   ;;  %s23628_s16 = sld [smem:[#allocation61_spill]]  ;;  %v329_v59 = vlaneseq }
 0x170   :  { %17500 = vmatprep.subr.bf16.mxu1 %v23543_v0  ;;  %16262 = vmatprep.mubr.msk.f32.mxu1 %vm20429_vm0, %v23541_v1  ;;  %s23629_s7 = sld [smem:[#allocation59_spill]]  ;;  %v315_v12 = vld [vmem:[#allocation2 + $0x8] sm:$0xff]  ;;  %v318_v13 = vld [vmem:[#allocation2 + $0x20] sm:$0xff]  ;;  %v317_v16 = vld [vmem:[#allocation2 + $0x18] sm:$0xff]  ;;  %vm344_vm1 = vcmask 130048   ;;  %vm505_vm2 = vcmask 261120  }
 0x171   :  { %412 = vmatprep.mubr.f32.mxu0 %v23541_v1  ;;  %v20835_v14 = vpack.c.bf16 %v318_v13, %v315_v12  ;;  %v314_v15 = vld [vmem:[#allocation2] sm:$0xff]  ;;  %v321_v24 = vld [vmem:[#allocation2 + $0x38] sm:$0xff]  ;;  %v324_v25 = vld [vmem:[#allocation2 + $0x50] sm:$0xff]  ;;  %v330_v60 = vshrl.u32 %v329_v59, 7  ;;  %s23636_s6 = sld [smem:[#allocation65_spill]]  ;;  %vm5436_vm3 = vcmask 523264  }
 0x172   :  { %v20842_v18 = vpack.c.bf16 %v317_v16, %v314_v15  ;;  %v320_v26 = vld [vmem:[#allocation2 + $0x30] sm:$0xff]  ;;  %v20858_v27 = vpack.c.bf16 %v324_v25, %v321_v24  ;;  %v323_v28 = vld [vmem:[#allocation2 + $0x48] sm:$0xff]  ;;  %v685_v30 = vld [vmem:[#allocation2 + $0x80] sm:$0xff]  ;;  %s23693_s21 = sld [smem:[#allocation60_spill]]  ;;  %vm14920_vm4 = vcmask 1043456   ;;  %s23756_s10 = sld [smem:[#allocation69_spill]] }
 0x173   :  { %v682_v29 = vld [vmem:[#allocation2 + $0x68] sm:$0xff]  ;;  %v681_v31 = vld [vmem:[#allocation2 + $0x60] sm:$0xff]  ;;  %v684_v32 = vld [vmem:[#allocation2 + $0x78] sm:$0xff]  ;;  %v20864_v33 = vpack.c.bf16 %v323_v28, %v320_v26  ;;  %v20950_v61 = vsub.s32 0, %v330_v60  ;;  %v20952_v62 = vsub.s32 1, %v330_v60  ;;  %v20980_v59 = vsub.s32 2, %v330_v60 }
 0x174   :  { %v20866_v34 = vpack.c.bf16 %v685_v30, %v682_v29  ;;  %v688_v35 = vld [vmem:[#allocation2 + $0x98] sm:$0xff]  ;;  %v691_v36 = vld [vmem:[#allocation2 + $0xb0] sm:$0xff]  ;;  %v20873_v38 = vpack.c.bf16 %v684_v32, %v681_v31  ;;  %v319_v40 = vld [vmem:[#allocation2 + $0x28] sm:$0xff]  ;;  %s23755_s17 = sld [smem:[#allocation68_spill]]  ;;  %s23759_s22 = sld [smem:[#allocation70_spill]] }
 0x175   :  { %v309_v2 = vld [vmem:[%s23628_s16 + $0x8] sm:$0xff]  ;;  %v312_v3 = vld [vmem:[%s23628_s16 + $0x20] sm:$0xff]  ;;  %v310_v4 = vld [vmem:[%s23628_s16 + $0x10] sm:$0xff]  ;;  %v20877_v41 = vpack.c.bf16 %v691_v36, %v688_v35  ;;  %23630 = vst [vmem:[#allocation40_spill] sm:$0xff] %v20950_v61 }
 0x176   :  { %v20816_v5 = vpack.c.bf16 %v312_v3, %v309_v2  ;;  %v313_v6 = vld [vmem:[%s23628_s16 + $0x28] sm:$0xff]  ;;  %v308_v7 = vld [vmem:[%s23628_s16] sm:$0xff]  ;;  %v311_v8 = vld [vmem:[%s23628_s16 + $0x18] sm:$0xff]  ;;  %23631 = vst [vmem:[#allocation41_spill] sm:$0xff] %v20952_v62 }
 0x177   :  { %v20827_v9 = vpack.c.bf16 %v313_v6, %v310_v4  ;;  %v20829_v10 = vpack.c.bf16 %v311_v8, %v308_v7  ;;  %v307_v11 = vld [vmem:[%s23629_s7] sm:$0xf]  ;;  %v15329_v17 = vld [vmem:[%s23628_s16 + $0x38] sm:$0xff]  ;;  %v15332_v19 = vld [vmem:[%s23628_s16 + $0x50] sm:$0xff]  ;;  %23632 = vst [vmem:[#allocation42_spill] sm:$0xff] %v20980_v59 }
 0x178   :  { %17497 = vmatprep.subr.bf16.mxu0 %v20816_v5  ;;  %v15328_v20 = vld [vmem:[%s23628_s16 + $0x30] sm:$0xff]  ;;  %v15331_v21 = vld [vmem:[%s23628_s16 + $0x48] sm:$0xff]  ;;  %v20854_v22 = vpack.c.bf16 %v15332_v19, %v15329_v17  ;;  %v15327_v37 = vld [vmem:[%s23629_s7 + $0x1c] sm:$0xf] }
 0x179   :  { %17502 = vmatpush3.bf16.msra.mxu1 %v20827_v9  ;;  %17499 = vmatpush1.bf16.msra.mxu0 %v20829_v10  ;;  %v20856_v23 = vpack.c.bf16 %v15331_v21, %v15328_v20  ;;  %v316_v39 = vld [vmem:[#allocation2 + $0x10] sm:$0xff]  ;;  %v690_v43 = vld [vmem:[#allocation2 + $0xa8] sm:$0xff]  ;;  %v322_v46 = vld [vmem:[#allocation2 + $0x40] sm:$0xff] }
 0x17a   :  { %17504 = vmatprep.subr.bf16.mxu1 %v20835_v14  ;;  %17518 = vmatprep.subr.bf16.mxu0 %v20854_v22  ;;  %v687_v42 = vld [vmem:[#allocation2 + $0x90] sm:$0xff]  ;;  %v20882_v44 = vpack.c.bf16 %v319_v40, %v316_v39  ;;  %v325_v47 = vld [vmem:[#allocation2 + $0x58] sm:$0xff]  ;;  %v15330_v49 = vld [vmem:[%s23628_s16 + $0x40] sm:$0xff] }
 0x17b   :  { %v20885_v45 = vpack.c.bf16 %v690_v43, %v687_v42  ;;  %v20892_v48 = vpack.c.bf16 %v325_v47, %v322_v46  ;;  %v15333_v50 = vld [vmem:[%s23628_s16 + $0x58] sm:$0xff]  ;;  %v683_v52 = vld [vmem:[#allocation2 + $0x70] sm:$0xff]  ;;  %v686_v53 = vld [vmem:[#allocation2 + $0x88] sm:$0xff] }
 0x17c   :  { %16263 = vmatmul.mubr.msk.f32.vlgmr.msra.gmra.mrb[0].mxu1 %vm344_vm1, %v307_v11  ;;  %15323 = vmatmul.mubr.msk.f32.vlgmr.msra.gmra.mrb[0].mxu0 %vm344_vm1, %v307_v11  ;;  %v20907_v51 = vpack.c.bf16 %v15333_v50, %v15330_v49  ;;  %v20917_v54 = vpack.c.bf16 %v686_v53, %v683_v52  ;;  %v689_v55 = vld [vmem:[#allocation2 + $0xa0] sm:$0xff]  ;;  %v692_v56 = vld [vmem:[#allocation2 + $0xb8] sm:$0xff]  ;;  %v696_v19 = vld [vmem:[#allocation6 + $0x3] sm:$0x7] }
 0x17d   :  { %17506 = vmatpush1.bf16.msra.mxu1 %v20842_v18  ;;  %17520 = vmatpush1.bf16.msra.mxu0 %v20856_v23  ;;  %v20922_v57 = vpack.c.bf16 %v692_v56, %v689_v55  ;;  %v15338_v58 = vld [vmem:[%s23629_s7 + $0x4] sm:$0xf]  ;;  %v326_v63 = vld [vmem:[#allocation4] sm:$0x7]  ;;  %v861_v25 = vrot.slane %v696_v19, %v20950_v61  ;;  %v865_v31 = vrot.slane %v696_v19, %v20952_v62 }
 0x17e   :  { %17508 = vmatprep.subr.bf16.mxu1 %v20858_v27  ;;  %780 = vmatprep.mubr.f32.mxu0 %v23541_v1  ;;  %v20955_v2 = vrot.slane %v326_v63, %v20950_v61  ;;  %v327_v3 = vld [vmem:[#allocation6] sm:$0x7]  ;;  %v20958_v4 = vrot.slane %v326_v63, %v20952_v62  ;;  %v694_v17 = vld [vmem:[#allocation4 + $0x3] sm:$0x7] }
 0x17f   :  { %17525 = vmatprep.subr.bf16.mxu0 %v20866_v34  ;;  %573 = vmatprep.mubr.f32.mxu1 %v23541_v1  ;;  %v20962_v12 = vrot.slane %v327_v3, %v20950_v61  ;;  %v20966_v16 = vrot.slane %v327_v3, %v20952_v62  ;;  %v701_v24 = vrot.slane %v694_v17, %v20950_v61 }
 0x180   :  { %15334 = vmatmul.mubr.msk.f32.vlgmr.msra.gmra.mrb[2].mxu0 %vm344_vm1, %v15327_v37  ;;  %v705_v30 = vrot.slane %v694_v17, %v20952_v62 }
 0x181   :  { %17510 = vmatpush1.bf16.msra.mxu1 %v20864_v33  ;;  %17527 = vmatpush1.bf16.msra.mxu0 %v20873_v38  ;;  %v20974_v35 = vadd.f32 %v861_v25, %v701_v24 }
 0x182   :  { %937 = vmatprep.mubr.f32.mxu0 %v23541_v1  ;;  %17529 = vmatprep.subr.bf16.mxu0 %v20877_v41  ;;  %v20976_v39 = vadd.f32 %v865_v31, %v705_v30  ;;  %v20994_v31 = vrot.slane %v694_v17, %v20980_v59 }
 0x183   :  { %17511 = vmatprep.subr.bf16.mxu1 %v23543_v0 }
 0x184   :  { %574 = vmatmul.mubr.f32.vlgmr.msra.gmra.mrb[2].mxu1 %v23541_v1 }
 0x185   :  { %17513 = vmatpush3.bf16.msra.mxu1 %v20882_v44  ;;  %16273 = vmatprep.mubr.msk.f32.mxu1 %vm20429_vm0, %v23541_v1 }
 0x186   :  { %17531 = vmatpush1.bf16.msra.mxu0 %v20885_v45  ;;  %17514 = vmatprep.subr.bf16.mxu1 %v23543_v0 }
 0x187   :  { %17539 = vmatprep.subr.bf16.mxu0 %v20816_v5 }
 0x189   :  { %938 = vmatmul.mubr.f32.vlgmr.msra.gmra.mrb[2].mxu0 %v23541_v1  ;;  %17516 = vmatpush3.bf16.msra.mxu1 %v20892_v48 }
 0x18a   :  { %17521 = vmatprep.subr.bf16.mxu1 %v23543_v0  ;;  %17541 = vmatpush1.bf16.msra.mxu0 %v20829_v10 }
 0x18b   :  { %1104 = vmatprep.mubr.f32.mxu0 %v23541_v1  ;;  %17546 = vmatprep.subr.bf16.mxu0 %v20835_v14 }
 0x18c   :  { %16274 = vmatmul.mubr.f32.vlgmr.msra.gmra.mrb[4].mxu1 %v23541_v1 }
 0x18d   :  { %17523 = vmatpush3.bf16.msra.mxu1 %v20907_v51  ;;  %16280 = vmatprep.mubr.msk.f32.mxu1 %vm20429_vm0, %v23541_v1 }
 0x18e   :  { %17532 = vmatprep.subr.bf16.mxu1 %v23543_v0  ;;  %15339 = vmatmul.mubr.msk.f32.vlgmr.msra.gmra.mrb[4].mxu0 %vm344_vm1, %v15338_v58 }
 0x18f   :  { %17548 = vmatpush1.bf16.msra.mxu0 %v20842_v18  ;;  %1248 = vmatprep.mubr.f32.mxu0 %v23541_v1 }
 0x190   :  { %16281 = vmatmul.mubr.msk.f32.vlgmr.msra.gmra.mrb[6].mxu1 %vm344_vm1, %v15327_v37  ;;  %17550 = vmatprep.subr.bf16.mxu0 %v20858_v27 }
 0x191   :  { %17534 = vmatpush3.bf16.msra.mxu1 %v20917_v54  ;;  %16291 = vmatprep.mubr.msk.f32.mxu1 %vm20429_vm0, %v23541_v1 }
 0x192   :  { %17535 = vmatprep.subr.bf16.mxu1 %v23543_v0 }
 0x193   :  { %17552 = vmatpush1.bf16.msra.mxu0 %v20864_v33 }
 0x194   :  { %17560 = vmatprep.subr.bf16.mxu0 %v20854_v22 }
 0x195   :  { %17537 = vmatpush3.bf16.msra.mxu1 %v20922_v57 }
 0x196   :  { %17542 = vmatprep.subr.bf16.mxu1 %v23543_v0 }
 0x198   :  { %16292 = vmatmul.mubr.f32.vlgmr.msra.gmra.mrb[8].mxu1 %v23541_v1 }
 0x199   :  { %17544 = vmatpush3.bf16.msra.mxu1 %v20827_v9  ;;  %16298 = vmatprep.mubr.msk.f32.mxu1 %vm20429_vm0, %v23541_v1 }
 0x19a   :  { %17553 = vmatprep.subr.bf16.mxu1 %v23543_v0 }
 0x19c   :  { %16299 = vmatmul.mubr.msk.f32.vlgmr.msra.gmra.mrb[10].mxu1 %vm344_vm1, %v15338_v58 }
 0x19d   :  { %17555 = vmatpush3.bf16.msra.mxu1 %v20882_v44  ;;  %16309 = vmatprep.mubr.msk.f32.mxu1 %vm20429_vm0, %v23541_v1 }
 0x19e   :  { %17556 = vmatprep.subr.bf16.mxu1 %v23543_v0 }
 0x1a1   :  { %17558 = vmatpush3.bf16.msra.mxu1 %v20892_v48 }
 0x1a2   :  { %17563 = vmatprep.subr.bf16.mxu1 %v23543_v0 }
 0x24f   :  { %v485_v6 = vpop.f32.mrb[0].mxu1  ;;  %v414_v7 = vpop.f32.mrb[0].mxu0 }
 0x250   :  { %v16264_v8 = vpop.f32.mrb[1].mxu1  ;;  %v415_v11 = vadd.f32 %v414_v7, %v20955_v2  ;;  %v416_v13 = vpop.f32.mrb[1].mxu0 }
 0x251   :  { %v417_v15 = vadd.f32 %v416_v13, %v20958_v4 }
 0x252   :  { %v19222_v20 = vadd.f32 %v20962_v12, %v415_v11  ;;  %v20983_v11 = vrot.slane %v327_v3, %v20980_v59 }
 0x253   :  { %v19225_v21 = vadd.f32 %v20966_v16, %v417_v15 }
 0x257   :  { %v575_v26 = vpop.f32.mrb[2].mxu1 }
 0x258   :  { %v19223_v28 = vadd.f32 %v19222_v20, %v575_v26  ;;  %v577_v29 = vpop.f32.mrb[3].mxu1  ;;  %v20990_v26 = vrot.slane %v696_v19, %v20980_v59 }
 0x259   :  { %v19226_v32 = vadd.f32 %v19225_v21, %v577_v29  ;;  %v20986_v21 = vrot.slane %v326_v63, %v20980_v59 }
 0x25a   :  { %v15325_v36 = vmul.f32 -1.442695, %v19223_v28 }
 0x25b   :  { %v15326_v43 = vmul.f32 -1.442695, %v19226_v32  ;;  %v486_v29 = vadd.f32 %v485_v6, %v20986_v21 }
 0x25c   :  { %19525 = vpow2.f32 %v15325_v36  ;;  %v939_v37 = vpop.f32.mrb[2].mxu0 }
 0x25d   :  { %v19228_v40 = vadd.f32 %v20974_v35, %v939_v37  ;;  %v941_v42 = vpop.f32.mrb[3].mxu0 }
 0x25e   :  { %v19230_v49 = vadd.f32 %v20976_v39, %v941_v42 }
 0x25f   :  { %v15336_v46 = vmul.f32 -1.442695, %v19228_v40  ;;  %v646_v47 = vpop.f32.mrb[4].mxu1 }
 0x260   :  { %v16275_v50 = vpop.f32.mrb[5].mxu1  ;;  %v15337_v53 = vmul.f32 -1.442695, %v19230_v49  ;;  %v647_v25 = vadd.f32 %v646_v47, %v20983_v11 }
 0x261   :  { %19527 = vpow2.f32 %v15336_v46 }
 0x262   :  { %19529 = vpow2.f32 %v15326_v43 }
 0x263   :  { %v853_v52 = vpop.f32.mrb[6].mxu1  ;;  %19531 = vpow2.f32 %v15337_v53 }
 0x264   :  { %v16282_v55 = vpop.f32.mrb[7].mxu1  ;;  %v854_v37 = vadd.f32 %v853_v52, %v20994_v31  ;;  %v21009_v52 = vld [vmem:[%s23629_s7 + $0x18] sm:$0xf] }
 0x266   :  { %v19526_v56 = vpop.eup %19525 }
 0x267   :  { %v654_v58 = vadd.f32 1.0, %v19526_v56 }
 0x269   :  { %19533 = vrcp.f32 %v654_v58 }
 0x26b   :  { %v19528_v7 = vpop.eup %19527  ;;  %v1010_v8 = vpop.f32.mrb[8].mxu1 }
 0x26c   :  { %v1018_v13 = vadd.f32 1.0, %v19528_v7  ;;  %v16293_v15 = vpop.f32.mrb[9].mxu1  ;;  %v19530_v20 = vpop.eup %19529  ;;  %v1011_v32 = vadd.f32 %v1010_v8, %v20990_v26 }
 0x26d   :  { %v661_v24 = vadd.f32 1.0, %v19530_v20  ;;  %v19532_v60 = vpop.eup %19531  ;;  %v21066_v15 = vadd.f32 %v20962_v12, %v20955_v2  ;;  %v21070_v20 = vadd.f32 %v20966_v16, %v20958_v4 }
 0x26e   :  { %19535 = vrcp.f32 %v1018_v13  ;;  %v1025_v30 = vadd.f32 1.0, %v19532_v60  ;;  %v21047_v13 = vld [vmem:[%s23629_s7 + $0x8] sm:$0xf] }
 0x26f   :  { %19537 = vrcp.f32 %v661_v24  ;;  %v1177_v7 = vpop.f32.mrb[10].mxu1 }
 0x270   :  { %v16300_v8 = vpop.f32.mrb[11].mxu1 }
 0x273   :  { %v19534_v28 = vpop.eup %19533 }
 0x274   :  { %v664_v3 = vmul.f32 %v19534_v28, %v647_v25 }
 0x276   :  { %v665_v63 = vadd.f32 %v664_v3, %v486_v29 }
 0x278   :  { %v19536_v36 = vpop.eup %19535  ;;  %19539 = vtanh.f32 %v665_v63 }
 0x279   :  { %19541 = vrcp.f32 %v1025_v30  ;;  %v1028_v19 = vmul.f32 %v19536_v36, %v1011_v32  ;;  %v19538_v42 = vpop.eup %19537 }
 0x27a   :  { %v667_v43 = vsub.f32 1.0, %v19538_v42  ;;  %v669_v49 = vmul.f32 0.0, %v19538_v42 }
 0x27b   :  { %v1029_v40 = vadd.f32 %v1028_v19, %v854_v37 }
 0x27d   :  { %19543 = vtanh.f32 %v1029_v40 }
 0x282   :  { %v19540_v6 = vpop.eup %19539 }
 0x283   :  { %v19542_v46 = vpop.eup %19541  ;;  %v668_v47 = vmul.f32 %v19540_v6, %v667_v43 }
 0x284   :  { %v1031_v50 = vsub.f32 1.0, %v19542_v46  ;;  %v1033_v56 = vmul.f32 0.0, %v19542_v46 }
 0x285   :  { %v20998_v17 = vadd.f32 %v669_v49, %v668_v47 }
 0x287   :  { %v19544_v53 = vpop.eup %19543  ;;  %15341 = vmatmul.mubr.msk.f32.vlgmr.msra.gmra.mrb[4].mxu0 %vm505_vm2, %v20998_v17  ;;  %16310 = vmatmul.mubr.msk.f32.vlgmr.msra.gmra.mrb[12].mxu1 %vm505_vm2, %v20998_v17 }
 0x288   :  { %17565 = vmatpush3.bf16.msra.mxu1 %v20907_v51  ;;  %17562 = vmatpush1.bf16.msra.mxu0 %v20856_v23  ;;  %v1032_v55 = vmul.f32 %v19544_v53, %v1031_v50 }
 0x289   :  { %1415 = vmatprep.mubr.f32.mxu0 %v23541_v1  ;;  %16316 = vmatprep.mubr.msk.f32.mxu1 %vm20429_vm0, %v23541_v1 }
 0x28a   :  { %17574 = vmatprep.subr.bf16.mxu1 %v23543_v0  ;;  %17567 = vmatprep.subr.bf16.mxu0 %v20866_v34  ;;  %v21016_v58 = vadd.f32 %v1033_v56, %v1032_v55  ;;  %v1178_v56 = vadd.f32 %v1177_v7, %v20986_v21 }
 0x28b   :  { %15346 = vmatmul.mubr.msk.f32.vlgmr.msra.gmra.mrb[6].mxu0 %vm344_vm1, %v21009_v52  ;;  %16317 = vmatmul.mubr.msk.f32.vlgmr.msra.gmra.mrb[14].mxu1 %vm344_vm1, %v21009_v52 }
 0x28c   :  { %17576 = vmatpush3.bf16.msra.mxu1 %v20917_v54  ;;  %17569 = vmatpush1.bf16.msra.mxu0 %v20873_v38 }
 0x28d   :  { %17577 = vmatprep.subr.bf16.mxu1 %v23543_v0  ;;  %17571 = vmatprep.subr.bf16.mxu0 %v20877_v41 }
 0x28e   :  { %16327 = vmatprep.mubr.msk.f32.mxu1 %vm20429_vm0, %v23541_v1  ;;  %1559 = vmatprep.mubr.f32.mxu0 %v23541_v1 }
 0x290   :  { %17579 = vmatpush3.bf16.msra.mxu1 %v20922_v57  ;;  %17573 = vmatpush1.bf16.msra.mxu0 %v20885_v45 }
 0x291   :  { %17581 = vmatprep.subr.bf16.mxu0 %v20816_v5  ;;  %17584 = vmatprep.subr.bf16.mxu1 %v23543_v0 }
 0x293   :  { %16328 = vmatmul.mubr.msk.f32.vlgmr.msra.gmra.mrb[16].mxu1 %vm505_vm2, %v21016_v58  ;;  %15348 = vmatmul.mubr.msk.f32.vlgmr.msra.gmra.mrb[6].mxu0 %vm505_vm2, %v21016_v58 }
 0x294   :  { %17583 = vmatpush1.bf16.msra.mxu0 %v20829_v10  ;;  %17586 = vmatpush3.bf16.msra.mxu1 %v20827_v9 }
 0x295   :  { %1726 = vmatprep.mubr.f32.mxu0 %v23541_v1  ;;  %16334 = vmatprep.mubr.msk.f32.mxu1 %vm20429_vm0, %v23541_v1 }
 0x296   :  { %17588 = vmatprep.subr.bf16.mxu0 %v20835_v14  ;;  %17595 = vmatprep.subr.bf16.mxu1 %v23543_v0 }
 0x297   :  { %15353 = vmatmul.mubr.msk.f32.vlgmr.msra.gmra.mrb[8].mxu0 %vm344_vm1, %v21047_v13  ;;  %16335 = vmatmul.mubr.msk.f32.vlgmr.msra.gmra.mrb[18].mxu1 %vm344_vm1, %v21047_v13 }
 0x298   :  { %17590 = vmatpush1.bf16.msra.mxu0 %v20842_v18  ;;  %17597 = vmatpush3.bf16.msra.mxu1 %v20882_v44 }
 0x299   :  { %17592 = vmatprep.subr.bf16.mxu0 %v20858_v27  ;;  %17598 = vmatprep.subr.bf16.mxu1 %v23543_v0 }
 0x29a   :  { %1870 = vmatprep.mubr.f32.mxu0 %v23541_v1  ;;  %16345 = vmatprep.mubr.msk.f32.mxu1 %vm20429_vm0, %v23541_v1 }
 0x29c   :  { %17594 = vmatpush1.bf16.msra.mxu0 %v20864_v33  ;;  %17600 = vmatpush3.bf16.msra.mxu1 %v20892_v48 }
 0x29d   :  { %17602 = vmatprep.subr.bf16.mxu0 %v20854_v22  ;;  %17605 = vmatprep.subr.bf16.mxu1 %v23543_v0 }
 0x35a   :  { %v1250_v24 = vpop.f32.mrb[4].mxu0  ;;  %v1321_v25 = vpop.f32.mrb[12].mxu1 }
 0x35b   :  { %v19232_v60 = vadd.f32 %v21066_v15, %v1250_v24  ;;  %v1252_v28 = vpop.f32.mrb[5].mxu0  ;;  %v16311_v29 = vpop.f32.mrb[13].mxu1  ;;  %v1322_v50 = vadd.f32 %v1321_v25, %v20983_v11 }
 0x35c   :  { %v19234_v30 = vadd.f32 %v21070_v20, %v1252_v28 }
 0x35d   :  { %v15343_v3 = vmul.f32 -1.442695, %v19232_v60 }
 0x35e   :  { %v1488_v32 = vpop.f32.mrb[14].mxu1  ;;  %v15344_v36 = vmul.f32 -1.442695, %v19234_v30 }
 0x35f   :  { %19545 = vpow2.f32 %v15343_v3  ;;  %v16318_v63 = vpop.f32.mrb[15].mxu1 }
 0x360   :  { %19547 = vpow2.f32 %v15344_v36  ;;  %v1489_v63 = vadd.f32 %v1488_v32, %v20994_v31  ;;  %v21092_v32 = vld [vmem:[%s23629_s7 + $0x14] sm:$0xf] }
 0x366   :  { %v1632_v2 = vpop.f32.mrb[16].mxu1  ;;  %v1561_v12 = vpop.f32.mrb[6].mxu0 }
 0x367   :  { %v19236_v37 = vadd.f32 %v20974_v35, %v1561_v12  ;;  %v16329_v4 = vpop.f32.mrb[17].mxu1  ;;  %v1563_v16 = vpop.f32.mrb[7].mxu0  ;;  %v1633_v3 = vadd.f32 %v1632_v2, %v20990_v26 }
 0x368   :  { %v19238_v43 = vadd.f32 %v20976_v39, %v1563_v16 }
 0x369   :  { %v19546_v19 = vpop.eup %19545  ;;  %v15350_v40 = vmul.f32 -1.442695, %v19236_v37 }
 0x36a   :  { %v1329_v42 = vadd.f32 1.0, %v19546_v19  ;;  %v15351_v6 = vmul.f32 -1.442695, %v19238_v43  ;;  %v19548_v46 = vpop.eup %19547 }
 0x36b   :  { %19549 = vpow2.f32 %v15350_v40  ;;  %v1336_v47 = vadd.f32 1.0, %v19548_v46  ;;  %v1799_v46 = vpop.f32.mrb[18].mxu1 }
 0x36c   :  { %19551 = vrcp.f32 %v1329_v42 }
 0x36d   :  { %19553 = vpow2.f32 %v15351_v6 }
 0x36e   :  { %19555 = vrcp.f32 %v1336_v47  ;;  %v16336_v47 = vpop.f32.mrb[19].mxu1 }
 0x375   :  { %v19550_v49 = vpop.eup %19549 }
 0x376   :  { %v19552_v53 = vpop.eup %19551  ;;  %v1640_v55 = vadd.f32 1.0, %v19550_v49  ;;  %v21131_v49 = vld [vmem:[%s23629_s7 + $0xc] sm:$0xf] }
 0x377   :  { %v1339_v8 = vmul.f32 %v19552_v53, %v1322_v50  ;;  %v19554_v60 = vpop.eup %19553 }
 0x378   :  { %19557 = vrcp.f32 %v1640_v55  ;;  %v1647_v28 = vadd.f32 1.0, %v19554_v60  ;;  %v19556_v29 = vpop.eup %19555 }
 0x379   :  { %v1340_v24 = vadd.f32 %v1339_v8, %v1178_v56  ;;  %v1342_v25 = vsub.f32 1.0, %v19556_v29  ;;  %v1344_v7 = vmul.f32 %v19556_v29, %v20998_v17 }
 0x37b   :  { %19559 = vtanh.f32 %v1340_v24 }
 0x37c   :  { %19561 = vrcp.f32 %v1647_v28 }
 0x382   :  { %v19558_v30 = vpop.eup %19557 }
 0x383   :  { %v1650_v36 = vmul.f32 %v19558_v30, %v1633_v3 }
 0x385   :  { %v19560_v12 = vpop.eup %19559  ;;  %v1651_v37 = vadd.f32 %v1650_v36, %v1489_v63 }
 0x386   :  { %v1343_v4 = vmul.f32 %v19560_v12, %v1342_v25  ;;  %v19562_v2 = vpop.eup %19561 }
 0x387   :  { %19563 = vtanh.f32 %v1651_v37  ;;  %v1653_v19 = vsub.f32 1.0, %v19562_v2  ;;  %v1655_v43 = vmul.f32 %v19562_v2, %v21016_v58 }
 0x388   :  { %v21081_v16 = vadd.f32 %v1344_v7, %v1343_v4 }
 0x38a   :  { %15355 = vmatmul.mubr.msk.f32.vlgmr.msra.gmra.mrb[8].mxu0 %vm505_vm2, %v21081_v16  ;;  %16346 = vmatmul.mubr.msk.f32.vlgmr.msra.gmra.mrb[20].mxu1 %vm505_vm2, %v21081_v16 }
 0x38b   :  { %17604 = vmatpush1.bf16.msra.mxu0 %v20856_v23  ;;  %17607 = vmatpush3.bf16.msra.mxu1 %v20907_v51 }
 0x38c   :  { %2037 = vmatprep.mubr.f32.mxu0 %v23541_v1  ;;  %16352 = vmatprep.mubr.msk.f32.mxu1 %vm20429_vm0, %v23541_v1 }
 0x38d   :  { %17609 = vmatprep.subr.bf16.mxu0 %v20866_v34  ;;  %17616 = vmatprep.subr.bf16.mxu1 %v23543_v0 }
 0x38e   :  { %15360 = vmatmul.mubr.msk.f32.vlgmr.msra.gmra.mrb[10].mxu0 %vm344_vm1, %v21092_v32  ;;  %16353 = vmatmul.mubr.msk.f32.vlgmr.msra.gmra.mrb[22].mxu1 %vm344_vm1, %v21092_v32 }
 0x38f   :  { %17611 = vmatpush1.bf16.msra.mxu0 %v20873_v38  ;;  %17618 = vmatpush3.bf16.msra.mxu1 %v20917_v54 }
 0x390   :  { %17613 = vmatprep.subr.bf16.mxu0 %v20877_v41  ;;  %17619 = vmatprep.subr.bf16.mxu1 %v23543_v0 }
 0x391   :  { %v19564_v40 = vpop.eup %19563  ;;  %2181 = vmatprep.mubr.f32.mxu0 %v23541_v1  ;;  %16363 = vmatprep.mubr.msk.f32.mxu1 %vm20429_vm0, %v23541_v1 }
 0x392   :  { %v1654_v42 = vmul.f32 %v19564_v40, %v1653_v19 }
 0x393   :  { %17615 = vmatpush1.bf16.msra.mxu0 %v20885_v45  ;;  %17621 = vmatpush3.bf16.msra.mxu1 %v20922_v57 }
 0x394   :  { %v21113_v6 = vadd.f32 %v1655_v43, %v1654_v42  ;;  %17623 = vmatprep.subr.bf16.mxu0 %v20816_v5  ;;  %17626 = vmatprep.subr.bf16.mxu1 %v23543_v0 }
 0x396   :  { %15362 = vmatmul.mubr.msk.f32.vlgmr.msra.gmra.mrb[10].mxu0 %vm505_vm2, %v21113_v6  ;;  %16364 = vmatmul.mubr.msk.f32.vlgmr.msra.gmra.mrb[24].mxu1 %vm505_vm2, %v21113_v6 }
 0x397   :  { %17625 = vmatpush1.bf16.msra.mxu0 %v20829_v10  ;;  %17628 = vmatpush3.bf16.msra.mxu1 %v20827_v9 }
 0x398   :  { %2348 = vmatprep.mubr.f32.mxu0 %v23541_v1  ;;  %16370 = vmatprep.mubr.msk.f32.mxu1 %vm20429_vm0, %v23541_v1 }
 0x399   :  { %17630 = vmatprep.subr.bf16.mxu0 %v20835_v14  ;;  %17637 = vmatprep.subr.bf16.mxu1 %v23543_v0 }
 0x39a   :  { %15367 = vmatmul.mubr.msk.f32.vlgmr.msra.gmra.mrb[12].mxu0 %vm344_vm1, %v21131_v49  ;;  %16371 = vmatmul.mubr.msk.f32.vlgmr.msra.gmra.mrb[26].mxu1 %vm344_vm1, %v21131_v49 }
 0x39b   :  { %17632 = vmatpush1.bf16.msra.mxu0 %v20842_v18  ;;  %17639 = vmatpush3.bf16.msra.mxu1 %v20882_v44 }
 0x39c   :  { %17634 = vmatprep.subr.bf16.mxu0 %v20858_v27  ;;  %17640 = vmatprep.subr.bf16.mxu1 %v23543_v0 }
 0x39d   :  { %2492 = vmatprep.mubr.f32.mxu0 %v23541_v1  ;;  %16381 = vmatprep.mubr.msk.f32.mxu1 %vm20429_vm0, %v23541_v1 }
 0x39f   :  { %17636 = vmatpush1.bf16.msra.mxu0 %v20864_v33  ;;  %17642 = vmatpush3.bf16.msra.mxu1 %v20892_v48 }
 0x3a0   :  { %17644 = vmatprep.subr.bf16.mxu0 %v20854_v22  ;;  %17647 = vmatprep.subr.bf16.mxu1 %v23543_v0 }
 0x45d   :  { %v1872_v50 = vpop.f32.mrb[8].mxu0  ;;  %v1943_v53 = vpop.f32.mrb[20].mxu1 }
 0x45e   :  { %v19240_v55 = vadd.f32 %v21066_v15, %v1872_v50  ;;  %v1874_v56 = vpop.f32.mrb[9].mxu0  ;;  %v16347_v8 = vpop.f32.mrb[21].mxu1  ;;  %v1944_v47 = vadd.f32 %v1943_v53, %v20983_v11 }
 0x45f   :  { %v19242_v60 = vadd.f32 %v21070_v20, %v1874_v56  ;;  %v1800_v56 = vadd.f32 %v1799_v46, %v20986_v21 }
 0x460   :  { %v15357_v24 = vmul.f32 -1.442695, %v19240_v55 }
 0x461   :  { %v2110_v28 = vpop.f32.mrb[22].mxu1  ;;  %v15358_v3 = vmul.f32 -1.442695, %v19242_v60 }
 0x462   :  { %19565 = vpow2.f32 %v15357_v24  ;;  %v16354_v29 = vpop.f32.mrb[23].mxu1 }
 0x463   :  { %19567 = vpow2.f32 %v15358_v3 }
 0x469   :  { %v2183_v30 = vpop.f32.mrb[10].mxu0  ;;  %v2254_v63 = vpop.f32.mrb[24].mxu1 }
 0x46a   :  { %v19244_v36 = vadd.f32 %v20974_v35, %v2183_v30  ;;  %v2185_v25 = vpop.f32.mrb[11].mxu0  ;;  %v16365_v12 = vpop.f32.mrb[25].mxu1  ;;  %v2255_v30 = vadd.f32 %v2254_v63, %v20990_v26 }
 0x46b   :  { %v19246_v2 = vadd.f32 %v20976_v39, %v2185_v25  ;;  %v2111_v25 = vadd.f32 %v2110_v28, %v20994_v31  ;;  %v15373_v28 = vld [vmem:[%s23629_s7 + $0x10] sm:$0xf] }
 0x46c   :  { %v19566_v37 = vpop.eup %19565  ;;  %v15364_v4 = vmul.f32 -1.442695, %v19244_v36 }
 0x46d   :  { %v1951_v7 = vadd.f32 1.0, %v19566_v37  ;;  %v15365_v19 = vmul.f32 -1.442695, %v19246_v2  ;;  %v19568_v40 = vpop.eup %19567 }
 0x46e   :  { %19569 = vpow2.f32 %v15364_v4  ;;  %v1958_v42 = vadd.f32 1.0, %v19568_v40 }
 0x46f   :  { %19571 = vrcp.f32 %v1951_v7 }
 0x470   :  { %19573 = vpow2.f32 %v15365_v19 }
 0x471   :  { %19575 = vrcp.f32 %v1958_v42 }
 0x478   :  { %v19570_v43 = vpop.eup %19569 }
 0x479   :  { %v19572_v50 = vpop.eup %19571  ;;  %v2262_v55 = vadd.f32 1.0, %v19570_v43 }
 0x47a   :  { %v1961_v8 = vmul.f32 %v19572_v50, %v1944_v47  ;;  %v19574_v60 = vpop.eup %19573  ;;  %v2421_v50 = vpop.f32.mrb[26].mxu1 }
 0x47b   :  { %19577 = vrcp.f32 %v2262_v55  ;;  %v2269_v29 = vadd.f32 1.0, %v19574_v60  ;;  %v19576_v3 = vpop.eup %19575  ;;  %v16372_v55 = vpop.f32.mrb[27].mxu1 }
 0x47c   :  { %v1962_v24 = vadd.f32 %v1961_v8, %v1800_v56  ;;  %v1964_v53 = vsub.f32 1.0, %v19576_v3  ;;  %v1966_v46 = vmul.f32 %v19576_v3, %v21081_v16 }
 0x47e   :  { %19579 = vtanh.f32 %v1962_v24 }
 0x47f   :  { %19581 = vrcp.f32 %v2269_v29 }
 0x485   :  { %v19578_v36 = vpop.eup %19577 }
 0x486   :  { %v2272_v12 = vmul.f32 %v19578_v36, %v2255_v30 }
 0x488   :  { %v19580_v37 = vpop.eup %19579  ;;  %v2273_v4 = vadd.f32 %v2272_v12, %v2111_v25 }
 0x489   :  { %v1965_v7 = vmul.f32 %v19580_v37, %v1964_v53  ;;  %v19582_v63 = vpop.eup %19581 }
 0x48a   :  { %19583 = vtanh.f32 %v2273_v4  ;;  %v2275_v19 = vsub.f32 1.0, %v19582_v63  ;;  %v2277_v43 = vmul.f32 %v19582_v63, %v21113_v6 }
 0x48b   :  { %v21157_v2 = vadd.f32 %v1966_v46, %v1965_v7 }
 0x48d   :  { %15369 = vmatmul.mubr.msk.f32.vlgmr.msra.gmra.mrb[12].mxu0 %vm505_vm2, %v21157_v2  ;;  %16382 = vmatmul.mubr.msk.f32.vlgmr.msra.gmra.mrb[28].mxu1 %vm505_vm2, %v21157_v2 }
 0x48e   :  { %17646 = vmatpush1.bf16.msra.mxu0 %v20856_v23  ;;  %17649 = vmatpush3.bf16.msra.mxu1 %v20907_v51 }
 0x48f   :  { %2659 = vmatprep.mubr.f32.mxu0 %v23541_v1  ;;  %16388 = vmatprep.mubr.msk.f32.mxu1 %vm20429_vm0, %v23541_v1 }
 0x490   :  { %17651 = vmatprep.subr.bf16.mxu0 %v20866_v34  ;;  %17658 = vmatprep.subr.bf16.mxu1 %v23543_v0 }
 0x491   :  { %15374 = vmatmul.mubr.msk.f32.vlgmr.msra.gmra.mrb[14].mxu0 %vm344_vm1, %v15373_v28  ;;  %16389 = vmatmul.mubr.msk.f32.vlgmr.msra.gmra.mrb[30].mxu1 %vm344_vm1, %v15373_v28 }
 0x492   :  { %17653 = vmatpush1.bf16.msra.mxu0 %v20873_v38  ;;  %17660 = vmatpush3.bf16.msra.mxu1 %v20917_v54 }
 0x493   :  { %17655 = vmatprep.subr.bf16.mxu0 %v20877_v41  ;;  %17661 = vmatprep.subr.bf16.mxu1 %v23543_v0 }
 0x494   :  { %v19584_v40 = vpop.eup %19583  ;;  %2803 = vmatprep.mubr.f32.mxu0 %v23541_v1  ;;  %16399 = vmatprep.mubr.msk.f32.mxu1 %vm20429_vm0, %v23541_v1 }
 0x495   :  { %v2276_v42 = vmul.f32 %v19584_v40, %v2275_v19 }
 0x496   :  { %17657 = vmatpush1.bf16.msra.mxu0 %v20885_v45  ;;  %17663 = vmatpush3.bf16.msra.mxu1 %v20922_v57 }
 0x497   :  { %v21185_v47 = vadd.f32 %v2277_v43, %v2276_v42  ;;  %17665 = vmatprep.subr.bf16.mxu0 %v20816_v5  ;;  %17668 = vmatprep.subr.bf16.mxu1 %v23543_v0 }
 0x499   :  { %15376 = vmatmul.mubr.msk.f32.vlgmr.msra.gmra.mrb[14].mxu0 %vm505_vm2, %v21185_v47  ;;  %16400 = vmatmul.mubr.msk.f32.vlgmr.msra.gmra.mrb[32].mxu1 %vm505_vm2, %v21185_v47 }
 0x49a   :  { %17667 = vmatpush1.bf16.msra.mxu0 %v20829_v10  ;;  %17670 = vmatpush3.bf16.msra.mxu1 %v20827_v9 }
 0x49b   :  { %2965 = vmatprep.mubr.f32.mxu0 %v23541_v1  ;;  %16406 = vmatprep.mubr.msk.f32.mxu1 %vm20429_vm0, %v23541_v1 }
 0x49c   :  { %17672 = vmatprep.subr.bf16.mxu0 %v20835_v14  ;;  %17679 = vmatprep.subr.bf16.mxu1 %v23543_v0 }
 0x49d   :  { %15380 = vmatmul.mubr.msk.f32.vlgmr.msra.gmra.mrb[16].mxu0 %vm344_vm1, %v15373_v28  ;;  %16407 = vmatmul.mubr.msk.f32.vlgmr.msra.gmra.mrb[34].mxu1 %vm344_vm1, %v15373_v28 }
 0x49e   :  { %17674 = vmatpush1.bf16.msra.mxu0 %v20842_v18  ;;  %17681 = vmatpush3.bf16.msra.mxu1 %v20882_v44 }
 0x49f   :  { %17676 = vmatprep.subr.bf16.mxu0 %v20858_v27  ;;  %17682 = vmatprep.subr.bf16.mxu1 %v23543_v0 }
 0x4a0   :  { %3109 = vmatprep.mubr.f32.mxu0 %v23541_v1  ;;  %16417 = vmatprep.mubr.msk.f32.mxu1 %vm20429_vm0, %v23541_v1 }
 0x4a2   :  { %17678 = vmatpush1.bf16.msra.mxu0 %v20864_v33  ;;  %17684 = vmatpush3.bf16.msra.mxu1 %v20892_v48 }
 0x4a3   :  { %17686 = vmatprep.subr.bf16.mxu0 %v20854_v22  ;;  %17689 = vmatprep.subr.bf16.mxu1 %v23543_v0 }
 0x560   :  { %v2494_v56 = vpop.f32.mrb[12].mxu0  ;;  %v2565_v8 = vpop.f32.mrb[28].mxu1 }
 0x561   :  { %v19248_v24 = vadd.f32 %v21066_v15, %v2494_v56  ;;  %v2496_v60 = vpop.f32.mrb[13].mxu0  ;;  %v16383_v29 = vpop.f32.mrb[29].mxu1 }
 0x562   :  { %v19250_v30 = vadd.f32 %v21070_v20, %v2496_v60  ;;  %v2566_v29 = vadd.f32 %v2565_v8, %v20983_v11 }
 0x563   :  { %v15371_v3 = vmul.f32 -1.442695, %v19248_v24 }
 0x564   :  { %v2732_v36 = vpop.f32.mrb[30].mxu1  ;;  %v15372_v12 = vmul.f32 -1.442695, %v19250_v30 }
 0x565   :  { %19585 = vpow2.f32 %v15371_v3  ;;  %v16390_v25 = vpop.f32.mrb[31].mxu1 }
 0x566   :  { %19587 = vpow2.f32 %v15372_v12  ;;  %v2422_v25 = vadd.f32 %v2421_v50, %v20986_v21 }
 0x56c   :  { %v2805_v53 = vpop.f32.mrb[14].mxu0  ;;  %v2876_v37 = vpop.f32.mrb[32].mxu1 }
 0x56d   :  { %v19252_v4 = vadd.f32 %v20974_v35, %v2805_v53  ;;  %v2807_v7 = vpop.f32.mrb[15].mxu0  ;;  %v16401_v46 = vpop.f32.mrb[33].mxu1 }
 0x56e   :  { %v19254_v40 = vadd.f32 %v20976_v39, %v2807_v7 }
 0x56f   :  { %v19586_v28 = vpop.eup %19585  ;;  %v15378_v63 = vmul.f32 -1.442695, %v19252_v4 }
 0x570   :  { %v2573_v19 = vadd.f32 1.0, %v19586_v28  ;;  %v21217_v42 = vpop.f32.mrb[34].mxu1  ;;  %v15379_v55 = vmul.f32 -1.442695, %v19254_v40  ;;  %v19588_v56 = vpop.eup %19587  ;;  %v2877_v28 = vadd.f32 %v2876_v37, %v20990_v26 }
 0x571   :  { %19589 = vpow2.f32 %v15378_v63  ;;  %v16408_v43 = vpop.f32.mrb[35].mxu1  ;;  %v2580_v24 = vadd.f32 1.0, %v19588_v56 }
 0x572   :  { %19591 = vrcp.f32 %v2573_v19  ;;  %v2733_v19 = vadd.f32 %v2732_v36, %v20994_v31 }
 0x573   :  { %19593 = vpow2.f32 %v15379_v55 }
 0x574   :  { %19595 = vrcp.f32 %v2580_v24 }
 0x57b   :  { %v19590_v60 = vpop.eup %19589 }
 0x57c   :  { %v19592_v3 = vpop.eup %19591  ;;  %v2884_v30 = vadd.f32 1.0, %v19590_v60 }
 0x57d   :  { %v2583_v12 = vmul.f32 %v19592_v3, %v2566_v29  ;;  %v19594_v4 = vpop.eup %19593 }
 0x57e   :  { %19597 = vrcp.f32 %v2884_v30  ;;  %v2891_v7 = vadd.f32 1.0, %v19594_v4  ;;  %v19596_v46 = vpop.eup %19595 }
 0x57f   :  { %v2584_v53 = vadd.f32 %v2583_v12, %v2422_v25  ;;  %v2586_v8 = vsub.f32 1.0, %v19596_v46  ;;  %v2588_v50 = vmul.f32 %v19596_v46, %v21157_v2 }
 0x581   :  { %19599 = vtanh.f32 %v2584_v53 }
 0x582   :  { %19601 = vrcp.f32 %v2891_v7 }
 0x588   :  { %v19598_v63 = vpop.eup %19597 }
 0x589   :  { %v2894_v40 = vmul.f32 %v19598_v63, %v2877_v28 }
 0x58b   :  { %v19600_v43 = vpop.eup %19599  ;;  %v2895_v55 = vadd.f32 %v2894_v40, %v2733_v19 }
 0x58c   :  { %v2587_v56 = vmul.f32 %v19600_v43, %v2586_v8  ;;  %v19602_v36 = vpop.eup %19601 }
 0x58d   :  { %19603 = vtanh.f32 %v2895_v55  ;;  %v2897_v37 = vsub.f32 1.0, %v19602_v36  ;;  %v2899_v3 = vmul.f32 %v19602_v36, %v21185_v47 }
 0x58e   :  { %v21224_v24 = vadd.f32 %v2588_v50, %v2587_v56 }
 0x590   :  { %23633 = vst [vmem:[#allocation43_spill] sm:$0xff] %v21224_v24  ;;  %15382 = vmatmul.mubr.msk.f32.vlgmr.msra.gmra.mrb[16].mxu0 %vm505_vm2, %v21224_v24  ;;  %16418 = vmatmul.mubr.msk.f32.vlgmr.msra.gmra.mrb[36].mxu1 %vm505_vm2, %v21224_v24 }
 0x591   :  { %17688 = vmatpush1.bf16.msra.mxu0 %v20856_v23  ;;  %17691 = vmatpush3.bf16.msra.mxu1 %v20907_v51 }
 0x592   :  { %3271 = vmatprep.mubr.f32.mxu0 %v23541_v1  ;;  %16424 = vmatprep.mubr.msk.f32.mxu1 %vm20429_vm0, %v23541_v1 }
 0x593   :  { %17693 = vmatprep.subr.bf16.mxu0 %v20866_v34  ;;  %17700 = vmatprep.subr.bf16.mxu1 %v23543_v0 }
 0x594   :  { %15386 = vmatmul.mubr.msk.f32.vlgmr.msra.gmra.mrb[18].mxu0 %vm344_vm1, %v21131_v49  ;;  %16425 = vmatmul.mubr.msk.f32.vlgmr.msra.gmra.mrb[38].mxu1 %vm344_vm1, %v21131_v49 }
 0x595   :  { %17695 = vmatpush1.bf16.msra.mxu0 %v20873_v38  ;;  %17702 = vmatpush3.bf16.msra.mxu1 %v20917_v54 }
 0x596   :  { %17697 = vmatprep.subr.bf16.mxu0 %v20877_v41  ;;  %17703 = vmatprep.subr.bf16.mxu1 %v23543_v0 }
 0x597   :  { %v19604_v60 = vpop.eup %19603  ;;  %3415 = vmatprep.mubr.f32.mxu0 %v23541_v1  ;;  %16435 = vmatprep.mubr.msk.f32.mxu1 %vm20429_vm0, %v23541_v1 }
 0x598   :  { %v2898_v29 = vmul.f32 %v19604_v60, %v2897_v37 }
 0x599   :  { %17699 = vmatpush1.bf16.msra.mxu0 %v20885_v45  ;;  %17705 = vmatpush3.bf16.msra.mxu1 %v20922_v57 }
 0x59a   :  { %v21251_v49 = vadd.f32 %v2899_v3, %v2898_v29  ;;  %17707 = vmatprep.subr.bf16.mxu0 %v20816_v5  ;;  %17710 = vmatprep.subr.bf16.mxu1 %v23543_v0 }
 0x59c   :  { %15388 = vmatmul.mubr.msk.f32.vlgmr.msra.gmra.mrb[18].mxu0 %vm505_vm2, %v21251_v49  ;;  %16436 = vmatmul.mubr.msk.f32.vlgmr.msra.gmra.mrb[40].mxu1 %vm505_vm2, %v21251_v49 }
 0x59d   :  { %17709 = vmatpush1.bf16.msra.mxu0 %v20829_v10  ;;  %17712 = vmatpush3.bf16.msra.mxu1 %v20827_v9 }
 0x59e   :  { %3577 = vmatprep.mubr.f32.mxu0 %v23541_v1  ;;  %16442 = vmatprep.mubr.msk.f32.mxu1 %vm20429_vm0, %v23541_v1 }
 0x59f   :  { %17714 = vmatprep.subr.bf16.mxu0 %v20835_v14  ;;  %17721 = vmatprep.subr.bf16.mxu1 %v23543_v0 }
 0x5a0   :  { %15392 = vmatmul.mubr.msk.f32.vlgmr.msra.gmra.mrb[20].mxu0 %vm344_vm1, %v21092_v32  ;;  %16443 = vmatmul.mubr.msk.f32.vlgmr.msra.gmra.mrb[42].mxu1 %vm344_vm1, %v21092_v32 }
 0x5a1   :  { %17716 = vmatpush1.bf16.msra.mxu0 %v20842_v18  ;;  %17723 = vmatpush3.bf16.msra.mxu1 %v20882_v44 }
 0x5a2   :  { %17718 = vmatprep.subr.bf16.mxu0 %v20858_v27  ;;  %17724 = vmatprep.subr.bf16.mxu1 %v23543_v0 }
 0x5a3   :  { %3721 = vmatprep.mubr.f32.mxu0 %v23541_v1  ;;  %16453 = vmatprep.mubr.msk.f32.mxu1 %vm20429_vm0, %v23541_v1 }
 0x5a5   :  { %17720 = vmatpush1.bf16.msra.mxu0 %v20864_v33  ;;  %17726 = vmatpush3.bf16.msra.mxu1 %v20892_v48 }
 0x5a6   :  { %17728 = vmatprep.subr.bf16.mxu0 %v20854_v22  ;;  %17731 = vmatprep.subr.bf16.mxu1 %v23543_v0 }
 0x663   :  { %v3111_v32 = vpop.f32.mrb[16].mxu0  ;;  %v3182_v30 = vpop.f32.mrb[36].mxu1 }
 0x664   :  { %v19256_v25 = vadd.f32 %v21066_v15, %v3111_v32  ;;  %v3113_v12 = vpop.f32.mrb[17].mxu0  ;;  %v16419_v53 = vpop.f32.mrb[37].mxu1 }
 0x665   :  { %v19258_v7 = vadd.f32 %v21070_v20, %v3113_v12  ;;  %v3183_v53 = vadd.f32 %v3182_v30, %v20983_v11 }
 0x666   :  { %v15384_v4 = vmul.f32 -1.442695, %v19256_v25 }
 0x667   :  { %v3344_v46 = vpop.f32.mrb[38].mxu1  ;;  %v15385_v63 = vmul.f32 -1.442695, %v19258_v7 }
 0x668   :  { %19605 = vpow2.f32 %v15384_v4  ;;  %v16426_v28 = vpop.f32.mrb[39].mxu1 }
 0x669   :  { %19607 = vpow2.f32 %v15385_v63  ;;  %v3039_v28 = vadd.f32 %v21217_v42, %v20986_v21 }
 0x66f   :  { %v3417_v19 = vpop.f32.mrb[18].mxu0  ;;  %v3488_v40 = vpop.f32.mrb[40].mxu1 }
 0x670   :  { %v19260_v8 = vadd.f32 %v20974_v35, %v3417_v19  ;;  %v3419_v43 = vpop.f32.mrb[19].mxu0  ;;  %v16437_v55 = vpop.f32.mrb[41].mxu1 }
 0x671   :  { %v19262_v37 = vadd.f32 %v20976_v39, %v3419_v43 }
 0x672   :  { %v19606_v56 = vpop.eup %19605  ;;  %v15390_v50 = vmul.f32 -1.442695, %v19260_v8 }
 0x673   :  { %v3190_v36 = vadd.f32 1.0, %v19606_v56  ;;  %v21285_v60 = vpop.f32.mrb[42].mxu1  ;;  %v15391_v3 = vmul.f32 -1.442695, %v19262_v37  ;;  %v19608_v32 = vpop.eup %19607  ;;  %v3489_v56 = vadd.f32 %v3488_v40, %v20990_v26 }
 0x674   :  { %19609 = vpow2.f32 %v15390_v50  ;;  %v16444_v29 = vpop.f32.mrb[43].mxu1  ;;  %v3197_v25 = vadd.f32 1.0, %v19608_v32 }
 0x675   :  { %19611 = vrcp.f32 %v3190_v36  ;;  %v3345_v36 = vadd.f32 %v3344_v46, %v20994_v31 }
 0x676   :  { %19613 = vpow2.f32 %v15391_v3 }
 0x677   :  { %19615 = vrcp.f32 %v3197_v25 }
 0x67e   :  { %v19610_v12 = vpop.eup %19609 }
 0x67f   :  { %v19612_v4 = vpop.eup %19611  ;;  %v3496_v7 = vadd.f32 1.0, %v19610_v12 }
 0x680   :  { %v3200_v63 = vmul.f32 %v19612_v4, %v3183_v53  ;;  %v19614_v8 = vpop.eup %19613 }
 0x681   :  { %19617 = vrcp.f32 %v3496_v7  ;;  %v3503_v43 = vadd.f32 1.0, %v19614_v8  ;;  %v19616_v55 = vpop.eup %19615 }
 0x682   :  { %v3201_v19 = vadd.f32 %v3200_v63, %v3039_v28  ;;  %v3203_v30 = vsub.f32 1.0, %v19616_v55  ;;  %v3205_v42 = vmul.f32 %v19616_v55, %v21224_v24 }
 0x684   :  { %19619 = vtanh.f32 %v3201_v19 }
 0x685   :  { %19621 = vrcp.f32 %v3503_v43 }
 0x68b   :  { %v19618_v50 = vpop.eup %19617 }
 0x68c   :  { %v3506_v37 = vmul.f32 %v19618_v50, %v3489_v56 }
 0x68e   :  { %v19620_v29 = vpop.eup %19619  ;;  %v3507_v3 = vadd.f32 %v3506_v37, %v3345_v36 }
 0x68f   :  { %v3204_v32 = vmul.f32 %v19620_v29, %v3203_v30  ;;  %v19622_v46 = vpop.eup %19621 }
 0x690   :  { %19623 = vtanh.f32 %v3507_v3  ;;  %v3509_v40 = vsub.f32 1.0, %v19622_v46  ;;  %v3511_v4 = vmul.f32 %v19622_v46, %v21251_v49 }
 0x691   :  { %v21293_v25 = vadd.f32 %v3205_v42, %v3204_v32 }
 0x693   :  { %23634 = vst [vmem:[#allocation44_spill] sm:$0xff] %v21293_v25  ;;  %15394 = vmatmul.mubr.msk.f32.vlgmr.msra.gmra.mrb[20].mxu0 %vm505_vm2, %v21293_v25  ;;  %16454 = vmatmul.mubr.msk.f32.vlgmr.msra.gmra.mrb[44].mxu1 %vm505_vm2, %v21293_v25 }
 0x694   :  { %17730 = vmatpush1.bf16.msra.mxu0 %v20856_v23  ;;  %17733 = vmatpush3.bf16.msra.mxu1 %v20907_v51 }
 0x695   :  { %3883 = vmatprep.mubr.f32.mxu0 %v23541_v1  ;;  %16460 = vmatprep.mubr.msk.f32.mxu1 %vm20429_vm0, %v23541_v1 }
 0x696   :  { %17735 = vmatprep.subr.bf16.mxu0 %v20866_v34  ;;  %17742 = vmatprep.subr.bf16.mxu1 %v23543_v0 }
 0x697   :  { %15398 = vmatmul.mubr.msk.f32.vlgmr.msra.gmra.mrb[22].mxu0 %vm344_vm1, %v21047_v13  ;;  %16461 = vmatmul.mubr.msk.f32.vlgmr.msra.gmra.mrb[46].mxu1 %vm344_vm1, %v21047_v13 }
 0x698   :  { %17737 = vmatpush1.bf16.msra.mxu0 %v20873_v38  ;;  %17744 = vmatpush3.bf16.msra.mxu1 %v20917_v54 }
 0x699   :  { %17739 = vmatprep.subr.bf16.mxu0 %v20877_v41  ;;  %17745 = vmatprep.subr.bf16.mxu1 %v23543_v0 }
 0x69a   :  { %v19624_v12 = vpop.eup %19623  ;;  %4027 = vmatprep.mubr.f32.mxu0 %v23541_v1  ;;  %16471 = vmatprep.mubr.msk.f32.mxu1 %vm20429_vm0, %v23541_v1 }
 0x69b   :  { %v3510_v53 = vmul.f32 %v19624_v12, %v3509_v40 }
 0x69c   :  { %17741 = vmatpush1.bf16.msra.mxu0 %v20885_v45  ;;  %17747 = vmatpush3.bf16.msra.mxu1 %v20922_v57 }
 0x69d   :  { %v21320_v13 = vadd.f32 %v3511_v4, %v3510_v53  ;;  %17749 = vmatprep.subr.bf16.mxu0 %v20816_v5  ;;  %17752 = vmatprep.subr.bf16.mxu1 %v23543_v0 }
 0x69f   :  { %15400 = vmatmul.mubr.msk.f32.vlgmr.msra.gmra.mrb[22].mxu0 %vm505_vm2, %v21320_v13  ;;  %16472 = vmatmul.mubr.msk.f32.vlgmr.msra.gmra.mrb[48].mxu1 %vm505_vm2, %v21320_v13 }
 0x6a0   :  { %17751 = vmatpush1.bf16.msra.mxu0 %v20829_v10  ;;  %17754 = vmatpush3.bf16.msra.mxu1 %v20827_v9 }
 0x6a1   :  { %4189 = vmatprep.mubr.f32.mxu0 %v23541_v1  ;;  %16478 = vmatprep.mubr.msk.f32.mxu1 %vm20429_vm0, %v23541_v1 }
 0x6a2   :  { %17756 = vmatprep.subr.bf16.mxu0 %v20835_v14  ;;  %17763 = vmatprep.subr.bf16.mxu1 %v23543_v0 }
 0x6a3   :  { %15404 = vmatmul.mubr.msk.f32.vlgmr.msra.gmra.mrb[24].mxu0 %vm344_vm1, %v21009_v52  ;;  %16479 = vmatmul.mubr.msk.f32.vlgmr.msra.gmra.mrb[50].mxu1 %vm344_vm1, %v21009_v52 }
 0x6a4   :  { %17758 = vmatpush1.bf16.msra.mxu0 %v20842_v18  ;;  %17765 = vmatpush3.bf16.msra.mxu1 %v20882_v44 }
 0x6a5   :  { %17760 = vmatprep.subr.bf16.mxu0 %v20858_v27  ;;  %17766 = vmatprep.subr.bf16.mxu1 %v23543_v0 }
 0x6a6   :  { %4333 = vmatprep.mubr.f32.mxu0 %v23541_v1  ;;  %16489 = vmatprep.mubr.msk.f32.mxu1 %vm20429_vm0, %v23541_v1 }
 0x6a8   :  { %17762 = vmatpush1.bf16.msra.mxu0 %v20864_v33  ;;  %17768 = vmatpush3.bf16.msra.mxu1 %v20892_v48 }
 0x6a9   :  { %17770 = vmatprep.subr.bf16.mxu0 %v20854_v22  ;;  %17773 = vmatprep.subr.bf16.mxu1 %v23543_v0 }
 0x766   :  { %v3723_v52 = vpop.f32.mrb[20].mxu0  ;;  %v3794_v7 = vpop.f32.mrb[44].mxu1 }
 0x767   :  { %v19264_v28 = vadd.f32 %v21066_v15, %v3723_v52  ;;  %v3725_v63 = vpop.f32.mrb[21].mxu0  ;;  %v16455_v19 = vpop.f32.mrb[45].mxu1 }
 0x768   :  { %v19266_v43 = vadd.f32 %v21070_v20, %v3725_v63  ;;  %v3795_v19 = vadd.f32 %v3794_v7, %v20983_v11 }
 0x769   :  { %v15396_v8 = vmul.f32 -1.442695, %v19264_v28 }
 0x76a   :  { %v3956_v55 = vpop.f32.mrb[46].mxu1  ;;  %v15397_v50 = vmul.f32 -1.442695, %v19266_v43 }
 0x76b   :  { %19625 = vpow2.f32 %v15396_v8  ;;  %v16462_v56 = vpop.f32.mrb[47].mxu1 }
 0x76c   :  { %19627 = vpow2.f32 %v15397_v50  ;;  %v3651_v56 = vadd.f32 %v21285_v60, %v20986_v21 }
 0x772   :  { %v4029_v36 = vpop.f32.mrb[22].mxu0  ;;  %v4100_v37 = vpop.f32.mrb[48].mxu1 }
 0x773   :  { %v19268_v30 = vadd.f32 %v20974_v35, %v4029_v36  ;;  %v4031_v29 = vpop.f32.mrb[23].mxu0  ;;  %v16473_v3 = vpop.f32.mrb[49].mxu1 }
 0x774   :  { %v19270_v40 = vadd.f32 %v20976_v39, %v4031_v29 }
 0x775   :  { %v19626_v32 = vpop.eup %19625  ;;  %v15402_v42 = vmul.f32 -1.442695, %v19268_v30 }
 0x776   :  { %v3802_v46 = vadd.f32 1.0, %v19626_v32  ;;  %v21354_v12 = vpop.f32.mrb[50].mxu1  ;;  %v15403_v4 = vmul.f32 -1.442695, %v19270_v40  ;;  %v19628_v52 = vpop.eup %19627  ;;  %v4101_v32 = vadd.f32 %v4100_v37, %v20990_v26  ;;  %v19985_v37 = vld [vmem:[%s23629_s7 + $0x4] sm:$0xf] }
 0x777   :  { %19629 = vpow2.f32 %v15402_v42  ;;  %v16480_v53 = vpop.f32.mrb[51].mxu1  ;;  %v3809_v28 = vadd.f32 1.0, %v19628_v52 }
 0x778   :  { %19631 = vrcp.f32 %v3802_v46  ;;  %v3957_v46 = vadd.f32 %v3956_v55, %v20994_v31 }
 0x779   :  { %19633 = vpow2.f32 %v15403_v4 }
 0x77a   :  { %19635 = vrcp.f32 %v3809_v28 }
 0x781   :  { %v19630_v63 = vpop.eup %19629 }
 0x782   :  { %v19632_v8 = vpop.eup %19631  ;;  %v4108_v43 = vadd.f32 1.0, %v19630_v63 }
 0x783   :  { %v3812_v50 = vmul.f32 %v19632_v8, %v3795_v19  ;;  %v19634_v30 = vpop.eup %19633 }
 0x784   :  { %19637 = vrcp.f32 %v4108_v43  ;;  %v4115_v29 = vadd.f32 1.0, %v19634_v30  ;;  %v19636_v3 = vpop.eup %19635 }
 0x785   :  { %v3813_v36 = vadd.f32 %v3812_v50, %v3651_v56  ;;  %v3815_v7 = vsub.f32 1.0, %v19636_v3  ;;  %v3817_v60 = vmul.f32 %v19636_v3, %v21293_v25  ;;  %v5798_v25 = vld [vmem:[#allocation9 + $0x3] sm:$0x7] }
 0x787   :  { %19639 = vtanh.f32 %v3813_v36 }
 0x788   :  { %19641 = vrcp.f32 %v4115_v29 }
 0x78e   :  { %v19638_v42 = vpop.eup %19637 }
 0x78f   :  { %v4118_v40 = vmul.f32 %v19638_v42, %v4101_v32 }
 0x791   :  { %v19640_v53 = vpop.eup %19639  ;;  %v4119_v4 = vadd.f32 %v4118_v40, %v3957_v46 }
 0x792   :  { %v3816_v52 = vmul.f32 %v19640_v53, %v3815_v7  ;;  %v19642_v55 = vpop.eup %19641 }
 0x793   :  { %19643 = vtanh.f32 %v4119_v4  ;;  %v4121_v63 = vsub.f32 1.0, %v19642_v55  ;;  %v4123_v43 = vmul.f32 %v19642_v55, %v21320_v13 }
 0x794   :  { %v21362_v28 = vadd.f32 %v3817_v60, %v3816_v52 }
 0x796   :  { %23635 = vst [vmem:[#allocation45_spill] sm:$0xff] %v21362_v28  ;;  %15406 = vmatmul.mubr.msk.f32.vlgmr.msra.gmra.mrb[24].mxu0 %vm505_vm2, %v21362_v28  ;;  %16490 = vmatmul.mubr.msk.f32.vlgmr.msra.gmra.mrb[52].mxu1 %vm505_vm2, %v21362_v28 }
 0x797   :  { %17772 = vmatpush1.bf16.msra.mxu0 %v20856_v23  ;;  %17775 = vmatpush3.bf16.msra.mxu1 %v20907_v51 }
 0x798   :  { %4495 = vmatprep.mubr.f32.mxu0 %v23541_v1  ;;  %16496 = vmatprep.mubr.msk.f32.mxu1 %vm20429_vm0, %v23541_v1 }
 0x799   :  { %17777 = vmatprep.subr.bf16.mxu0 %v20866_v34  ;;  %17784 = vmatprep.subr.bf16.mxu1 %v23543_v0 }
 0x79a   :  { %15410 = vmatmul.mubr.msk.f32.vlgmr.msra.gmra.mrb[26].mxu0 %vm344_vm1, %v19985_v37  ;;  %16497 = vmatmul.mubr.msk.f32.vlgmr.msra.gmra.mrb[54].mxu1 %vm344_vm1, %v19985_v37 }
 0x79b   :  { %17779 = vmatpush1.bf16.msra.mxu0 %v20873_v38  ;;  %17786 = vmatpush3.bf16.msra.mxu1 %v20917_v54 }
 0x79c   :  { %17781 = vmatprep.subr.bf16.mxu0 %v20877_v41  ;;  %17787 = vmatprep.subr.bf16.mxu1 %v23543_v0 }
 0x79d   :  { %v19644_v19 = vpop.eup %19643  ;;  %4639 = vmatprep.mubr.f32.mxu0 %v23541_v1  ;;  %16507 = vmatprep.mubr.msk.f32.mxu1 %vm20429_vm0, %v23541_v1 }
 0x79e   :  { %v4122_v8 = vmul.f32 %v19644_v19, %v4121_v63  ;;  %v4263_v19 = vadd.f32 %v21354_v12, %v20986_v21 }
 0x79f   :  { %17783 = vmatpush1.bf16.msra.mxu0 %v20885_v45  ;;  %17789 = vmatpush3.bf16.msra.mxu1 %v20922_v57 }
 0x7a0   :  { %v21390_v56 = vadd.f32 %v4123_v43, %v4122_v8  ;;  %17791 = vmatprep.subr.bf16.mxu0 %v20816_v5  ;;  %17794 = vmatprep.subr.bf16.mxu1 %v23543_v0  ;;  %v19986_v5 = vld [vmem:[%s23629_s7 + $0x1c] sm:$0xf] }
 0x7a2   :  { %15412 = vmatmul.mubr.msk.f32.vlgmr.msra.gmra.mrb[26].mxu0 %vm505_vm2, %v21390_v56  ;;  %16508 = vmatmul.mubr.msk.f32.vlgmr.msra.gmra.mrb[56].mxu1 %vm505_vm2, %v21390_v56 }
 0x7a3   :  { %17793 = vmatpush1.bf16.msra.mxu0 %v20829_v10  ;;  %17796 = vmatpush3.bf16.msra.mxu1 %v20827_v9 }
 0x7a4   :  { %4801 = vmatprep.mubr.f32.mxu0 %v23541_v1  ;;  %16514 = vmatprep.mubr.msk.f32.mxu1 %vm20429_vm0, %v23541_v1 }
 0x7a5   :  { %17798 = vmatprep.subr.bf16.mxu0 %v20835_v14  ;;  %17805 = vmatprep.subr.bf16.mxu1 %v23543_v0 }
 0x7a6   :  { %15416 = vmatmul.mubr.msk.f32.vlgmr.msra.gmra.mrb[28].mxu0 %vm344_vm1, %v19986_v5  ;;  %16515 = vmatmul.mubr.msk.f32.vlgmr.msra.gmra.mrb[58].mxu1 %vm344_vm1, %v19986_v5 }
 0x7a7   :  { %17800 = vmatpush1.bf16.msra.mxu0 %v20842_v18  ;;  %17807 = vmatpush3.bf16.msra.mxu1 %v20882_v44 }
 0x7a8   :  { %17802 = vmatprep.subr.bf16.mxu0 %v20858_v27  ;;  %17808 = vmatprep.subr.bf16.mxu1 %v23543_v0 }
 0x7a9   :  { %4945 = vmatprep.mubr.f32.mxu0 %v23541_v1  ;;  %16525 = vmatprep.mubr.msk.f32.mxu1 %vm20429_vm0, %v23541_v1 }
 0x7ab   :  { %17804 = vmatpush1.bf16.msra.mxu0 %v20864_v33  ;;  %17810 = vmatpush3.bf16.msra.mxu1 %v20892_v48 }
 0x7ac   :  { %17812 = vmatprep.subr.bf16.mxu0 %v20854_v22  ;;  %17815 = vmatprep.subr.bf16.mxu1 %v23543_v0 }
 0x869   :  { %v4335_v9 = vpop.f32.mrb[24].mxu0  ;;  %v4406_v10 = vpop.f32.mrb[52].mxu1 }
 0x86a   :  { %v19272_v14 = vadd.f32 %v21066_v15, %v4335_v9  ;;  %v4337_v18 = vpop.f32.mrb[25].mxu0  ;;  %v16491_v27 = vpop.f32.mrb[53].mxu1  ;;  %v4407_v55 = vadd.f32 %v4406_v10, %v20983_v11 }
 0x86b   :  { %v19274_v50 = vadd.f32 %v21070_v20, %v4337_v18 }
 0x86c   :  { %v15408_v44 = vmul.f32 -1.442695, %v19272_v14 }
 0x86d   :  { %v4568_v36 = vpop.f32.mrb[54].mxu1  ;;  %v15409_v29 = vmul.f32 -1.442695, %v19274_v50 }
 0x86e   :  { %19645 = vpow2.f32 %v15408_v44  ;;  %v16498_v30 = vpop.f32.mrb[55].mxu1  ;;  %v4569_v44 = vadd.f32 %v4568_v36, %v20994_v31 }
 0x86f   :  { %19647 = vpow2.f32 %v15409_v29 }
 0x875   :  { %v4641_v33 = vpop.f32.mrb[26].mxu0  ;;  %v4712_v48 = vpop.f32.mrb[56].mxu1 }
 0x876   :  { %v19276_v22 = vadd.f32 %v20974_v35, %v4641_v33  ;;  %v4643_v3 = vpop.f32.mrb[27].mxu0  ;;  %v16509_v32 = vpop.f32.mrb[57].mxu1  ;;  %v4713_v18 = vadd.f32 %v4712_v48, %v20990_v26  ;;  %v19987_v48 = vld [vmem:[%s23629_s7] sm:$0xf]  ;;  %s20431_s7 = smov 32  }
 0x877   :  { %v19278_v7 = vadd.f32 %v20976_v39, %v4643_v3  ;;  %v5382_v32 = vld [vmem:[%s23636_s6] sm:$0xff] }
 0x878   :  { %v19646_v42 = vpop.eup %19645  ;;  %v15414_v46 = vmul.f32 -1.442695, %v19276_v22 }
 0x879   :  { %v4414_v40 = vadd.f32 1.0, %v19646_v42  ;;  %v15415_v53 = vmul.f32 -1.442695, %v19278_v7  ;;  %v19648_v4 = vpop.eup %19647  ;;  %v5389_v7 = vld [vmem:[%s23636_s6 + $0x38] sm:$0xff] }
 0x87a   :  { %19649 = vpow2.f32 %v15414_v46  ;;  %v4421_v52 = vadd.f32 1.0, %v19648_v4  ;;  %v5388_v4 = vld [vmem:[%s23636_s6 + $0x30] sm:$0xff] }
 0x87b   :  { %19651 = vrcp.f32 %v4414_v40 }
 0x87c   :  { %19653 = vpow2.f32 %v15415_v53  ;;  %v5392_v53 = vld [vmem:[%s23636_s6 + $0x50] sm:$0xff] }
 0x87d   :  { %19655 = vrcp.f32 %v4421_v52  ;;  %v21513_v52 = vpack.c.bf16 %v5392_v53, %v5389_v7 }
 0x884   :  { %v19650_v60 = vpop.eup %19649 }
 0x885   :  { %v19652_v37 = vpop.eup %19651  ;;  %v4720_v63 = vadd.f32 1.0, %v19650_v60  ;;  %v5391_v60 = vld [vmem:[%s23636_s6 + $0x48] sm:$0xff] }
 0x886   :  { %v4424_v8 = vmul.f32 %v19652_v37, %v4407_v55  ;;  %v19654_v5 = vpop.eup %19653  ;;  %v5390_v55 = vld [vmem:[%s23636_s6 + $0x40] sm:$0xff]  ;;  %v5393_v37 = vld [vmem:[%s23636_s6 + $0x58] sm:$0xff] }
 0x887   :  { %19657 = vrcp.f32 %v4720_v63  ;;  %v4727_v9 = vadd.f32 1.0, %v19654_v5  ;;  %v19656_v14 = vpop.eup %19655  ;;  %v21526_v63 = vpack.c.bf16 %v5391_v60, %v5388_v4  ;;  %v5394_v5 = vld [vmem:[%s23636_s6 + $0x60] sm:$0xff] }
 0x888   :  { %v4425_v43 = vadd.f32 %v4424_v8, %v4263_v19  ;;  %v4427_v10 = vsub.f32 1.0, %v19656_v14  ;;  %v4429_v12 = vmul.f32 %v19656_v14, %v21362_v28  ;;  %v21528_v19 = vpack.c.bf16 %v5393_v37, %v5390_v55  ;;  %v5395_v8 = vld [vmem:[%s23636_s6 + $0x68] sm:$0xff]  ;;  %v5397_v14 = vld [vmem:[%s23636_s6 + $0x78] sm:$0xff] }
 0x88a   :  { %19659 = vtanh.f32 %v4425_v43  ;;  %v5398_v43 = vld [vmem:[%s23636_s6 + $0x80] sm:$0xff] }
 0x88b   :  { %19661 = vrcp.f32 %v4727_v9  ;;  %v21541_v9 = vpack.c.bf16 %v5398_v43, %v5395_v8 }
 0x891   :  { %v19658_v27 = vpop.eup %19657 }
 0x892   :  { %v4730_v50 = vmul.f32 %v19658_v27, %v4713_v18  ;;  %v5396_v18 = vld [vmem:[%s23636_s6 + $0x70] sm:$0xff]  ;;  %v5399_v27 = vld [vmem:[%s23636_s6 + $0x88] sm:$0xff] }
 0x894   :  { %v19660_v30 = vpop.eup %19659  ;;  %v4731_v29 = vadd.f32 %v4730_v50, %v4569_v44  ;;  %v5401_v44 = vld [vmem:[%s23636_s6 + $0x98] sm:$0xff]  ;;  %v5404_v50 = vld [vmem:[%s23636_s6 + $0xb0] sm:$0xff] }
 0x895   :  { %v4428_v33 = vmul.f32 %v19660_v30, %v4427_v10  ;;  %v19662_v36 = vpop.eup %19661  ;;  %v21560_v10 = vpack.c.bf16 %v5397_v14, %v5394_v5  ;;  %v21562_v30 = vpack.c.bf16 %v5399_v27, %v5396_v18 }
 0x896   :  { %19663 = vtanh.f32 %v4731_v29  ;;  %v4735_v3 = vmul.f32 %v19662_v36, %v21390_v56  ;;  %v5400_v29 = vld [vmem:[%s23636_s6 + $0x90] sm:$0xff] }
 0x897   :  { %v21431_v22 = vadd.f32 %v4429_v12, %v4428_v33  ;;  %v21569_v33 = vpack.c.bf16 %v5404_v50, %v5401_v44  ;;  %v5403_v12 = vld [vmem:[%s23636_s6 + $0xa8] sm:$0xff] }
 0x899   :  { %15418 = vmatmul.mubr.msk.f32.vlgmr.msra.gmra.mrb[28].mxu0 %vm505_vm2, %v21431_v22  ;;  %16526 = vmatmul.mubr.msk.f32.vlgmr.msra.gmra.mrb[60].mxu1 %vm505_vm2, %v21431_v22 }
 0x89a   :  { %17814 = vmatpush1.bf16.msra.mxu0 %v20856_v23  ;;  %17817 = vmatpush3.bf16.msra.mxu1 %v20907_v51  ;;  %v4733_v23 = vsub.f32 1.0, %v19662_v36  ;;  %v5402_v36 = vld [vmem:[%s23636_s6 + $0xa0] sm:$0xff] }
 0x89b   :  { %5107 = vmatprep.mubr.f32.mxu0 %v23541_v1  ;;  %16532 = vmatprep.mubr.msk.f32.mxu1 %vm20429_vm0, %v23541_v1 }
 0x89c   :  { %17819 = vmatprep.subr.bf16.mxu0 %v20866_v34  ;;  %17826 = vmatprep.subr.bf16.mxu1 %v23543_v0 }
 0x89d   :  { %15422 = vmatmul.mubr.msk.f32.vlgmr.msra.gmra.mrb[30].mxu0 %vm344_vm1, %v19987_v48  ;;  %16533 = vmatmul.mubr.msk.f32.vlgmr.msra.gmra.mrb[62].mxu1 %vm344_vm1, %v19987_v48  ;;  %v5405_v48 = vld [vmem:[%s23636_s6 + $0xb8] sm:$0xff] }
 0x89e   :  { %17821 = vmatpush1.bf16.msra.mxu0 %v20873_v38  ;;  %17828 = vmatpush3.bf16.msra.mxu1 %v20917_v54 }
 0x89f   :  { %17823 = vmatprep.subr.bf16.mxu0 %v20877_v41  ;;  %17829 = vmatprep.subr.bf16.mxu1 %v23543_v0  ;;  %v21462_v41 = vpop.f32.mrb[58].mxu1 }
 0x8a0   :  { %v19664_v34 = vpop.eup %19663  ;;  %5251 = vmatprep.mubr.f32.mxu0 %v23541_v1  ;;  %16543 = vmatprep.mubr.msk.f32.mxu1 %vm20429_vm0, %v23541_v1  ;;  %v16516_v54 = vpop.f32.mrb[59].mxu1 }
 0x8a1   :  { %v4734_v51 = vmul.f32 %v19664_v34, %v4733_v23  ;;  %v21582_v23 = vpack.c.bf16 %v5403_v12, %v5400_v29  ;;  %v21584_v34 = vpack.c.bf16 %v5405_v48, %v5402_v36 }
 0x8a2   :  { %17825 = vmatpush1.bf16.msra.mxu0 %v20885_v45  ;;  %17831 = vmatpush3.bf16.msra.mxu1 %v20922_v57  ;;  %v5383_v45 = vld [vmem:[%s23636_s6 + $0x8] sm:$0xff]  ;;  %v5386_v57 = vld [vmem:[%s23636_s6 + $0x20] sm:$0xff] }
 0x8a3   :  { %v21459_v38 = vadd.f32 %v4735_v3, %v4734_v51  ;;  %17848 = vmatprep.subr.bf16.mxu1 %v23543_v0  ;;  %v21488_v42 = vpack.c.bf16 %v5386_v57, %v5383_v45 }
 0x8a5   :  { %5354 = vrot.lane.b32.xlu1 %v21459_v38, %s20431_s7  ;;  %15424 = vmatmul.mubr.msk.f32.vlgmr.msra.gmra.mrb[30].mxu0 %vm505_vm2, %v21459_v38 }
 0x8a6   :  { %16544 = vmatmul.mubr.msk.f32.vlgmr.msra.gmra.mrb[64].mxu1 %vm505_vm2, %v21459_v38  ;;  %5504 = vmatprep.mubr.f32.mxu0 %v23541_v1 }
 0x8a7   :  { %16562 = vmatprep.mubr.msk.f32.mxu1 %vm20429_vm0, %v23541_v1  ;;  %17833 = vmatprep.subr.bf16.mxu0 %v21488_v42 }
 0x8a9   :  { %5374 = vrot.lane.b32.xlu1 %v21113_v6, %s20431_s7  ;;  %v5385_v6 = vld [vmem:[%s23636_s6 + $0x18] sm:$0xff] }
 0x8aa   :  { %v21499_v46 = vpack.c.bf16 %v5385_v6, %v5382_v32 }
 0x8ac   :  { %17835 = vmatpush1.bf16.msra.mxu0 %v21499_v46 }
 0x8ad   :  { %5370 = vrot.lane.b32.xlu1 %v21185_v47, %s20431_s7  ;;  %v5384_v47 = vld [vmem:[%s23636_s6 + $0x10] sm:$0xff]  ;;  %17837 = vmatprep.subr.bf16.mxu0 %v21513_v52 }
 0x8b0   :  { %17839 = vmatpush1.bf16.msra.mxu0 %v21526_v63 }
 0x8b1   :  { %5366 = vrot.lane.b32.xlu1 %v21251_v49, %s20431_s7  ;;  %v5387_v49 = vld [vmem:[%s23636_s6 + $0x28] sm:$0xff]  ;;  %17841 = vmatprep.subr.bf16.mxu0 %v21541_v9 }
 0x8b2   :  { %v21501_v40 = vpack.c.bf16 %v5387_v49, %v5384_v47 }
 0x8b4   :  { %17850 = vmatpush3.bf16.msra.mxu1 %v21501_v40  ;;  %17843 = vmatpush1.bf16.msra.mxu0 %v21560_v10 }
 0x8b5   :  { %17851 = vmatprep.subr.bf16.mxu1 %v23543_v0  ;;  %17845 = vmatprep.subr.bf16.mxu0 %v21569_v33 }
 0x8b8   :  { %17853 = vmatpush3.bf16.msra.mxu1 %v21528_v19  ;;  %17847 = vmatpush1.bf16.msra.mxu0 %v21582_v23 }
 0x8b9   :  { %17854 = vmatprep.subr.bf16.mxu1 %v23543_v0 }
 0x8bc   :  { %17856 = vmatpush3.bf16.msra.mxu1 %v21562_v30 }
 0x8bd   :  { %17857 = vmatprep.subr.bf16.mxu1 %v23543_v0 }
 0x8c0   :  { %17859 = vmatpush3.bf16.msra.mxu1 %v21584_v34 }
 0x8c1   :  { %17868 = vmatprep.subr.bf16.mxu1 %v23543_v0 }
 0x96c   :  { %v4947_v51 = vpop.f32.mrb[28].mxu0  ;;  %v5018_v3 = vpop.f32.mrb[60].mxu1 }
 0x96d   :  { %v19280_v54 = vadd.f32 %v21066_v15, %v4947_v51  ;;  %v4949_v45 = vpop.f32.mrb[29].mxu0  ;;  %v16527_v57 = vpop.f32.mrb[61].mxu1  ;;  %v5019_v44 = vadd.f32 %v5018_v3, %v20983_v11 }
 0x96e   :  { %v19282_v6 = vadd.f32 %v21070_v20, %v4949_v45 }
 0x96f   :  { %v15420_v32 = vmul.f32 -1.442695, %v19280_v54 }
 0x970   :  { %v5180_v47 = vpop.f32.mrb[62].mxu1  ;;  %v15421_v7 = vmul.f32 -1.442695, %v19282_v6 }
 0x971   :  { %19665 = vpow2.f32 %v15420_v32  ;;  %v16534_v49 = vpop.f32.mrb[63].mxu1  ;;  %v5181_v57 = vadd.f32 %v5180_v47, %v20994_v31 }
 0x972   :  { %19667 = vpow2.f32 %v15421_v7  ;;  %v5407_v7 = vld [vmem:[#allocation7 + $0x8] sm:$0xff] }
 0x978   :  { %v5253_v53 = vpop.f32.mrb[30].mxu0 }
 0x979   :  { %v19284_v4 = vadd.f32 %v20974_v35, %v5253_v53  ;;  %v5324_v60 = vpop.f32.mrb[64].mxu1  ;;  %v5255_v55 = vpop.f32.mrb[31].mxu0  ;;  %v4875_v35 = vadd.f32 %v21462_v41, %v20986_v21  ;;  %v5410_v53 = vld [vmem:[#allocation7 + $0x20] sm:$0xff] }
 0x97a   :  { %v16545_v37 = vpop.f32.mrb[65].mxu1  ;;  %v19286_v15 = vadd.f32 %v20976_v39, %v5255_v55  ;;  %v5325_v54 = vadd.f32 %v5324_v60, %v20990_v26 }
 0x97b   :  { %v19666_v8 = vpop.eup %19665  ;;  %v15426_v43 = vmul.f32 -1.442695, %v19284_v4  ;;  %v21603_v4 = vpack.c.bf16 %v5410_v53, %v5407_v7  ;;  %v15441_v7 = vld [vmem:[%s23636_s6 + $0x108] sm:$0xff]  ;;  %v15440_v53 = vld [vmem:[%s23636_s6 + $0x100] sm:$0xff] }
 0x97c   :  { %v5026_v5 = vadd.f32 1.0, %v19666_v8  ;;  %v15427_v14 = vmul.f32 -1.442695, %v19286_v15  ;;  %v19668_v20 = vpop.eup %19667  ;;  %v5406_v8 = vld [vmem:[#allocation7] sm:$0xff]  ;;  %v5411_v15 = vld [vmem:[#allocation7 + $0x28] sm:$0xff] }
 0x97d   :  { %19669 = vpow2.f32 %v15426_v43  ;;  %v5033_v18 = vadd.f32 1.0, %v19668_v20  ;;  %17861 = vmatprep.subr.bf16.mxu0 %v21603_v4  ;;  %v5409_v43 = vld [vmem:[#allocation7 + $0x18] sm:$0xff]  ;;  %v5416_v20 = vld [vmem:[#allocation7 + $0x50] sm:$0xff] }
 0x97e   :  { %19671 = vrcp.f32 %v5026_v5  ;;  %v5408_v5 = vld [vmem:[#allocation7 + $0x10] sm:$0xff] }
 0x97f   :  { %19673 = vpow2.f32 %v15427_v14  ;;  %v5413_v14 = vld [vmem:[#allocation7 + $0x38] sm:$0xff] }
 0x980   :  { %19675 = vrcp.f32 %v5033_v18  ;;  %v21616_v18 = vpack.c.bf16 %v5411_v15, %v5408_v5  ;;  %v15446_v5 = vld [vmem:[%s23636_s6 + $0x130] sm:$0xff]  ;;  %v15449_v15 = vld [vmem:[%s23636_s6 + $0x148] sm:$0xff] }
 0x987   :  { %v19670_v27 = vpop.eup %19669 }
 0x988   :  { %v19672_v50 = vpop.eup %19671  ;;  %v5332_v29 = vadd.f32 1.0, %v19670_v27  ;;  %v5412_v27 = vld [vmem:[#allocation7 + $0x30] sm:$0xff] }
 0x989   :  { %v5036_v12 = vmul.f32 %v19672_v50, %v5019_v44  ;;  %v19674_v39 = vpop.eup %19673  ;;  %v5415_v50 = vld [vmem:[#allocation7 + $0x48] sm:$0xff] }
 0x98a   :  { %19677 = vrcp.f32 %v5332_v29  ;;  %v5339_v48 = vadd.f32 1.0, %v19674_v39  ;;  %v19676_v51 = vpop.eup %19675  ;;  %v5417_v29 = vld [vmem:[#allocation7 + $0x58] sm:$0xff] }
 0x98b   :  { %v5037_v36 = vadd.f32 %v5036_v12, %v4875_v35  ;;  %v5039_v11 = vsub.f32 1.0, %v19676_v51  ;;  %v5041_v21 = vmul.f32 %v19676_v51, %v21431_v22  ;;  %v15433_v12 = vld [vmem:[%s23636_s6 + $0xc8] sm:$0xff] }
 0x98d   :  { %19679 = vtanh.f32 %v5037_v36  ;;  %v15436_v36 = vld [vmem:[%s23636_s6 + $0xe0] sm:$0xff] }
 0x98e   :  { %19681 = vrcp.f32 %v5339_v48  ;;  %v15432_v48 = vld [vmem:[%s23636_s6 + $0xc0] sm:$0xff]  ;;  %v21649_v51 = vpack.c.bf16 %v15436_v36, %v15433_v12  ;;  %v15455_v36 = vld [vmem:[%s23636_s6 + $0x178] sm:$0xff] }
 0x98f   :  { %v15452_v12 = vld [vmem:[%s23636_s6 + $0x160] sm:$0xff] }
 0x990   :  { %23640 = vst [vmem:[#allocation49_spill] sm:$0xff] %v21649_v51 }
 0x994   :  { %v19678_v45 = vpop.eup %19677 }
 0x995   :  { %v5342_v32 = vmul.f32 %v19678_v45, %v5325_v54  ;;  %v15435_v54 = vld [vmem:[%s23636_s6 + $0xd8] sm:$0xff]  ;;  %v15434_v45 = vld [vmem:[%s23636_s6 + $0xd0] sm:$0xff] }
 0x997   :  { %v19680_v3 = vpop.eup %19679  ;;  %v5343_v6 = vadd.f32 %v5342_v32, %v5181_v57  ;;  %v15437_v57 = vld [vmem:[%s23636_s6 + $0xe8] sm:$0xff]  ;;  %v15439_v32 = vld [vmem:[%s23636_s6 + $0xf8] sm:$0xff] }
 0x998   :  { %v5040_v49 = vmul.f32 %v19680_v3, %v5039_v11  ;;  %v19682_v26 = vpop.eup %19681  ;;  %v15442_v11 = vld [vmem:[%s23636_s6 + $0x110] sm:$0xff]  ;;  %v21671_v3 = vpack.c.bf16 %v15435_v54, %v15432_v48 }
 0x999   :  { %19683 = vtanh.f32 %v5343_v6  ;;  %v5345_v60 = vsub.f32 1.0, %v19682_v26  ;;  %v5347_v55 = vmul.f32 %v19682_v26, %v21459_v38  ;;  %v21614_v38 = vpack.c.bf16 %v5409_v43, %v5406_v8  ;;  %v15443_v26 = vld [vmem:[%s23636_s6 + $0x118] sm:$0xff]  ;;  %v5789_v54 = vld [vmem:[#allocation7 + $0x80] sm:$0xff] }
 0x99a   :  { %v21601_v41 = vadd.f32 %v5041_v21, %v5040_v49  ;;  %v21673_v6 = vpack.c.bf16 %v15437_v57, %v15434_v45  ;;  %v15438_v49 = vld [vmem:[%s23636_s6 + $0xf0] sm:$0xff]  ;;  %v21680_v21 = vpack.c.bf16 %v15442_v11, %v15439_v32  ;;  %v15447_v43 = vld [vmem:[%s23636_s6 + $0x138] sm:$0xff]  ;;  %v21756_v57 = vpack.c.bf16 %v15455_v36, %v15452_v12 }
 0x99b   :  { %v5786_v48 = vld [vmem:[#allocation7 + $0x68] sm:$0xff]  ;;  %v5785_v32 = vld [vmem:[#allocation7 + $0x60] sm:$0xff] }
 0x99c   :  { %v21760_v11 = vpack.c.bf16 %v5789_v54, %v5786_v48  ;;  %v5418_v54 = vld [vmem:[#allocation9] sm:$0x7] }
 0x99d   :  { %v21857_v24 = vrot.slane %v5418_v54, %v20980_v59 }
 0x9a3   :  { %v19684_v31 = vpop.eup %19683 }
 0x9a4   :  { %v5346_v47 = vmul.f32 %v19684_v31, %v5345_v60  ;;  %v15445_v60 = vld [vmem:[%s23636_s6 + $0x128] sm:$0xff]  ;;  %v15448_v31 = vld [vmem:[%s23636_s6 + $0x140] sm:$0xff] }
 0x9a5   :  { %v21710_v8 = vpack.c.bf16 %v15448_v31, %v15445_v60  ;;  %v5795_v60 = vld [vmem:[#allocation7 + $0xb0] sm:$0xff] }
 0x9a6   :  { %v5348_v37 = vadd.f32 %v5347_v55, %v5346_v47  ;;  %v21701_v47 = vpack.c.bf16 %v15441_v7, %v15438_v49  ;;  %v21703_v55 = vpack.c.bf16 %v15443_v26, %v15440_v53  ;;  %v5788_v49 = vld [vmem:[#allocation7 + $0x78] sm:$0xff]  ;;  %v5787_v7 = vld [vmem:[#allocation7 + $0x70] sm:$0xff]  ;;  %v5790_v53 = vld [vmem:[#allocation7 + $0x88] sm:$0xff] }
 0x9a7   :  { %v5792_v26 = vld [vmem:[#allocation7 + $0x98] sm:$0xff] }
 0x9a8   :  { %5350 = vrot.lane.b32.xlu0 %v5348_v37, %s20431_s7  ;;  %v15444_v37 = vld [vmem:[%s23636_s6 + $0x120] sm:$0xff] }
 0x9ac   :  { %5378 = vrot.lane.b32.xlu0 %v21016_v58, %s20431_s7  ;;  %v21618_v58 = vpack.c.bf16 %v5416_v20, %v5413_v14  ;;  %v15451_v14 = vld [vmem:[%s23636_s6 + $0x158] sm:$0xff]  ;;  %v15454_v20 = vld [vmem:[%s23636_s6 + $0x170] sm:$0xff] }
 0x9b0   :  { %5358 = vrot.lane.b32.xlu0 %v21390_v56, %s20431_s7  ;;  %v5414_v56 = vld [vmem:[#allocation7 + $0x40] sm:$0xff] }
 0x9b1   :  { %v21642_v39 = vpack.c.bf16 %v5417_v29, %v5414_v56  ;;  %v21741_v56 = vpack.c.bf16 %v15454_v20, %v15451_v14  ;;  %v15453_v29 = vld [vmem:[%s23636_s6 + $0x168] sm:$0xff]  ;;  %v5794_v14 = vld [vmem:[#allocation7 + $0xa8] sm:$0xff] }
 0x9b2   :  { %v5793_v20 = vld [vmem:[#allocation7 + $0xa0] sm:$0xff] }
 0x9b3   :  { %23639 = vst [vmem:[#allocation48_spill] sm:$0xff] %v21642_v39 }
 0x9b4   :  { %5362 = vrot.lane.b32.xlu0 %v21320_v13, %s20431_s7 }
 0xa1a   :  { %v5351_v44 = vpop.permute.xlu0 %5350 }
 0xa1b   :  { %v21622_v13 = vsel %vm505_vm2, %v20998_v17, %v5351_v44  ;;  %v21626_v35 = vsel %vm505_vm2, %v21601_v41, %v5351_v44  ;;  %v21640_v17 = vpack.c.bf16 %v5415_v50, %v5412_v27  ;;  %v21732_v27 = vpack.c.bf16 %v15447_v43, %v15444_v37  ;;  %v15450_v50 = vld [vmem:[%s23636_s6 + $0x150] sm:$0xff] }
 0xa1c   :  { %23637 = vst [vmem:[#allocation46_spill] sm:$0xff] %v21622_v13  ;;  %23638 = vst [vmem:[#allocation47_spill] sm:$0xff] %v21626_v35  ;;  %15428 = vmatmul.mubr.msk.f32.vlgmr.msra.gmra.mrb[32].mxu0 %vm5436_vm3, %v21622_v13  ;;  %16563 = vmatmul.mubr.msk.f32.vlgmr.msra.gmra.mrb[66].mxu1 %vm5436_vm3, %v21622_v13  ;;  %v21734_v44 = vpack.c.bf16 %v15449_v15, %v15446_v5  ;;  %v21754_v45 = vpack.c.bf16 %v15453_v29, %v15450_v50  ;;  %v5791_v5 = vld [vmem:[#allocation7 + $0x90] sm:$0xff]  ;;  %v5796_v50 = vld [vmem:[#allocation7 + $0xb8] sm:$0xff] }
 0xa1d   :  { %17863 = vmatpush1.bf16.msra.mxu0 %v21614_v38  ;;  %17870 = vmatpush3.bf16.msra.mxu1 %v21616_v18  ;;  %v21764_v37 = vpack.c.bf16 %v5788_v49, %v5785_v32  ;;  %v21766_v43 = vpack.c.bf16 %v5790_v53, %v5787_v7  ;;  %v21770_v15 = vpack.c.bf16 %v5795_v60, %v5792_v26  ;;  %v5800_v13 = vld [vmem:[#allocation10 + $0x3] sm:$0x7] }
 0xa1e   :  { %17865 = vmatprep.subr.bf16.mxu0 %v21618_v58  ;;  %17871 = vmatprep.subr.bf16.mxu1 %v23543_v0  ;;  %v5379_v31 = vpop.permute.xlu0 %5378  ;;  %v21782_v12 = vpack.c.bf16 %v5794_v14, %v5791_v5  ;;  %v21784_v36 = vpack.c.bf16 %v5796_v50, %v5793_v20  ;;  %v5424_v7 = vrot.slane %v5418_v54, %v20950_v61 }
 0xa1f   :  { %5661 = vmatprep.mubr.f32.mxu0 %v23541_v1  ;;  %16573 = vmatprep.mubr.msk.f32.mxu1 %vm20429_vm0, %v23541_v1  ;;  %v21774_v29 = vsel %vm505_vm2, %v21601_v41, %v5379_v31  ;;  %v5355_v41 = vpop.permute.xlu1 %5354  ;;  %v5428_v26 = vrot.slane %v5418_v54, %v20952_v62 }
 0xa20   :  { %23641 = vst [vmem:[#allocation50_spill] sm:$0xff] %v21774_v29  ;;  %v21818_v48 = vsel %vm505_vm2, %v21081_v16, %v5355_v41  ;;  %v5419_v16 = vld [vmem:[#allocation10] sm:$0x7] }
 0xa21   :  { %17867 = vmatpush1.bf16.msra.mxu0 %v21640_v17  ;;  %17873 = vmatpush3.bf16.msra.mxu1 %v21642_v39  ;;  %23642 = vst [vmem:[#allocation51_spill] sm:$0xff] %v21818_v48  ;;  %v5585_v53 = vrot.slane %v5419_v16, %v20950_v61  ;;  %v5589_v60 = vrot.slane %v5419_v16, %v20952_v62 }
 0xa22   :  { %17875 = vmatprep.subr.bf16.mxu0 %v21649_v51  ;;  %17890 = vmatprep.subr.bf16.mxu1 %v23543_v0 }
 0xa23   :  { %v21839_v31 = vadd.f32 %v5585_v53, %v5424_v7  ;;  %v21841_v5 = vadd.f32 %v5589_v60, %v5428_v26  ;;  %v5805_v26 = vrot.slane %v5798_v25, %v20950_v61  ;;  %v5965_v60 = vrot.slane %v5800_v13, %v20950_v61 }
 0xa24   :  { %5662 = vmatmul.mubr.f32.vlgmr.msra.gmra.mrb[32].mxu0 %v23541_v1  ;;  %16574 = vmatmul.mubr.f32.vlgmr.msra.gmra.mrb[68].mxu1 %v23541_v1 }
 0xa25   :  { %17877 = vmatpush1.bf16.msra.mxu0 %v21671_v3  ;;  %17892 = vmatpush3.bf16.msra.mxu1 %v21673_v6  ;;  %23643 = vst [vmem:[#allocation52_spill] sm:$0xff] %v21839_v31  ;;  %23644 = vst [vmem:[#allocation53_spill] sm:$0xff] %v21841_v5 }
 0xa26   :  { %17879 = vmatprep.subr.bf16.mxu0 %v21680_v21  ;;  %17893 = vmatprep.subr.bf16.mxu1 %v23543_v0 }
 0xa27   :  { %5884 = vmatprep.mubr.f32.mxu0 %v23541_v1  ;;  %16592 = vmatprep.mubr.msk.f32.mxu1 %vm20429_vm0, %v23541_v1 }
 0xa29   :  { %17881 = vmatpush1.bf16.msra.mxu0 %v21701_v47  ;;  %17895 = vmatpush3.bf16.msra.mxu1 %v21703_v55 }
 0xa2a   :  { %17883 = vmatprep.subr.bf16.mxu0 %v21710_v8  ;;  %17896 = vmatprep.subr.bf16.mxu1 %v23543_v0 }
 0xa2d   :  { %17885 = vmatpush1.bf16.msra.mxu0 %v21732_v27  ;;  %17898 = vmatpush3.bf16.msra.mxu1 %v21734_v44 }
 0xa2e   :  { %17887 = vmatprep.subr.bf16.mxu0 %v21741_v56  ;;  %17899 = vmatprep.subr.bf16.mxu1 %v23543_v0 }
 0xa31   :  { %17889 = vmatpush1.bf16.msra.mxu0 %v21754_v45  ;;  %17901 = vmatpush3.bf16.msra.mxu1 %v21756_v57 }
 0xa32   :  { %17903 = vmatprep.subr.bf16.mxu0 %v21760_v11  ;;  %17910 = vmatprep.subr.bf16.mxu1 %v23543_v0 }
 0xa34   :  { %15456 = vmatmul.mubr.msk.f32.vlgmr.msra.gmra.mrb[34].mxu0 %vm5436_vm3, %v21774_v29  ;;  %16593 = vmatmul.mubr.msk.f32.vlgmr.msra.gmra.mrb[70].mxu1 %vm5436_vm3, %v21774_v29 }
 0xa35   :  { %17905 = vmatpush1.bf16.msra.mxu0 %v21764_v37  ;;  %17912 = vmatpush3.bf16.msra.mxu1 %v21766_v43 }
 0xa36   :  { %17907 = vmatprep.subr.bf16.mxu0 %v21770_v15  ;;  %17913 = vmatprep.subr.bf16.mxu1 %v23543_v0 }
 0xa37   :  { %6041 = vmatprep.mubr.f32.mxu0 %v23541_v1  ;;  %16603 = vmatprep.mubr.msk.f32.mxu1 %vm20429_vm0, %v23541_v1 }
 0xa39   :  { %17909 = vmatpush1.bf16.msra.mxu0 %v21782_v12  ;;  %17915 = vmatpush3.bf16.msra.mxu1 %v21784_v36 }
 0xa3a   :  { %17917 = vmatprep.subr.bf16.mxu0 %v21488_v42  ;;  %17932 = vmatprep.subr.bf16.mxu1 %v23543_v0 }
 0xa3c   :  { %6042 = vmatmul.mubr.f32.vlgmr.msra.gmra.mrb[34].mxu0 %v23541_v1  ;;  %16604 = vmatmul.mubr.f32.vlgmr.msra.gmra.mrb[72].mxu1 %v23541_v1 }
 0xa3d   :  { %17919 = vmatpush1.bf16.msra.mxu0 %v21499_v46  ;;  %17934 = vmatpush3.bf16.msra.mxu1 %v21501_v40 }
 0xa3e   :  { %17921 = vmatprep.subr.bf16.mxu0 %v21513_v52  ;;  %17935 = vmatprep.subr.bf16.mxu1 %v23543_v0 }
 0xa3f   :  { %6206 = vmatprep.mubr.f32.mxu0 %v23541_v1  ;;  %16622 = vmatprep.mubr.msk.f32.mxu1 %vm20429_vm0, %v23541_v1 }
 0xa41   :  { %17923 = vmatpush1.bf16.msra.mxu0 %v21526_v63  ;;  %17937 = vmatpush3.bf16.msra.mxu1 %v21528_v19 }
 0xa42   :  { %17925 = vmatprep.subr.bf16.mxu0 %v21541_v9  ;;  %17938 = vmatprep.subr.bf16.mxu1 %v23543_v0 }
 0xa45   :  { %17927 = vmatpush1.bf16.msra.mxu0 %v21560_v10  ;;  %17940 = vmatpush3.bf16.msra.mxu1 %v21562_v30 }
 0xa46   :  { %17929 = vmatprep.subr.bf16.mxu0 %v21569_v33  ;;  %17941 = vmatprep.subr.bf16.mxu1 %v23543_v0 }
 0xa49   :  { %17931 = vmatpush1.bf16.msra.mxu0 %v21582_v23  ;;  %17943 = vmatpush3.bf16.msra.mxu1 %v21584_v34 }
 0xa4a   :  { %17945 = vmatprep.subr.bf16.mxu0 %v21603_v4  ;;  %17952 = vmatprep.subr.bf16.mxu1 %v23543_v0 }
 0xa4c   :  { %15460 = vmatmul.mubr.msk.f32.vlgmr.msra.gmra.mrb[36].mxu0 %vm5436_vm3, %v21818_v48  ;;  %16623 = vmatmul.mubr.msk.f32.vlgmr.msra.gmra.mrb[74].mxu1 %vm5436_vm3, %v21818_v48 }
 0xa4d   :  { %17947 = vmatpush1.bf16.msra.mxu0 %v21614_v38  ;;  %17954 = vmatpush3.bf16.msra.mxu1 %v21616_v18 }
 0xa4e   :  { %17949 = vmatprep.subr.bf16.mxu0 %v21618_v58  ;;  %17955 = vmatprep.subr.bf16.mxu1 %v23543_v0 }
 0xa4f   :  { %6350 = vmatprep.mubr.f32.mxu0 %v23541_v1  ;;  %16633 = vmatprep.mubr.msk.f32.mxu1 %vm20429_vm0, %v23541_v1 }
 0xa51   :  { %17951 = vmatpush1.bf16.msra.mxu0 %v21640_v17  ;;  %17957 = vmatpush3.bf16.msra.mxu1 %v21642_v39 }
 0xa52   :  { %17959 = vmatprep.subr.bf16.mxu0 %v21649_v51  ;;  %17974 = vmatprep.subr.bf16.mxu1 %v23543_v0 }
 0xaef   :  { %v5577_v32 = vpop.f32.mrb[66].mxu1 }
 0xaf0   :  { %v16564_v49 = vpop.f32.mrb[67].mxu1 }
 0xaf7   :  { %v5663_v14 = vpop.f32.mrb[32].mxu0  ;;  %v5734_v20 = vpop.f32.mrb[68].mxu1 }
 0xaf8   :  { %v19288_v50 = vadd.f32 %v21839_v31, %v5663_v14  ;;  %v5665_v41 = vpop.f32.mrb[33].mxu0  ;;  %v16575_v1 = vpop.f32.mrb[69].mxu1  ;;  %v5809_v14 = vrot.slane %v5798_v25, %v20952_v62 }
 0xaf9   :  { %v19290_v49 = vadd.f32 %v21841_v5, %v5665_v41  ;;  %v5969_v1 = vrot.slane %v5800_v13, %v20952_v62 }
 0xafa   :  { %v15430_v0 = vmul.f32 -1.442695, %v19288_v50 }
 0xafb   :  { %v15431_v35 = vmul.f32 -1.442695, %v19290_v49  ;;  %v21854_v49 = vadd.f32 %v5969_v1, %v5809_v14 }
 0xafc   :  { %19685 = vpow2.f32 %v15430_v0  ;;  %v21850_v0 = vrot.slane %v5419_v16, %v20980_v59 }
 0xafd   :  { %19687 = vpow2.f32 %v15431_v35  ;;  %v21852_v35 = vadd.f32 %v5965_v60, %v5805_v26  ;;  %23647 = vst [vmem:[#allocation56_spill] sm:$0xff] %v21854_v49  ;;  %v5578_v26 = vadd.f32 %v5577_v32, %v21857_v24 }
 0xafe   :  { %23645 = vst [vmem:[#allocation54_spill] sm:$0xff] %v21850_v0 }
 0xaff   :  { %23646 = vst [vmem:[#allocation55_spill] sm:$0xff] %v21852_v35 }
 0xb06   :  { %v19686_v29 = vpop.eup %19685 }
 0xb07   :  { %v5742_v48 = vadd.f32 1.0, %v19686_v29  ;;  %v5957_v7 = vpop.f32.mrb[70].mxu1  ;;  %v19688_v50 = vpop.eup %19687 }
 0xb08   :  { %v16594_v53 = vpop.f32.mrb[71].mxu1  ;;  %v5749_v41 = vadd.f32 1.0, %v19688_v50 }
 0xb09   :  { %19689 = vrcp.f32 %v5742_v48  ;;  %v5735_v48 = vadd.f32 %v5734_v20, %v21850_v0 }
 0xb0a   :  { %19691 = vrcp.f32 %v5749_v41 }
 0xb0f   :  { %v6043_v29 = vpop.f32.mrb[34].mxu0  ;;  %v6114_v53 = vpop.f32.mrb[72].mxu1 }
 0xb10   :  { %v19292_v61 = vadd.f32 %v21852_v35, %v6043_v29  ;;  %v6045_v28 = vpop.f32.mrb[35].mxu0  ;;  %v16605_v62 = vpop.f32.mrb[73].mxu1 }
 0xb11   :  { %v19294_v16 = vadd.f32 %v21854_v49, %v6045_v28  ;;  %v21866_v28 = vrot.slane %v5800_v13, %v20980_v59  ;;  %v23648_v13 = vmov 0.0|0.0  }
 0xb12   :  { %v15458_v5 = vmul.f32 -1.442695, %v19292_v61 }
 0xb13   :  { %v19690_v31 = vpop.eup %19689  ;;  %v15459_v1 = vmul.f32 -1.442695, %v19294_v16  ;;  %v6115_v16 = vadd.f32 %v6114_v53, %v21866_v28 }
 0xb14   :  { %v5752_v60 = vmul.f32 %v19690_v31, %v5735_v48  ;;  %19693 = vpow2.f32 %v15458_v5  ;;  %v19692_v54 = vpop.eup %19691  ;;  %v21875_v5 = vrot.slane %v5798_v25, %v20980_v59 }
 0xb15   :  { %v5755_v62 = vsub.f32 1.0, %v19692_v54  ;;  %v5757_v35 = vmul.f32 0.0, %v19692_v54 }
 0xb16   :  { %v5753_v14 = vadd.f32 %v5752_v60, %v5578_v26  ;;  %v5958_v25 = vadd.f32 %v5957_v7, %v21875_v5  ;;  %v5375_v7 = vpop.permute.xlu1 %5374 }
 0xb18   :  { %19695 = vtanh.f32 %v5753_v14 }
 0xb19   :  { %19697 = vpow2.f32 %v15459_v1  ;;  %v21900_v1 = vsel %vm505_vm2, %v21431_v22, %v5375_v7 }
 0xb1a   :  { %23650 = vst [vmem:[#allocation57_spill] sm:$0xff] %v21900_v1 }
 0xb1e   :  { %v19694_v50 = vpop.eup %19693 }
 0xb1f   :  { %v6122_v20 = vadd.f32 1.0, %v19694_v50  ;;  %v21863_v0 = vpop.f32.mrb[74].mxu1 }
 0xb20   :  { %v16624_v29 = vpop.f32.mrb[75].mxu1 }
 0xb21   :  { %19699 = vrcp.f32 %v6122_v20 }
 0xb22   :  { %v19696_v61 = vpop.eup %19695 }
 0xb23   :  { %v5756_v41 = vmul.f32 %v19696_v61, %v5755_v62  ;;  %v19698_v32 = vpop.eup %19697  ;;  %v5359_v62 = vpop.permute.xlu0 %5358 }
 0xb24   :  { %v6129_v48 = vadd.f32 1.0, %v19698_v32  ;;  %v21944_v61 = vsel %vm505_vm2, %v21157_v2, %v5359_v62  ;;  %v23652_v32 = vld [vmem:[#allocation52_spill] sm:$0xff] }
 0xb25   :  { %v21868_v31 = vadd.f32 %v5757_v35, %v5756_v41  ;;  %v23649_v35 = vmov 0.0   ;;  %23651 = vst [vmem:[#allocation58_spill] sm:$0xff] %v21944_v61 }
 0xb26   :  { %19701 = vrcp.f32 %v6129_v48 }
 0xb27   :  { %15462 = vmatmul.mubr.msk.f32.vlgmr.msra.gmra.mrb[36].mxu0 %vm505_vm2, %v21868_v31  ;;  %16634 = vmatmul.mubr.msk.f32.vlgmr.msra.gmra.mrb[76].mxu1 %vm505_vm2, %v21868_v31 }
 0xb28   :  { %17961 = vmatpush1.bf16.msra.mxu0 %v21671_v3  ;;  %17976 = vmatpush3.bf16.msra.mxu1 %v21673_v6 }
 0xb29   :  { %17963 = vmatprep.subr.bf16.mxu0 %v21680_v21  ;;  %17977 = vmatprep.subr.bf16.mxu1 %v23648_v13 }
 0xb2a   :  { %6515 = vmatprep.mubr.f32.mxu0 %v23649_v35  ;;  %16652 = vmatprep.mubr.msk.f32.mxu1 %vm20429_vm0, %v23649_v35 }
 0xb2b   :  { %v19700_v26 = vpop.eup %19699 }
 0xb2c   :  { %v6132_v60 = vmul.f32 %v19700_v26, %v6115_v16  ;;  %17965 = vmatpush1.bf16.msra.mxu0 %v21701_v47  ;;  %17979 = vmatpush3.bf16.msra.mxu1 %v21703_v55 }
 0xb2d   :  { %17967 = vmatprep.subr.bf16.mxu0 %v21710_v8  ;;  %17980 = vmatprep.subr.bf16.mxu1 %v23648_v13 }
 0xb2e   :  { %v6133_v53 = vadd.f32 %v6132_v60, %v5958_v25  ;;  %v23653_v60 = vld [vmem:[#allocation53_spill] sm:$0xff] }
 0xb30   :  { %19703 = vtanh.f32 %v6133_v53  ;;  %17969 = vmatpush1.bf16.msra.mxu0 %v21732_v27  ;;  %17982 = vmatpush3.bf16.msra.mxu1 %v21734_v44  ;;  %v19702_v14 = vpop.eup %19701 }
 0xb31   :  { %17971 = vmatprep.subr.bf16.mxu0 %v21741_v56  ;;  %17983 = vmatprep.subr.bf16.mxu1 %v23648_v13  ;;  %v6135_v54 = vsub.f32 1.0, %v19702_v14  ;;  %v6137_v20 = vmul.f32 0.0, %v19702_v14 }
 0xb34   :  { %17973 = vmatpush1.bf16.msra.mxu0 %v21754_v45  ;;  %17985 = vmatpush3.bf16.msra.mxu1 %v21756_v57 }
 0xb35   :  { %17987 = vmatprep.subr.bf16.mxu0 %v21760_v11  ;;  %17994 = vmatprep.subr.bf16.mxu1 %v23648_v13 }
 0xb37   :  { %15466 = vmatmul.mubr.msk.f32.vlgmr.msra.gmra.mrb[38].mxu0 %vm5436_vm3, %v21900_v1  ;;  %16653 = vmatmul.mubr.msk.f32.vlgmr.msra.gmra.mrb[78].mxu1 %vm5436_vm3, %v21900_v1 }
 0xb38   :  { %17989 = vmatpush1.bf16.msra.mxu0 %v21764_v37  ;;  %17996 = vmatpush3.bf16.msra.mxu1 %v21766_v43 }
 0xb39   :  { %17991 = vmatprep.subr.bf16.mxu0 %v21770_v15  ;;  %17997 = vmatprep.subr.bf16.mxu1 %v23648_v13 }
 0xb3a   :  { %v19704_v50 = vpop.eup %19703  ;;  %6659 = vmatprep.mubr.f32.mxu0 %v23649_v35  ;;  %16663 = vmatprep.mubr.msk.f32.mxu1 %vm20429_vm0, %v23649_v35 }
 0xb3b   :  { %v6136_v22 = vmul.f32 %v19704_v50, %v6135_v54 }
 0xb3c   :  { %17993 = vmatpush1.bf16.msra.mxu0 %v21782_v12  ;;  %17999 = vmatpush3.bf16.msra.mxu1 %v21784_v36 }
 0xb3d   :  { %v21915_v29 = vadd.f32 %v6137_v20, %v6136_v22  ;;  %18001 = vmatprep.subr.bf16.mxu0 %v21488_v42  ;;  %18016 = vmatprep.subr.bf16.mxu1 %v23648_v13 }
 0xb3f   :  { %15468 = vmatmul.mubr.msk.f32.vlgmr.msra.gmra.mrb[38].mxu0 %vm505_vm2, %v21915_v29  ;;  %16664 = vmatmul.mubr.msk.f32.vlgmr.msra.gmra.mrb[80].mxu1 %vm505_vm2, %v21915_v29 }
 0xb40   :  { %18003 = vmatpush1.bf16.msra.mxu0 %v21499_v46  ;;  %18018 = vmatpush3.bf16.msra.mxu1 %v21501_v40 }
 0xb41   :  { %18005 = vmatprep.subr.bf16.mxu0 %v21513_v52  ;;  %18019 = vmatprep.subr.bf16.mxu1 %v23648_v13 }
 0xb42   :  { %6824 = vmatprep.mubr.f32.mxu0 %v23649_v35  ;;  %16682 = vmatprep.mubr.msk.f32.mxu1 %vm20429_vm0, %v23649_v35 }
 0xb44   :  { %18007 = vmatpush1.bf16.msra.mxu0 %v21526_v63  ;;  %18021 = vmatpush3.bf16.msra.mxu1 %v21528_v19 }
 0xb45   :  { %18009 = vmatprep.subr.bf16.mxu0 %v21541_v9  ;;  %18022 = vmatprep.subr.bf16.mxu1 %v23648_v13 }
 0xb48   :  { %18011 = vmatpush1.bf16.msra.mxu0 %v21560_v10  ;;  %18024 = vmatpush3.bf16.msra.mxu1 %v21562_v30 }
 0xb49   :  { %18013 = vmatprep.subr.bf16.mxu0 %v21569_v33  ;;  %18025 = vmatprep.subr.bf16.mxu1 %v23648_v13 }
 0xb4c   :  { %18015 = vmatpush1.bf16.msra.mxu0 %v21582_v23  ;;  %18027 = vmatpush3.bf16.msra.mxu1 %v21584_v34 }
 0xb4d   :  { %18029 = vmatprep.subr.bf16.mxu0 %v21603_v4  ;;  %18036 = vmatprep.subr.bf16.mxu1 %v23648_v13 }
 0xb4f   :  { %15472 = vmatmul.mubr.msk.f32.vlgmr.msra.gmra.mrb[40].mxu0 %vm5436_vm3, %v21944_v61  ;;  %16683 = vmatmul.mubr.msk.f32.vlgmr.msra.gmra.mrb[82].mxu1 %vm5436_vm3, %v21944_v61  ;;  %v23654_v61 = vld [vmem:[#allocation55_spill] sm:$0xff] }
 0xb50   :  { %18031 = vmatpush1.bf16.msra.mxu0 %v21614_v38  ;;  %18038 = vmatpush3.bf16.msra.mxu1 %v21616_v18 }
 0xb51   :  { %18033 = vmatprep.subr.bf16.mxu0 %v21618_v58  ;;  %18039 = vmatprep.subr.bf16.mxu1 %v23648_v13 }
 0xb52   :  { %6968 = vmatprep.mubr.f32.mxu0 %v23649_v35  ;;  %16693 = vmatprep.mubr.msk.f32.mxu1 %vm20429_vm0, %v23649_v35 }
 0xb54   :  { %18035 = vmatpush1.bf16.msra.mxu0 %v21640_v17  ;;  %18041 = vmatpush3.bf16.msra.mxu1 %v21642_v39 }
 0xb55   :  { %18043 = vmatprep.subr.bf16.mxu0 %v21649_v51  ;;  %18058 = vmatprep.subr.bf16.mxu1 %v23648_v13 }
 0xbfa   :  { %v6352_v2 = vpop.f32.mrb[36].mxu0  ;;  %v6423_v41 = vpop.f32.mrb[76].mxu1 }
 0xbfb   :  { %v19296_v48 = vadd.f32 %v23652_v32, %v6352_v2  ;;  %v6354_v16 = vpop.f32.mrb[37].mxu0  ;;  %v16635_v26 = vpop.f32.mrb[77].mxu1 }
 0xbfc   :  { %v19298_v53 = vadd.f32 %v23653_v60, %v6354_v16  ;;  %v23655_v26 = vld [vmem:[#allocation54_spill] sm:$0xff] }
 0xbfd   :  { %v15464_v25 = vmul.f32 -1.442695, %v19296_v48  ;;  %v6424_v48 = vadd.f32 %v6423_v41, %v23655_v26 }
 0xbfe   :  { %v15465_v7 = vmul.f32 -1.442695, %v19298_v53  ;;  %v6280_v53 = vadd.f32 %v21863_v0, %v21857_v24 }
 0xbff   :  { %19705 = vpow2.f32 %v15464_v25 }
 0xc00   :  { %19707 = vpow2.f32 %v15465_v7 }
 0xc09   :  { %v19706_v14 = vpop.eup %19705 }
 0xc0a   :  { %v6431_v54 = vadd.f32 1.0, %v19706_v14  ;;  %v6588_v50 = vpop.f32.mrb[78].mxu1  ;;  %v19708_v20 = vpop.eup %19707 }
 0xc0b   :  { %v16654_v22 = vpop.f32.mrb[79].mxu1  ;;  %v6438_v62 = vadd.f32 1.0, %v19708_v20 }
 0xc0c   :  { %19709 = vrcp.f32 %v6431_v54 }
 0xc0d   :  { %19711 = vrcp.f32 %v6438_v62 }
 0xc12   :  { %v6661_v59 = vpop.f32.mrb[38].mxu0  ;;  %v6732_v1 = vpop.f32.mrb[80].mxu1 }
 0xc13   :  { %v19300_v51 = vadd.f32 %v23654_v61, %v6661_v59  ;;  %v6663_v2 = vpop.f32.mrb[39].mxu0  ;;  %v16665_v32 = vpop.f32.mrb[81].mxu1 }
 0xc14   :  { %v19302_v25 = vadd.f32 %v21854_v49, %v6663_v2 }
 0xc15   :  { %v15470_v39 = vmul.f32 -1.442695, %v19300_v51 }
 0xc16   :  { %v19710_v16 = vpop.eup %19709  ;;  %v15471_v54 = vmul.f32 -1.442695, %v19302_v25  ;;  %v23656_v25 = vld [vmem:[#allocation45_spill] sm:$0xff] }
 0xc17   :  { %v6441_v7 = vmul.f32 %v19710_v16, %v6424_v48  ;;  %19713 = vpow2.f32 %v15470_v39  ;;  %v19712_v22 = vpop.eup %19711  ;;  %v6589_v48 = vadd.f32 %v6588_v50, %v21875_v5 }
 0xc18   :  { %v6444_v51 = vsub.f32 1.0, %v19712_v22  ;;  %v6446_v2 = vmul.f32 %v19712_v22, %v21868_v31  ;;  %v6733_v31 = vadd.f32 %v6732_v1, %v21866_v28  ;;  %v5371_v1 = vpop.permute.xlu1 %5370 }
 0xc19   :  { %v6442_v14 = vadd.f32 %v6441_v7, %v6280_v53  ;;  %v22000_v53 = vsel %vm505_vm2, %v23656_v25, %v5371_v1 }
 0xc1a   :  { %23657 = vst [vmem:[#allocation53_spill] sm:$0xff] %v22000_v53 }
 0xc1b   :  { %19715 = vtanh.f32 %v6442_v14 }
 0xc1c   :  { %19717 = vpow2.f32 %v15471_v54 }
 0xc21   :  { %v19714_v59 = vpop.eup %19713 }
 0xc22   :  { %v6740_v20 = vadd.f32 1.0, %v19714_v59  ;;  %v21968_v32 = vpop.f32.mrb[82].mxu1 }
 0xc23   :  { %v16684_v41 = vpop.f32.mrb[83].mxu1 }
 0xc24   :  { %19719 = vrcp.f32 %v6740_v20  ;;  %v23658_v20 = vld [vmem:[#allocation43_spill] sm:$0xff] }
 0xc25   :  { %v19716_v62 = vpop.eup %19715 }
 0xc26   :  { %v6445_v26 = vmul.f32 %v19716_v62, %v6444_v51  ;;  %v19718_v49 = vpop.eup %19717  ;;  %v23660_v51 = vld [vmem:[#allocation48_spill] sm:$0xff]  ;;  %v23661_v62 = vld [vmem:[#allocation49_spill] sm:$0xff] }
 0xc27   :  { %v6747_v39 = vadd.f32 1.0, %v19718_v49 }
 0xc28   :  { %v21971_v0 = vadd.f32 %v6446_v2, %v6445_v26 }
 0xc29   :  { %19721 = vrcp.f32 %v6747_v39 }
 0xc2a   :  { %15474 = vmatmul.mubr.msk.f32.vlgmr.msra.gmra.mrb[40].mxu0 %vm505_vm2, %v21971_v0  ;;  %16694 = vmatmul.mubr.msk.f32.vlgmr.msra.gmra.mrb[84].mxu1 %vm505_vm2, %v21971_v0 }
 0xc2b   :  { %18045 = vmatpush1.bf16.msra.mxu0 %v21671_v3  ;;  %18060 = vmatpush3.bf16.msra.mxu1 %v21673_v6 }
 0xc2c   :  { %18047 = vmatprep.subr.bf16.mxu0 %v21680_v21  ;;  %18061 = vmatprep.subr.bf16.mxu1 %v23648_v13 }
 0xc2d   :  { %7133 = vmatprep.mubr.f32.mxu0 %v23649_v35  ;;  %16712 = vmatprep.mubr.msk.f32.mxu1 %vm20429_vm0, %v23649_v35 }
 0xc2e   :  { %v19720_v26 = vpop.eup %19719 }
 0xc2f   :  { %v6750_v16 = vmul.f32 %v19720_v26, %v6733_v31  ;;  %18049 = vmatpush1.bf16.msra.mxu0 %v21701_v47  ;;  %18063 = vmatpush3.bf16.msra.mxu1 %v21703_v55  ;;  %v23662_v31 = vld [vmem:[#allocation52_spill] sm:$0xff] }
 0xc30   :  { %18051 = vmatprep.subr.bf16.mxu0 %v21710_v8  ;;  %18064 = vmatprep.subr.bf16.mxu1 %v23648_v13 }
 0xc31   :  { %v6751_v49 = vadd.f32 %v6750_v16, %v6589_v48 }
 0xc33   :  { %19723 = vtanh.f32 %v6751_v49  ;;  %18053 = vmatpush1.bf16.msra.mxu0 %v21732_v27  ;;  %18066 = vmatpush3.bf16.msra.mxu1 %v21734_v44  ;;  %v19722_v50 = vpop.eup %19721 }
 0xc34   :  { %18055 = vmatprep.subr.bf16.mxu0 %v21741_v56  ;;  %18067 = vmatprep.subr.bf16.mxu1 %v23648_v13  ;;  %v6753_v7 = vsub.f32 1.0, %v19722_v50  ;;  %v6755_v22 = vmul.f32 %v19722_v50, %v21915_v29  ;;  %v5363_v29 = vpop.permute.xlu0 %5362 }
 0xc35   :  { %v22045_v41 = vsel %vm505_vm2, %v23658_v20, %v5363_v29 }
 0xc36   :  { %23659 = vst [vmem:[#allocation45_spill] sm:$0xff] %v22045_v41 }
 0xc37   :  { %18057 = vmatpush1.bf16.msra.mxu0 %v21754_v45  ;;  %18069 = vmatpush3.bf16.msra.mxu1 %v21756_v57 }
 0xc38   :  { %18071 = vmatprep.subr.bf16.mxu0 %v21760_v11  ;;  %18078 = vmatprep.subr.bf16.mxu1 %v23648_v13 }
 0xc3a   :  { %15478 = vmatmul.mubr.msk.f32.vlgmr.msra.gmra.mrb[42].mxu0 %vm5436_vm3, %v22000_v53  ;;  %16713 = vmatmul.mubr.msk.f32.vlgmr.msra.gmra.mrb[86].mxu1 %vm5436_vm3, %v22000_v53 }
 0xc3b   :  { %18073 = vmatpush1.bf16.msra.mxu0 %v21764_v37  ;;  %18080 = vmatpush3.bf16.msra.mxu1 %v21766_v43 }
 0xc3c   :  { %18075 = vmatprep.subr.bf16.mxu0 %v21770_v15  ;;  %18081 = vmatprep.subr.bf16.mxu1 %v23648_v13 }
 0xc3d   :  { %v19724_v14 = vpop.eup %19723  ;;  %7277 = vmatprep.mubr.f32.mxu0 %v23649_v35  ;;  %16723 = vmatprep.mubr.msk.f32.mxu1 %vm20429_vm0, %v23649_v35 }
 0xc3e   :  { %v6754_v54 = vmul.f32 %v19724_v14, %v6753_v7 }
 0xc3f   :  { %18077 = vmatpush1.bf16.msra.mxu0 %v21782_v12  ;;  %18083 = vmatpush3.bf16.msra.mxu1 %v21784_v36 }
 0xc40   :  { %v22016_v59 = vadd.f32 %v6755_v22, %v6754_v54  ;;  %18085 = vmatprep.subr.bf16.mxu0 %v21488_v42  ;;  %18100 = vmatprep.subr.bf16.mxu1 %v23648_v13 }
 0xc42   :  { %15480 = vmatmul.mubr.msk.f32.vlgmr.msra.gmra.mrb[42].mxu0 %vm505_vm2, %v22016_v59  ;;  %16724 = vmatmul.mubr.msk.f32.vlgmr.msra.gmra.mrb[88].mxu1 %vm505_vm2, %v22016_v59 }
 0xc43   :  { %18087 = vmatpush1.bf16.msra.mxu0 %v21499_v46  ;;  %18102 = vmatpush3.bf16.msra.mxu1 %v21501_v40 }
 0xc44   :  { %18089 = vmatprep.subr.bf16.mxu0 %v21513_v52  ;;  %18103 = vmatprep.subr.bf16.mxu1 %v23648_v13 }
 0xc45   :  { %7442 = vmatprep.mubr.f32.mxu0 %v23649_v35  ;;  %16742 = vmatprep.mubr.msk.f32.mxu1 %vm20429_vm0, %v23649_v35 }
 0xc47   :  { %18091 = vmatpush1.bf16.msra.mxu0 %v21526_v63  ;;  %18105 = vmatpush3.bf16.msra.mxu1 %v21528_v19 }
 0xc48   :  { %18093 = vmatprep.subr.bf16.mxu0 %v21541_v9  ;;  %18106 = vmatprep.subr.bf16.mxu1 %v23648_v13 }
 0xc4b   :  { %18095 = vmatpush1.bf16.msra.mxu0 %v21560_v10  ;;  %18108 = vmatpush3.bf16.msra.mxu1 %v21562_v30 }
 0xc4c   :  { %18097 = vmatprep.subr.bf16.mxu0 %v21569_v33  ;;  %18109 = vmatprep.subr.bf16.mxu1 %v23648_v13 }
 0xc4f   :  { %18099 = vmatpush1.bf16.msra.mxu0 %v21582_v23  ;;  %18111 = vmatpush3.bf16.msra.mxu1 %v21584_v34 }
 0xc50   :  { %18113 = vmatprep.subr.bf16.mxu0 %v21603_v4  ;;  %18120 = vmatprep.subr.bf16.mxu1 %v23648_v13 }
 0xc52   :  { %15484 = vmatmul.mubr.msk.f32.vlgmr.msra.gmra.mrb[44].mxu0 %vm5436_vm3, %v22045_v41  ;;  %16743 = vmatmul.mubr.msk.f32.vlgmr.msra.gmra.mrb[90].mxu1 %vm5436_vm3, %v22045_v41 }
 0xc53   :  { %18115 = vmatpush1.bf16.msra.mxu0 %v21614_v38  ;;  %18122 = vmatpush3.bf16.msra.mxu1 %v21616_v18 }
 0xc54   :  { %18117 = vmatprep.subr.bf16.mxu0 %v21618_v58  ;;  %18123 = vmatprep.subr.bf16.mxu1 %v23648_v13 }
 0xc55   :  { %7586 = vmatprep.mubr.f32.mxu0 %v23649_v35  ;;  %16753 = vmatprep.mubr.msk.f32.mxu1 %vm20429_vm0, %v23649_v35 }
 0xc57   :  { %18119 = vmatpush1.bf16.msra.mxu0 %v21640_v17  ;;  %18125 = vmatpush3.bf16.msra.mxu1 %v23660_v51 }
 0xc58   :  { %18127 = vmatprep.subr.bf16.mxu0 %v23661_v62  ;;  %18142 = vmatprep.subr.bf16.mxu1 %v23648_v13 }
 0xcfd   :  { %v6970_v2 = vpop.f32.mrb[40].mxu0  ;;  %v7041_v39 = vpop.f32.mrb[84].mxu1 }
 0xcfe   :  { %v19304_v26 = vadd.f32 %v23662_v31, %v6970_v2  ;;  %v6972_v48 = vpop.f32.mrb[41].mxu0  ;;  %v16695_v16 = vpop.f32.mrb[85].mxu1 }
 0xcff   :  { %v19306_v1 = vadd.f32 %v23653_v60, %v6972_v48  ;;  %v23663_v16 = vld [vmem:[#allocation54_spill] sm:$0xff] }
 0xd00   :  { %v15476_v49 = vmul.f32 -1.442695, %v19304_v26  ;;  %v7042_v26 = vadd.f32 %v7041_v39, %v23663_v16 }
 0xd01   :  { %v15477_v50 = vmul.f32 -1.442695, %v19306_v1 }
 0xd02   :  { %19725 = vpow2.f32 %v15476_v49  ;;  %v23664_v49 = vld [vmem:[#allocation56_spill] sm:$0xff] }
 0xd03   :  { %19727 = vpow2.f32 %v15477_v50  ;;  %v6898_v50 = vadd.f32 %v21968_v32, %v21857_v24 }
 0xd0c   :  { %v19726_v25 = vpop.eup %19725 }
 0xd0d   :  { %v7049_v7 = vadd.f32 1.0, %v19726_v25  ;;  %v7206_v14 = vpop.f32.mrb[86].mxu1  ;;  %v19728_v22 = vpop.eup %19727 }
 0xd0e   :  { %v16714_v54 = vpop.f32.mrb[87].mxu1  ;;  %v7056_v29 = vadd.f32 1.0, %v19728_v22 }
 0xd0f   :  { %19729 = vrcp.f32 %v7049_v7 }
 0xd10   :  { %19731 = vrcp.f32 %v7056_v29 }
 0xd15   :  { %v7279_v20 = vpop.f32.mrb[42].mxu0  ;;  %v7350_v53 = vpop.f32.mrb[88].mxu1 }
 0xd16   :  { %v19308_v41 = vadd.f32 %v23654_v61, %v7279_v20  ;;  %v7281_v2 = vpop.f32.mrb[43].mxu0  ;;  %v16725_v31 = vpop.f32.mrb[89].mxu1 }
 0xd17   :  { %v19310_v1 = vadd.f32 %v23664_v49, %v7281_v2 }
 0xd18   :  { %v15482_v62 = vmul.f32 -1.442695, %v19308_v41 }
 0xd19   :  { %v19730_v48 = vpop.eup %19729  ;;  %v15483_v54 = vmul.f32 -1.442695, %v19310_v1 }
 0xd1a   :  { %v7059_v25 = vmul.f32 %v19730_v48, %v7042_v26  ;;  %19733 = vpow2.f32 %v15482_v62  ;;  %v19732_v22 = vpop.eup %19731 }
 0xd1b   :  { %v7062_v41 = vsub.f32 1.0, %v19732_v22  ;;  %v7064_v2 = vmul.f32 %v19732_v22, %v21971_v0 }
 0xd1c   :  { %v7060_v7 = vadd.f32 %v7059_v25, %v6898_v50 }
 0xd1e   :  { %19735 = vtanh.f32 %v7060_v7 }
 0xd1f   :  { %19737 = vpow2.f32 %v15483_v54 }
 0xd24   :  { %v19734_v20 = vpop.eup %19733 }
 0xd25   :  { %v7358_v61 = vadd.f32 1.0, %v19734_v20  ;;  %v22069_v31 = vpop.f32.mrb[90].mxu1 }
 0xd26   :  { %v16744_v39 = vpop.f32.mrb[91].mxu1 }
 0xd27   :  { %19739 = vrcp.f32 %v7358_v61  ;;  %v7351_v61 = vadd.f32 %v7350_v53, %v21866_v28  ;;  %v5367_v53 = vpop.permute.xlu1 %5366 }
 0xd28   :  { %v19736_v29 = vpop.eup %19735 }
 0xd29   :  { %v7063_v16 = vmul.f32 %v19736_v29, %v7062_v41  ;;  %v19738_v49 = vpop.eup %19737  ;;  %v23667_v41 = vld [vmem:[#allocation52_spill] sm:$0xff] }
 0xd2a   :  { %v7365_v62 = vadd.f32 1.0, %v19738_v49  ;;  %v23665_v49 = vld [vmem:[#allocation44_spill] sm:$0xff] }
 0xd2b   :  { %v22072_v32 = vadd.f32 %v7064_v2, %v7063_v16  ;;  %v7207_v16 = vadd.f32 %v7206_v14, %v21875_v5  ;;  %v5369_v1 = vsel %vm505_vm2, %v23665_v49, %v5367_v53 }
 0xd2c   :  { %19741 = vrcp.f32 %v7365_v62 }
 0xd2d   :  { %15486 = vmatmul.mubr.msk.f32.vlgmr.msra.gmra.mrb[44].mxu0 %vm505_vm2, %v22072_v32  ;;  %16754 = vmatmul.mubr.msk.f32.vlgmr.msra.gmra.mrb[92].mxu1 %vm505_vm2, %v22072_v32 }
 0xd2e   :  { %18129 = vmatpush1.bf16.msra.mxu0 %v21671_v3  ;;  %18144 = vmatpush3.bf16.msra.mxu1 %v21673_v6 }
 0xd2f   :  { %18131 = vmatprep.subr.bf16.mxu0 %v21680_v21  ;;  %18145 = vmatprep.subr.bf16.mxu1 %v23648_v13 }
 0xd30   :  { %7751 = vmatprep.mubr.f32.mxu0 %v23649_v35  ;;  %16772 = vmatprep.mubr.msk.f32.mxu1 %vm20429_vm0, %v23649_v35 }
 0xd31   :  { %v19740_v0 = vpop.eup %19739 }
 0xd32   :  { %v7368_v26 = vmul.f32 %v19740_v0, %v7351_v61  ;;  %18133 = vmatpush1.bf16.msra.mxu0 %v21701_v47  ;;  %18147 = vmatpush3.bf16.msra.mxu1 %v21703_v55 }
 0xd33   :  { %18135 = vmatprep.subr.bf16.mxu0 %v21710_v8  ;;  %18148 = vmatprep.subr.bf16.mxu1 %v23648_v13 }
 0xd34   :  { %v7369_v48 = vadd.f32 %v7368_v26, %v7207_v16 }
 0xd36   :  { %19743 = vtanh.f32 %v7369_v48  ;;  %18137 = vmatpush1.bf16.msra.mxu0 %v21732_v27  ;;  %18150 = vmatpush3.bf16.msra.mxu1 %v21734_v44  ;;  %v19742_v14 = vpop.eup %19741 }
 0xd37   :  { %18139 = vmatprep.subr.bf16.mxu0 %v21741_v56  ;;  %18151 = vmatprep.subr.bf16.mxu1 %v23648_v13  ;;  %v7371_v50 = vsub.f32 1.0, %v19742_v14  ;;  %v7373_v54 = vmul.f32 %v19742_v14, %v22016_v59  ;;  %v23666_v59 = vld [vmem:[#allocation49_spill] sm:$0xff] }
 0xd3a   :  { %18141 = vmatpush1.bf16.msra.mxu0 %v21754_v45  ;;  %18153 = vmatpush3.bf16.msra.mxu1 %v21756_v57 }
 0xd3b   :  { %18155 = vmatprep.subr.bf16.mxu0 %v21760_v11  ;;  %18162 = vmatprep.subr.bf16.mxu1 %v23648_v13 }
 0xd3d   :  { %15490 = vmatmul.mubr.msk.f32.vlgmr.msra.gmra.mrb[46].mxu0 %vm5436_vm3, %v5369_v1  ;;  %16773 = vmatmul.mubr.msk.f32.vlgmr.msra.gmra.mrb[94].mxu1 %vm5436_vm3, %v5369_v1 }
 0xd3e   :  { %18157 = vmatpush1.bf16.msra.mxu0 %v21764_v37  ;;  %18164 = vmatpush3.bf16.msra.mxu1 %v21766_v43 }
 0xd3f   :  { %18159 = vmatprep.subr.bf16.mxu0 %v21770_v15  ;;  %18165 = vmatprep.subr.bf16.mxu1 %v23648_v13 }
 0xd40   :  { %v19744_v25 = vpop.eup %19743  ;;  %7895 = vmatprep.mubr.f32.mxu0 %v23649_v35  ;;  %16783 = vmatprep.mubr.msk.f32.mxu1 %vm20429_vm0, %v23649_v35 }
 0xd41   :  { %v7372_v7 = vmul.f32 %v19744_v25, %v7371_v50 }
 0xd42   :  { %18161 = vmatpush1.bf16.msra.mxu0 %v21782_v12  ;;  %18167 = vmatpush3.bf16.msra.mxu1 %v21784_v36 }
 0xd43   :  { %v22113_v22 = vadd.f32 %v7373_v54, %v7372_v7  ;;  %18169 = vmatprep.subr.bf16.mxu0 %v21488_v42  ;;  %18184 = vmatprep.subr.bf16.mxu1 %v23648_v13  ;;  %v23668_v7 = vld [vmem:[#allocation55_spill] sm:$0xff] }
 0xd45   :  { %15492 = vmatmul.mubr.msk.f32.vlgmr.msra.gmra.mrb[46].mxu0 %vm505_vm2, %v22113_v22  ;;  %16784 = vmatmul.mubr.msk.f32.vlgmr.msra.gmra.mrb[96].mxu1 %vm505_vm2, %v22113_v22 }
 0xd46   :  { %18171 = vmatpush1.bf16.msra.mxu0 %v21499_v46  ;;  %18186 = vmatpush3.bf16.msra.mxu1 %v21501_v40 }
 0xd47   :  { %18173 = vmatprep.subr.bf16.mxu0 %v21513_v52  ;;  %18187 = vmatprep.subr.bf16.mxu1 %v23648_v13 }
 0xd48   :  { %8057 = vmatprep.mubr.f32.mxu0 %v23649_v35  ;;  %16802 = vmatprep.mubr.msk.f32.mxu1 %vm20429_vm0, %v23649_v35 }
 0xd4a   :  { %18175 = vmatpush1.bf16.msra.mxu0 %v21526_v63  ;;  %18189 = vmatpush3.bf16.msra.mxu1 %v21528_v19 }
 0xd4b   :  { %18177 = vmatprep.subr.bf16.mxu0 %v21541_v9  ;;  %18190 = vmatprep.subr.bf16.mxu1 %v23648_v13 }
 0xd4e   :  { %18179 = vmatpush1.bf16.msra.mxu0 %v21560_v10  ;;  %18192 = vmatpush3.bf16.msra.mxu1 %v21562_v30 }
 0xd4f   :  { %18181 = vmatprep.subr.bf16.mxu0 %v21569_v33  ;;  %18193 = vmatprep.subr.bf16.mxu1 %v23648_v13 }
 0xd52   :  { %18183 = vmatpush1.bf16.msra.mxu0 %v21582_v23  ;;  %18195 = vmatpush3.bf16.msra.mxu1 %v21584_v34 }
 0xd53   :  { %18197 = vmatprep.subr.bf16.mxu0 %v21603_v4  ;;  %18204 = vmatprep.subr.bf16.mxu1 %v23648_v13 }
 0xd55   :  { %15496 = vmatmul.mubr.msk.f32.vlgmr.msra.gmra.mrb[48].mxu0 %vm5436_vm3, %v5369_v1  ;;  %16803 = vmatmul.mubr.msk.f32.vlgmr.msra.gmra.mrb[98].mxu1 %vm5436_vm3, %v5369_v1 }
 0xd56   :  { %18199 = vmatpush1.bf16.msra.mxu0 %v21614_v38  ;;  %18206 = vmatpush3.bf16.msra.mxu1 %v21616_v18 }
 0xd57   :  { %18201 = vmatprep.subr.bf16.mxu0 %v21618_v58  ;;  %18207 = vmatprep.subr.bf16.mxu1 %v23648_v13 }
 0xd58   :  { %8201 = vmatprep.mubr.f32.mxu0 %v23649_v35  ;;  %16813 = vmatprep.mubr.msk.f32.mxu1 %vm20429_vm0, %v23649_v35 }
 0xd5a   :  { %18203 = vmatpush1.bf16.msra.mxu0 %v21640_v17  ;;  %18209 = vmatpush3.bf16.msra.mxu1 %v23660_v51 }
 0xd5b   :  { %18211 = vmatprep.subr.bf16.mxu0 %v23666_v59  ;;  %18226 = vmatprep.subr.bf16.mxu1 %v23648_v13 }
 0xe00   :  { %v7588_v20 = vpop.f32.mrb[44].mxu0  ;;  %v7659_v39 = vpop.f32.mrb[92].mxu1 }
 0xe01   :  { %v19312_v29 = vadd.f32 %v23667_v41, %v7588_v20  ;;  %v7590_v2 = vpop.f32.mrb[45].mxu0  ;;  %v16755_v62 = vpop.f32.mrb[93].mxu1 }
 0xe02   :  { %v19314_v0 = vadd.f32 %v23653_v60, %v7590_v2  ;;  %v23669_v62 = vld [vmem:[#allocation54_spill] sm:$0xff] }
 0xe03   :  { %v15488_v61 = vmul.f32 -1.442695, %v19312_v29  ;;  %v7660_v29 = vadd.f32 %v7659_v39, %v23669_v62 }
 0xe04   :  { %v15489_v16 = vmul.f32 -1.442695, %v19314_v0 }
 0xe05   :  { %19745 = vpow2.f32 %v15488_v61  ;;  %v23670_v61 = vld [vmem:[#allocation56_spill] sm:$0xff] }
 0xe06   :  { %19747 = vpow2.f32 %v15489_v16  ;;  %v7516_v16 = vadd.f32 %v22069_v31, %v21857_v24 }
 0xe0f   :  { %v19746_v26 = vpop.eup %19745 }
 0xe10   :  { %v7667_v48 = vadd.f32 1.0, %v19746_v26  ;;  %v7824_v53 = vpop.f32.mrb[94].mxu1  ;;  %v19748_v49 = vpop.eup %19747 }
 0xe11   :  { %v16774_v14 = vpop.f32.mrb[95].mxu1  ;;  %v7674_v1 = vadd.f32 1.0, %v19748_v49 }
 0xe12   :  { %19749 = vrcp.f32 %v7667_v48 }
 0xe13   :  { %19751 = vrcp.f32 %v7674_v1 }
 0xe18   :  { %v7897_v50 = vpop.f32.mrb[46].mxu0  ;;  %v7968_v25 = vpop.f32.mrb[96].mxu1 }
 0xe19   :  { %v19316_v54 = vadd.f32 %v23668_v7, %v7897_v50  ;;  %v7899_v20 = vpop.f32.mrb[47].mxu0  ;;  %v16785_v41 = vpop.f32.mrb[97].mxu1 }
 0xe1a   :  { %v19318_v0 = vadd.f32 %v23670_v61, %v7899_v20 }
 0xe1b   :  { %v15494_v59 = vmul.f32 -1.442695, %v19316_v54 }
 0xe1c   :  { %v19750_v2 = vpop.eup %19749  ;;  %v15495_v14 = vmul.f32 -1.442695, %v19318_v0 }
 0xe1d   :  { %v7677_v26 = vmul.f32 %v19750_v2, %v7660_v29  ;;  %19753 = vpow2.f32 %v15494_v59  ;;  %v19752_v49 = vpop.eup %19751 }
 0xe1e   :  { %v7680_v54 = vsub.f32 1.0, %v19752_v49  ;;  %v7682_v20 = vmul.f32 %v19752_v49, %v22072_v32  ;;  %v7969_v32 = vadd.f32 %v7968_v25, %v21866_v28  ;;  %v23671_v25 = vld [vmem:[#allocation45_spill] sm:$0xff] }
 0xe1f   :  { %v7678_v48 = vadd.f32 %v7677_v26, %v7516_v16 }
 0xe21   :  { %19755 = vtanh.f32 %v7678_v48 }
 0xe22   :  { %19757 = vpow2.f32 %v15495_v14  ;;  %v23673_v14 = vld [vmem:[#allocation49_spill] sm:$0xff] }
 0xe27   :  { %v19754_v50 = vpop.eup %19753 }
 0xe28   :  { %v7976_v7 = vadd.f32 1.0, %v19754_v50  ;;  %v22160_v41 = vpop.f32.mrb[98].mxu1 }
 0xe29   :  { %v16804_v39 = vpop.f32.mrb[99].mxu1 }
 0xe2a   :  { %19759 = vrcp.f32 %v7976_v7  ;;  %v23674_v39 = vld [vmem:[#allocation52_spill] sm:$0xff] }
 0xe2b   :  { %v19756_v1 = vpop.eup %19755 }
 0xe2c   :  { %v7681_v62 = vmul.f32 %v19756_v1, %v7680_v54  ;;  %v19758_v61 = vpop.eup %19757 }
 0xe2d   :  { %v7983_v59 = vadd.f32 1.0, %v19758_v61 }
 0xe2e   :  { %v22163_v31 = vadd.f32 %v7682_v20, %v7681_v62  ;;  %v7825_v62 = vadd.f32 %v7824_v53, %v21875_v5 }
 0xe2f   :  { %19761 = vrcp.f32 %v7983_v59 }
 0xe30   :  { %15498 = vmatmul.mubr.msk.f32.vlgmr.msra.gmra.mrb[48].mxu0 %vm505_vm2, %v22163_v31  ;;  %16814 = vmatmul.mubr.msk.f32.vlgmr.msra.gmra.mrb[100].mxu1 %vm505_vm2, %v22163_v31 }
 0xe31   :  { %18213 = vmatpush1.bf16.msra.mxu0 %v21671_v3  ;;  %18228 = vmatpush3.bf16.msra.mxu1 %v21673_v6 }
 0xe32   :  { %18215 = vmatprep.subr.bf16.mxu0 %v21680_v21  ;;  %18229 = vmatprep.subr.bf16.mxu1 %v23648_v13 }
 0xe33   :  { %8363 = vmatprep.mubr.f32.mxu0 %v23649_v35  ;;  %16832 = vmatprep.mubr.msk.f32.mxu1 %vm20429_vm0, %v23649_v35 }
 0xe34   :  { %v19760_v7 = vpop.eup %19759 }
 0xe35   :  { %v7986_v29 = vmul.f32 %v19760_v7, %v7969_v32  ;;  %18217 = vmatpush1.bf16.msra.mxu0 %v21701_v47  ;;  %18231 = vmatpush3.bf16.msra.mxu1 %v21703_v55 }
 0xe36   :  { %18219 = vmatprep.subr.bf16.mxu0 %v21710_v8  ;;  %18232 = vmatprep.subr.bf16.mxu1 %v23648_v13 }
 0xe37   :  { %v7987_v2 = vadd.f32 %v7986_v29, %v7825_v62 }
 0xe39   :  { %19763 = vtanh.f32 %v7987_v2  ;;  %18221 = vmatpush1.bf16.msra.mxu0 %v21732_v27  ;;  %18234 = vmatpush3.bf16.msra.mxu1 %v21734_v44  ;;  %v19762_v53 = vpop.eup %19761 }
 0xe3a   :  { %18223 = vmatprep.subr.bf16.mxu0 %v21741_v56  ;;  %18235 = vmatprep.subr.bf16.mxu1 %v23648_v13  ;;  %v7989_v61 = vsub.f32 1.0, %v19762_v53  ;;  %v7991_v26 = vmul.f32 %v19762_v53, %v22113_v22  ;;  %v23672_v22 = vld [vmem:[#allocation53_spill] sm:$0xff] }
 0xe3d   :  { %18225 = vmatpush1.bf16.msra.mxu0 %v21754_v45  ;;  %18237 = vmatpush3.bf16.msra.mxu1 %v21756_v57 }
 0xe3e   :  { %18239 = vmatprep.subr.bf16.mxu0 %v21760_v11  ;;  %18246 = vmatprep.subr.bf16.mxu1 %v23648_v13 }
 0xe40   :  { %15502 = vmatmul.mubr.msk.f32.vlgmr.msra.gmra.mrb[50].mxu0 %vm5436_vm3, %v23671_v25  ;;  %16833 = vmatmul.mubr.msk.f32.vlgmr.msra.gmra.mrb[102].mxu1 %vm5436_vm3, %v23671_v25 }
 0xe41   :  { %18241 = vmatpush1.bf16.msra.mxu0 %v21764_v37  ;;  %18248 = vmatpush3.bf16.msra.mxu1 %v21766_v43 }
 0xe42   :  { %18243 = vmatprep.subr.bf16.mxu0 %v21770_v15  ;;  %18249 = vmatprep.subr.bf16.mxu1 %v23648_v13 }
 0xe43   :  { %v19764_v0 = vpop.eup %19763  ;;  %8507 = vmatprep.mubr.f32.mxu0 %v23649_v35  ;;  %16843 = vmatprep.mubr.msk.f32.mxu1 %vm20429_vm0, %v23649_v35 }
 0xe44   :  { %v7990_v16 = vmul.f32 %v19764_v0, %v7989_v61 }
 0xe45   :  { %18245 = vmatpush1.bf16.msra.mxu0 %v21782_v12  ;;  %18251 = vmatpush3.bf16.msra.mxu1 %v21784_v36 }
 0xe46   :  { %v22204_v48 = vadd.f32 %v7991_v26, %v7990_v16  ;;  %18253 = vmatprep.subr.bf16.mxu0 %v21488_v42  ;;  %18268 = vmatprep.subr.bf16.mxu1 %v23648_v13  ;;  %v23675_v26 = vld [vmem:[#allocation55_spill] sm:$0xff] }
 0xe48   :  { %15504 = vmatmul.mubr.msk.f32.vlgmr.msra.gmra.mrb[50].mxu0 %vm505_vm2, %v22204_v48  ;;  %16844 = vmatmul.mubr.msk.f32.vlgmr.msra.gmra.mrb[104].mxu1 %vm505_vm2, %v22204_v48 }
 0xe49   :  { %18255 = vmatpush1.bf16.msra.mxu0 %v21499_v46  ;;  %18270 = vmatpush3.bf16.msra.mxu1 %v21501_v40 }
 0xe4a   :  { %18257 = vmatprep.subr.bf16.mxu0 %v21513_v52  ;;  %18271 = vmatprep.subr.bf16.mxu1 %v23648_v13 }
 0xe4b   :  { %8669 = vmatprep.mubr.f32.mxu0 %v23649_v35  ;;  %16862 = vmatprep.mubr.msk.f32.mxu1 %vm20429_vm0, %v23649_v35 }
 0xe4d   :  { %18259 = vmatpush1.bf16.msra.mxu0 %v21526_v63  ;;  %18273 = vmatpush3.bf16.msra.mxu1 %v21528_v19 }
 0xe4e   :  { %18261 = vmatprep.subr.bf16.mxu0 %v21541_v9  ;;  %18274 = vmatprep.subr.bf16.mxu1 %v23648_v13 }
 0xe51   :  { %18263 = vmatpush1.bf16.msra.mxu0 %v21560_v10  ;;  %18276 = vmatpush3.bf16.msra.mxu1 %v21562_v30 }
 0xe52   :  { %18265 = vmatprep.subr.bf16.mxu0 %v21569_v33  ;;  %18277 = vmatprep.subr.bf16.mxu1 %v23648_v13 }
 0xe55   :  { %18267 = vmatpush1.bf16.msra.mxu0 %v21582_v23  ;;  %18279 = vmatpush3.bf16.msra.mxu1 %v21584_v34 }
 0xe56   :  { %18281 = vmatprep.subr.bf16.mxu0 %v21603_v4  ;;  %18288 = vmatprep.subr.bf16.mxu1 %v23648_v13 }
 0xe58   :  { %15508 = vmatmul.mubr.msk.f32.vlgmr.msra.gmra.mrb[52].mxu0 %vm5436_vm3, %v23672_v22  ;;  %16863 = vmatmul.mubr.msk.f32.vlgmr.msra.gmra.mrb[106].mxu1 %vm5436_vm3, %v23672_v22 }
 0xe59   :  { %18283 = vmatpush1.bf16.msra.mxu0 %v21614_v38  ;;  %18290 = vmatpush3.bf16.msra.mxu1 %v21616_v18 }
 0xe5a   :  { %18285 = vmatprep.subr.bf16.mxu0 %v21618_v58  ;;  %18291 = vmatprep.subr.bf16.mxu1 %v23648_v13 }
 0xe5b   :  { %8813 = vmatprep.mubr.f32.mxu0 %v23649_v35  ;;  %16873 = vmatprep.mubr.msk.f32.mxu1 %vm20429_vm0, %v23649_v35 }
 0xe5d   :  { %18287 = vmatpush1.bf16.msra.mxu0 %v21640_v17  ;;  %18293 = vmatpush3.bf16.msra.mxu1 %v23660_v51 }
 0xe5e   :  { %18295 = vmatprep.subr.bf16.mxu0 %v23673_v14  ;;  %18310 = vmatprep.subr.bf16.mxu1 %v23648_v13 }
 0xf03   :  { %v8203_v49 = vpop.f32.mrb[48].mxu0  ;;  %v8274_v50 = vpop.f32.mrb[100].mxu1 }
 0xf04   :  { %v19320_v54 = vadd.f32 %v23674_v39, %v8203_v49  ;;  %v8205_v1 = vpop.f32.mrb[49].mxu0  ;;  %v16815_v20 = vpop.f32.mrb[101].mxu1 }
 0xf05   :  { %v19322_v32 = vadd.f32 %v23653_v60, %v8205_v1  ;;  %v23676_v20 = vld [vmem:[#allocation54_spill] sm:$0xff] }
 0xf06   :  { %v15500_v59 = vmul.f32 -1.442695, %v19320_v54  ;;  %v8275_v54 = vadd.f32 %v8274_v50, %v23676_v20 }
 0xf07   :  { %v15501_v7 = vmul.f32 -1.442695, %v19322_v32 }
 0xf08   :  { %19765 = vpow2.f32 %v15500_v59  ;;  %v23677_v59 = vld [vmem:[#allocation56_spill] sm:$0xff] }
 0xf09   :  { %19767 = vpow2.f32 %v15501_v7  ;;  %v8131_v7 = vadd.f32 %v22160_v41, %v21857_v24 }
 0xf12   :  { %v19766_v62 = vpop.eup %19765 }
 0xf13   :  { %v8282_v29 = vadd.f32 1.0, %v19766_v62  ;;  %v8436_v2 = vpop.f32.mrb[102].mxu1  ;;  %v19768_v25 = vpop.eup %19767 }
 0xf14   :  { %v16834_v53 = vpop.f32.mrb[103].mxu1  ;;  %v8289_v61 = vadd.f32 1.0, %v19768_v25 }
 0xf15   :  { %19769 = vrcp.f32 %v8282_v29 }
 0xf16   :  { %19771 = vrcp.f32 %v8289_v61 }
 0xf1b   :  { %v8509_v0 = vpop.f32.mrb[50].mxu0  ;;  %v8580_v16 = vpop.f32.mrb[104].mxu1 }
 0xf1c   :  { %v19324_v22 = vadd.f32 %v23675_v26, %v8509_v0  ;;  %v8511_v49 = vpop.f32.mrb[51].mxu0  ;;  %v16845_v39 = vpop.f32.mrb[105].mxu1 }
 0xf1d   :  { %v19326_v32 = vadd.f32 %v23677_v59, %v8511_v49 }
 0xf1e   :  { %v15506_v14 = vmul.f32 -1.442695, %v19324_v22 }
 0xf1f   :  { %v19770_v1 = vpop.eup %19769  ;;  %v15507_v53 = vmul.f32 -1.442695, %v19326_v32 }
 0xf20   :  { %v8292_v62 = vmul.f32 %v19770_v1, %v8275_v54  ;;  %19773 = vpow2.f32 %v15506_v14  ;;  %v19772_v25 = vpop.eup %19771 }
 0xf21   :  { %v8295_v22 = vsub.f32 1.0, %v19772_v25  ;;  %v8297_v49 = vmul.f32 %v19772_v25, %v22163_v31  ;;  %v8581_v31 = vadd.f32 %v8580_v16, %v21866_v28  ;;  %v23678_v16 = vld [vmem:[#allocation58_spill] sm:$0xff] }
 0xf22   :  { %v8293_v29 = vadd.f32 %v8292_v62, %v8131_v7 }
 0xf24   :  { %19775 = vtanh.f32 %v8293_v29 }
 0xf25   :  { %19777 = vpow2.f32 %v15507_v53  ;;  %v23680_v53 = vld [vmem:[#allocation49_spill] sm:$0xff] }
 0xf2a   :  { %v19774_v0 = vpop.eup %19773 }
 0xf2b   :  { %v8588_v26 = vadd.f32 1.0, %v19774_v0  ;;  %v22253_v39 = vpop.f32.mrb[106].mxu1 }
 0xf2c   :  { %v16864_v50 = vpop.f32.mrb[107].mxu1 }
 0xf2d   :  { %19779 = vrcp.f32 %v8588_v26  ;;  %v23681_v50 = vld [vmem:[#allocation52_spill] sm:$0xff] }
 0xf2e   :  { %v19776_v61 = vpop.eup %19775 }
 0xf2f   :  { %v8296_v20 = vmul.f32 %v19776_v61, %v8295_v22  ;;  %v19778_v59 = vpop.eup %19777 }
 0xf30   :  { %v8595_v14 = vadd.f32 1.0, %v19778_v59 }
 0xf31   :  { %v22256_v41 = vadd.f32 %v8297_v49, %v8296_v20  ;;  %v8437_v20 = vadd.f32 %v8436_v2, %v21875_v5 }
 0xf32   :  { %19781 = vrcp.f32 %v8595_v14 }
 0xf33   :  { %15510 = vmatmul.mubr.msk.f32.vlgmr.msra.gmra.mrb[52].mxu0 %vm505_vm2, %v22256_v41  ;;  %16874 = vmatmul.mubr.msk.f32.vlgmr.msra.gmra.mrb[108].mxu1 %vm505_vm2, %v22256_v41 }
 0xf34   :  { %18297 = vmatpush1.bf16.msra.mxu0 %v21671_v3  ;;  %18312 = vmatpush3.bf16.msra.mxu1 %v21673_v6 }
 0xf35   :  { %18299 = vmatprep.subr.bf16.mxu0 %v21680_v21  ;;  %18313 = vmatprep.subr.bf16.mxu1 %v23648_v13 }
 0xf36   :  { %8975 = vmatprep.mubr.f32.mxu0 %v23649_v35  ;;  %16892 = vmatprep.mubr.msk.f32.mxu1 %vm20429_vm0, %v23649_v35 }
 0xf37   :  { %v19780_v26 = vpop.eup %19779 }
 0xf38   :  { %v8598_v54 = vmul.f32 %v19780_v26, %v8581_v31  ;;  %18301 = vmatpush1.bf16.msra.mxu0 %v21701_v47  ;;  %18315 = vmatpush3.bf16.msra.mxu1 %v21703_v55 }
 0xf39   :  { %18303 = vmatprep.subr.bf16.mxu0 %v21710_v8  ;;  %18316 = vmatprep.subr.bf16.mxu1 %v23648_v13 }
 0xf3a   :  { %v8599_v1 = vadd.f32 %v8598_v54, %v8437_v20 }
 0xf3c   :  { %19783 = vtanh.f32 %v8599_v1  ;;  %18305 = vmatpush1.bf16.msra.mxu0 %v21732_v27  ;;  %18318 = vmatpush3.bf16.msra.mxu1 %v21734_v44  ;;  %v19782_v2 = vpop.eup %19781 }
 0xf3d   :  { %18307 = vmatprep.subr.bf16.mxu0 %v21741_v56  ;;  %18319 = vmatprep.subr.bf16.mxu1 %v23648_v13  ;;  %v8601_v59 = vsub.f32 1.0, %v19782_v2  ;;  %v8603_v62 = vmul.f32 %v19782_v2, %v22204_v48  ;;  %v23679_v48 = vld [vmem:[#allocation57_spill] sm:$0xff] }
 0xf40   :  { %18309 = vmatpush1.bf16.msra.mxu0 %v21754_v45  ;;  %18321 = vmatpush3.bf16.msra.mxu1 %v21756_v57 }
 0xf41   :  { %18323 = vmatprep.subr.bf16.mxu0 %v21760_v11  ;;  %18330 = vmatprep.subr.bf16.mxu1 %v23648_v13 }
 0xf43   :  { %15514 = vmatmul.mubr.msk.f32.vlgmr.msra.gmra.mrb[54].mxu0 %vm5436_vm3, %v23678_v16  ;;  %16893 = vmatmul.mubr.msk.f32.vlgmr.msra.gmra.mrb[110].mxu1 %vm5436_vm3, %v23678_v16 }
 0xf44   :  { %18325 = vmatpush1.bf16.msra.mxu0 %v21764_v37  ;;  %18332 = vmatpush3.bf16.msra.mxu1 %v21766_v43 }
 0xf45   :  { %18327 = vmatprep.subr.bf16.mxu0 %v21770_v15  ;;  %18333 = vmatprep.subr.bf16.mxu1 %v23648_v13 }
 0xf46   :  { %v19784_v32 = vpop.eup %19783  ;;  %9119 = vmatprep.mubr.f32.mxu0 %v23649_v35  ;;  %16903 = vmatprep.mubr.msk.f32.mxu1 %vm20429_vm0, %v23649_v35 }
 0xf47   :  { %v8602_v7 = vmul.f32 %v19784_v32, %v8601_v59 }
 0xf48   :  { %18329 = vmatpush1.bf16.msra.mxu0 %v21782_v12  ;;  %18335 = vmatpush3.bf16.msra.mxu1 %v21784_v36 }
 0xf49   :  { %v22297_v29 = vadd.f32 %v8603_v62, %v8602_v7  ;;  %18337 = vmatprep.subr.bf16.mxu0 %v21488_v42  ;;  %18352 = vmatprep.subr.bf16.mxu1 %v23648_v13  ;;  %v23682_v62 = vld [vmem:[#allocation55_spill] sm:$0xff] }
 0xf4b   :  { %15516 = vmatmul.mubr.msk.f32.vlgmr.msra.gmra.mrb[54].mxu0 %vm505_vm2, %v22297_v29  ;;  %16904 = vmatmul.mubr.msk.f32.vlgmr.msra.gmra.mrb[112].mxu1 %vm505_vm2, %v22297_v29 }
 0xf4c   :  { %18339 = vmatpush1.bf16.msra.mxu0 %v21499_v46  ;;  %18354 = vmatpush3.bf16.msra.mxu1 %v21501_v40 }
 0xf4d   :  { %18341 = vmatprep.subr.bf16.mxu0 %v21513_v52  ;;  %18355 = vmatprep.subr.bf16.mxu1 %v23648_v13 }
 0xf4e   :  { %9281 = vmatprep.mubr.f32.mxu0 %v23649_v35  ;;  %16922 = vmatprep.mubr.msk.f32.mxu1 %vm20429_vm0, %v23649_v35 }
 0xf50   :  { %18343 = vmatpush1.bf16.msra.mxu0 %v21526_v63  ;;  %18357 = vmatpush3.bf16.msra.mxu1 %v21528_v19 }
 0xf51   :  { %18345 = vmatprep.subr.bf16.mxu0 %v21541_v9  ;;  %18358 = vmatprep.subr.bf16.mxu1 %v23648_v13 }
 0xf54   :  { %18347 = vmatpush1.bf16.msra.mxu0 %v21560_v10  ;;  %18360 = vmatpush3.bf16.msra.mxu1 %v21562_v30 }
 0xf55   :  { %18349 = vmatprep.subr.bf16.mxu0 %v21569_v33  ;;  %18361 = vmatprep.subr.bf16.mxu1 %v23648_v13 }
 0xf58   :  { %18351 = vmatpush1.bf16.msra.mxu0 %v21582_v23  ;;  %18363 = vmatpush3.bf16.msra.mxu1 %v21584_v34 }
 0xf59   :  { %18365 = vmatprep.subr.bf16.mxu0 %v21603_v4  ;;  %18372 = vmatprep.subr.bf16.mxu1 %v23648_v13 }
 0xf5b   :  { %15520 = vmatmul.mubr.msk.f32.vlgmr.msra.gmra.mrb[56].mxu0 %vm5436_vm3, %v23679_v48  ;;  %16923 = vmatmul.mubr.msk.f32.vlgmr.msra.gmra.mrb[114].mxu1 %vm5436_vm3, %v23679_v48 }
 0xf5c   :  { %18367 = vmatpush1.bf16.msra.mxu0 %v21614_v38  ;;  %18374 = vmatpush3.bf16.msra.mxu1 %v21616_v18 }
 0xf5d   :  { %18369 = vmatprep.subr.bf16.mxu0 %v21618_v58  ;;  %18375 = vmatprep.subr.bf16.mxu1 %v23648_v13 }
 0xf5e   :  { %9425 = vmatprep.mubr.f32.mxu0 %v23649_v35  ;;  %16933 = vmatprep.mubr.msk.f32.mxu1 %vm20429_vm0, %v23649_v35 }
 0xf60   :  { %18371 = vmatpush1.bf16.msra.mxu0 %v21640_v17  ;;  %18377 = vmatpush3.bf16.msra.mxu1 %v23660_v51 }
 0xf61   :  { %18379 = vmatprep.subr.bf16.mxu0 %v23680_v53  ;;  %18394 = vmatprep.subr.bf16.mxu1 %v23648_v13 }
0x1006   :  { %v8815_v25 = vpop.f32.mrb[52].mxu0  ;;  %v8886_v0 = vpop.f32.mrb[108].mxu1 }
0x1007   :  { %v19328_v22 = vadd.f32 %v23681_v50, %v8815_v25  ;;  %v8817_v61 = vpop.f32.mrb[53].mxu0  ;;  %v16875_v49 = vpop.f32.mrb[109].mxu1 }
0x1008   :  { %v19330_v31 = vadd.f32 %v23653_v60, %v8817_v61  ;;  %v23683_v49 = vld [vmem:[#allocation54_spill] sm:$0xff] }
0x1009   :  { %v15512_v14 = vmul.f32 -1.442695, %v19328_v22  ;;  %v8887_v22 = vadd.f32 %v8886_v0, %v23683_v49 }
0x100a   :  { %v15513_v26 = vmul.f32 -1.442695, %v19330_v31 }
0x100b   :  { %19785 = vpow2.f32 %v15512_v14  ;;  %v23684_v14 = vld [vmem:[#allocation56_spill] sm:$0xff] }
0x100c   :  { %19787 = vpow2.f32 %v15513_v26  ;;  %v8743_v26 = vadd.f32 %v22253_v39, %v21857_v24 }
0x1015   :  { %v19786_v20 = vpop.eup %19785 }
0x1016   :  { %v8894_v54 = vadd.f32 1.0, %v19786_v20  ;;  %v9048_v1 = vpop.f32.mrb[110].mxu1  ;;  %v19788_v16 = vpop.eup %19787 }
0x1017   :  { %v16894_v2 = vpop.f32.mrb[111].mxu1  ;;  %v8901_v59 = vadd.f32 1.0, %v19788_v16 }
0x1018   :  { %19789 = vrcp.f32 %v8894_v54 }
0x1019   :  { %19791 = vrcp.f32 %v8901_v59 }
0x101e   :  { %v9121_v32 = vpop.f32.mrb[54].mxu0  ;;  %v9192_v7 = vpop.f32.mrb[112].mxu1 }
0x101f   :  { %v19332_v48 = vadd.f32 %v23682_v62, %v9121_v32  ;;  %v9123_v25 = vpop.f32.mrb[55].mxu0  ;;  %v16905_v50 = vpop.f32.mrb[113].mxu1 }
0x1020   :  { %v19334_v31 = vadd.f32 %v23684_v14, %v9123_v25 }
0x1021   :  { %v15518_v53 = vmul.f32 -1.442695, %v19332_v48 }
0x1022   :  { %v19790_v61 = vpop.eup %19789  ;;  %v15519_v2 = vmul.f32 -1.442695, %v19334_v31 }
0x1023   :  { %v8904_v20 = vmul.f32 %v19790_v61, %v8887_v22  ;;  %19793 = vpow2.f32 %v15518_v53  ;;  %v19792_v16 = vpop.eup %19791 }
0x1024   :  { %v8907_v48 = vsub.f32 1.0, %v19792_v16  ;;  %v8909_v25 = vmul.f32 %v19792_v16, %v22256_v41  ;;  %v9193_v41 = vadd.f32 %v9192_v7, %v21866_v28  ;;  %v23685_v7 = vld [vmem:[#allocation51_spill] sm:$0xff] }
0x1025   :  { %v8905_v54 = vadd.f32 %v8904_v20, %v8743_v26 }
0x1027   :  { %19795 = vtanh.f32 %v8905_v54 }
0x1028   :  { %19797 = vpow2.f32 %v15519_v2  ;;  %v23689_v2 = vld [vmem:[#allocation55_spill] sm:$0xff] }
0x102d   :  { %v19794_v32 = vpop.eup %19793 }
0x102e   :  { %v9200_v62 = vadd.f32 1.0, %v19794_v32  ;;  %v22346_v50 = vpop.f32.mrb[114].mxu1 }
0x102f   :  { %v16924_v0 = vpop.f32.mrb[115].mxu1 }
0x1030   :  { %19799 = vrcp.f32 %v9200_v62 }
0x1031   :  { %v19796_v59 = vpop.eup %19795 }
0x1032   :  { %v8908_v49 = vmul.f32 %v19796_v59, %v8907_v48  ;;  %v19798_v14 = vpop.eup %19797  ;;  %v23690_v48 = vld [vmem:[#allocation54_spill] sm:$0xff] }
0x1033   :  { %v9207_v53 = vadd.f32 1.0, %v19798_v14 }
0x1034   :  { %v22349_v39 = vadd.f32 %v8909_v25, %v8908_v49  ;;  %v9049_v49 = vadd.f32 %v9048_v1, %v21875_v5 }
0x1035   :  { %19801 = vrcp.f32 %v9207_v53 }
0x1036   :  { %15522 = vmatmul.mubr.msk.f32.vlgmr.msra.gmra.mrb[56].mxu0 %vm505_vm2, %v22349_v39  ;;  %16934 = vmatmul.mubr.msk.f32.vlgmr.msra.gmra.mrb[116].mxu1 %vm505_vm2, %v22349_v39 }
0x1037   :  { %18381 = vmatpush1.bf16.msra.mxu0 %v21671_v3  ;;  %18396 = vmatpush3.bf16.msra.mxu1 %v21673_v6 }
0x1038   :  { %18383 = vmatprep.subr.bf16.mxu0 %v21680_v21  ;;  %18397 = vmatprep.subr.bf16.mxu1 %v23648_v13 }
0x1039   :  { %9587 = vmatprep.mubr.f32.mxu0 %v23649_v35  ;;  %16952 = vmatprep.mubr.msk.f32.mxu1 %vm20429_vm0, %v23649_v35 }
0x103a   :  { %v19800_v62 = vpop.eup %19799 }
0x103b   :  { %v9210_v22 = vmul.f32 %v19800_v62, %v9193_v41  ;;  %18385 = vmatpush1.bf16.msra.mxu0 %v21701_v47  ;;  %18399 = vmatpush3.bf16.msra.mxu1 %v21703_v55  ;;  %v23691_v41 = vld [vmem:[#allocation56_spill] sm:$0xff] }
0x103c   :  { %18387 = vmatprep.subr.bf16.mxu0 %v21710_v8  ;;  %18400 = vmatprep.subr.bf16.mxu1 %v23648_v13 }
0x103d   :  { %v9211_v61 = vadd.f32 %v9210_v22, %v9049_v49  ;;  %v9355_v49 = vadd.f32 %v22346_v50, %v21857_v24 }
0x103f   :  { %19803 = vtanh.f32 %v9211_v61  ;;  %18389 = vmatpush1.bf16.msra.mxu0 %v21732_v27  ;;  %18402 = vmatpush3.bf16.msra.mxu1 %v21734_v44  ;;  %v19802_v1 = vpop.eup %19801 }
0x1040   :  { %18391 = vmatprep.subr.bf16.mxu0 %v21741_v56  ;;  %18403 = vmatprep.subr.bf16.mxu1 %v23648_v13  ;;  %v9213_v14 = vsub.f32 1.0, %v19802_v1  ;;  %v9215_v20 = vmul.f32 %v19802_v1, %v22297_v29 }
0x1043   :  { %18393 = vmatpush1.bf16.msra.mxu0 %v21754_v45  ;;  %18405 = vmatpush3.bf16.msra.mxu1 %v21756_v57 }
0x1044   :  { %18407 = vmatprep.subr.bf16.mxu0 %v21760_v11  ;;  %18414 = vmatprep.subr.bf16.mxu1 %v23648_v13 }
0x1046   :  { %15526 = vmatmul.mubr.msk.f32.vlgmr.msra.gmra.mrb[58].mxu0 %vm5436_vm3, %v23685_v7  ;;  %16953 = vmatmul.mubr.msk.f32.vlgmr.msra.gmra.mrb[118].mxu1 %vm5436_vm3, %v23685_v7 }
0x1047   :  { %18409 = vmatpush1.bf16.msra.mxu0 %v21764_v37  ;;  %18416 = vmatpush3.bf16.msra.mxu1 %v21766_v43 }
0x1048   :  { %18411 = vmatprep.subr.bf16.mxu0 %v21770_v15  ;;  %18417 = vmatprep.subr.bf16.mxu1 %v23648_v13 }
0x1049   :  { %v19804_v31 = vpop.eup %19803  ;;  %9731 = vmatprep.mubr.f32.mxu0 %v23649_v35  ;;  %16963 = vmatprep.mubr.msk.f32.mxu1 %vm20429_vm0, %v23649_v35 }
0x104a   :  { %v9214_v26 = vmul.f32 %v19804_v31, %v9213_v14 }
0x104b   :  { %18413 = vmatpush1.bf16.msra.mxu0 %v21782_v12  ;;  %18419 = vmatpush3.bf16.msra.mxu1 %v21784_v36 }
0x104c   :  { %v22390_v54 = vadd.f32 %v9215_v20, %v9214_v26  ;;  %18421 = vmatprep.subr.bf16.mxu0 %v21488_v42  ;;  %18436 = vmatprep.subr.bf16.mxu1 %v23648_v13  ;;  %v23686_v42 = vld [vmem:[#allocation50_spill] sm:$0xff] }
0x104e   :  { %15528 = vmatmul.mubr.msk.f32.vlgmr.msra.gmra.mrb[58].mxu0 %vm505_vm2, %v22390_v54  ;;  %16964 = vmatmul.mubr.msk.f32.vlgmr.msra.gmra.mrb[120].mxu1 %vm505_vm2, %v22390_v54 }
0x104f   :  { %18423 = vmatpush1.bf16.msra.mxu0 %v21499_v46  ;;  %18438 = vmatpush3.bf16.msra.mxu1 %v21501_v40  ;;  %v23687_v46 = vld [vmem:[#allocation49_spill] sm:$0xff] }
0x1050   :  { %18425 = vmatprep.subr.bf16.mxu0 %v21513_v52  ;;  %18439 = vmatprep.subr.bf16.mxu1 %v23648_v13 }
0x1051   :  { %9893 = vmatprep.mubr.f32.mxu0 %v23649_v35  ;;  %16982 = vmatprep.mubr.msk.f32.mxu1 %vm20429_vm0, %v23649_v35 }
0x1053   :  { %18427 = vmatpush1.bf16.msra.mxu0 %v21526_v63  ;;  %18441 = vmatpush3.bf16.msra.mxu1 %v21528_v19  ;;  %v23688_v63 = vld [vmem:[#allocation52_spill] sm:$0xff] }
0x1054   :  { %18429 = vmatprep.subr.bf16.mxu0 %v21541_v9  ;;  %18442 = vmatprep.subr.bf16.mxu1 %v23648_v13 }
0x1057   :  { %18431 = vmatpush1.bf16.msra.mxu0 %v21560_v10  ;;  %18444 = vmatpush3.bf16.msra.mxu1 %v21562_v30 }
0x1058   :  { %18433 = vmatprep.subr.bf16.mxu0 %v21569_v33  ;;  %18445 = vmatprep.subr.bf16.mxu1 %v23648_v13 }
0x105b   :  { %18435 = vmatpush1.bf16.msra.mxu0 %v21582_v23  ;;  %18447 = vmatpush3.bf16.msra.mxu1 %v21584_v34 }
0x105c   :  { %18449 = vmatprep.subr.bf16.mxu0 %v21603_v4  ;;  %18456 = vmatprep.subr.bf16.mxu1 %v23648_v13 }
0x105e   :  { %15532 = vmatmul.mubr.msk.f32.vlgmr.msra.gmra.mrb[60].mxu0 %vm5436_vm3, %v23686_v42  ;;  %16983 = vmatmul.mubr.msk.f32.vlgmr.msra.gmra.mrb[122].mxu1 %vm5436_vm3, %v23686_v42 }
0x105f   :  { %18451 = vmatpush1.bf16.msra.mxu0 %v21614_v38  ;;  %18458 = vmatpush3.bf16.msra.mxu1 %v21616_v18 }
0x1060   :  { %18453 = vmatprep.subr.bf16.mxu0 %v21618_v58  ;;  %18459 = vmatprep.subr.bf16.mxu1 %v23648_v13 }
0x1061   :  { %10037 = vmatprep.mubr.f32.mxu0 %v23649_v35  ;;  %16993 = vmatprep.mubr.msk.f32.mxu1 %vm20429_vm0, %v23649_v35 }
0x1063   :  { %18455 = vmatpush1.bf16.msra.mxu0 %v21640_v17  ;;  %18461 = vmatpush3.bf16.msra.mxu1 %v23660_v51 }
0x1064   :  { %18463 = vmatprep.subr.bf16.mxu0 %v23687_v46  ;;  %18478 = vmatprep.subr.bf16.mxu1 %v23648_v13 }
0x1109   :  { %v9427_v40 = vpop.f32.mrb[56].mxu0  ;;  %v9498_v52 = vpop.f32.mrb[116].mxu1 }
0x110a   :  { %v19336_v19 = vadd.f32 %v23688_v63, %v9427_v40  ;;  %v9429_v9 = vpop.f32.mrb[57].mxu0  ;;  %v16935_v10 = vpop.f32.mrb[117].mxu1  ;;  %v9499_v59 = vadd.f32 %v9498_v52, %v23690_v48 }
0x110b   :  { %v19338_v33 = vadd.f32 %v23653_v60, %v9429_v9 }
0x110c   :  { %v15524_v30 = vmul.f32 -1.442695, %v19336_v19 }
0x110d   :  { %v15525_v23 = vmul.f32 -1.442695, %v19338_v33 }
0x110e   :  { %19805 = vpow2.f32 %v15524_v30 }
0x110f   :  { %19807 = vpow2.f32 %v15525_v23  ;;  %v10455_v23 = vld [vmem:[#allocation13 + $0x8] sm:$0xff] }
0x1118   :  { %v19806_v34 = vpop.eup %19805 }
0x1119   :  { %v9506_v4 = vadd.f32 1.0, %v19806_v34  ;;  %v9660_v38 = vpop.f32.mrb[118].mxu1  ;;  %v19808_v58 = vpop.eup %19807  ;;  %v10458_v34 = vld [vmem:[#allocation13 + $0x20] sm:$0xff] }
0x111a   :  { %v16954_v18 = vpop.f32.mrb[119].mxu1  ;;  %v9513_v17 = vadd.f32 1.0, %v19808_v58  ;;  %v9661_v30 = vadd.f32 %v9660_v38, %v21875_v5  ;;  %v10454_v38 = vld [vmem:[#allocation13] sm:$0xff]  ;;  %v10457_v58 = vld [vmem:[#allocation13 + $0x18] sm:$0xff] }
0x111b   :  { %19809 = vrcp.f32 %v9506_v4 }
0x111c   :  { %19811 = vrcp.f32 %v9513_v17  ;;  %v10456_v17 = vld [vmem:[#allocation13 + $0x10] sm:$0xff] }
0x1121   :  { %v9733_v51 = vpop.f32.mrb[58].mxu0  ;;  %v9804_v29 = vpop.f32.mrb[120].mxu1 }
0x1122   :  { %v19340_v16 = vadd.f32 %v23689_v2, %v9733_v51  ;;  %v9735_v32 = vpop.f32.mrb[59].mxu0  ;;  %v16965_v0 = vpop.f32.mrb[121].mxu1  ;;  %v22493_v51 = vpack.c.bf16 %v10458_v34, %v10455_v23 }
0x1123   :  { %v19342_v62 = vadd.f32 %v23691_v41, %v9735_v32  ;;  %v10460_v0 = vld [vmem:[#allocation13 + $0x30] sm:$0xff] }
0x1124   :  { %v15530_v25 = vmul.f32 -1.442695, %v19340_v16  ;;  %v22504_v16 = vpack.c.bf16 %v10457_v58, %v10454_v38  ;;  %v10827_v38 = vld [vmem:[#allocation18 + $0x30] sm:$0xff]  ;;  %v10830_v58 = vld [vmem:[#allocation18 + $0x48] sm:$0xff] }
0x1125   :  { %v19810_v53 = vpop.eup %19809  ;;  %v15531_v1 = vmul.f32 -1.442695, %v19342_v62  ;;  %v10465_v62 = vld [vmem:[#allocation13 + $0x58] sm:$0xff] }
0x1126   :  { %v9516_v22 = vmul.f32 %v19810_v53, %v9499_v59  ;;  %19813 = vpow2.f32 %v15530_v25  ;;  %v19812_v7 = vpop.eup %19811  ;;  %v10463_v25 = vld [vmem:[#allocation13 + $0x48] sm:$0xff]  ;;  %v10462_v53 = vld [vmem:[#allocation13 + $0x40] sm:$0xff] }
0x1127   :  { %v9519_v42 = vsub.f32 1.0, %v19812_v7  ;;  %v9521_v52 = vmul.f32 %v19812_v7, %v22349_v39  ;;  %v9805_v39 = vadd.f32 %v9804_v29, %v21866_v28  ;;  %v10461_v29 = vld [vmem:[#allocation13 + $0x38] sm:$0xff]  ;;  %v10466_v7 = vld [vmem:[#allocation13 + $0x60] sm:$0xff] }
0x1128   :  { %v9517_v61 = vadd.f32 %v9516_v22, %v9355_v49  ;;  %v10467_v49 = vld [vmem:[#allocation13 + $0x68] sm:$0xff]  ;;  %v10470_v22 = vld [vmem:[#allocation13 + $0x80] sm:$0xff] }
0x112a   :  { %19815 = vtanh.f32 %v9517_v61  ;;  %v22519_v61 = vpack.c.bf16 %v10463_v25, %v10460_v0 }
0x112b   :  { %19817 = vpow2.f32 %v15531_v1  ;;  %v22521_v1 = vpack.c.bf16 %v10465_v62, %v10462_v53  ;;  %v10833_v53 = vld [vmem:[#allocation18 + $0x60] sm:$0xff]  ;;  %v10836_v62 = vld [vmem:[#allocation18 + $0x78] sm:$0xff] }
0x1130   :  { %v19814_v14 = vpop.eup %19813 }
0x1131   :  { %v9812_v31 = vadd.f32 1.0, %v19814_v14  ;;  %v22439_v26 = vpop.f32.mrb[122].mxu1  ;;  %v22525_v14 = vpack.c.bf16 %v10470_v22, %v10467_v49  ;;  %v10835_v49 = vld [vmem:[#allocation18 + $0x70] sm:$0xff]  ;;  %v10838_v22 = vld [vmem:[#allocation18 + $0x88] sm:$0xff] }
0x1132   :  { %v16984_v20 = vpop.f32.mrb[123].mxu1 }
0x1133   :  { %19819 = vrcp.f32 %v9812_v31  ;;  %v10469_v31 = vld [vmem:[#allocation13 + $0x78] sm:$0xff]  ;;  %v10468_v20 = vld [vmem:[#allocation13 + $0x70] sm:$0xff] }
0x1134   :  { %v19816_v46 = vpop.eup %19815 }
0x1135   :  { %v9520_v40 = vmul.f32 %v19816_v46, %v9519_v42  ;;  %v19818_v19 = vpop.eup %19817  ;;  %v10471_v42 = vld [vmem:[#allocation13 + $0x88] sm:$0xff]  ;;  %v10473_v46 = vld [vmem:[#allocation13 + $0x98] sm:$0xff] }
0x1136   :  { %v9819_v9 = vadd.f32 1.0, %v19818_v19  ;;  %v22534_v19 = vpack.c.bf16 %v10471_v42, %v10468_v20  ;;  %v22578_v20 = vpack.c.bf16 %v10836_v62, %v10833_v53  ;;  %v22582_v42 = vpack.c.bf16 %v10838_v22, %v10835_v49 }
0x1137   :  { %v22442_v50 = vadd.f32 %v9521_v52, %v9520_v40  ;;  %v10476_v40 = vld [vmem:[#allocation13 + $0xb0] sm:$0xff]  ;;  %v22532_v52 = vpack.c.bf16 %v10469_v31, %v10466_v7  ;;  %v10840_v7 = vld [vmem:[#allocation18 + $0x98] sm:$0xff]  ;;  %v10843_v31 = vld [vmem:[#allocation18 + $0xb0] sm:$0xff] }
0x1138   :  { %19821 = vrcp.f32 %v9819_v9  ;;  %v10472_v9 = vld [vmem:[#allocation13 + $0x90] sm:$0xff]  ;;  %23695 = vst [vmem:[#allocation43_spill] sm:$0xff] %v22578_v20  ;;  %23696 = vst [vmem:[#allocation48_spill] sm:$0xff] %v22582_v42 }
0x1139   :  { %15534 = vmatmul.mubr.msk.f32.vlgmr.msra.gmra.mrb[60].mxu0 %vm505_vm2, %v22442_v50  ;;  %16994 = vmatmul.mubr.msk.f32.vlgmr.msra.gmra.mrb[124].mxu1 %vm505_vm2, %v22442_v50 }
0x113a   :  { %18465 = vmatpush1.bf16.msra.mxu0 %v21671_v3  ;;  %18480 = vmatpush3.bf16.msra.mxu1 %v21673_v6 }
0x113b   :  { %18467 = vmatprep.subr.bf16.mxu0 %v21680_v21  ;;  %18481 = vmatprep.subr.bf16.mxu1 %v23648_v13  ;;  %v10449_v21 = vld [vmem:[#allocation12 + $0x8] sm:$0xff] }
0x113c   :  { %10199 = vmatprep.mubr.f32.mxu0 %v23649_v35  ;;  %17012 = vmatprep.mubr.msk.f32.mxu1 %vm20429_vm0, %v23649_v35 }
0x113d   :  { %v19820_v10 = vpop.eup %19819 }
0x113e   :  { %v9822_v33 = vmul.f32 %v19820_v10, %v9805_v39  ;;  %18469 = vmatpush1.bf16.msra.mxu0 %v21701_v47  ;;  %18483 = vmatpush3.bf16.msra.mxu1 %v21703_v55  ;;  %v10452_v47 = vld [vmem:[#allocation12 + $0x20] sm:$0xff]  ;;  %v23692_v55 = vld [vmem:[#allocation46_spill] sm:$0xff]  ;;  %v22538_v39 = vpack.c.bf16 %v10476_v40, %v10473_v46  ;;  %v22584_v46 = vpack.c.bf16 %v10843_v31, %v10840_v7  ;;  %v10839_v40 = vld [vmem:[#allocation18 + $0x90] sm:$0xff] }
0x113f   :  { %18471 = vmatprep.subr.bf16.mxu0 %v21710_v8  ;;  %18484 = vmatprep.subr.bf16.mxu1 %v23648_v13  ;;  %v10448_v8 = vld [vmem:[#allocation12] sm:$0xff]  ;;  %v10475_v10 = vld [vmem:[#allocation13 + $0xa8] sm:$0xff] }
0x1140   :  { %v9823_v3 = vadd.f32 %v9822_v33, %v9661_v30  ;;  %v10474_v30 = vld [vmem:[#allocation13 + $0xa0] sm:$0xff]  ;;  %v10477_v33 = vld [vmem:[#allocation13 + $0xb8] sm:$0xff]  ;;  %23697 = vst [vmem:[#allocation44_spill] sm:$0xff] %v22584_v46 }
0x1142   :  { %19823 = vtanh.f32 %v9823_v3  ;;  %18473 = vmatpush1.bf16.msra.mxu0 %v21732_v27  ;;  %18486 = vmatpush3.bf16.msra.mxu1 %v21734_v44  ;;  %v19822_v6 = vpop.eup %19821  ;;  %v22477_v44 = vpack.c.bf16 %v10452_v47, %v10449_v21  ;;  %v22542_v3 = vpack.c.bf16 %v10475_v10, %v10472_v9  ;;  %v23694_v21 = vld [vmem:[#allocation47_spill] sm:$0xff] }
0x1143   :  { %18475 = vmatprep.subr.bf16.mxu0 %v21741_v56  ;;  %18487 = vmatprep.subr.bf16.mxu1 %v23648_v13  ;;  %v9825_v27 = vsub.f32 1.0, %v19822_v6  ;;  %v10451_v56 = vld [vmem:[#allocation12 + $0x18] sm:$0xff]  ;;  %v10822_v47 = vld [vmem:[#allocation18 + $0x8] sm:$0xff] }
0x1144   :  { %v10842_v9 = vld [vmem:[#allocation18 + $0xa8] sm:$0xff]  ;;  %v10841_v10 = vld [vmem:[#allocation18 + $0xa0] sm:$0xff] }
0x1146   :  { %18477 = vmatpush1.bf16.msra.mxu0 %v21754_v45  ;;  %18489 = vmatpush3.bf16.msra.mxu1 %v21756_v57  ;;  %v10450_v45 = vld [vmem:[#allocation12 + $0x10] sm:$0xff]  ;;  %v10453_v57 = vld [vmem:[#allocation12 + $0x28] sm:$0xff] }
0x1147   :  { %18491 = vmatprep.subr.bf16.mxu0 %v21760_v11  ;;  %18498 = vmatprep.subr.bf16.mxu1 %v23648_v13  ;;  %v22487_v4 = vpack.c.bf16 %v10453_v57, %v10450_v45  ;;  %v10823_v45 = vld [vmem:[#allocation18 + $0x10] sm:$0xff] }
0x1149   :  { %15538 = vmatmul.mubr.msk.f32.vlgmr.msra.gmra.mrb[62].mxu0 %vm5436_vm3, %v23692_v55  ;;  %17013 = vmatmul.mubr.msk.f32.vlgmr.msra.gmra.mrb[126].mxu1 %vm5436_vm3, %v23692_v55  ;;  %v10825_v55 = vld [vmem:[#allocation18 + $0x20] sm:$0xff] }
0x114a   :  { %18493 = vmatpush1.bf16.msra.mxu0 %v21764_v37  ;;  %18500 = vmatpush3.bf16.msra.mxu1 %v21766_v43  ;;  %v9827_v43 = vmul.f32 %v19822_v6, %v22390_v54  ;;  %v10459_v54 = vld [vmem:[#allocation13 + $0x28] sm:$0xff]  ;;  %v22544_v6 = vpack.c.bf16 %v10477_v33, %v10474_v30  ;;  %v10844_v30 = vld [vmem:[#allocation18 + $0xb8] sm:$0xff]  ;;  %v22588_v33 = vpack.c.bf16 %v10842_v9, %v10839_v40 }
0x114b   :  { %18495 = vmatprep.subr.bf16.mxu0 %v21770_v15  ;;  %18501 = vmatprep.subr.bf16.mxu1 %v23648_v13  ;;  %v22485_v15 = vpack.c.bf16 %v10451_v56, %v10448_v8  ;;  %v22506_v32 = vpack.c.bf16 %v10459_v54, %v10456_v17  ;;  %v22558_v8 = vpack.c.bf16 %v10825_v55, %v10822_v47  ;;  %v10824_v56 = vld [vmem:[#allocation18 + $0x18] sm:$0xff]  ;;  %v10829_v17 = vld [vmem:[#allocation18 + $0x40] sm:$0xff]  ;;  %v10846_v55 = vld [vmem:[#allocation19 + $0x8] sm:$0xff] }
0x114c   :  { %v19824_v11 = vpop.eup %19823  ;;  %10343 = vmatprep.mubr.f32.mxu0 %v23649_v35  ;;  %17023 = vmatprep.mubr.msk.f32.mxu1 %vm20429_vm0, %v23649_v35  ;;  %v22568_v54 = vpack.c.bf16 %v10830_v58, %v10827_v38  ;;  %23698 = vst [vmem:[#allocation45_spill] sm:$0xff] %v22588_v33  ;;  %v22592_v47 = vpack.c.bf16 %v10844_v30, %v10841_v10 }
0x114d   :  { %v9826_v37 = vmul.f32 %v19824_v11, %v9825_v27  ;;  %v10821_v27 = vld [vmem:[#allocation18] sm:$0xff]  ;;  %v10826_v11 = vld [vmem:[#allocation18 + $0x28] sm:$0xff] }
0x114e   :  { %18497 = vmatpush1.bf16.msra.mxu0 %v21782_v12  ;;  %18503 = vmatpush3.bf16.msra.mxu1 %v21784_v36  ;;  %v10464_v12 = vld [vmem:[#allocation13 + $0x50] sm:$0xff]  ;;  %v10447_v36 = vld [vmem:[%s23693_s21] sm:$0xf]  ;;  %v22560_v57 = vpack.c.bf16 %v10824_v56, %v10821_v27  ;;  %v22563_v23 = vpack.c.bf16 %v10826_v11, %v10823_v45  ;;  %23699 = vst [vmem:[#allocation53_spill] sm:$0xff] %v22592_v47  ;;  %v10849_v27 = vld [vmem:[#allocation19 + $0x20] sm:$0xff] }
0x114f   :  { %v22489_v18 = vadd.f32 %v9827_v43, %v9826_v37  ;;  %18505 = vmatprep.subr.bf16.mxu0 %v22477_v44  ;;  %18508 = vmatprep.subr.bf16.mxu1 %v23648_v13  ;;  %v22511_v59 = vpack.c.bf16 %v10464_v12, %v10461_v29  ;;  %v10828_v37 = vld [vmem:[#allocation18 + $0x38] sm:$0xff]  ;;  %v10831_v43 = vld [vmem:[#allocation18 + $0x50] sm:$0xff]  ;;  %v10834_v12 = vld [vmem:[#allocation18 + $0x68] sm:$0xff]  ;;  %v22597_v56 = vpack.c.bf16 %v10849_v27, %v10846_v55 }
0x1150   :  { %v22565_v34 = vpack.c.bf16 %v10831_v43, %v10828_v37  ;;  %v10832_v29 = vld [vmem:[#allocation18 + $0x58] sm:$0xff] }
0x1151   :  { %15540 = vmatmul.mubr.msk.f32.vlgmr.msra.gmra.mrb[62].mxu0 %vm505_vm2, %v22489_v18  ;;  %17024 = vmatmul.mubr.msk.f32.vlgmr.msra.gmra.mrb[128].mxu1 %vm505_vm2, %v22489_v18  ;;  %v22572_v0 = vpack.c.bf16 %v10832_v29, %v10829_v17  ;;  %23700 = vst [vmem:[#allocation58_spill] sm:$0xff] %v22597_v56 }
0x1152   :  { %18507 = vmatpush1.bf16.msra.mxu0 %v22485_v15  ;;  %18510 = vmatpush3.bf16.msra.mxu1 %v22487_v4 }
0x1153   :  { %10563 = vmatprep.mubr.f32.mxu0 %v23649_v35  ;;  %17030 = vmatprep.mubr.msk.f32.mxu1 %vm20429_vm0, %v23649_v35 }
0x1154   :  { %18512 = vmatprep.subr.bf16.mxu0 %v22493_v51  ;;  %18527 = vmatprep.subr.bf16.mxu1 %v23648_v13 }
0x1155   :  { %15544 = vmatmul.mubr.msk.f32.vlgmr.msra.gmra.mrb[64].mxu0 %vm344_vm1, %v10447_v36  ;;  %17031 = vmatmul.mubr.msk.f32.vlgmr.msra.gmra.mrb[130].mxu1 %vm344_vm1, %v10447_v36  ;;  %v10837_v36 = vld [vmem:[#allocation18 + $0x80] sm:$0xff] }
0x1156   :  { %18514 = vmatpush1.bf16.msra.mxu0 %v22504_v16  ;;  %18529 = vmatpush3.bf16.msra.mxu1 %v22506_v32  ;;  %v22574_v25 = vpack.c.bf16 %v10837_v36, %v10834_v12 }
0x1157   :  { %18516 = vmatprep.subr.bf16.mxu0 %v22511_v59  ;;  %18530 = vmatprep.subr.bf16.mxu1 %v23648_v13 }
0x1158   :  { %10723 = vmatprep.mubr.f32.mxu0 %v23649_v35  ;;  %17049 = vmatprep.mubr.msk.f32.mxu1 %vm20429_vm0, %v23649_v35 }
0x115a   :  { %18518 = vmatpush1.bf16.msra.mxu0 %v22519_v61  ;;  %18532 = vmatpush3.bf16.msra.mxu1 %v22521_v1 }
0x115b   :  { %18520 = vmatprep.subr.bf16.mxu0 %v22525_v14  ;;  %18533 = vmatprep.subr.bf16.mxu1 %v23648_v13 }
0x115e   :  { %18522 = vmatpush1.bf16.msra.mxu0 %v22532_v52  ;;  %18535 = vmatpush3.bf16.msra.mxu1 %v22534_v19 }
0x115f   :  { %18524 = vmatprep.subr.bf16.mxu0 %v22538_v39  ;;  %18536 = vmatprep.subr.bf16.mxu1 %v23648_v13 }
0x1162   :  { %18526 = vmatpush1.bf16.msra.mxu0 %v22542_v3  ;;  %18538 = vmatpush3.bf16.msra.mxu1 %v22544_v6 }
0x1163   :  { %18555 = vmatprep.subr.bf16.mxu1 %v23648_v13  ;;  %18540 = vmatprep.subr.bf16.mxu0 %v22558_v8 }
0x1165   :  { %15546 = vmatmul.mubr.msk.f32.vlgmr.msra.gmra.mrb[64].mxu0 %vm5436_vm3, %v23694_v21  ;;  %17050 = vmatmul.mubr.msk.f32.vlgmr.msra.gmra.mrb[132].mxu1 %vm5436_vm3, %v23694_v21 }
0x1166   :  { %10954 = vmatprep.mubr.f32.mxu0 %v23649_v35  ;;  %17068 = vmatprep.mubr.msk.f32.mxu1 %vm20429_vm0, %v23649_v35 }
0x1167   :  { %18542 = vmatpush1.bf16.msra.mxu0 %v22560_v57  ;;  %18557 = vmatpush3.bf16.msra.mxu1 %v22563_v23 }
0x1168   :  { %18544 = vmatprep.subr.bf16.mxu0 %v22565_v34  ;;  %18558 = vmatprep.subr.bf16.mxu1 %v23648_v13 }
0x116b   :  { %18546 = vmatpush1.bf16.msra.mxu0 %v22568_v54  ;;  %18560 = vmatpush3.bf16.msra.mxu1 %v22572_v0 }
0x116c   :  { %18548 = vmatprep.subr.bf16.mxu0 %v22574_v25  ;;  %18561 = vmatprep.subr.bf16.mxu1 %v23648_v13 }
0x116f   :  { %18550 = vmatpush1.bf16.msra.mxu0 %v22578_v20  ;;  %18563 = vmatpush3.bf16.msra.mxu1 %v22582_v42 }
0x1170   :  { %18552 = vmatprep.subr.bf16.mxu0 %v22584_v46  ;;  %18564 = vmatprep.subr.bf16.mxu1 %v23648_v13 }
0x1173   :  { %18554 = vmatpush1.bf16.msra.mxu0 %v22588_v33  ;;  %18566 = vmatpush3.bf16.msra.mxu1 %v22592_v47 }
0x1174   :  { %18583 = vmatprep.subr.bf16.mxu1 %v23648_v13  ;;  %18568 = vmatprep.subr.bf16.mxu0 %v22597_v56 }
0x120c   :  { %v10039_v45 = vpop.f32.mrb[60].mxu0  ;;  %v10110_v11 = vpop.f32.mrb[124].mxu1 }
0x120d   :  { %v19344_v37 = vadd.f32 %v23688_v63, %v10039_v45  ;;  %v10041_v43 = vpop.f32.mrb[61].mxu0  ;;  %v16995_v38 = vpop.f32.mrb[125].mxu1  ;;  %v10111_v10 = vadd.f32 %v10110_v11, %v23690_v48  ;;  %v9967_v45 = vadd.f32 %v22439_v26, %v21857_v24 }
0x120e   :  { %v19346_v17 = vadd.f32 %v23653_v60, %v10041_v43 }
0x120f   :  { %v15536_v58 = vmul.f32 -1.442695, %v19344_v37 }
0x1210   :  { %v15537_v29 = vmul.f32 -1.442695, %v19346_v17  ;;  %v10479_v17 = vld [vmem:[#allocation16] sm:$0x7] }
0x1211   :  { %19825 = vpow2.f32 %v15536_v58 }
0x1212   :  { %19827 = vpow2.f32 %v15537_v29  ;;  %v23701_v29 = vld [vmem:[#allocation40_spill] sm:$0xff] }
0x1213   :  { %v10644_v11 = vrot.slane %v10479_v17, %v23701_v29 }
0x121b   :  { %v19826_v12 = vpop.eup %19825 }
0x121c   :  { %v10118_v36 = vadd.f32 1.0, %v19826_v12  ;;  %v10272_v53 = vpop.f32.mrb[126].mxu1  ;;  %v19828_v49 = vpop.eup %19827 }
0x121d   :  { %v17014_v62 = vpop.f32.mrb[127].mxu1  ;;  %v10125_v22 = vadd.f32 1.0, %v19828_v49 }
0x121e   :  { %19829 = vrcp.f32 %v10118_v36  ;;  %v23702_v62 = vld [vmem:[#allocation41_spill] sm:$0xff] }
0x121f   :  { %19831 = vrcp.f32 %v10125_v22  ;;  %v10648_v24 = vrot.slane %v10479_v17, %v23702_v62 }
0x1224   :  { %v10345_v7 = vpop.f32.mrb[62].mxu0  ;;  %v10416_v31 = vpop.f32.mrb[128].mxu1 }
0x1225   :  { %v19348_v40 = vadd.f32 %v23689_v2, %v10345_v7  ;;  %v10347_v63 = vpop.f32.mrb[63].mxu0  ;;  %v17025_v9 = vpop.f32.mrb[129].mxu1  ;;  %v10478_v2 = vld [vmem:[#allocation15] sm:$0x7] }
0x1226   :  { %v19350_v55 = vadd.f32 %v23691_v41, %v10347_v63  ;;  %v10484_v48 = vrot.slane %v10478_v2, %v23701_v29  ;;  %v10488_v49 = vrot.slane %v10478_v2, %v23702_v62 }
0x1227   :  { %v15542_v30 = vmul.f32 -1.442695, %v19348_v40 }
0x1228   :  { %v19830_v60 = vpop.eup %19829  ;;  %v10636_v27 = vpop.f32.mrb[130].mxu1  ;;  %v15543_v58 = vmul.f32 -1.442695, %v19350_v55  ;;  %v22612_v26 = vadd.f32 %v10644_v11, %v10484_v48  ;;  %v22614_v9 = vadd.f32 %v10648_v24, %v10488_v49  ;;  %v10417_v11 = vadd.f32 %v10416_v31, %v21866_v28 }
0x1229   :  { %v10128_v37 = vmul.f32 %v19830_v60, %v10111_v10  ;;  %19833 = vpow2.f32 %v15542_v30  ;;  %v17032_v43 = vpop.f32.mrb[131].mxu1  ;;  %v19832_v12 = vpop.eup %19831  ;;  %v10273_v49 = vadd.f32 %v10272_v53, %v21875_v5 }
0x122a   :  { %23703 = vst [vmem:[#allocation57_spill] sm:$0xff] %v22612_v26  ;;  %v10131_v22 = vsub.f32 1.0, %v19832_v12  ;;  %23704 = vst [vmem:[#allocation51_spill] sm:$0xff] %v22614_v9  ;;  %v10133_v30 = vmul.f32 %v19832_v12, %v22442_v50 }
0x122b   :  { %v10129_v38 = vadd.f32 %v10128_v37, %v9967_v45 }
0x122d   :  { %19835 = vtanh.f32 %v10129_v38 }
0x122e   :  { %19837 = vpow2.f32 %v15543_v58 }
0x1233   :  { %v19834_v36 = vpop.eup %19833 }
0x1234   :  { %v10424_v41 = vadd.f32 1.0, %v19834_v36 }
0x1236   :  { %19839 = vrcp.f32 %v10424_v41 }
0x1237   :  { %v19836_v7 = vpop.eup %19835 }
0x1238   :  { %v10725_v40 = vpop.f32.mrb[64].mxu0  ;;  %v10796_v63 = vpop.f32.mrb[132].mxu1  ;;  %v10132_v10 = vmul.f32 %v19836_v7, %v10131_v22 }
0x1239   :  { %v19352_v60 = vadd.f32 %v22612_v26, %v10725_v40  ;;  %v10727_v55 = vpop.f32.mrb[65].mxu0  ;;  %v17051_v45 = vpop.f32.mrb[133].mxu1 }
0x123a   :  { %v19838_v37 = vpop.eup %19837  ;;  %v22618_v43 = vadd.f32 %v10133_v30, %v10132_v10  ;;  %v19354_v58 = vadd.f32 %v22614_v9, %v10727_v55 }
0x123b   :  { %v15548_v38 = vmul.f32 -1.442695, %v19352_v60  ;;  %v10431_v48 = vadd.f32 1.0, %v19838_v37  ;;  %v23705_v60 = vld [vmem:[#allocation42_spill] sm:$0xff] }
0x123c   :  { %v15549_v41 = vmul.f32 -1.442695, %v19354_v58  ;;  %v22624_v55 = vrot.slane %v10478_v2, %v23705_v60  ;;  %v22627_v28 = vrot.slane %v10479_v17, %v23705_v60 }
0x123d   :  { %19841 = vpow2.f32 %v15548_v38 }
0x123e   :  { %19843 = vrcp.f32 %v10431_v48  ;;  %v10637_v37 = vadd.f32 %v10636_v27, %v22624_v55  ;;  %v10797_v38 = vadd.f32 %v10796_v63, %v22627_v28 }
0x123f   :  { %19845 = vpow2.f32 %v15549_v41  ;;  %v10848_v41 = vld [vmem:[#allocation19 + $0x18] sm:$0xff] }
0x1240   :  { %v19840_v36 = vpop.eup %19839 }
0x1241   :  { %v10434_v24 = vmul.f32 %v19840_v36, %v10417_v11  ;;  %v10845_v36 = vld [vmem:[#allocation19] sm:$0xff] }
0x1242   :  { %v22634_v63 = vpack.c.bf16 %v10848_v41, %v10845_v36  ;;  %v10862_v36 = vld [vmem:[#allocation19 + $0x88] sm:$0xff]  ;;  %v10867_v41 = vld [vmem:[#allocation19 + $0xb0] sm:$0xff] }
0x1243   :  { %v10435_v50 = vadd.f32 %v10434_v24, %v10273_v49  ;;  %v10847_v49 = vld [vmem:[#allocation19 + $0x10] sm:$0xff]  ;;  %v10850_v24 = vld [vmem:[#allocation19 + $0x28] sm:$0xff] }
0x1245   :  { %19847 = vtanh.f32 %v10435_v50  ;;  %v10852_v50 = vld [vmem:[#allocation19 + $0x38] sm:$0xff] }
0x1247   :  { %v19842_v12 = vpop.eup %19841 }
0x1248   :  { %v10804_v22 = vadd.f32 1.0, %v19842_v12  ;;  %v19844_v7 = vpop.eup %19843  ;;  %v10855_v12 = vld [vmem:[#allocation19 + $0x50] sm:$0xff] }
0x1249   :  { %v19846_v40 = vpop.eup %19845  ;;  %v10437_v10 = vsub.f32 1.0, %v19844_v7  ;;  %v10439_v5 = vmul.f32 %v19844_v7, %v22489_v18  ;;  %v22636_v7 = vpack.c.bf16 %v10850_v24, %v10847_v49 }
0x124a   :  { %19849 = vrcp.f32 %v10804_v22  ;;  %v10811_v53 = vadd.f32 1.0, %v19846_v40  ;;  %v10851_v40 = vld [vmem:[#allocation19 + $0x30] sm:$0xff] }
0x124c   :  { %19851 = vrcp.f32 %v10811_v53  ;;  %v10856_v53 = vld [vmem:[#allocation19 + $0x58] sm:$0xff] }
0x124f   :  { %v19848_v30 = vpop.eup %19847 }
0x1250   :  { %v10438_v31 = vmul.f32 %v19848_v30, %v10437_v10  ;;  %v22640_v30 = vpack.c.bf16 %v10855_v12, %v10852_v50  ;;  %v10866_v12 = vld [vmem:[#allocation19 + $0xa8] sm:$0xff] }
0x1252   :  { %v10440_v45 = vadd.f32 %v10439_v5, %v10438_v31  ;;  %v10854_v31 = vld [vmem:[#allocation19 + $0x48] sm:$0xff]  ;;  %v10853_v5 = vld [vmem:[#allocation19 + $0x40] sm:$0xff] }
0x1254   :  { %v19850_v58 = vpop.eup %19849  ;;  %10443 = vrot.lane.b32.xlu0 %v10440_v45, %s20431_s7  ;;  %v10858_v45 = vld [vmem:[#allocation19 + $0x68] sm:$0xff] }
0x1255   :  { %v10814_v48 = vmul.f32 %v19850_v58, %v10797_v38  ;;  %v22650_v38 = vpack.c.bf16 %v10856_v53, %v10853_v5  ;;  %v10857_v58 = vld [vmem:[#allocation19 + $0x60] sm:$0xff] }
0x1256   :  { %v19852_v2 = vpop.eup %19851 }
0x1257   :  { %v10815_v11 = vadd.f32 %v10814_v48, %v10637_v37  ;;  %v10817_v17 = vsub.f32 1.0, %v19852_v2  ;;  %v10819_v27 = vmul.f32 %v19852_v2, %v23694_v21  ;;  %v10861_v37 = vld [vmem:[#allocation19 + $0x80] sm:$0xff]  ;;  %v22648_v21 = vpack.c.bf16 %v10854_v31, %v10851_v40  ;;  %v10859_v2 = vld [vmem:[#allocation19 + $0x70] sm:$0xff] }
0x1258   :  { %v22654_v48 = vpack.c.bf16 %v10861_v37, %v10858_v45  ;;  %v22663_v24 = vpack.c.bf16 %v10862_v36, %v10859_v2  ;;  %v15556_v45 = vld [vmem:[%s23693_s21 + $0x4] sm:$0xf] }
0x1259   :  { %19853 = vtanh.f32 %v10815_v11  ;;  %v10860_v11 = vld [vmem:[#allocation19 + $0x78] sm:$0xff] }
0x125a   :  { %v22661_v49 = vpack.c.bf16 %v10860_v11, %v10857_v58  ;;  %v10870_v58 = vld [vmem:[#allocation22] sm:$0x7]  ;;  %v10869_v11 = vld [vmem:[#allocation21] sm:$0x7] }
0x125b   :  { %v10875_v2 = vrot.slane %v10869_v11, %v23701_v29  ;;  %v11035_v36 = vrot.slane %v10870_v58, %v23701_v29 }
0x1263   :  { %v19854_v18 = vpop.eup %19853 }
0x1264   :  { %v10818_v22 = vmul.f32 %v19854_v18, %v10817_v17  ;;  %v10864_v17 = vld [vmem:[#allocation19 + $0x98] sm:$0xff]  ;;  %v10863_v18 = vld [vmem:[#allocation19 + $0x90] sm:$0xff] }
0x1265   :  { %v22667_v50 = vpack.c.bf16 %v10867_v41, %v10864_v17  ;;  %v22671_v40 = vpack.c.bf16 %v10866_v12, %v10863_v18  ;;  %v10879_v17 = vrot.slane %v10869_v11, %v23702_v62  ;;  %v11039_v41 = vrot.slane %v10870_v58, %v23702_v62 }
0x1266   :  { %v22638_v10 = vadd.f32 %v10819_v27, %v10818_v22  ;;  %v10865_v22 = vld [vmem:[#allocation19 + $0xa0] sm:$0xff]  ;;  %v10868_v27 = vld [vmem:[#allocation19 + $0xb8] sm:$0xff]  ;;  %v22747_v18 = vadd.f32 %v11035_v36, %v10875_v2 }
0x1267   :  { %v22673_v31 = vpack.c.bf16 %v10868_v27, %v10865_v22  ;;  %v22749_v27 = vadd.f32 %v11039_v41, %v10879_v17 }
0x1268   :  { %15550 = vmatmul.mubr.msk.f32.vlgmr.msra.gmra.mrb[66].mxu0 %vm5436_vm3, %v22638_v10  ;;  %17069 = vmatmul.mubr.msk.f32.vlgmr.msra.gmra.mrb[134].mxu1 %vm5436_vm3, %v22638_v10  ;;  %23706 = vst [vmem:[#allocation50_spill] sm:$0xff] %v22747_v18 }
0x1269   :  { %18570 = vmatpush1.bf16.msra.mxu0 %v22634_v63  ;;  %18585 = vmatpush3.bf16.msra.mxu1 %v22636_v7  ;;  %23707 = vst [vmem:[#allocation49_spill] sm:$0xff] %v22749_v27 }
0x126a   :  { %18572 = vmatprep.subr.bf16.mxu0 %v22640_v30  ;;  %18586 = vmatprep.subr.bf16.mxu1 %v23648_v13 }
0x126b   :  { %11114 = vmatprep.mubr.f32.mxu0 %v23649_v35  ;;  %17087 = vmatprep.mubr.msk.f32.mxu1 %vm20429_vm0, %v23649_v35 }
0x126d   :  { %18574 = vmatpush1.bf16.msra.mxu0 %v22648_v21  ;;  %18588 = vmatpush3.bf16.msra.mxu1 %v22650_v38 }
0x126e   :  { %18576 = vmatprep.subr.bf16.mxu0 %v22654_v48  ;;  %18589 = vmatprep.subr.bf16.mxu1 %v23648_v13 }
0x1271   :  { %18578 = vmatpush1.bf16.msra.mxu0 %v22661_v49  ;;  %18591 = vmatpush3.bf16.msra.mxu1 %v22663_v24 }
0x1272   :  { %18580 = vmatprep.subr.bf16.mxu0 %v22667_v50  ;;  %18592 = vmatprep.subr.bf16.mxu1 %v23648_v13 }
0x1275   :  { %18582 = vmatpush1.bf16.msra.mxu0 %v22671_v40  ;;  %18594 = vmatpush3.bf16.msra.mxu1 %v22673_v31 }
0x1276   :  { %18596 = vmatprep.subr.bf16.mxu0 %v22477_v44  ;;  %18599 = vmatprep.subr.bf16.mxu1 %v23648_v13 }
0x12c6   :  { %v10444_v5 = vpop.permute.xlu0 %10443 }
0x12c7   :  { %v22683_v53 = vsel %vm505_vm2, %v22618_v43, %v10444_v5 }
0x12c8   :  { %15552 = vmatmul.mubr.msk.f32.vlgmr.msra.gmra.mrb[66].mxu0 %vm5436_vm3, %v22683_v53  ;;  %17088 = vmatmul.mubr.msk.f32.vlgmr.msra.gmra.mrb[136].mxu1 %vm5436_vm3, %v22683_v53 }
0x12c9   :  { %18598 = vmatpush1.bf16.msra.mxu0 %v22485_v15  ;;  %18601 = vmatpush3.bf16.msra.mxu1 %v22487_v4 }
0x12ca   :  { %11281 = vmatprep.mubr.f32.mxu0 %v23649_v35  ;;  %17094 = vmatprep.mubr.msk.f32.mxu1 %vm20429_vm0, %v23649_v35 }
0x12cb   :  { %18603 = vmatprep.subr.bf16.mxu0 %v22493_v51  ;;  %18618 = vmatprep.subr.bf16.mxu1 %v23648_v13 }
0x12cc   :  { %15557 = vmatmul.mubr.msk.f32.vlgmr.msra.gmra.mrb[68].mxu0 %vm344_vm1, %v15556_v45  ;;  %17095 = vmatmul.mubr.msk.f32.vlgmr.msra.gmra.mrb[138].mxu1 %vm344_vm1, %v15556_v45 }
0x12cd   :  { %18605 = vmatpush1.bf16.msra.mxu0 %v22504_v16  ;;  %18620 = vmatpush3.bf16.msra.mxu1 %v22506_v32 }
0x12ce   :  { %18607 = vmatprep.subr.bf16.mxu0 %v22511_v59  ;;  %18621 = vmatprep.subr.bf16.mxu1 %v23648_v13 }
0x12cf   :  { %11422 = vmatprep.mubr.f32.mxu0 %v23649_v35  ;;  %17113 = vmatprep.mubr.msk.f32.mxu1 %vm20429_vm0, %v23649_v35 }
0x12d1   :  { %18609 = vmatpush1.bf16.msra.mxu0 %v22519_v61  ;;  %18623 = vmatpush3.bf16.msra.mxu1 %v22521_v1 }
0x12d2   :  { %18611 = vmatprep.subr.bf16.mxu0 %v22525_v14  ;;  %18624 = vmatprep.subr.bf16.mxu1 %v23648_v13 }
0x12d5   :  { %18613 = vmatpush1.bf16.msra.mxu0 %v22532_v52  ;;  %18626 = vmatpush3.bf16.msra.mxu1 %v22534_v19 }
0x12d6   :  { %18615 = vmatprep.subr.bf16.mxu0 %v22538_v39  ;;  %18627 = vmatprep.subr.bf16.mxu1 %v23648_v13 }
0x12d9   :  { %18617 = vmatpush1.bf16.msra.mxu0 %v22542_v3  ;;  %18629 = vmatpush3.bf16.msra.mxu1 %v22544_v6 }
0x12da   :  { %18631 = vmatprep.subr.bf16.mxu0 %v22558_v8  ;;  %18646 = vmatprep.subr.bf16.mxu1 %v23648_v13 }
0x12dc   :  { %15559 = vmatmul.mubr.msk.f32.vlgmr.msra.gmra.mrb[68].mxu0 %vm5436_vm3, %v22638_v10  ;;  %17114 = vmatmul.mubr.msk.f32.vlgmr.msra.gmra.mrb[140].mxu1 %vm5436_vm3, %v22638_v10 }
0x12dd   :  { %18633 = vmatpush1.bf16.msra.mxu0 %v22560_v57  ;;  %18648 = vmatpush3.bf16.msra.mxu1 %v22563_v23 }
0x12de   :  { %18635 = vmatprep.subr.bf16.mxu0 %v22565_v34  ;;  %18649 = vmatprep.subr.bf16.mxu1 %v23648_v13 }
0x12df   :  { %11587 = vmatprep.mubr.f32.mxu0 %v23649_v35  ;;  %17132 = vmatprep.mubr.msk.f32.mxu1 %vm20429_vm0, %v23649_v35 }
0x12e1   :  { %18637 = vmatpush1.bf16.msra.mxu0 %v22568_v54  ;;  %18651 = vmatpush3.bf16.msra.mxu1 %v22572_v0 }
0x12e2   :  { %18639 = vmatprep.subr.bf16.mxu0 %v22574_v25  ;;  %18652 = vmatprep.subr.bf16.mxu1 %v23648_v13 }
0x12e5   :  { %18641 = vmatpush1.bf16.msra.mxu0 %v22578_v20  ;;  %18654 = vmatpush3.bf16.msra.mxu1 %v22582_v42 }
0x12e6   :  { %18643 = vmatprep.subr.bf16.mxu0 %v22584_v46  ;;  %18655 = vmatprep.subr.bf16.mxu1 %v23648_v13 }
0x12e9   :  { %18645 = vmatpush1.bf16.msra.mxu0 %v22588_v33  ;;  %18657 = vmatpush3.bf16.msra.mxu1 %v22592_v47 }
0x12ea   :  { %18659 = vmatprep.subr.bf16.mxu0 %v22597_v56  ;;  %18674 = vmatprep.subr.bf16.mxu1 %v23648_v13 }
0x133b   :  { %v11027_v43 = vpop.f32.mrb[134].mxu1 }
0x133c   :  { %v17070_v37 = vpop.f32.mrb[135].mxu1 }
0x139b   :  { %v11116_v12 = vpop.f32.mrb[66].mxu0  ;;  %v11187_v22 = vpop.f32.mrb[136].mxu1 }
0x139c   :  { %v19356_v5 = vadd.f32 %v22747_v18, %v11116_v12  ;;  %v11118_v45 = vpop.f32.mrb[67].mxu0  ;;  %v17089_v37 = vpop.f32.mrb[137].mxu1 }
0x139d   :  { %v19358_v47 = vadd.f32 %v22749_v27, %v11118_v45  ;;  %v22755_v37 = vrot.slane %v10870_v58, %v23705_v60 }
0x139e   :  { %v15554_v56 = vmul.f32 -1.442695, %v19356_v5 }
0x139f   :  { %v11354_v33 = vpop.f32.mrb[138].mxu1  ;;  %v15555_v46 = vmul.f32 -1.442695, %v19358_v47  ;;  %23708 = vst [vmem:[#allocation52_spill] sm:$0xff] %v22755_v37 }
0x13a0   :  { %19855 = vpow2.f32 %v15554_v56  ;;  %v17096_v29 = vpop.f32.mrb[139].mxu1  ;;  %v22759_v56 = vrot.slane %v10869_v11, %v23705_v60 }
0x13a1   :  { %19857 = vpow2.f32 %v15555_v46 }
0x13aa   :  { %v19856_v42 = vpop.eup %19855 }
0x13ab   :  { %v11195_v62 = vadd.f32 1.0, %v19856_v42  ;;  %v19858_v12 = vpop.eup %19857  ;;  %v11188_v42 = vadd.f32 %v11187_v22, %v22755_v37 }
0x13ac   :  { %v11202_v46 = vadd.f32 1.0, %v19858_v12 }
0x13ad   :  { %19859 = vrcp.f32 %v11195_v62  ;;  %v11028_v62 = vadd.f32 %v11027_v43, %v22759_v56 }
0x13af   :  { %v11424_v2 = vpop.f32.mrb[68].mxu0  ;;  %v11495_v36 = vpop.f32.mrb[140].mxu1 }
0x13b0   :  { %v19360_v17 = vadd.f32 %v22612_v26, %v11424_v2  ;;  %v11426_v41 = vpop.f32.mrb[69].mxu0  ;;  %v17115_v20 = vpop.f32.mrb[141].mxu1  ;;  %v11496_v43 = vadd.f32 %v11495_v36, %v22627_v28  ;;  %v23713_v36 = vld [vmem:[#allocation45_spill] sm:$0xff] }
0x13b1   :  { %v19362_v45 = vadd.f32 %v22614_v9, %v11426_v41 }
0x13b2   :  { %v15561_v5 = vmul.f32 -1.442695, %v19360_v17 }
0x13b3   :  { %v15562_v29 = vmul.f32 -1.442695, %v19362_v45 }
0x13b4   :  { %19861 = vpow2.f32 %v15561_v5 }
0x13b5   :  { %19863 = vrcp.f32 %v11202_v46  ;;  %v11355_v46 = vadd.f32 %v11354_v33, %v22624_v55  ;;  %v15569_v33 = vld [vmem:[%s23693_s21 + $0x8] sm:$0xf] }
0x13b6   :  { %19865 = vpow2.f32 %v15562_v29 }
0x13b7   :  { %v19860_v47 = vpop.eup %19859 }
0x13b8   :  { %v11205_v2 = vmul.f32 %v19860_v47, %v11188_v42 }
0x13ba   :  { %v11206_v20 = vadd.f32 %v11205_v2, %v11028_v62 }
0x13bc   :  { %19867 = vtanh.f32 %v11206_v20 }
0x13be   :  { %v19862_v58 = vpop.eup %19861 }
0x13bf   :  { %v11503_v17 = vadd.f32 1.0, %v19862_v58  ;;  %v19864_v41 = vpop.eup %19863 }
0x13c0   :  { %v19866_v9 = vpop.eup %19865  ;;  %v11208_v60 = vsub.f32 1.0, %v19864_v41  ;;  %v11210_v5 = vmul.f32 %v19864_v41, %v22683_v53  ;;  %v23712_v53 = vld [vmem:[#allocation44_spill] sm:$0xff]  ;;  %v23714_v41 = vld [vmem:[#allocation53_spill] sm:$0xff] }
0x13c1   :  { %19869 = vrcp.f32 %v11503_v17  ;;  %v11510_v22 = vadd.f32 1.0, %v19866_v9  ;;  %v23710_v9 = vld [vmem:[#allocation43_spill] sm:$0xff] }
0x13c3   :  { %19871 = vrcp.f32 %v11510_v22 }
0x13c6   :  { %v19868_v11 = vpop.eup %19867 }
0x13c7   :  { %v11209_v12 = vmul.f32 %v19868_v11, %v11208_v60  ;;  %v23715_v60 = vld [vmem:[#allocation58_spill] sm:$0xff] }
0x13c9   :  { %v22764_v37 = vadd.f32 %v11210_v5, %v11209_v12 }
0x13cb   :  { %23709 = vst [vmem:[#allocation55_spill] sm:$0xff] %v22764_v37  ;;  %v19870_v45 = vpop.eup %19869 }
0x13cc   :  { %v11513_v42 = vmul.f32 %v19870_v45, %v11496_v43 }
0x13cd   :  { %v19872_v29 = vpop.eup %19871 }
0x13ce   :  { %v11514_v47 = vadd.f32 %v11513_v42, %v11355_v46  ;;  %v11516_v62 = vsub.f32 1.0, %v19872_v29  ;;  %v11518_v58 = vmul.f32 %v19872_v29, %v22638_v10  ;;  %v23711_v10 = vld [vmem:[#allocation48_spill] sm:$0xff] }
0x13d0   :  { %19873 = vtanh.f32 %v11514_v47 }
0x13da   :  { %v19874_v2 = vpop.eup %19873 }
0x13db   :  { %v11517_v20 = vmul.f32 %v19874_v2, %v11516_v62 }
0x13dd   :  { %v22769_v17 = vadd.f32 %v11518_v58, %v11517_v20 }
0x13df   :  { %15563 = vmatmul.mubr.msk.f32.vlgmr.msra.gmra.mrb[70].mxu0 %vm5436_vm3, %v22769_v17  ;;  %17133 = vmatmul.mubr.msk.f32.vlgmr.msra.gmra.mrb[142].mxu1 %vm5436_vm3, %v22769_v17 }
0x13e0   :  { %18661 = vmatpush1.bf16.msra.mxu0 %v22634_v63  ;;  %18676 = vmatpush3.bf16.msra.mxu1 %v22636_v7 }
0x13e1   :  { %18663 = vmatprep.subr.bf16.mxu0 %v22640_v30  ;;  %18677 = vmatprep.subr.bf16.mxu1 %v23648_v13 }
0x13e2   :  { %11731 = vmatprep.mubr.f32.mxu0 %v23649_v35  ;;  %17151 = vmatprep.mubr.msk.f32.mxu1 %vm20429_vm0, %v23649_v35 }
0x13e4   :  { %18665 = vmatpush1.bf16.msra.mxu0 %v22648_v21  ;;  %18679 = vmatpush3.bf16.msra.mxu1 %v22650_v38 }
0x13e5   :  { %18667 = vmatprep.subr.bf16.mxu0 %v22654_v48  ;;  %18680 = vmatprep.subr.bf16.mxu1 %v23648_v13 }
0x13e8   :  { %18669 = vmatpush1.bf16.msra.mxu0 %v22661_v49  ;;  %18682 = vmatpush3.bf16.msra.mxu1 %v22663_v24 }
0x13e9   :  { %18671 = vmatprep.subr.bf16.mxu0 %v22667_v50  ;;  %18683 = vmatprep.subr.bf16.mxu1 %v23648_v13 }
0x13ec   :  { %18673 = vmatpush1.bf16.msra.mxu0 %v22671_v40  ;;  %18685 = vmatpush3.bf16.msra.mxu1 %v22673_v31 }
0x13ed   :  { %18687 = vmatprep.subr.bf16.mxu0 %v22477_v44  ;;  %18690 = vmatprep.subr.bf16.mxu1 %v23648_v13 }
0x13ef   :  { %15565 = vmatmul.mubr.msk.f32.vlgmr.msra.gmra.mrb[70].mxu0 %vm5436_vm3, %v22764_v37  ;;  %17152 = vmatmul.mubr.msk.f32.vlgmr.msra.gmra.mrb[144].mxu1 %vm5436_vm3, %v22764_v37 }
0x13f0   :  { %18689 = vmatpush1.bf16.msra.mxu0 %v22485_v15  ;;  %18692 = vmatpush3.bf16.msra.mxu1 %v22487_v4 }
0x13f1   :  { %11898 = vmatprep.mubr.f32.mxu0 %v23649_v35  ;;  %17158 = vmatprep.mubr.msk.f32.mxu1 %vm20429_vm0, %v23649_v35 }
0x13f2   :  { %18694 = vmatprep.subr.bf16.mxu0 %v22493_v51  ;;  %18709 = vmatprep.subr.bf16.mxu1 %v23648_v13 }
0x13f3   :  { %15570 = vmatmul.mubr.msk.f32.vlgmr.msra.gmra.mrb[72].mxu0 %vm344_vm1, %v15569_v33  ;;  %17159 = vmatmul.mubr.msk.f32.vlgmr.msra.gmra.mrb[146].mxu1 %vm344_vm1, %v15569_v33 }
0x13f4   :  { %18696 = vmatpush1.bf16.msra.mxu0 %v22504_v16  ;;  %18711 = vmatpush3.bf16.msra.mxu1 %v22506_v32 }
0x13f5   :  { %18698 = vmatprep.subr.bf16.mxu0 %v22511_v59  ;;  %18712 = vmatprep.subr.bf16.mxu1 %v23648_v13 }
0x13f6   :  { %12039 = vmatprep.mubr.f32.mxu0 %v23649_v35  ;;  %17177 = vmatprep.mubr.msk.f32.mxu1 %vm20429_vm0, %v23649_v35 }
0x13f8   :  { %18700 = vmatpush1.bf16.msra.mxu0 %v22519_v61  ;;  %18714 = vmatpush3.bf16.msra.mxu1 %v22521_v1 }
0x13f9   :  { %18702 = vmatprep.subr.bf16.mxu0 %v22525_v14  ;;  %18715 = vmatprep.subr.bf16.mxu1 %v23648_v13 }
0x13fc   :  { %18704 = vmatpush1.bf16.msra.mxu0 %v22532_v52  ;;  %18717 = vmatpush3.bf16.msra.mxu1 %v22534_v19 }
0x13fd   :  { %18706 = vmatprep.subr.bf16.mxu0 %v22538_v39  ;;  %18718 = vmatprep.subr.bf16.mxu1 %v23648_v13 }
0x1400   :  { %18708 = vmatpush1.bf16.msra.mxu0 %v22542_v3  ;;  %18720 = vmatpush3.bf16.msra.mxu1 %v22544_v6 }
0x1401   :  { %18722 = vmatprep.subr.bf16.mxu0 %v22558_v8  ;;  %18737 = vmatprep.subr.bf16.mxu1 %v23648_v13 }
0x1403   :  { %15572 = vmatmul.mubr.msk.f32.vlgmr.msra.gmra.mrb[72].mxu0 %vm5436_vm3, %v22769_v17  ;;  %17178 = vmatmul.mubr.msk.f32.vlgmr.msra.gmra.mrb[148].mxu1 %vm5436_vm3, %v22769_v17 }
0x1404   :  { %18724 = vmatpush1.bf16.msra.mxu0 %v22560_v57  ;;  %18739 = vmatpush3.bf16.msra.mxu1 %v22563_v23 }
0x1405   :  { %18726 = vmatprep.subr.bf16.mxu0 %v22565_v34  ;;  %18740 = vmatprep.subr.bf16.mxu1 %v23648_v13 }
0x1406   :  { %12204 = vmatprep.mubr.f32.mxu0 %v23649_v35  ;;  %17196 = vmatprep.mubr.msk.f32.mxu1 %vm20429_vm0, %v23649_v35 }
0x1408   :  { %18728 = vmatpush1.bf16.msra.mxu0 %v22568_v54  ;;  %18742 = vmatpush3.bf16.msra.mxu1 %v22572_v0 }
0x1409   :  { %18730 = vmatprep.subr.bf16.mxu0 %v22574_v25  ;;  %18743 = vmatprep.subr.bf16.mxu1 %v23648_v13 }
0x140c   :  { %18732 = vmatpush1.bf16.msra.mxu0 %v23710_v9  ;;  %18745 = vmatpush3.bf16.msra.mxu1 %v23711_v10 }
0x140d   :  { %18734 = vmatprep.subr.bf16.mxu0 %v23712_v53  ;;  %18746 = vmatprep.subr.bf16.mxu1 %v23648_v13 }
0x1410   :  { %18736 = vmatpush1.bf16.msra.mxu0 %v23713_v36  ;;  %18748 = vmatpush3.bf16.msra.mxu1 %v23714_v41 }
0x1411   :  { %18750 = vmatprep.subr.bf16.mxu0 %v23715_v60  ;;  %18765 = vmatprep.subr.bf16.mxu1 %v23648_v13 }
0x14b2   :  { %v11660_v11 = vpop.f32.mrb[142].mxu1 }
0x14b3   :  { %v17134_v12 = vpop.f32.mrb[143].mxu1 }
0x14c2   :  { %v11733_v5 = vpop.f32.mrb[70].mxu0  ;;  %v11804_v22 = vpop.f32.mrb[144].mxu1 }
0x14c3   :  { %v19364_v43 = vadd.f32 %v22747_v18, %v11733_v5  ;;  %v11735_v45 = vpop.f32.mrb[71].mxu0  ;;  %v17153_v46 = vpop.f32.mrb[145].mxu1 }
0x14c4   :  { %v19366_v47 = vadd.f32 %v22749_v27, %v11735_v45  ;;  %v23716_v46 = vld [vmem:[#allocation51_spill] sm:$0xff]  ;;  %v23717_v45 = vld [vmem:[#allocation52_spill] sm:$0xff] }
0x14c5   :  { %v15567_v42 = vmul.f32 -1.442695, %v19364_v43 }
0x14c6   :  { %v11971_v29 = vpop.f32.mrb[146].mxu1  ;;  %v15568_v2 = vmul.f32 -1.442695, %v19366_v47 }
0x14c7   :  { %19875 = vpow2.f32 %v15567_v42  ;;  %v17160_v62 = vpop.f32.mrb[147].mxu1  ;;  %v11805_v42 = vadd.f32 %v11804_v22, %v23717_v45 }
0x14c8   :  { %19877 = vpow2.f32 %v15568_v2  ;;  %v11661_v2 = vadd.f32 %v11660_v11, %v22759_v56 }
0x14d1   :  { %v19876_v20 = vpop.eup %19875 }
0x14d2   :  { %v11812_v58 = vadd.f32 1.0, %v19876_v20  ;;  %v19878_v5 = vpop.eup %19877 }
0x14d3   :  { %v11819_v53 = vadd.f32 1.0, %v19878_v5 }
0x14d4   :  { %19879 = vrcp.f32 %v11812_v58 }
0x14d6   :  { %v12041_v33 = vpop.f32.mrb[72].mxu0  ;;  %v12112_v60 = vpop.f32.mrb[148].mxu1 }
0x14d7   :  { %v19368_v12 = vadd.f32 %v22612_v26, %v12041_v33  ;;  %v12043_v41 = vpop.f32.mrb[73].mxu0  ;;  %v17179_v36 = vpop.f32.mrb[149].mxu1  ;;  %v12113_v11 = vadd.f32 %v12112_v60, %v22627_v28  ;;  %v23719_v60 = vld [vmem:[#allocation44_spill] sm:$0xff] }
0x14d8   :  { %v19370_v43 = vadd.f32 %v23716_v46, %v12043_v41 }
0x14d9   :  { %v15574_v18 = vmul.f32 -1.442695, %v19368_v12 }
0x14da   :  { %v15575_v47 = vmul.f32 -1.442695, %v19370_v43 }
0x14db   :  { %19881 = vpow2.f32 %v15574_v18 }
0x14dc   :  { %19883 = vrcp.f32 %v11819_v53  ;;  %v11972_v53 = vadd.f32 %v11971_v29, %v22624_v55  ;;  %v23720_v29 = vld [vmem:[#allocation45_spill] sm:$0xff] }
0x14dd   :  { %19885 = vpow2.f32 %v15575_v47 }
0x14de   :  { %v19880_v62 = vpop.eup %19879 }
0x14df   :  { %v11822_v20 = vmul.f32 %v19880_v62, %v11805_v42 }
0x14e1   :  { %v11823_v58 = vadd.f32 %v11822_v20, %v11661_v2 }
0x14e3   :  { %19887 = vtanh.f32 %v11823_v58 }
0x14e5   :  { %v19882_v33 = vpop.eup %19881 }
0x14e6   :  { %v12120_v26 = vadd.f32 1.0, %v19882_v33  ;;  %v19884_v36 = vpop.eup %19883  ;;  %v23721_v33 = vld [vmem:[#allocation53_spill] sm:$0xff] }
0x14e7   :  { %v19886_v12 = vpop.eup %19885  ;;  %v11825_v27 = vsub.f32 1.0, %v19884_v36  ;;  %v11827_v18 = vmul.f32 %v19884_v36, %v22764_v37  ;;  %v23722_v36 = vld [vmem:[#allocation58_spill] sm:$0xff] }
0x14e8   :  { %19889 = vrcp.f32 %v12120_v26  ;;  %v12127_v22 = vadd.f32 1.0, %v19886_v12 }
0x14ea   :  { %19891 = vrcp.f32 %v12127_v22  ;;  %v23723_v22 = vld [vmem:[#allocation50_spill] sm:$0xff] }
0x14ed   :  { %v19888_v41 = vpop.eup %19887 }
0x14ee   :  { %v11826_v5 = vmul.f32 %v19888_v41, %v11825_v27 }
0x14f0   :  { %v22859_v45 = vadd.f32 %v11827_v18, %v11826_v5 }
0x14f2   :  { %23718 = vst [vmem:[#allocation54_spill] sm:$0xff] %v22859_v45  ;;  %v19890_v43 = vpop.eup %19889 }
0x14f3   :  { %v12130_v42 = vmul.f32 %v19890_v43, %v12113_v11 }
0x14f4   :  { %v19892_v26 = vpop.eup %19891 }
0x14f5   :  { %v12131_v62 = vadd.f32 %v12130_v42, %v11972_v53  ;;  %v12133_v47 = vsub.f32 1.0, %v19892_v26  ;;  %v12135_v27 = vmul.f32 %v19892_v26, %v22769_v17  ;;  %v15582_v17 = vld [vmem:[%s23693_s21 + $0xc] sm:$0xf] }
0x14f7   :  { %19893 = vtanh.f32 %v12131_v62  ;;  %v23724_v62 = vld [vmem:[#allocation49_spill] sm:$0xff] }
0x1501   :  { %v19894_v2 = vpop.eup %19893 }
0x1502   :  { %v12134_v20 = vmul.f32 %v19894_v2, %v12133_v47 }
0x1504   :  { %v22864_v58 = vadd.f32 %v12135_v27, %v12134_v20 }
0x1506   :  { %15576 = vmatmul.mubr.msk.f32.vlgmr.msra.gmra.mrb[74].mxu0 %vm5436_vm3, %v22864_v58  ;;  %17197 = vmatmul.mubr.msk.f32.vlgmr.msra.gmra.mrb[150].mxu1 %vm5436_vm3, %v22864_v58 }
0x1507   :  { %18752 = vmatpush1.bf16.msra.mxu0 %v22634_v63  ;;  %18767 = vmatpush3.bf16.msra.mxu1 %v22636_v7 }
0x1508   :  { %18754 = vmatprep.subr.bf16.mxu0 %v22640_v30  ;;  %18768 = vmatprep.subr.bf16.mxu1 %v23648_v13 }
0x1509   :  { %12348 = vmatprep.mubr.f32.mxu0 %v23649_v35  ;;  %17215 = vmatprep.mubr.msk.f32.mxu1 %vm20429_vm0, %v23649_v35 }
0x150b   :  { %18756 = vmatpush1.bf16.msra.mxu0 %v22648_v21  ;;  %18770 = vmatpush3.bf16.msra.mxu1 %v22650_v38 }
0x150c   :  { %18758 = vmatprep.subr.bf16.mxu0 %v22654_v48  ;;  %18771 = vmatprep.subr.bf16.mxu1 %v23648_v13 }
0x150f   :  { %18760 = vmatpush1.bf16.msra.mxu0 %v22661_v49  ;;  %18773 = vmatpush3.bf16.msra.mxu1 %v22663_v24 }
0x1510   :  { %18762 = vmatprep.subr.bf16.mxu0 %v22667_v50  ;;  %18774 = vmatprep.subr.bf16.mxu1 %v23648_v13 }
0x1513   :  { %18764 = vmatpush1.bf16.msra.mxu0 %v22671_v40  ;;  %18776 = vmatpush3.bf16.msra.mxu1 %v22673_v31 }
0x1514   :  { %18778 = vmatprep.subr.bf16.mxu0 %v22477_v44  ;;  %18781 = vmatprep.subr.bf16.mxu1 %v23648_v13 }
0x1516   :  { %15578 = vmatmul.mubr.msk.f32.vlgmr.msra.gmra.mrb[74].mxu0 %vm5436_vm3, %v22859_v45  ;;  %17216 = vmatmul.mubr.msk.f32.vlgmr.msra.gmra.mrb[152].mxu1 %vm5436_vm3, %v22859_v45 }
0x1517   :  { %18780 = vmatpush1.bf16.msra.mxu0 %v22485_v15  ;;  %18783 = vmatpush3.bf16.msra.mxu1 %v22487_v4 }
0x1518   :  { %12515 = vmatprep.mubr.f32.mxu0 %v23649_v35  ;;  %17222 = vmatprep.mubr.msk.f32.mxu1 %vm20429_vm0, %v23649_v35 }
0x1519   :  { %18785 = vmatprep.subr.bf16.mxu0 %v22493_v51  ;;  %18800 = vmatprep.subr.bf16.mxu1 %v23648_v13 }
0x151a   :  { %15583 = vmatmul.mubr.msk.f32.vlgmr.msra.gmra.mrb[76].mxu0 %vm344_vm1, %v15582_v17  ;;  %17223 = vmatmul.mubr.msk.f32.vlgmr.msra.gmra.mrb[154].mxu1 %vm344_vm1, %v15582_v17 }
0x151b   :  { %18787 = vmatpush1.bf16.msra.mxu0 %v22504_v16  ;;  %18802 = vmatpush3.bf16.msra.mxu1 %v22506_v32 }
0x151c   :  { %18789 = vmatprep.subr.bf16.mxu0 %v22511_v59  ;;  %18803 = vmatprep.subr.bf16.mxu1 %v23648_v13 }
0x151d   :  { %12656 = vmatprep.mubr.f32.mxu0 %v23649_v35  ;;  %17241 = vmatprep.mubr.msk.f32.mxu1 %vm20429_vm0, %v23649_v35 }
0x151f   :  { %18791 = vmatpush1.bf16.msra.mxu0 %v22519_v61  ;;  %18805 = vmatpush3.bf16.msra.mxu1 %v22521_v1 }
0x1520   :  { %18793 = vmatprep.subr.bf16.mxu0 %v22525_v14  ;;  %18806 = vmatprep.subr.bf16.mxu1 %v23648_v13 }
0x1523   :  { %18795 = vmatpush1.bf16.msra.mxu0 %v22532_v52  ;;  %18808 = vmatpush3.bf16.msra.mxu1 %v22534_v19 }
0x1524   :  { %18797 = vmatprep.subr.bf16.mxu0 %v22538_v39  ;;  %18809 = vmatprep.subr.bf16.mxu1 %v23648_v13 }
0x1527   :  { %18799 = vmatpush1.bf16.msra.mxu0 %v22542_v3  ;;  %18811 = vmatpush3.bf16.msra.mxu1 %v22544_v6 }
0x1528   :  { %18813 = vmatprep.subr.bf16.mxu0 %v22558_v8  ;;  %18828 = vmatprep.subr.bf16.mxu1 %v23648_v13 }
0x152a   :  { %15585 = vmatmul.mubr.msk.f32.vlgmr.msra.gmra.mrb[76].mxu0 %vm5436_vm3, %v22864_v58  ;;  %17242 = vmatmul.mubr.msk.f32.vlgmr.msra.gmra.mrb[156].mxu1 %vm5436_vm3, %v22864_v58 }
0x152b   :  { %18815 = vmatpush1.bf16.msra.mxu0 %v22560_v57  ;;  %18830 = vmatpush3.bf16.msra.mxu1 %v22563_v23 }
0x152c   :  { %18817 = vmatprep.subr.bf16.mxu0 %v22565_v34  ;;  %18831 = vmatprep.subr.bf16.mxu1 %v23648_v13 }
0x152d   :  { %12821 = vmatprep.mubr.f32.mxu0 %v23649_v35  ;;  %17260 = vmatprep.mubr.msk.f32.mxu1 %vm20429_vm0, %v23649_v35 }
0x152f   :  { %18819 = vmatpush1.bf16.msra.mxu0 %v22568_v54  ;;  %18833 = vmatpush3.bf16.msra.mxu1 %v22572_v0 }
0x1530   :  { %18821 = vmatprep.subr.bf16.mxu0 %v22574_v25  ;;  %18834 = vmatprep.subr.bf16.mxu1 %v23648_v13 }
0x1533   :  { %18823 = vmatpush1.bf16.msra.mxu0 %v23710_v9  ;;  %18836 = vmatpush3.bf16.msra.mxu1 %v23711_v10 }
0x1534   :  { %18825 = vmatprep.subr.bf16.mxu0 %v23719_v60  ;;  %18837 = vmatprep.subr.bf16.mxu1 %v23648_v13 }
0x1537   :  { %18827 = vmatpush1.bf16.msra.mxu0 %v23720_v29  ;;  %18839 = vmatpush3.bf16.msra.mxu1 %v23721_v33 }
0x1538   :  { %18841 = vmatprep.subr.bf16.mxu0 %v23722_v36  ;;  %18856 = vmatprep.subr.bf16.mxu1 %v23648_v13 }
0x15d9   :  { %v12277_v12 = vpop.f32.mrb[150].mxu1 }
0x15da   :  { %v17198_v41 = vpop.f32.mrb[151].mxu1 }
0x15db   :  { %v23725_v41 = vld [vmem:[#allocation57_spill] sm:$0xff] }
0x15e9   :  { %v12350_v5 = vpop.f32.mrb[74].mxu0  ;;  %v12421_v18 = vpop.f32.mrb[152].mxu1 }
0x15ea   :  { %v19372_v11 = vadd.f32 %v23723_v22, %v12350_v5  ;;  %v12352_v43 = vpop.f32.mrb[75].mxu0  ;;  %v17217_v53 = vpop.f32.mrb[153].mxu1 }
0x15eb   :  { %v19374_v26 = vadd.f32 %v23724_v62, %v12352_v43  ;;  %v23726_v43 = vld [vmem:[#allocation52_spill] sm:$0xff] }
0x15ec   :  { %v15580_v42 = vmul.f32 -1.442695, %v19372_v11 }
0x15ed   :  { %v12588_v47 = vpop.f32.mrb[154].mxu1  ;;  %v15581_v20 = vmul.f32 -1.442695, %v19374_v26 }
0x15ee   :  { %19895 = vpow2.f32 %v15580_v42  ;;  %v17224_v2 = vpop.f32.mrb[155].mxu1  ;;  %v12422_v42 = vadd.f32 %v12421_v18, %v23726_v43 }
0x15ef   :  { %19897 = vpow2.f32 %v15581_v20  ;;  %v12278_v20 = vadd.f32 %v12277_v12, %v22759_v56 }
0x15f8   :  { %v19896_v27 = vpop.eup %19895 }
0x15f9   :  { %v12429_v17 = vadd.f32 1.0, %v19896_v27  ;;  %v19898_v5 = vpop.eup %19897 }
0x15fa   :  { %v12436_v53 = vadd.f32 1.0, %v19898_v5 }
0x15fb   :  { %19899 = vrcp.f32 %v12429_v17 }
0x15fd   :  { %v12658_v37 = vpop.f32.mrb[76].mxu0  ;;  %v12729_v36 = vpop.f32.mrb[156].mxu1 }
0x15fe   :  { %v19376_v33 = vadd.f32 %v23725_v41, %v12658_v37  ;;  %v12660_v29 = vpop.f32.mrb[77].mxu0  ;;  %v17243_v60 = vpop.f32.mrb[157].mxu1  ;;  %v12730_v12 = vadd.f32 %v12729_v36, %v22627_v28  ;;  %v23728_v36 = vld [vmem:[#allocation44_spill] sm:$0xff] }
0x15ff   :  { %v19378_v11 = vadd.f32 %v23716_v46, %v12660_v29 }
0x1600   :  { %v15587_v22 = vmul.f32 -1.442695, %v19376_v33 }
0x1601   :  { %v15588_v26 = vmul.f32 -1.442695, %v19378_v11 }
0x1602   :  { %19901 = vpow2.f32 %v15587_v22 }
0x1603   :  { %19903 = vrcp.f32 %v12436_v53  ;;  %v12589_v53 = vadd.f32 %v12588_v47, %v22624_v55  ;;  %v23729_v47 = vld [vmem:[#allocation45_spill] sm:$0xff] }
0x1604   :  { %19905 = vpow2.f32 %v15588_v26 }
0x1605   :  { %v19900_v2 = vpop.eup %19899 }
0x1606   :  { %v12439_v27 = vmul.f32 %v19900_v2, %v12422_v42 }
0x1608   :  { %v12440_v17 = vadd.f32 %v12439_v27, %v12278_v20 }
0x160a   :  { %19907 = vtanh.f32 %v12440_v17 }
0x160c   :  { %v19902_v37 = vpop.eup %19901 }
0x160d   :  { %v12737_v41 = vadd.f32 1.0, %v19902_v37  ;;  %v19904_v60 = vpop.eup %19903  ;;  %v23730_v37 = vld [vmem:[#allocation53_spill] sm:$0xff] }
0x160e   :  { %v19906_v33 = vpop.eup %19905  ;;  %v12442_v62 = vsub.f32 1.0, %v19904_v60  ;;  %v12444_v22 = vmul.f32 %v19904_v60, %v22859_v45  ;;  %v23731_v60 = vld [vmem:[#allocation58_spill] sm:$0xff] }
0x160f   :  { %19909 = vrcp.f32 %v12737_v41  ;;  %v12744_v18 = vadd.f32 1.0, %v19906_v33 }
0x1611   :  { %19911 = vrcp.f32 %v12744_v18  ;;  %v23732_v18 = vld [vmem:[#allocation50_spill] sm:$0xff] }
0x1614   :  { %v19908_v29 = vpop.eup %19907 }
0x1615   :  { %v12443_v5 = vmul.f32 %v19908_v29, %v12442_v62 }
0x1617   :  { %v22954_v43 = vadd.f32 %v12444_v22, %v12443_v5 }
0x1619   :  { %23727 = vst [vmem:[#allocation56_spill] sm:$0xff] %v22954_v43  ;;  %v19910_v11 = vpop.eup %19909 }
0x161a   :  { %v12747_v42 = vmul.f32 %v19910_v11, %v12730_v12 }
0x161b   :  { %v19912_v41 = vpop.eup %19911 }
0x161c   :  { %v12748_v2 = vadd.f32 %v12747_v42, %v12589_v53  ;;  %v12750_v26 = vsub.f32 1.0, %v19912_v41  ;;  %v12752_v62 = vmul.f32 %v19912_v41, %v22864_v58  ;;  %v15595_v58 = vld [vmem:[%s23693_s21 + $0x10] sm:$0xf] }
0x161e   :  { %19913 = vtanh.f32 %v12748_v2  ;;  %v23733_v2 = vld [vmem:[#allocation49_spill] sm:$0xff] }
0x1628   :  { %v19914_v20 = vpop.eup %19913 }
0x1629   :  { %v12751_v27 = vmul.f32 %v19914_v20, %v12750_v26 }
0x162b   :  { %v22959_v17 = vadd.f32 %v12752_v62, %v12751_v27 }
0x162d   :  { %15589 = vmatmul.mubr.msk.f32.vlgmr.msra.gmra.mrb[78].mxu0 %vm5436_vm3, %v22959_v17  ;;  %17261 = vmatmul.mubr.msk.f32.vlgmr.msra.gmra.mrb[158].mxu1 %vm5436_vm3, %v22959_v17 }
0x162e   :  { %18843 = vmatpush1.bf16.msra.mxu0 %v22634_v63  ;;  %18858 = vmatpush3.bf16.msra.mxu1 %v22636_v7 }
0x162f   :  { %18845 = vmatprep.subr.bf16.mxu0 %v22640_v30  ;;  %18859 = vmatprep.subr.bf16.mxu1 %v23648_v13 }
0x1630   :  { %12965 = vmatprep.mubr.f32.mxu0 %v23649_v35  ;;  %17279 = vmatprep.mubr.msk.f32.mxu1 %vm20429_vm0, %v23649_v35 }
0x1632   :  { %18847 = vmatpush1.bf16.msra.mxu0 %v22648_v21  ;;  %18861 = vmatpush3.bf16.msra.mxu1 %v22650_v38 }
0x1633   :  { %18849 = vmatprep.subr.bf16.mxu0 %v22654_v48  ;;  %18862 = vmatprep.subr.bf16.mxu1 %v23648_v13 }
0x1636   :  { %18851 = vmatpush1.bf16.msra.mxu0 %v22661_v49  ;;  %18864 = vmatpush3.bf16.msra.mxu1 %v22663_v24 }
0x1637   :  { %18853 = vmatprep.subr.bf16.mxu0 %v22667_v50  ;;  %18865 = vmatprep.subr.bf16.mxu1 %v23648_v13 }
0x163a   :  { %18855 = vmatpush1.bf16.msra.mxu0 %v22671_v40  ;;  %18867 = vmatpush3.bf16.msra.mxu1 %v22673_v31 }
0x163b   :  { %18869 = vmatprep.subr.bf16.mxu0 %v22477_v44  ;;  %18872 = vmatprep.subr.bf16.mxu1 %v23648_v13 }
0x163d   :  { %15591 = vmatmul.mubr.msk.f32.vlgmr.msra.gmra.mrb[78].mxu0 %vm5436_vm3, %v22954_v43  ;;  %17280 = vmatmul.mubr.msk.f32.vlgmr.msra.gmra.mrb[160].mxu1 %vm5436_vm3, %v22954_v43 }
0x163e   :  { %18871 = vmatpush1.bf16.msra.mxu0 %v22485_v15  ;;  %18874 = vmatpush3.bf16.msra.mxu1 %v22487_v4 }
0x163f   :  { %13132 = vmatprep.mubr.f32.mxu0 %v23649_v35  ;;  %17286 = vmatprep.mubr.msk.f32.mxu1 %vm20429_vm0, %v23649_v35 }
0x1640   :  { %18876 = vmatprep.subr.bf16.mxu0 %v22493_v51  ;;  %18891 = vmatprep.subr.bf16.mxu1 %v23648_v13 }
0x1641   :  { %15596 = vmatmul.mubr.msk.f32.vlgmr.msra.gmra.mrb[80].mxu0 %vm344_vm1, %v15595_v58  ;;  %17287 = vmatmul.mubr.msk.f32.vlgmr.msra.gmra.mrb[162].mxu1 %vm344_vm1, %v15595_v58 }
0x1642   :  { %18878 = vmatpush1.bf16.msra.mxu0 %v22504_v16  ;;  %18893 = vmatpush3.bf16.msra.mxu1 %v22506_v32 }
0x1643   :  { %18880 = vmatprep.subr.bf16.mxu0 %v22511_v59  ;;  %18894 = vmatprep.subr.bf16.mxu1 %v23648_v13 }
0x1644   :  { %13273 = vmatprep.mubr.f32.mxu0 %v23649_v35  ;;  %17305 = vmatprep.mubr.msk.f32.mxu1 %vm20429_vm0, %v23649_v35 }
0x1646   :  { %18882 = vmatpush1.bf16.msra.mxu0 %v22519_v61  ;;  %18896 = vmatpush3.bf16.msra.mxu1 %v22521_v1 }
0x1647   :  { %18884 = vmatprep.subr.bf16.mxu0 %v22525_v14  ;;  %18897 = vmatprep.subr.bf16.mxu1 %v23648_v13 }
0x164a   :  { %18886 = vmatpush1.bf16.msra.mxu0 %v22532_v52  ;;  %18899 = vmatpush3.bf16.msra.mxu1 %v22534_v19 }
0x164b   :  { %18888 = vmatprep.subr.bf16.mxu0 %v22538_v39  ;;  %18900 = vmatprep.subr.bf16.mxu1 %v23648_v13 }
0x164e   :  { %18890 = vmatpush1.bf16.msra.mxu0 %v22542_v3  ;;  %18902 = vmatpush3.bf16.msra.mxu1 %v22544_v6 }
0x164f   :  { %18904 = vmatprep.subr.bf16.mxu0 %v22558_v8  ;;  %18919 = vmatprep.subr.bf16.mxu1 %v23648_v13 }
0x1651   :  { %15598 = vmatmul.mubr.msk.f32.vlgmr.msra.gmra.mrb[80].mxu0 %vm5436_vm3, %v22959_v17  ;;  %17306 = vmatmul.mubr.msk.f32.vlgmr.msra.gmra.mrb[164].mxu1 %vm5436_vm3, %v22959_v17 }
0x1652   :  { %18906 = vmatpush1.bf16.msra.mxu0 %v22560_v57  ;;  %18921 = vmatpush3.bf16.msra.mxu1 %v22563_v23 }
0x1653   :  { %18908 = vmatprep.subr.bf16.mxu0 %v22565_v34  ;;  %18922 = vmatprep.subr.bf16.mxu1 %v23648_v13 }
0x1654   :  { %13438 = vmatprep.mubr.f32.mxu0 %v23649_v35  ;;  %17324 = vmatprep.mubr.msk.f32.mxu1 %vm20429_vm0, %v23649_v35 }
0x1656   :  { %18910 = vmatpush1.bf16.msra.mxu0 %v22568_v54  ;;  %18924 = vmatpush3.bf16.msra.mxu1 %v22572_v0 }
0x1657   :  { %18912 = vmatprep.subr.bf16.mxu0 %v22574_v25  ;;  %18925 = vmatprep.subr.bf16.mxu1 %v23648_v13 }
0x165a   :  { %18914 = vmatpush1.bf16.msra.mxu0 %v23710_v9  ;;  %18927 = vmatpush3.bf16.msra.mxu1 %v23711_v10 }
0x165b   :  { %18916 = vmatprep.subr.bf16.mxu0 %v23728_v36  ;;  %18928 = vmatprep.subr.bf16.mxu1 %v23648_v13 }
0x165e   :  { %18918 = vmatpush1.bf16.msra.mxu0 %v23729_v47  ;;  %18930 = vmatpush3.bf16.msra.mxu1 %v23730_v37 }
0x165f   :  { %18932 = vmatprep.subr.bf16.mxu0 %v23731_v60  ;;  %18947 = vmatprep.subr.bf16.mxu1 %v23648_v13 }
0x1700   :  { %v12894_v33 = vpop.f32.mrb[158].mxu1 }
0x1701   :  { %v17262_v29 = vpop.f32.mrb[159].mxu1 }
0x1702   :  { %v23734_v29 = vld [vmem:[#allocation57_spill] sm:$0xff] }
0x1710   :  { %v12967_v5 = vpop.f32.mrb[78].mxu0  ;;  %v13038_v22 = vpop.f32.mrb[160].mxu1 }
0x1711   :  { %v19380_v12 = vadd.f32 %v23732_v18, %v12967_v5  ;;  %v12969_v11 = vpop.f32.mrb[79].mxu0  ;;  %v17281_v53 = vpop.f32.mrb[161].mxu1 }
0x1712   :  { %v19382_v41 = vadd.f32 %v23733_v2, %v12969_v11  ;;  %v23735_v11 = vld [vmem:[#allocation52_spill] sm:$0xff] }
0x1713   :  { %v15593_v42 = vmul.f32 -1.442695, %v19380_v12 }
0x1714   :  { %v13205_v26 = vpop.f32.mrb[162].mxu1  ;;  %v15594_v27 = vmul.f32 -1.442695, %v19382_v41 }
0x1715   :  { %19915 = vpow2.f32 %v15593_v42  ;;  %v17288_v20 = vpop.f32.mrb[163].mxu1  ;;  %v13039_v42 = vadd.f32 %v13038_v22, %v23735_v11 }
0x1716   :  { %19917 = vpow2.f32 %v15594_v27  ;;  %v12895_v27 = vadd.f32 %v12894_v33, %v22759_v56 }
0x171f   :  { %v19916_v62 = vpop.eup %19915 }
0x1720   :  { %v13046_v58 = vadd.f32 1.0, %v19916_v62  ;;  %v19918_v5 = vpop.eup %19917 }
0x1721   :  { %v13053_v53 = vadd.f32 1.0, %v19918_v5 }
0x1722   :  { %19919 = vrcp.f32 %v13046_v58 }
0x1724   :  { %v13275_v45 = vpop.f32.mrb[80].mxu0  ;;  %v13346_v60 = vpop.f32.mrb[164].mxu1 }
0x1725   :  { %v19384_v37 = vadd.f32 %v23734_v29, %v13275_v45  ;;  %v13277_v47 = vpop.f32.mrb[81].mxu0  ;;  %v17307_v36 = vpop.f32.mrb[165].mxu1  ;;  %v13347_v33 = vadd.f32 %v13346_v60, %v22627_v28  ;;  %v23736_v60 = vld [vmem:[#allocation44_spill] sm:$0xff] }
0x1726   :  { %v19386_v12 = vadd.f32 %v23716_v46, %v13277_v47 }
0x1727   :  { %v15600_v18 = vmul.f32 -1.442695, %v19384_v37 }
0x1728   :  { %v15601_v41 = vmul.f32 -1.442695, %v19386_v12 }
0x1729   :  { %19921 = vpow2.f32 %v15600_v18 }
0x172a   :  { %19923 = vrcp.f32 %v13053_v53  ;;  %v13206_v53 = vadd.f32 %v13205_v26, %v22624_v55  ;;  %v23737_v26 = vld [vmem:[#allocation45_spill] sm:$0xff] }
0x172b   :  { %19925 = vpow2.f32 %v15601_v41 }
0x172c   :  { %v19920_v20 = vpop.eup %19919 }
0x172d   :  { %v13056_v62 = vmul.f32 %v19920_v20, %v13039_v42 }
0x172f   :  { %v13057_v58 = vadd.f32 %v13056_v62, %v12895_v27 }
0x1731   :  { %19927 = vtanh.f32 %v13057_v58 }
0x1733   :  { %v19922_v45 = vpop.eup %19921 }
0x1734   :  { %v13354_v29 = vadd.f32 1.0, %v19922_v45  ;;  %v19924_v36 = vpop.eup %19923  ;;  %v23738_v45 = vld [vmem:[#allocation53_spill] sm:$0xff] }
0x1735   :  { %v19926_v37 = vpop.eup %19925  ;;  %v13059_v2 = vsub.f32 1.0, %v19924_v36  ;;  %v13061_v18 = vmul.f32 %v19924_v36, %v22954_v43  ;;  %v23739_v36 = vld [vmem:[#allocation58_spill] sm:$0xff] }
0x1736   :  { %19929 = vrcp.f32 %v13354_v29  ;;  %v13361_v22 = vadd.f32 1.0, %v19926_v37 }
0x1738   :  { %19931 = vrcp.f32 %v13361_v22  ;;  %v23740_v22 = vld [vmem:[#allocation50_spill] sm:$0xff] }
0x173b   :  { %v19928_v47 = vpop.eup %19927 }
0x173c   :  { %v13060_v5 = vmul.f32 %v19928_v47, %v13059_v2 }
0x173e   :  { %v23049_v11 = vadd.f32 %v13061_v18, %v13060_v5 }
0x1740   :  { %v19930_v12 = vpop.eup %19929 }
0x1741   :  { %v13364_v42 = vmul.f32 %v19930_v12, %v13347_v33 }
0x1742   :  { %v19932_v29 = vpop.eup %19931 }
0x1743   :  { %v13365_v20 = vadd.f32 %v13364_v42, %v13206_v53  ;;  %v13367_v41 = vsub.f32 1.0, %v19932_v29  ;;  %v13369_v2 = vmul.f32 %v19932_v29, %v22959_v17  ;;  %v15608_v17 = vld [vmem:[%s23693_s21 + $0x14] sm:$0xf] }
0x1745   :  { %19933 = vtanh.f32 %v13365_v20  ;;  %v23741_v20 = vld [vmem:[#allocation49_spill] sm:$0xff] }
0x174f   :  { %v19934_v27 = vpop.eup %19933 }
0x1750   :  { %v13368_v62 = vmul.f32 %v19934_v27, %v13367_v41 }
0x1752   :  { %v23054_v58 = vadd.f32 %v13369_v2, %v13368_v62 }
0x1754   :  { %15602 = vmatmul.mubr.msk.f32.vlgmr.msra.gmra.mrb[82].mxu0 %vm5436_vm3, %v23054_v58  ;;  %17325 = vmatmul.mubr.msk.f32.vlgmr.msra.gmra.mrb[166].mxu1 %vm5436_vm3, %v23054_v58 }
0x1755   :  { %18934 = vmatpush1.bf16.msra.mxu0 %v22634_v63  ;;  %18949 = vmatpush3.bf16.msra.mxu1 %v22636_v7 }
0x1756   :  { %18936 = vmatprep.subr.bf16.mxu0 %v22640_v30  ;;  %18950 = vmatprep.subr.bf16.mxu1 %v23648_v13 }
0x1757   :  { %13582 = vmatprep.mubr.f32.mxu0 %v23649_v35  ;;  %17343 = vmatprep.mubr.msk.f32.mxu1 %vm20429_vm0, %v23649_v35 }
0x1759   :  { %18938 = vmatpush1.bf16.msra.mxu0 %v22648_v21  ;;  %18952 = vmatpush3.bf16.msra.mxu1 %v22650_v38 }
0x175a   :  { %18940 = vmatprep.subr.bf16.mxu0 %v22654_v48  ;;  %18953 = vmatprep.subr.bf16.mxu1 %v23648_v13 }
0x175d   :  { %18942 = vmatpush1.bf16.msra.mxu0 %v22661_v49  ;;  %18955 = vmatpush3.bf16.msra.mxu1 %v22663_v24 }
0x175e   :  { %18944 = vmatprep.subr.bf16.mxu0 %v22667_v50  ;;  %18956 = vmatprep.subr.bf16.mxu1 %v23648_v13 }
0x1761   :  { %18946 = vmatpush1.bf16.msra.mxu0 %v22671_v40  ;;  %18958 = vmatpush3.bf16.msra.mxu1 %v22673_v31 }
0x1762   :  { %18960 = vmatprep.subr.bf16.mxu0 %v22477_v44  ;;  %18963 = vmatprep.subr.bf16.mxu1 %v23648_v13 }
0x1764   :  { %15604 = vmatmul.mubr.msk.f32.vlgmr.msra.gmra.mrb[82].mxu0 %vm5436_vm3, %v23049_v11  ;;  %17344 = vmatmul.mubr.msk.f32.vlgmr.msra.gmra.mrb[168].mxu1 %vm5436_vm3, %v23049_v11 }
0x1765   :  { %18962 = vmatpush1.bf16.msra.mxu0 %v22485_v15  ;;  %18965 = vmatpush3.bf16.msra.mxu1 %v22487_v4 }
0x1766   :  { %13749 = vmatprep.mubr.f32.mxu0 %v23649_v35  ;;  %17350 = vmatprep.mubr.msk.f32.mxu1 %vm20429_vm0, %v23649_v35 }
0x1767   :  { %18967 = vmatprep.subr.bf16.mxu0 %v22493_v51  ;;  %18982 = vmatprep.subr.bf16.mxu1 %v23648_v13 }
0x1768   :  { %15609 = vmatmul.mubr.msk.f32.vlgmr.msra.gmra.mrb[84].mxu0 %vm344_vm1, %v15608_v17  ;;  %17351 = vmatmul.mubr.msk.f32.vlgmr.msra.gmra.mrb[170].mxu1 %vm344_vm1, %v15608_v17 }
0x1769   :  { %18969 = vmatpush1.bf16.msra.mxu0 %v22504_v16  ;;  %18984 = vmatpush3.bf16.msra.mxu1 %v22506_v32 }
0x176a   :  { %18971 = vmatprep.subr.bf16.mxu0 %v22511_v59  ;;  %18985 = vmatprep.subr.bf16.mxu1 %v23648_v13 }
0x176b   :  { %13890 = vmatprep.mubr.f32.mxu0 %v23649_v35  ;;  %17369 = vmatprep.mubr.msk.f32.mxu1 %vm20429_vm0, %v23649_v35 }
0x176d   :  { %18973 = vmatpush1.bf16.msra.mxu0 %v22519_v61  ;;  %18987 = vmatpush3.bf16.msra.mxu1 %v22521_v1 }
0x176e   :  { %18975 = vmatprep.subr.bf16.mxu0 %v22525_v14  ;;  %18988 = vmatprep.subr.bf16.mxu1 %v23648_v13 }
0x1771   :  { %18977 = vmatpush1.bf16.msra.mxu0 %v22532_v52  ;;  %18990 = vmatpush3.bf16.msra.mxu1 %v22534_v19 }
0x1772   :  { %18979 = vmatprep.subr.bf16.mxu0 %v22538_v39  ;;  %18991 = vmatprep.subr.bf16.mxu1 %v23648_v13 }
0x1775   :  { %18981 = vmatpush1.bf16.msra.mxu0 %v22542_v3  ;;  %18993 = vmatpush3.bf16.msra.mxu1 %v22544_v6 }
0x1776   :  { %18995 = vmatprep.subr.bf16.mxu0 %v22558_v8  ;;  %19010 = vmatprep.subr.bf16.mxu1 %v23648_v13 }
0x1778   :  { %15611 = vmatmul.mubr.msk.f32.vlgmr.msra.gmra.mrb[84].mxu0 %vm5436_vm3, %v23054_v58  ;;  %17370 = vmatmul.mubr.msk.f32.vlgmr.msra.gmra.mrb[172].mxu1 %vm5436_vm3, %v23054_v58 }
0x1779   :  { %18997 = vmatpush1.bf16.msra.mxu0 %v22560_v57  ;;  %19012 = vmatpush3.bf16.msra.mxu1 %v22563_v23 }
0x177a   :  { %18999 = vmatprep.subr.bf16.mxu0 %v22565_v34  ;;  %19013 = vmatprep.subr.bf16.mxu1 %v23648_v13 }
0x177b   :  { %14055 = vmatprep.mubr.f32.mxu0 %v23649_v35  ;;  %17388 = vmatprep.mubr.msk.f32.mxu1 %vm20429_vm0, %v23649_v35 }
0x177d   :  { %19001 = vmatpush1.bf16.msra.mxu0 %v22568_v54  ;;  %19015 = vmatpush3.bf16.msra.mxu1 %v22572_v0 }
0x177e   :  { %19003 = vmatprep.subr.bf16.mxu0 %v22574_v25  ;;  %19016 = vmatprep.subr.bf16.mxu1 %v23648_v13 }
0x1781   :  { %19005 = vmatpush1.bf16.msra.mxu0 %v23710_v9  ;;  %19018 = vmatpush3.bf16.msra.mxu1 %v23711_v10 }
0x1782   :  { %19007 = vmatprep.subr.bf16.mxu0 %v23736_v60  ;;  %19019 = vmatprep.subr.bf16.mxu1 %v23648_v13 }
0x1785   :  { %19009 = vmatpush1.bf16.msra.mxu0 %v23737_v26  ;;  %19021 = vmatpush3.bf16.msra.mxu1 %v23738_v45 }
0x1786   :  { %19023 = vmatprep.subr.bf16.mxu0 %v23739_v36  ;;  %19038 = vmatprep.subr.bf16.mxu1 %v23648_v13 }
0x1827   :  { %v13511_v37 = vpop.f32.mrb[166].mxu1 }
0x1828   :  { %v17326_v47 = vpop.f32.mrb[167].mxu1 }
0x1829   :  { %v23742_v47 = vld [vmem:[#allocation57_spill] sm:$0xff] }
0x1837   :  { %v13584_v5 = vpop.f32.mrb[82].mxu0  ;;  %v13655_v18 = vpop.f32.mrb[168].mxu1 }
0x1838   :  { %v19388_v33 = vadd.f32 %v23740_v22, %v13584_v5  ;;  %v13586_v12 = vpop.f32.mrb[83].mxu0  ;;  %v17345_v53 = vpop.f32.mrb[169].mxu1 }
0x1839   :  { %v19390_v29 = vadd.f32 %v23741_v20, %v13586_v12  ;;  %v23743_v12 = vld [vmem:[#allocation52_spill] sm:$0xff] }
0x183a   :  { %v15606_v42 = vmul.f32 -1.442695, %v19388_v33 }
0x183b   :  { %v13822_v41 = vpop.f32.mrb[170].mxu1  ;;  %v15607_v62 = vmul.f32 -1.442695, %v19390_v29 }
0x183c   :  { %19935 = vpow2.f32 %v15606_v42  ;;  %v17352_v27 = vpop.f32.mrb[171].mxu1  ;;  %v13656_v42 = vadd.f32 %v13655_v18, %v23743_v12 }
0x183d   :  { %19937 = vpow2.f32 %v15607_v62  ;;  %v13512_v62 = vadd.f32 %v13511_v37, %v22759_v56 }
0x1846   :  { %v19936_v2 = vpop.eup %19935 }
0x1847   :  { %v13663_v17 = vadd.f32 1.0, %v19936_v2  ;;  %v19938_v5 = vpop.eup %19937 }
0x1848   :  { %v13670_v53 = vadd.f32 1.0, %v19938_v5 }
0x1849   :  { %19939 = vrcp.f32 %v13663_v17 }
0x184b   :  { %v13892_v43 = vpop.f32.mrb[84].mxu0  ;;  %v13963_v36 = vpop.f32.mrb[172].mxu1 }
0x184c   :  { %v19392_v45 = vadd.f32 %v23742_v47, %v13892_v43  ;;  %v13894_v26 = vpop.f32.mrb[85].mxu0  ;;  %v17371_v60 = vpop.f32.mrb[173].mxu1  ;;  %v13964_v37 = vadd.f32 %v13963_v36, %v22627_v28 }
0x184d   :  { %v19394_v33 = vadd.f32 %v23716_v46, %v13894_v26 }
0x184e   :  { %v15613_v22 = vmul.f32 -1.442695, %v19392_v45 }
0x184f   :  { %v15614_v29 = vmul.f32 -1.442695, %v19394_v33 }
0x1850   :  { %19941 = vpow2.f32 %v15613_v22 }
0x1851   :  { %19943 = vrcp.f32 %v13670_v53  ;;  %v13823_v53 = vadd.f32 %v13822_v41, %v22624_v55 }
0x1852   :  { %19945 = vpow2.f32 %v15614_v29 }
0x1853   :  { %v19940_v27 = vpop.eup %19939 }
0x1854   :  { %v13673_v2 = vmul.f32 %v19940_v27, %v13656_v42 }
0x1856   :  { %v13674_v17 = vadd.f32 %v13673_v2, %v13512_v62 }
0x1858   :  { %19947 = vtanh.f32 %v13674_v17 }
0x185a   :  { %v19942_v43 = vpop.eup %19941 }
0x185b   :  { %v13971_v47 = vadd.f32 1.0, %v19942_v43  ;;  %v19944_v60 = vpop.eup %19943 }
0x185c   :  { %v19946_v45 = vpop.eup %19945  ;;  %v13676_v20 = vsub.f32 1.0, %v19944_v60  ;;  %v13678_v22 = vmul.f32 %v19944_v60, %v23049_v11 }
0x185d   :  { %19949 = vrcp.f32 %v13971_v47  ;;  %v13978_v18 = vadd.f32 1.0, %v19946_v45 }
0x185f   :  { %19951 = vrcp.f32 %v13978_v18 }
0x1862   :  { %v19948_v26 = vpop.eup %19947 }
0x1863   :  { %v13677_v5 = vmul.f32 %v19948_v26, %v13676_v20 }
0x1865   :  { %v23144_v12 = vadd.f32 %v13678_v22, %v13677_v5  ;;  %v23751_v5 = vld [vmem:[#allocation52_spill] sm:$0xff] }
0x1867   :  { %v19950_v33 = vpop.eup %19949 }
0x1868   :  { %v13981_v42 = vmul.f32 %v19950_v33, %v13964_v37 }
0x1869   :  { %v19952_v47 = vpop.eup %19951 }
0x186a   :  { %v13982_v27 = vadd.f32 %v13981_v42, %v13823_v53  ;;  %v13984_v29 = vsub.f32 1.0, %v19952_v47  ;;  %v13986_v20 = vmul.f32 %v19952_v47, %v23054_v58  ;;  %v15621_v58 = vld [vmem:[%s23693_s21 + $0x18] sm:$0xf] }
0x186c   :  { %19953 = vtanh.f32 %v13982_v27 }
0x1876   :  { %v19954_v62 = vpop.eup %19953 }
0x1877   :  { %v13985_v2 = vmul.f32 %v19954_v62, %v13984_v29 }
0x1879   :  { %v23149_v17 = vadd.f32 %v13986_v20, %v13985_v2 }
0x187b   :  { %15615 = vmatmul.mubr.msk.f32.vlgmr.msra.gmra.mrb[86].mxu0 %vm5436_vm3, %v23149_v17  ;;  %17389 = vmatmul.mubr.msk.f32.vlgmr.msra.gmra.mrb[174].mxu1 %vm5436_vm3, %v23149_v17 }
0x187c   :  { %19025 = vmatpush1.bf16.msra.mxu0 %v22634_v63  ;;  %19040 = vmatpush3.bf16.msra.mxu1 %v22636_v7 }
0x187d   :  { %19027 = vmatprep.subr.bf16.mxu0 %v22640_v30  ;;  %19041 = vmatprep.subr.bf16.mxu1 %v23648_v13 }
0x187e   :  { %14199 = vmatprep.mubr.f32.mxu0 %v23649_v35  ;;  %17407 = vmatprep.mubr.msk.f32.mxu1 %vm20429_vm0, %v23649_v35 }
0x1880   :  { %19029 = vmatpush1.bf16.msra.mxu0 %v22648_v21  ;;  %19043 = vmatpush3.bf16.msra.mxu1 %v22650_v38 }
0x1881   :  { %19031 = vmatprep.subr.bf16.mxu0 %v22654_v48  ;;  %19044 = vmatprep.subr.bf16.mxu1 %v23648_v13 }
0x1884   :  { %19033 = vmatpush1.bf16.msra.mxu0 %v22661_v49  ;;  %19046 = vmatpush3.bf16.msra.mxu1 %v22663_v24 }
0x1885   :  { %19035 = vmatprep.subr.bf16.mxu0 %v22667_v50  ;;  %19047 = vmatprep.subr.bf16.mxu1 %v23648_v13 }
0x1888   :  { %19037 = vmatpush1.bf16.msra.mxu0 %v22671_v40  ;;  %19049 = vmatpush3.bf16.msra.mxu1 %v22673_v31 }
0x1889   :  { %19051 = vmatprep.subr.bf16.mxu0 %v22477_v44  ;;  %19054 = vmatprep.subr.bf16.mxu1 %v23648_v13  ;;  %v23744_v44 = vld [vmem:[#allocation44_spill] sm:$0xff] }
0x188b   :  { %15617 = vmatmul.mubr.msk.f32.vlgmr.msra.gmra.mrb[86].mxu0 %vm5436_vm3, %v23144_v12  ;;  %17408 = vmatmul.mubr.msk.f32.vlgmr.msra.gmra.mrb[176].mxu1 %vm5436_vm3, %v23144_v12 }
0x188c   :  { %19053 = vmatpush1.bf16.msra.mxu0 %v22485_v15  ;;  %19056 = vmatpush3.bf16.msra.mxu1 %v22487_v4  ;;  %v23745_v15 = vld [vmem:[#allocation45_spill] sm:$0xff] }
0x188d   :  { %14366 = vmatprep.mubr.f32.mxu0 %v23649_v35  ;;  %17414 = vmatprep.mubr.msk.f32.mxu1 %vm20429_vm0, %v23649_v35  ;;  %v23746_v4 = vld [vmem:[#allocation53_spill] sm:$0xff] }
0x188e   :  { %19058 = vmatprep.subr.bf16.mxu0 %v22493_v51  ;;  %19073 = vmatprep.subr.bf16.mxu1 %v23648_v13  ;;  %v23747_v51 = vld [vmem:[#allocation58_spill] sm:$0xff] }
0x188f   :  { %15622 = vmatmul.mubr.msk.f32.vlgmr.msra.gmra.mrb[88].mxu0 %vm344_vm1, %v15621_v58  ;;  %17415 = vmatmul.mubr.msk.f32.vlgmr.msra.gmra.mrb[178].mxu1 %vm344_vm1, %v15621_v58 }
0x1890   :  { %19060 = vmatpush1.bf16.msra.mxu0 %v22504_v16  ;;  %19075 = vmatpush3.bf16.msra.mxu1 %v22506_v32 }
0x1891   :  { %19062 = vmatprep.subr.bf16.mxu0 %v22511_v59  ;;  %19076 = vmatprep.subr.bf16.mxu1 %v23648_v13 }
0x1892   :  { %14507 = vmatprep.mubr.f32.mxu0 %v23649_v35  ;;  %17433 = vmatprep.mubr.msk.f32.mxu1 %vm20429_vm0, %v23649_v35 }
0x1894   :  { %19064 = vmatpush1.bf16.msra.mxu0 %v22519_v61  ;;  %19078 = vmatpush3.bf16.msra.mxu1 %v22521_v1  ;;  %v23748_v1 = vld [vmem:[#allocation50_spill] sm:$0xff] }
0x1895   :  { %19066 = vmatprep.subr.bf16.mxu0 %v22525_v14  ;;  %19079 = vmatprep.subr.bf16.mxu1 %v23648_v13 }
0x1898   :  { %19068 = vmatpush1.bf16.msra.mxu0 %v22532_v52  ;;  %19081 = vmatpush3.bf16.msra.mxu1 %v22534_v19 }
0x1899   :  { %19070 = vmatprep.subr.bf16.mxu0 %v22538_v39  ;;  %19082 = vmatprep.subr.bf16.mxu1 %v23648_v13 }
0x189c   :  { %19072 = vmatpush1.bf16.msra.mxu0 %v22542_v3  ;;  %19084 = vmatpush3.bf16.msra.mxu1 %v22544_v6  ;;  %v23749_v3 = vld [vmem:[#allocation49_spill] sm:$0xff] }
0x189d   :  { %19086 = vmatprep.subr.bf16.mxu0 %v22558_v8  ;;  %19101 = vmatprep.subr.bf16.mxu1 %v23648_v13 }
0x189f   :  { %15624 = vmatmul.mubr.msk.f32.vlgmr.msra.gmra.mrb[88].mxu0 %vm5436_vm3, %v23149_v17  ;;  %17434 = vmatmul.mubr.msk.f32.vlgmr.msra.gmra.mrb[180].mxu1 %vm5436_vm3, %v23149_v17 }
0x18a0   :  { %19088 = vmatpush1.bf16.msra.mxu0 %v22560_v57  ;;  %19103 = vmatpush3.bf16.msra.mxu1 %v22563_v23 }
0x18a1   :  { %19090 = vmatprep.subr.bf16.mxu0 %v22565_v34  ;;  %19104 = vmatprep.subr.bf16.mxu1 %v23648_v13 }
0x18a2   :  { %14672 = vmatprep.mubr.f32.mxu0 %v23649_v35  ;;  %17452 = vmatprep.mubr.msk.f32.mxu1 %vm20429_vm0, %v23649_v35 }
0x18a4   :  { %19092 = vmatpush1.bf16.msra.mxu0 %v22568_v54  ;;  %19106 = vmatpush3.bf16.msra.mxu1 %v22572_v0 }
0x18a5   :  { %19094 = vmatprep.subr.bf16.mxu0 %v22574_v25  ;;  %19107 = vmatprep.subr.bf16.mxu1 %v23648_v13 }
0x18a8   :  { %19096 = vmatpush1.bf16.msra.mxu0 %v23710_v9  ;;  %19109 = vmatpush3.bf16.msra.mxu1 %v23711_v10  ;;  %v23750_v9 = vld [vmem:[#allocation57_spill] sm:$0xff] }
0x18a9   :  { %19098 = vmatprep.subr.bf16.mxu0 %v23744_v44  ;;  %19110 = vmatprep.subr.bf16.mxu1 %v23648_v13 }
0x18ac   :  { %19100 = vmatpush1.bf16.msra.mxu0 %v23745_v15  ;;  %19112 = vmatpush3.bf16.msra.mxu1 %v23746_v4 }
0x18ad   :  { %19114 = vmatprep.subr.bf16.mxu0 %v23747_v51  ;;  %19129 = vmatprep.subr.bf16.mxu1 %v23648_v13 }
0x194e   :  { %v14128_v16 = vpop.f32.mrb[174].mxu1 }
0x194f   :  { %v17390_v32 = vpop.f32.mrb[175].mxu1  ;;  %v14129_v33 = vadd.f32 %v14128_v16, %v22759_v56 }
0x195e   :  { %v14201_v59 = vpop.f32.mrb[86].mxu0  ;;  %v14272_v61 = vpop.f32.mrb[176].mxu1 }
0x195f   :  { %v19396_v14 = vadd.f32 %v23748_v1, %v14201_v59  ;;  %v14203_v52 = vpop.f32.mrb[87].mxu0  ;;  %v17409_v19 = vpop.f32.mrb[177].mxu1  ;;  %v14273_v22 = vadd.f32 %v14272_v61, %v23751_v5 }
0x1960   :  { %v19398_v6 = vadd.f32 %v23749_v3, %v14203_v52 }
0x1961   :  { %v15619_v39 = vmul.f32 -1.442695, %v19396_v14 }
0x1962   :  { %v14439_v8 = vpop.f32.mrb[178].mxu1  ;;  %v15620_v23 = vmul.f32 -1.442695, %v19398_v6 }
0x1963   :  { %19955 = vpow2.f32 %v15619_v39  ;;  %v17416_v57 = vpop.f32.mrb[179].mxu1  ;;  %v14440_v16 = vadd.f32 %v14439_v8, %v22624_v55  ;;  %v14924_v55 = vld [vmem:[#allocation24] sm:$0xff] }
0x1964   :  { %19957 = vpow2.f32 %v15620_v23  ;;  %v14916_v57 = vrot.slane %v23049_v11, 4  ;;  %v15039_v11 = vld [vmem:[%s23755_s17 + $0x18] sm:$0xff] }
0x196d   :  { %v19956_v34 = vpop.eup %19955 }
0x196e   :  { %v14280_v54 = vadd.f32 1.0, %v19956_v34  ;;  %v19958_v43 = vpop.eup %19957  ;;  %v23754_v34 = vld [vmem:[#allocation56_spill] sm:$0xff] }
0x196f   :  { %v14287_v26 = vadd.f32 1.0, %v19958_v43 }
0x1970   :  { %19959 = vrcp.f32 %v14280_v54  ;;  %v14922_v54 = vsel %vm14920_vm4, %v23754_v34, %v14916_v57  ;;  %v15187_v57 = vld [vmem:[%s23756_s10 + $0x90] sm:$0xff] }
0x1972   :  { %v14509_v0 = vpop.f32.mrb[88].mxu0  ;;  %v14580_v25 = vpop.f32.mrb[180].mxu1 }
0x1973   :  { %v19400_v10 = vadd.f32 %v23750_v9, %v14509_v0  ;;  %v14511_v36 = vpop.f32.mrb[89].mxu0  ;;  %v17435_v41 = vpop.f32.mrb[181].mxu1  ;;  %v14581_v4 = vadd.f32 %v14580_v25, %v22627_v28  ;;  %v14925_v28 = vld [vmem:[#allocation24 + $0x8] sm:$0xff]  ;;  %v15037_v25 = vld [vmem:[%s23755_s17 + $0x8] sm:$0xff] }
0x1974   :  { %v19402_v45 = vadd.f32 %v23716_v46, %v14511_v36  ;;  %v15036_v9 = vld [vmem:[%s23755_s17] sm:$0xff]  ;;  %v15038_v36 = vld [vmem:[%s23755_s17 + $0x10] sm:$0xff]  ;;  %v15043_v41 = vld [vmem:[%s23755_s17 + $0x38] sm:$0xff] }
0x1975   :  { %v15626_v60 = vmul.f32 -1.442695, %v19400_v10  ;;  %v19157_v10 = vpack.c.bf16 %v15039_v11, %v15037_v25  ;;  %v19159_v43 = vpack.c.bf16 %v15038_v36, %v15036_v9  ;;  %v15172_v25 = vld [vmem:[%s23756_s10 + $0x18] sm:$0xff]  ;;  %v15189_v11 = vld [vmem:[%s23756_s10 + $0xa0] sm:$0xff]  ;;  %v15190_v9 = vld [vmem:[%s23756_s10 + $0xa8] sm:$0xff] }
0x1976   :  { %v15627_v37 = vmul.f32 -1.442695, %v19402_v45  ;;  %v15040_v45 = vld [vmem:[%s23755_s17 + $0x20] sm:$0xff]  ;;  %v19197_v36 = vpack.c.bf16 %v15190_v9, %v15189_v11 }
0x1977   :  { %19961 = vpow2.f32 %v15626_v60 }
0x1978   :  { %19963 = vrcp.f32 %v14287_v26  ;;  %v15042_v26 = vld [vmem:[%s23755_s17 + $0x30] sm:$0xff] }
0x1979   :  { %19965 = vpow2.f32 %v15627_v37  ;;  %v19163_v37 = vpack.c.bf16 %v15042_v26, %v15040_v45 }
0x197a   :  { %v19960_v18 = vpop.eup %19959 }
0x197b   :  { %v14290_v53 = vmul.f32 %v19960_v18, %v14273_v22  ;;  %v15045_v22 = vld [vmem:[%s23755_s17 + $0x48] sm:$0xff]  ;;  %v15047_v18 = vld [vmem:[%s23755_s17 + $0x58] sm:$0xff] }
0x197d   :  { %v14291_v42 = vadd.f32 %v14290_v53, %v14129_v33  ;;  %v19165_v33 = vpack.c.bf16 %v15047_v18, %v15045_v22  ;;  %v15044_v53 = vld [vmem:[%s23755_s17 + $0x40] sm:$0xff]  ;;  %v15175_v22 = vld [vmem:[%s23756_s10 + $0x30] sm:$0xff]  ;;  %v15176_v18 = vld [vmem:[%s23756_s10 + $0x38] sm:$0xff] }
0x197f   :  { %19967 = vtanh.f32 %v14291_v42  ;;  %v15046_v42 = vld [vmem:[%s23755_s17 + $0x50] sm:$0xff] }
0x1981   :  { %v19962_v27 = vpop.eup %19961 }
0x1982   :  { %v14588_v47 = vadd.f32 1.0, %v19962_v27  ;;  %v19964_v29 = vpop.eup %19963  ;;  %v19167_v27 = vpack.c.bf16 %v15046_v42, %v15044_v53  ;;  %v19203_v53 = vpack.c.bf16 %v15176_v18, %v15175_v22 }
0x1983   :  { %v19966_v62 = vpop.eup %19965  ;;  %v14293_v2 = vsub.f32 1.0, %v19964_v29  ;;  %v14295_v58 = vmul.f32 %v19964_v29, %v23144_v12  ;;  %v15051_v29 = vld [vmem:[%s23755_s17 + $0x78] sm:$0xff] }
0x1984   :  { %19969 = vrcp.f32 %v14588_v47  ;;  %v14595_v44 = vadd.f32 1.0, %v19966_v62  ;;  %v15049_v47 = vld [vmem:[%s23755_s17 + $0x68] sm:$0xff] }
0x1985   :  { %v19169_v62 = vpack.c.bf16 %v15051_v29, %v15049_v47  ;;  %v15178_v47 = vld [vmem:[%s23756_s10 + $0x48] sm:$0xff]  ;;  %v15195_v29 = vld [vmem:[%s23756_s10 + $0xd0] sm:$0xff] }
0x1986   :  { %19971 = vrcp.f32 %v14595_v44  ;;  %v15055_v44 = vld [vmem:[%s23755_s17 + $0x98] sm:$0xff] }
0x1989   :  { %v19968_v46 = vpop.eup %19967 }
0x198a   :  { %v14294_v20 = vmul.f32 %v19968_v46, %v14293_v2  ;;  %v15048_v2 = vld [vmem:[%s23755_s17 + $0x60] sm:$0xff]  ;;  %v15050_v46 = vld [vmem:[%s23755_s17 + $0x70] sm:$0xff] }
0x198c   :  { %v23239_v15 = vadd.f32 %v14295_v58, %v14294_v20  ;;  %v19171_v20 = vpack.c.bf16 %v15050_v46, %v15048_v2  ;;  %v15053_v58 = vld [vmem:[%s23755_s17 + $0x88] sm:$0xff] }
0x198e   :  { %v19970_v51 = vpop.eup %19969  ;;  %v14918_v23 = vrot.slane %v23239_v15, 4 }
0x198f   :  { %v14598_v32 = vmul.f32 %v19970_v51, %v14581_v4  ;;  %v19173_v4 = vpack.c.bf16 %v15055_v44, %v15053_v58  ;;  %v15052_v51 = vld [vmem:[%s23755_s17 + $0x80] sm:$0xff]  ;;  %v15180_v58 = vld [vmem:[%s23756_s10 + $0x58] sm:$0xff] }
0x1990   :  { %v19972_v61 = vpop.eup %19971  ;;  %v14923_v0 = vsel %vm14920_vm4, %v23144_v12, %v14918_v23  ;;  %v15041_v12 = vld [vmem:[%s23755_s17 + $0x28] sm:$0xff]  ;;  %v15188_v23 = vld [vmem:[%s23756_s10 + $0x98] sm:$0xff]  ;;  %v15197_v44 = vld [vmem:[%s23756_s10 + $0xe0] sm:$0xff] }
0x1991   :  { %v14599_v59 = vadd.f32 %v14598_v32, %v14440_v16  ;;  %v14601_v14 = vsub.f32 1.0, %v19972_v61  ;;  %v14603_v39 = vmul.f32 %v19972_v61, %v23149_v17  ;;  %v19161_v60 = vpack.c.bf16 %v15043_v41, %v15041_v12  ;;  %v15054_v16 = vld [vmem:[%s23755_s17 + $0x90] sm:$0xff]  ;;  %v15059_v61 = vld [vmem:[%s23755_s17 + $0xb8] sm:$0xff]  ;;  %v15173_v12 = vld [vmem:[%s23756_s10 + $0x20] sm:$0xff] }
0x1992   :  { %v19175_v32 = vpack.c.bf16 %v15054_v16, %v15052_v51  ;;  %v15174_v41 = vld [vmem:[%s23756_s10 + $0x28] sm:$0xff] }
0x1993   :  { %19973 = vtanh.f32 %v14599_v59  ;;  %v15057_v59 = vld [vmem:[%s23755_s17 + $0xa8] sm:$0xff]  ;;  %v19199_v45 = vpack.c.bf16 %v15174_v41, %v15173_v12  ;;  %v15068_v12 = vld [vmem:[#allocation27] sm:$0x3] }
0x1994   :  { %v23757_v41 = vld [vmem:[#allocation41_spill] sm:$0xff] }
0x199d   :  { %v19974_v52 = vpop.eup %19973 }
0x199e   :  { %v14602_v19 = vmul.f32 %v19974_v52, %v14601_v14  ;;  %v19177_v14 = vpack.c.bf16 %v15059_v61, %v15057_v59  ;;  %v15056_v52 = vld [vmem:[%s23755_s17 + $0xa0] sm:$0xff]  ;;  %v15182_v59 = vld [vmem:[%s23756_s10 + $0x68] sm:$0xff] }
0x19a0   :  { %v14604_v6 = vadd.f32 %v14603_v39, %v14602_v19  ;;  %v15058_v19 = vld [vmem:[%s23755_s17 + $0xb0] sm:$0xff] }
0x19a1   :  { %v19179_v39 = vpack.c.bf16 %v15058_v19, %v15056_v52 }
0x19a2   :  { %15628 = vmatmul.mubr.msk.f32.vlgmr.msra.gmra.mrb[90].mxu0 %vm5436_vm3, %v14604_v6  ;;  %17453 = vmatmul.mubr.msk.f32.vlgmr.msra.gmra.mrb[182].mxu1 %vm5436_vm3, %v14604_v6  ;;  %v15061_v6 = vld [vmem:[%s23755_s17 + $0xc8] sm:$0xff] }
0x19a3   :  { %19116 = vmatpush1.bf16.msra.mxu0 %v22634_v63  ;;  %19131 = vmatpush3.bf16.msra.mxu1 %v22636_v7  ;;  %v19141_v63 = vpack.c.bf16 %v14925_v28, %v14924_v55  ;;  %v14926_v7 = vld [vmem:[#allocation24 + $0x10] sm:$0xff]  ;;  %v15063_v55 = vld [vmem:[%s23755_s17 + $0xd8] sm:$0xff] }
0x19a4   :  { %19118 = vmatprep.subr.bf16.mxu0 %v22640_v30  ;;  %19132 = vmatprep.subr.bf16.mxu1 %v23648_v13  ;;  %v14927_v30 = vld [vmem:[#allocation24 + $0x18] sm:$0xff]  ;;  %v19181_v28 = vpack.c.bf16 %v15063_v55, %v15061_v6 }
0x19a5   :  { %14816 = vmatprep.mubr.f32.mxu0 %v23649_v35  ;;  %17471 = vmatprep.mubr.msk.f32.mxu1 %vm20429_vm0, %v23649_v35 }
0x19a7   :  { %19120 = vmatpush1.bf16.msra.mxu0 %v22648_v21  ;;  %19134 = vmatpush3.bf16.msra.mxu1 %v22650_v38  ;;  %v23752_v21 = vld [vmem:[#allocation54_spill] sm:$0xff]  ;;  %v19145_v38 = vpack.c.bf16 %v14927_v30, %v14926_v7 }
0x19a8   :  { %19122 = vmatprep.subr.bf16.mxu0 %v22654_v48  ;;  %19135 = vmatprep.subr.bf16.mxu1 %v23648_v13  ;;  %v14914_v17 = vrot.slane %v23752_v21, 4  ;;  %v14928_v48 = vld [vmem:[#allocation24 + $0x20] sm:$0xff]  ;;  %v15062_v7 = vld [vmem:[%s23755_s17 + $0xd0] sm:$0xff]  ;;  %v15065_v21 = vld [vmem:[%s23755_s17 + $0xe8] sm:$0xff] }
0x19ab   :  { %19124 = vmatpush1.bf16.msra.mxu0 %v22661_v49  ;;  %19137 = vmatpush3.bf16.msra.mxu1 %v22663_v24  ;;  %v14929_v49 = vld [vmem:[#allocation24 + $0x28] sm:$0xff] }
0x19ac   :  { %19126 = vmatprep.subr.bf16.mxu0 %v22667_v50  ;;  %19138 = vmatprep.subr.bf16.mxu1 %v23648_v13  ;;  %v23753_v13 = vld [vmem:[#allocation55_spill] sm:$0xff]  ;;  %v19149_v50 = vpack.c.bf16 %v14929_v49, %v14928_v48  ;;  %v15064_v48 = vld [vmem:[%s23755_s17 + $0xe0] sm:$0xff] }
0x19ad   :  { %v14921_v24 = vsel %vm14920_vm4, %v23753_v13, %v14914_v17  ;;  %v15067_v17 = vld [vmem:[%s23755_s17 + $0xf8] sm:$0xff]  ;;  %v15066_v49 = vld [vmem:[%s23755_s17 + $0xf0] sm:$0xff] }
0x19ae   :  { %v19187_v13 = vpack.c.bf16 %v15066_v49, %v15064_v48 }
0x19af   :  { %19128 = vmatpush1.bf16.msra.mxu0 %v22671_v40  ;;  %19140 = vmatpush3.bf16.msra.mxu1 %v22673_v31  ;;  %v14930_v40 = vld [vmem:[#allocation24 + $0x30] sm:$0xff]  ;;  %v14931_v31 = vld [vmem:[#allocation24 + $0x38] sm:$0xff] }
0x19b0   :  { %19142 = vmatprep.subr.bf16.mxu0 %v19141_v63  ;;  %v19153_v8 = vpack.c.bf16 %v14931_v31, %v14930_v40  ;;  %19158 = vmatprep.subr.bf16.mxu1 %v19157_v10  ;;  %v15169_v40 = vld [vmem:[%s23756_s10] sm:$0xff] }
0x19b2   :  { %15630 = vmatmul.mubr.msk.f32.vlgmr.msra.gmra.mrb[90].mxu0 %vm5436_vm3, %v23239_v15  ;;  %17472 = vmatmul.mubr.msk.f32.vlgmr.msra.gmra.mrb[184].mxu1 %vm5436_vm3, %v23239_v15 }
0x19b3   :  { %19144 = vmatpush3.bf16.msra.mxu0 %v19141_v63  ;;  %17490 = vmatprep.mubr.msk.f32.mxu0 %vm5436_vm3, %v14921_v24  ;;  %v15060_v63 = vld [vmem:[%s23755_s17 + $0xc0] sm:$0xff] }
0x19b4   :  { %19146 = vmatprep.subr.bf16.mxu0 %v19145_v38  ;;  %15144 = vmatprep.mubr.f32.mxu1 %v23649_v35  ;;  %v19183_v30 = vpack.c.bf16 %v15062_v7, %v15060_v63  ;;  %v15185_v24 = vld [vmem:[%s23756_s10 + $0x80] sm:$0xff] }
0x19b5   :  { %19160 = vmatpush1.bf16.msra.mxu1 %v19159_v43  ;;  %v15191_v43 = vld [vmem:[%s23756_s10 + $0xb0] sm:$0xff] }
0x19b6   :  { %19162 = vmatprep.subr.bf16.mxu1 %v19161_v60  ;;  %v15192_v60 = vld [vmem:[%s23756_s10 + $0xb8] sm:$0xff] }
0x19b7   :  { %19148 = vmatpush3.bf16.msra.mxu0 %v19145_v38  ;;  %v19185_v38 = vpack.c.bf16 %v15067_v17, %v15065_v21  ;;  %v19201_v26 = vpack.c.bf16 %v15192_v60, %v15191_v43  ;;  %v15634_v17 = vld [vmem:[#allocation25] ss:$0 sm:$0xff]  ;;  %v15077_v43 = vrot.slane %v15068_v12, %v23757_v41  ;;  %v23758_v60 = vld [vmem:[#allocation40_spill] sm:$0xff] }
0x19b8   :  { %19150 = vmatprep.subr.bf16.mxu0 %v19149_v50 }
0x19b9   :  { %19164 = vmatpush1.bf16.msra.mxu1 %v19163_v37  ;;  %v15193_v37 = vld [vmem:[%s23756_s10 + $0xc0] sm:$0xff] }
0x19ba   :  { %19166 = vmatprep.subr.bf16.mxu1 %v19165_v33  ;;  %v15194_v33 = vld [vmem:[%s23756_s10 + $0xc8] sm:$0xff] }
0x19bb   :  { %19152 = vmatpush3.bf16.msra.mxu0 %v19149_v50  ;;  %v15186_v50 = vld [vmem:[%s23756_s10 + $0x88] sm:$0xff]  ;;  %v19205_v42 = vpack.c.bf16 %v15194_v33, %v15193_v37 }
0x19bc   :  { %19154 = vmatprep.subr.bf16.mxu0 %v19153_v8  ;;  %v19189_v31 = vpack.c.bf16 %v15186_v50, %v15185_v24 }
0x19bd   :  { %19168 = vmatpush1.bf16.msra.mxu1 %v19167_v27  ;;  %v15177_v27 = vld [vmem:[%s23756_s10 + $0x40] sm:$0xff] }
0x19be   :  { %19170 = vmatprep.subr.bf16.mxu1 %v19169_v62  ;;  %v15196_v62 = vld [vmem:[%s23756_s10 + $0xd8] sm:$0xff]  ;;  %v19207_v2 = vpack.c.bf16 %v15178_v47, %v15177_v27 }
0x19bf   :  { %19156 = vmatpush3.bf16.msra.mxu0 %v19153_v8  ;;  %v15170_v8 = vld [vmem:[%s23756_s10 + $0x8] sm:$0xff]  ;;  %v19209_v46 = vpack.c.bf16 %v15196_v62, %v15195_v29 }
0x19c0   :  { %v19191_v34 = vpack.c.bf16 %v15170_v8, %v15169_v40  ;;  %19190 = vmatprep.subr.bf16.mxu0 %v19189_v31 }
0x19c1   :  { %19172 = vmatpush1.bf16.msra.mxu1 %v19171_v20  ;;  %v15179_v20 = vld [vmem:[%s23756_s10 + $0x50] sm:$0xff] }
0x19c2   :  { %17491 = vmatmul.mubr.msk.f32.vlgmr.msra.gmra.mrb[92].mxu0 %vm5436_vm3, %v14922_v54  ;;  %19174 = vmatprep.subr.bf16.mxu1 %v19173_v4  ;;  %v19193_v54 = vpack.c.bf16 %v15188_v23, %v15187_v57  ;;  %v15198_v4 = vld [vmem:[%s23756_s10 + $0xe8] sm:$0xff]  ;;  %v19211_v51 = vpack.c.bf16 %v15180_v58, %v15179_v20  ;;  %v15639_v20 = vld [vmem:[#allocation28] ss:$0 sm:$0xff] }
0x19c3   :  { %17493 = vmatprep.mubr.msk.f32.mxu0 %vm5436_vm3, %v14923_v0  ;;  %v15171_v0 = vld [vmem:[%s23756_s10 + $0x10] sm:$0xff]  ;;  %19192 = vmatpush3.bf16.msra.mxu0 %v19191_v34  ;;  %v19213_v16 = vpack.c.bf16 %v15198_v4, %v15197_v44 }
0x19c4   :  { %v19195_v10 = vpack.c.bf16 %v15172_v25, %v15171_v0  ;;  %19194 = vmatprep.subr.bf16.mxu0 %v19193_v54 }
0x19c5   :  { %19176 = vmatpush1.bf16.msra.mxu1 %v19175_v32  ;;  %v15181_v32 = vld [vmem:[%s23756_s10 + $0x60] sm:$0xff] }
0x19c6   :  { %19178 = vmatprep.subr.bf16.mxu1 %v19177_v14  ;;  %v19215_v61 = vpack.c.bf16 %v15182_v59, %v15181_v32 }
0x19c7   :  { %19196 = vmatpush3.bf16.msra.mxu0 %v19195_v10  ;;  %v15183_v10 = vld [vmem:[%s23756_s10 + $0x70] sm:$0xff] }
0x19c8   :  { %19198 = vmatprep.subr.bf16.mxu0 %v19197_v36 }
0x19c9   :  { %19180 = vmatpush1.bf16.msra.mxu1 %v19179_v39 }
0x19ca   :  { %19182 = vmatprep.subr.bf16.mxu1 %v19181_v28 }
0x19cb   :  { %19200 = vmatpush3.bf16.msra.mxu0 %v19199_v45  ;;  %v15073_v45 = vrot.slane %v15068_v12, %v23758_v60 }
0x19cc   :  { %19202 = vmatprep.subr.bf16.mxu0 %v19201_v26 }
0x19cd   :  { %19184 = vmatpush1.bf16.msra.mxu1 %v19183_v30 }
0x19ce   :  { %19186 = vmatprep.subr.bf16.mxu1 %v19185_v38 }
0x19cf   :  { %19204 = vmatpush3.bf16.msra.mxu0 %v19203_v53 }
0x19d0   :  { %19206 = vmatprep.subr.bf16.mxu0 %v19205_v42 }
0x19d1   :  { %19188 = vmatpush1.bf16.msra.mxu1 %v19187_v13 }
0x19d3   :  { %19208 = vmatpush3.bf16.msra.mxu0 %v19207_v2 }
0x19d4   :  { %19210 = vmatprep.subr.bf16.mxu0 %v19209_v46 }
0x19d7   :  { %19212 = vmatpush3.bf16.msra.mxu0 %v19211_v51 }
0x19d8   :  { %19214 = vmatprep.subr.bf16.mxu0 %v19213_v16 }
0x19db   :  { %19216 = vmatpush3.bf16.msra.mxu0 %v19215_v61 }
0x1a75   :  { %v14745_v14 = vpop.f32.mrb[182].mxu1 }
0x1a76   :  { %v17454_v52 = vpop.f32.mrb[183].mxu1  ;;  %v14746_v31 = vadd.f32 %v14745_v14, %v22759_v56  ;;  %v15200_v56 = vld [vmem:[%s23756_s10 + $0xf8] sm:$0xff] }
0x1a85   :  { %v14818_v19 = vpop.f32.mrb[90].mxu0  ;;  %v14889_v39 = vpop.f32.mrb[184].mxu1 }
0x1a86   :  { %v19404_v6 = vadd.f32 %v23748_v1, %v14818_v19  ;;  %v14820_v55 = vpop.f32.mrb[91].mxu0  ;;  %v17473_v28 = vpop.f32.mrb[185].mxu1 }
0x1a87   :  { %v19406_v7 = vadd.f32 %v23749_v3, %v14820_v55  ;;  %v14890_v3 = vadd.f32 %v14889_v39, %v23751_v5  ;;  %v15199_v5 = vld [vmem:[%s23756_s10 + $0xf0] sm:$0xff] }
0x1a88   :  { %v15632_v63 = vmul.f32 -1.442695, %v19404_v6  ;;  %v19217_v9 = vpack.c.bf16 %v15200_v56, %v15199_v5 }
0x1a89   :  { %v15633_v30 = vmul.f32 -1.442695, %v19406_v7 }
0x1a8a   :  { %19975 = vpow2.f32 %v15632_v63  ;;  %19218 = vmatprep.subr.bf16.mxu0 %v19217_v9 }
0x1a8b   :  { %19977 = vpow2.f32 %v15633_v30 }
0x1a94   :  { %v19976_v21 = vpop.eup %19975 }
0x1a95   :  { %v14897_v38 = vadd.f32 1.0, %v19976_v21  ;;  %v17492_v48 = vpop.f32.mrb[92].mxu0  ;;  %v19978_v24 = vpop.eup %19977 }
0x1a96   :  { %v15017_v49 = vpop.f32.mrb[93].mxu0  ;;  %v15023_v1 = vadd.f32 %v17492_v48, %v15634_v17  ;;  %v14904_v50 = vadd.f32 1.0, %v19978_v24 }
0x1a97   :  { %19979 = vrcp.f32 %v14897_v38  ;;  %v15018_v13 = vadd.f32 %v15634_v17, %v15017_v49 }
0x1a98   :  { %19981 = vrcp.f32 %v14904_v50 }
0x1a99   :  { %15145 = vmatmul.mubr.f32.vlgmr.msra.gmra.mrb[186].mxu1 %v15018_v13 }
0x1a9a   :  { %15150 = vmatprep.mubr.f32.mxu1 %v23649_v35 }
0x1a9d   :  { %15151 = vmatmul.mubr.f32.gmra.mrb[188].mxu1 %v15023_v1 }
0x1a9e   :  { %15156 = vmatprep.mubr.f32.mxu1 %v23649_v35 }
0x1aa1   :  { %v19980_v40 = vpop.eup %19979 }
0x1aa2   :  { %v14907_v8 = vmul.f32 %v19980_v40, %v14890_v3  ;;  %v19982_v23 = vpop.eup %19981 }
0x1aa3   :  { %v14910_v34 = vsub.f32 1.0, %v19982_v23  ;;  %v14912_v25 = vmul.f32 %v19982_v23, %v23239_v15  ;;  %v15184_v15 = vld [vmem:[%s23756_s10 + $0x78] sm:$0xff] }
0x1aa4   :  { %v14908_v57 = vadd.f32 %v14907_v8, %v14746_v31  ;;  %v19219_v36 = vpack.c.bf16 %v15184_v15, %v15183_v10 }
0x1aa6   :  { %19983 = vtanh.f32 %v14908_v57  ;;  %19220 = vmatpush3.bf16.msra.mxu0 %v19219_v36 }
0x1ab0   :  { %v19984_v54 = vpop.eup %19983 }
0x1ab1   :  { %v14911_v0 = vmul.f32 %v19984_v54, %v14910_v34 }
0x1ab3   :  { %v14913_v11 = vadd.f32 %v14912_v25, %v14911_v0 }
0x1ab5   :  { %17494 = vmatmul.mubr.msk.f32.gmra.mrb[94].mxu0 %vm5436_vm3, %v14913_v11 }
0x1b6c   :  { %v15146_v26 = vpop.f32.mrb[186].mxu1 }
0x1b6d   :  { %v15148_v22 = vpop.f32.mrb[187].mxu1  ;;  %v15147_v37 = vadd.f32 %v15146_v26, %v15073_v45 }
0x1b6e   :  { %v15149_v18 = vadd.f32 %v15148_v22, %v15077_v43 }
0x1b70   :  { %v15152_v33 = vpop.f32.mrb[188].mxu1  ;;  %15272 = vmatprep.mubr.f32.mxu0 %v15149_v18 }
0x1b71   :  { %v15154_v53 = vpop.f32.mrb[189].mxu1  ;;  %15273 = vmatmul.mubr.f32.vlgmr.msra.gmra.mrb[96].mxu0 %v15147_v37  ;;  %v15153_v27 = vadd.f32 %v15152_v33, %v15073_v45 }
0x1b72   :  { %v15155_v42 = vadd.f32 %v15154_v53, %v15077_v43 }
0x1b74   :  { %15277 = vmatprep.mubr.f32.mxu0 %v15155_v42 }
0x1b75   :  { %15278 = vmatmul.mubr.f32.gmra.mrb[98].mxu0 %v15153_v27 }
0x1b88   :  { %v17495_v47 = vpop.f32.mrb[94].mxu0 }
0x1b89   :  { %v15027_v29 = vpop.f32.mrb[95].mxu0  ;;  %v15033_v2 = vadd.f32 %v17495_v47, %v15634_v17 }
0x1b8a   :  { %v15028_v62 = vadd.f32 %v15634_v17, %v15027_v29 }
0x1b8c   :  { %15157 = vmatmul.mubr.f32.gmra.mrb[190].mxu1 %v15028_v62 }
0x1b8d   :  { %15162 = vmatprep.mubr.f32.mxu1 %v23649_v35 }
0x1b90   :  { %15163 = vmatmul.mubr.f32.gmra.mrb[192].mxu1 %v15033_v2 }
0x1c44   :  { %v16246_v46 = vpop.f32.mrb[96].mxu0 }
0x1c45   :  { %v16247_v58 = vpop.f32.mrb[97].mxu0 }
0x1c46   :  { %v16248_v44 = vadd.f32 %v16247_v58, %v16246_v46 }
0x1c48   :  { %v15275_v4 = vadd.f32 %v16248_v44, %v15639_v20  ;;  %v16249_v51 = vpop.f32.mrb[98].mxu0 }
0x1c49   :  { %v16250_v16 = vpop.f32.mrb[99].mxu0 }
0x1c4a   :  { %v15296_v32 = vcombine.high %v15275_v4, %v15275_v4  ;;  %15302 = vst [vmem:[%s23759_s22] sm:$0xf] %v15275_v4  ;;  %v16251_v59 = vadd.f32 %v16250_v16, %v16249_v51 }
0x1c4c   :  { %15303 = vst [vmem:[%s23759_s22 + $0x4] sm:$0xf] %v15296_v32  ;;  %v15280_v35 = vadd.f32 %v16251_v59, %v15639_v20 }
0x1c4e   :  { %v15297_v61 = vcombine.high %v15280_v35, %v15280_v35  ;;  %15304 = vst [vmem:[%s23759_s22 + $0x8] sm:$0xf] %v15280_v35 }
0x1c50   :  { %15305 = vst [vmem:[%s23759_s22 + $0xc] sm:$0xf] %v15297_v61 }
0x1c5f   :  { %v15158_v14 = vpop.f32.mrb[190].mxu1 }
0x1c60   :  { %v15160_v52 = vpop.f32.mrb[191].mxu1  ;;  %v15159_v39 = vadd.f32 %v15158_v14, %v15073_v45 }
0x1c61   :  { %v15161_v19 = vadd.f32 %v15160_v52, %v15077_v43 }
0x1c63   :  { %v15164_v6 = vpop.f32.mrb[192].mxu1  ;;  %15282 = vmatprep.mubr.f32.mxu0 %v15161_v19 }
0x1c64   :  { %v15166_v55 = vpop.f32.mrb[193].mxu1  ;;  %15283 = vmatmul.mubr.f32.gmra.mrb[100].mxu0 %v15159_v39  ;;  %v15165_v63 = vadd.f32 %v15164_v6, %v15073_v45 }
0x1c65   :  { %v15167_v28 = vadd.f32 %v15166_v55, %v15077_v43 }
0x1c67   :  { %15287 = vmatprep.mubr.f32.mxu0 %v15167_v28 }
0x1c68   :  { %15288 = vmatmul.mubr.f32.gmra.mrb[102].mxu0 %v15165_v63 }
0x1d37   :  { %v16252_v7 = vpop.f32.mrb[100].mxu0 }
0x1d38   :  { %v16253_v30 = vpop.f32.mrb[101].mxu0 }
0x1d39   :  { %v16254_v21 = vadd.f32 %v16253_v30, %v16252_v7 }
0x1d3b   :  { %v15285_v17 = vadd.f32 %v16254_v21, %v15639_v20  ;;  %v16255_v38 = vpop.f32.mrb[102].mxu0 }
0x1d3c   :  { %v16256_v48 = vpop.f32.mrb[103].mxu0 }
0x1d3d   :  { %v15298_v49 = vcombine.high %v15285_v17, %v15285_v17  ;;  %15306 = vst [vmem:[%s23759_s22 + $0x10] sm:$0xf] %v15285_v17  ;;  %v16257_v13 = vadd.f32 %v16256_v48, %v16255_v38 }
0x1d3f   :  { %15307 = vst [vmem:[%s23759_s22 + $0x14] sm:$0xf] %v15298_v49  ;;  %v15290_v24 = vadd.f32 %v16257_v13, %v15639_v20 }
0x1d41   :  { %15308 = vst [vmem:[%s23759_s22 + $0x18] sm:$0xf] %v15290_v24 }
0x1d42   :  { %15313 = vsyncpa [#allocation3], 1 }
0x1d43   :  { %15314 = vsyncpa [#allocation5], 1 }
0x1d44   :  { %15315 = vsyncpa [#allocation8], 1 }
0x1d45   :  { %15316 = vsyncpa [#allocation11], 1 }
0x1d46   :  { %15317 = vsyncpa [#allocation14], 1 }
0x1d47   :  { %15318 = vsyncpa [#allocation17], 1 }
0x1d48   :  { %15319 = vsyncpa [#allocation20], 1 }
0x1d49   :  { %15320 = vsyncpa [#allocation23], 1 }
0x1d4a   :  { %15321 = vsyncpa [#allocation26], 1 }
0x1d4b   :  { %15322 = vsyncpa [#allocation29], 1 }

</bundles_post_ra>
